<compile_context>
chip_gen: v6e
topology: v6e:2x2x1
jax: 0.10.0
libtpu: 0.0.40
codegen_flags: <defaults>
</compile_context>

<pallas_src>
import functools

import jax
import jax.numpy as jnp
from jax.experimental import pallas as pl
from jax.experimental.pallas import tpu as pltpu


def _round_up(x, m):
    return (x + m - 1) // m * m


# ---------------------------------------------------------------------------
# Fused conv stage: conv1(3x3,pad1,Cin=1,Cout=32)+relu+pool2 -> conv2(3x3,pad1,
# Cout=64)+relu+pool2, one batch tile per grid step.
# ---------------------------------------------------------------------------
def _conv_stage_kernel(x_ref, w1_ref, b1_ref, w2_ref, b2_ref, o_ref,
                       c1e_ref, c1o_ref, *, tb):
    # x_ref  : (tb, 1024, 1) f32, phase-split zero-padded 32x32 image:
    #          flat index = phase*128 + rb*8 + cb with phase=(r%2)*4+(c%4),
    #          rb=r//2, cb=c//4 of the padded image (pad = (1,3) on each axis).
    # w1_ref : (9, 32)  f32  conv1 weight, row k = di*3+dj               (Cin=1)
    # w2_ref : (288,64) bf16 conv2 GEMM weight, row (di*3+dj)*32 + ci
    # o_ref  : (tb, 104, 64) bf16 pooled conv2 activations in "vmax-flat" form:
    #          valid pooled pixel (hp, wp, c) lives at row 16*hp + wp; the other
    #          rows are finite junk that fc1 multiplies by zero weight rows.
    # c1e/c1o: (136, 32) bf16 scratch = conv2's zero-padded input split into
    #          even / odd padded columns (17 padded rows x 8 half-columns).
    w1v = w1_ref[...]
    b1v = b1_ref[...]
    b2v = b2_ref[...]
    w2v = w2_ref[...]
    row = jax.lax.broadcasted_iota(jnp.int32, (112, 1), 0)
    keep = jnp.where(row % 8 == 7, 0.0, 1.0).astype(jnp.float32)  # zero q==7 junk col

    for i in range(tb):
        # ---- conv1 (Cin=1): shifted-slice outer products on the VPU, 8 phases ----
        def conv1_phase(rho, gam):
            acc = jnp.zeros((112, 32), jnp.float32)
            for di in range(3):
                for dj in range(3):
                    phase = ((rho + di) % 2) * 4 + ((gam + dj) % 4)
                    off = phase * 128 + ((rho + di) // 2) * 8 + ((gam + dj) // 4)
                    patch = x_ref[i, pl.ds(off, 112), :]          # (112, 1)
                    k = di * 3 + dj
                    acc = acc + patch * w1v[k:k + 1, :]           # outer product
            return acc

        # 2x2 maxpool = max over (row parity) x (col pair). bias+relu commute with max.
        pool_even = jnp.maximum(jnp.maximum(conv1_phase(0, 0), conv1_phase(0, 1)),
                                jnp.maximum(conv1_phase(1, 0), conv1_phase(1, 1)))
        pool_odd = jnp.maximum(jnp.maximum(conv1_phase(0, 2), conv1_phase(0, 3)),
                               jnp.maximum(conv1_phase(1, 2), conv1_phase(1, 3)))
        pool_even = jnp.maximum(pool_even + b1v, 0.0) * keep      # pooled cols 0,2,..,12
        pool_odd = jnp.maximum(pool_odd + b1v, 0.0) * keep        # pooled cols 1,3,..,13

        # Two contiguous stores build conv2's zero-padded even/odd input halves.
        c1e_ref[...] = jnp.zeros((136, 32), jnp.bfloat16)
        c1o_ref[...] = jnp.zeros((136, 32), jnp.bfloat16)
        c1o_ref[pl.ds(8, 112), :] = pool_even.astype(jnp.bfloat16)
        c1e_ref[pl.ds(9, 112), :] = pool_odd.astype(jnp.bfloat16)

        # ---- conv2: in-VMEM im2col -> one K=288 MXU matmul per column parity ----
        def tap(ref, di, coff):
            return ref[pl.ds(di * 8 + coff, 112), :]              # (112, 32) bf16

        cols_e, cols_o = [], []
        for di in range(3):
            cols_e += [tap(c1e_ref, di, 0), tap(c1o_ref, di, 0), tap(c1e_ref, di, 1)]
            cols_o += [tap(c1o_ref, di, 0), tap(c1e_ref, di, 1), tap(c1o_ref, di, 1)]
        a_e = jnp.concatenate(cols_e, axis=1)                     # (112, 288)
        a_o = jnp.concatenate(cols_o, axis=1)
        acc_e = jnp.dot(a_e, w2v, preferred_element_type=jnp.float32)  # even out cols
        acc_o = jnp.dot(a_o, w2v, preferred_element_type=jnp.float32)  # odd out cols

        # 2x2 maxpool + bias + relu, applied once after the maxes.
        hmax = jnp.maximum(acc_e, acc_o)                          # (112, 64)
        vmax = jnp.maximum(hmax[:104, :], hmax[8:, :])            # (104, 64)
        o_ref[i] = jnp.maximum(vmax + b2v, 0.0).astype(jnp.bfloat16)


def conv_stage(x_nchw, w1, b1, w2, b2):
    """Fused conv1+relu+pool+conv2+relu+pool.  (B,1,28,28) f32 -> (B,104,64) bf16."""
    B = x_nchw.shape[0]
    tb = 4 if B >= 8 else 1          # amortize per-step overhead for real batches
    bp = _round_up(B, tb)
    # One-time input layout prep (tiny, single fused XLA op): pad to 32x32 and
    # split into the 8 (row parity x col mod 4) phases the kernel expects.
    xp = jnp.pad(x_nchw[:, 0], ((0, bp - B), (1, 3), (1, 3)))     # (bp, 32, 32)
    xp = xp.reshape(bp, 16, 2, 8, 4).transpose(0, 2, 4, 1, 3)     # (b, sig, kap, rb, cb)
    xp = xp.reshape(bp, 1024, 1)

    flops = bp * (2 * 28 * 28 * 9 * 32 + 2 * 2 * 112 * 288 * 64)
    bytes_accessed = bp * (1024 * 4 + 104 * 64 * 2) + 9 * 32 * 4 + 288 * 64 * 2
    act = pl.pallas_call(
        functools.partial(_conv_stage_kernel, tb=tb),
        out_shape=jax.ShapeDtypeStruct((bp, 104, 64), jnp.bfloat16),
        grid=(bp // tb,),
        in_specs=[
            pl.BlockSpec((tb, 1024, 1), lambda i: (i, 0, 0)),
            pl.BlockSpec((9, 32), lambda i: (0, 0)),
            pl.BlockSpec((1, 32), lambda i: (0, 0)),
            pl.BlockSpec((288, 64), lambda i: (0, 0)),
            pl.BlockSpec((1, 64), lambda i: (0, 0)),
        ],
        out_specs=pl.BlockSpec((tb, 104, 64), lambda i: (i, 0, 0)),
        scratch_shapes=[pltpu.VMEM((136, 32), jnp.bfloat16),
                        pltpu.VMEM((136, 32), jnp.bfloat16)],
        compiler_params=pltpu.CompilerParams(dimension_semantics=("parallel",)),
        cost_estimate=pl.CostEstimate(flops=flops, transcendentals=0,
                                      bytes_accessed=bytes_accessed),
    )(xp, w1, b1.reshape(1, 32), w2, b2.reshape(1, 64))
    return act[:B]


# ---------------------------------------------------------------------------
# Fused fc1 + relu + fc2 (both weights VMEM-resident, bf16 MXU, f32 accumulate,
# 128-lane-dense output).
# ---------------------------------------------------------------------------
def _fc_kernel(x_ref, w1_ref, b1_ref, w2_ref, b2_ref, o_ref):
    h = jnp.dot(x_ref[...], w1_ref[...], preferred_element_type=jnp.float32)
    h = jnp.maximum(h + b1_ref[...], 0.0)
    out = jnp.dot(h.astype(w2_ref.dtype), w2_ref[...],
                  preferred_element_type=jnp.float32)
    o_ref[...] = (out + b2_ref[...]).astype(o_ref.dtype)


def fc_stage(x, w1, b1, w2p, b2p):
    """Fused fc1+relu+fc2.  x: (B, 6656) bf16 -> (B, 128) f32 (cols >= 10 junk)."""
    B, K = x.shape
    if B <= 256:
        tb, bp = B, B                 # single step, no batch padding at all
    else:
        tb = 128                      # bounded padding (< 128 junk rows)
        bp = _round_up(B, tb)
        x = jnp.pad(x, ((0, bp - B), (0, 0)))
    flops = bp * 2 * (K * 128 + 128 * 128)
    bytes_accessed = bp * (K * 2 + 128 * 4) + K * 128 * 2 + 128 * 128 * 2
    out = pl.pallas_call(
        _fc_kernel,
        out_shape=jax.ShapeDtypeStruct((bp, 128), jnp.float32),
        grid=(bp // tb,),
        in_specs=[
            pl.BlockSpec((tb, K), lambda i: (i, 0)),
            pl.BlockSpec((K, 128), lambda i: (0, 0)),
            pl.BlockSpec((1, 128), lambda i: (0, 0)),
            pl.BlockSpec((128, 128), lambda i: (0, 0)),
            pl.BlockSpec((1, 128), lambda i: (0, 0)),
        ],
        out_specs=pl.BlockSpec((tb, 128), lambda i: (i, 0)),
        compiler_params=pltpu.CompilerParams(dimension_semantics=("parallel",)),
        cost_estimate=pl.CostEstimate(flops=flops, transcendentals=0,
                                      bytes_accessed=bytes_accessed),
    )(x, w1, b1.reshape(1, 128), w2p, b2p.reshape(1, 128))
    return out[:B]


# ---------------------------------------------------------------------------
# Model params & forward
# ---------------------------------------------------------------------------
def init_params(key):
    k1, k2, k3, k4 = jax.random.split(key, 4)
    return {
        # conv weights in GEMM form: w[(di*3+dj)*Cin + ci, co] == torch conv.weight[co, ci, di, dj]
        "w1": jax.random.normal(k1, (9, 32), jnp.float32) * 0.1,
        "b1": jnp.zeros((32,), jnp.float32),
        "w2": jax.random.normal(k2, (288, 64), jnp.float32) * 0.05,
        "b2": jnp.zeros((64,), jnp.float32),
        # fc1 weight with rows in NHWC-flat order (hp*7+wp)*64 + c
        # (== torch fc1.weight.T with rows permuted from torch's c*49 + hp*7 + wp).
        "w_fc1": jax.random.normal(k3, (7 * 7 * 64, 128), jnp.float32) * 0.02,
        "b_fc1": jnp.zeros((128,), jnp.float32),
        "w_fc2": jax.random.normal(k4, (128, 10), jnp.float32) * 0.1,
        "b_fc2": jnp.zeros((10,), jnp.float32),
    }


def prepare_params(p):
    """One-time host-side conversion to kernel-ready dtypes / layouts."""
    # Scatter the 3136 logical fc1 rows into the kernel's 104*64 "vmax-flat" rows
    # (row (16*hp + wp)*64 + c); junk rows keep zero weights.
    hp = jnp.arange(7)[:, None, None]
    wp = jnp.arange(7)[None, :, None]
    c = jnp.arange(64)[None, None, :]
    rows = ((16 * hp + wp) * 64 + c).reshape(-1)
    w_fc1_big = jnp.zeros((104 * 64, 128), jnp.float32).at[rows].set(p["w_fc1"])
    w_fc2p = jnp.zeros((128, 128), jnp.float32).at[:, :10].set(p["w_fc2"])
    b_fc2p = jnp.zeros((128,), jnp.float32).at[:10].set(p["b_fc2"])
    return {
        "w1": p["w1"], "b1": p["b1"],
        "w2": p["w2"].astype(jnp.bfloat16), "b2": p["b2"],
        "w_fc1": w_fc1_big.astype(jnp.bfloat16), "b_fc1": p["b_fc1"],
        "w_fc2p": w_fc2p.astype(jnp.bfloat16), "b_fc2p": b_fc2p,
    }


def cnn_forward(x_nchw, kp):
    B = x_nchw.shape[0]
    act = conv_stage(x_nchw, kp["w1"], kp["b1"], kp["w2"], kp["b2"])   # (B,104,64) bf16
    act = act.reshape(B, 104 * 64)   # free row-major flatten between the two kernels
    logits = fc_stage(act, kp["w_fc1"], kp["b_fc1"], kp["w_fc2p"], kp["b_fc2p"])
    return logits[:, :10]


# ---------------------------------------------------------------------------
# Pure-JAX reference (f32) for a sanity check.
# ---------------------------------------------------------------------------
def reference_forward(x_nchw, p):
    hi = jax.lax.Precision.HIGHEST
    x = jnp.transpose(x_nchw, (0, 2, 3, 1))
    w1 = p["w1"].reshape(3, 3, 1, 32)
    w2 = p["w2"].reshape(3, 3, 32, 64)

    def conv(a, w):
        return jax.lax.conv_general_dilated(
            a, w, (1, 1), ((1, 1), (1, 1)),
            dimension_numbers=("NHWC", "HWIO", "NHWC"), precision=hi)

    def pool(a):
        b, h, w, c = a.shape
        return a.reshape(b, h // 2, 2, w // 2, 2, c).max(axis=(2, 4))

    a = pool(jnp.maximum(conv(x, w1) + p["b1"], 0.0))
    a = pool(jnp.maximum(conv(a, w2) + p["b2"], 0.0))
    a = a.reshape(a.shape[0], -1)                       # NHWC-flat (hp, wp, c)
    h = jnp.maximum(jnp.dot(a, p["w_fc1"], precision=hi) + p["b_fc1"], 0.0)
    return jnp.dot(h, p["w_fc2"], precision=hi) + p["b_fc2"]


if __name__ == "__main__":
    key = jax.random.PRNGKey(0)
    k_param, k_input = jax.random.split(key)
    params = init_params(k_param)
    kernel_params = prepare_params(params)
    # 28x28 input is forced by fc1 expecting 64 * 7 * 7 features after two pools.
    x = jax.random.normal(k_input, (2, 1, 28, 28), jnp.float32)

    fwd = jax.jit(cnn_forward)
    out = fwd(x, kernel_params)
    jax.block_until_ready(out)
    assert out.shape == (2, 10), out.shape
    assert out.dtype == jnp.float32
    assert bool(jnp.isfinite(out).all())

    ref = reference_forward(x, params)
    err = float(jnp.max(jnp.abs(out - ref)))
    assert err < 0.08, f"kernel vs reference max abs err {err}"   # bf16 intermediates
    print("KERNEL_OK")
</pallas_src>

<mosaic_0001>
module attributes {stable_mosaic.version = 11 : i64} {
  func.func @_conv_stage_kernel(%arg0: i32, %arg1: memref<1x1024x1xf32, #tpu.memory_space<vmem>>, %arg2: memref<9x32xf32, #tpu.memory_space<vmem>>, %arg3: memref<1x32xf32, #tpu.memory_space<vmem>>, %arg4: memref<288x64xbf16, #tpu.memory_space<vmem>>, %arg5: memref<1x64xf32, #tpu.memory_space<vmem>>, %arg6: memref<1x104x64xbf16, #tpu.memory_space<vmem>>, %arg7: memref<136x32xbf16, #tpu.memory_space<vmem>>, %arg8: memref<136x32xbf16, #tpu.memory_space<vmem>>) attributes {dimension_semantics = [#tpu.dimension_semantics<parallel>], iteration_bounds = array<i64: 2>, scalar_prefetch = 0 : i64, scratch_operands = 2 : i64, tpu.core_type = #tpu.core_type<tc>, window_params = [{transform_indices = @transform_0, window_bounds = array<i64: 1, 1024, 1>}, {pipeline_mode = #tpu.pipeline_mode<synchronous>, transform_indices = @transform_1, window_bounds = array<i64: 9, 32>}, {pipeline_mode = #tpu.pipeline_mode<synchronous>, transform_indices = @transform_2, window_bounds = array<i64: 1, 32>}, {pipeline_mode = #tpu.pipeline_mode<synchronous>, transform_indices = @transform_3, window_bounds = array<i64: 288, 64>}, {pipeline_mode = #tpu.pipeline_mode<synchronous>, transform_indices = @transform_4, window_bounds = array<i64: 1, 64>}, {transform_indices = @transform_5, window_bounds = array<i64: 1, 104, 64>}]} {
    %c0 = arith.constant 0 : index
    %c0_0 = arith.constant 0 : index
    %0 = vector.load %arg2[%c0, %c0_0] : memref<9x32xf32, #tpu.memory_space<vmem>>, vector<9x32xf32>
    %c0_1 = arith.constant 0 : index
    %c0_2 = arith.constant 0 : index
    %1 = vector.load %arg3[%c0_1, %c0_2] : memref<1x32xf32, #tpu.memory_space<vmem>>, vector<1x32xf32>
    %c0_3 = arith.constant 0 : index
    %c0_4 = arith.constant 0 : index
    %2 = vector.load %arg5[%c0_3, %c0_4] : memref<1x64xf32, #tpu.memory_space<vmem>>, vector<1x64xf32>
    %c0_5 = arith.constant 0 : index
    %c0_6 = arith.constant 0 : index
    %3 = vector.load %arg4[%c0_5, %c0_6] : memref<288x64xbf16, #tpu.memory_space<vmem>>, vector<288x64xbf16>
    %4 = tpu.iota {dimensions = array<i32: 0>} : vector<112x1xi32>
    %c8_i32 = arith.constant 8 : i32
    %c0_i32 = arith.constant 0 : i32
    %5 = arith.cmpi eq, %c8_i32, %c0_i32 : i32
    %c1_i32 = arith.constant 1 : i32
    %6 = arith.select %5, %c1_i32, %c8_i32 : i32
    %7 = vector.broadcast %6 : i32 to vector<112x1xi32>
    %8 = arith.remsi %4, %7 : vector<112x1xi32>
    %c0_i32_7 = arith.constant 0 : i32
    %9 = vector.broadcast %c0_i32_7 : i32 to vector<112x1xi32>
    %10 = arith.cmpi ne, %8, %9 : vector<112x1xi32>
    %c0_i32_8 = arith.constant 0 : i32
    %11 = vector.broadcast %c0_i32_8 : i32 to vector<112x1xi32>
    %12 = arith.cmpi slt, %8, %11 : vector<112x1xi32>
    %c0_i32_9 = arith.constant 0 : i32
    %13 = arith.cmpi slt, %6, %c0_i32_9 : i32
    %14 = vector.broadcast %13 : i1 to vector<112x1xi1>
    %15 = vector.broadcast %14 : vector<112x1xi1> to vector<112x1xi1>
    %16 = arith.xori %12, %15 : vector<112x1xi1>
    %17 = arith.andi %16, %10 : vector<112x1xi1>
    %18 = vector.broadcast %6 : i32 to vector<112x1xi32>
    %19 = arith.addi %8, %18 : vector<112x1xi32>
    %20 = arith.select %17, %19, %8 : vector<112x1xi1>, vector<112x1xi32>
    %c7_i32 = arith.constant 7 : i32
    %21 = vector.broadcast %c7_i32 : i32 to vector<112x1xi32>
    %22 = arith.cmpi eq, %20, %21 : vector<112x1xi32>
    %cst = arith.constant 0.000000e+00 : f32
    %cst_10 = arith.constant 1.000000e+00 : f32
    %23 = vector.broadcast %cst : f32 to vector<112x1xf32>
    %24 = vector.broadcast %cst_10 : f32 to vector<112x1xf32>
    %25 = arith.select %22, %23, %24 : vector<112x1xi1>, vector<112x1xf32>
    %cst_11 = arith.constant 0.000000e+00 : f32
    %26 = vector.broadcast %cst_11 : f32 to vector<112x32xf32>
    %c0_12 = arith.constant 0 : index
    %c0_13 = arith.constant 0 : index
    %c0_14 = arith.constant 0 : index
    %27 = vector.load %arg1[%c0_12, %c0_13, %c0_14] : memref<1x1024x1xf32, #tpu.memory_space<vmem>>, vector<1x112x1xf32>
    %28 = vector.shape_cast %27 : vector<1x112x1xf32> to vector<112x1xf32>
    %29 = vector.extract_strided_slice %0 {offsets = [0, 0], sizes = [1, 32], strides = [1, 1]} : vector<9x32xf32> to vector<1x32xf32>
    %30 = vector.broadcast %28 : vector<112x1xf32> to vector<112x32xf32>
    %31 = vector.broadcast %29 : vector<1x32xf32> to vector<112x32xf32>
    %32 = arith.mulf %30, %31 : vector<112x32xf32>
    %33 = arith.addf %26, %32 : vector<112x32xf32>
    %c0_15 = arith.constant 0 : index
    %c128 = arith.constant 128 : index
    %c0_16 = arith.constant 0 : index
    %34 = vector.load %arg1[%c0_15, %c128, %c0_16] : memref<1x1024x1xf32, #tpu.memory_space<vmem>>, vector<1x112x1xf32>
    %35 = vector.shape_cast %34 : vector<1x112x1xf32> to vector<112x1xf32>
    %36 = vector.extract_strided_slice %0 {offsets = [1, 0], sizes = [1, 32], strides = [1, 1]} : vector<9x32xf32> to vector<1x32xf32>
    %37 = vector.broadcast %35 : vector<112x1xf32> to vector<112x32xf32>
    %38 = vector.broadcast %36 : vector<1x32xf32> to vector<112x32xf32>
    %39 = arith.mulf %37, %38 : vector<112x32xf32>
    %40 = arith.addf %33, %39 : vector<112x32xf32>
    %c0_17 = arith.constant 0 : index
    %c256 = arith.constant 256 : index
    %c0_18 = arith.constant 0 : index
    %41 = vector.load %arg1[%c0_17, %c256, %c0_18] : memref<1x1024x1xf32, #tpu.memory_space<vmem>>, vector<1x112x1xf32>
    %42 = vector.shape_cast %41 : vector<1x112x1xf32> to vector<112x1xf32>
    %43 = vector.extract_strided_slice %0 {offsets = [2, 0], sizes = [1, 32], strides = [1, 1]} : vector<9x32xf32> to vector<1x32xf32>
    %44 = vector.broadcast %42 : vector<112x1xf32> to vector<112x32xf32>
    %45 = vector.broadcast %43 : vector<1x32xf32> to vector<112x32xf32>
    %46 = arith.mulf %44, %45 : vector<112x32xf32>
    %47 = arith.addf %40, %46 : vector<112x32xf32>
    %c0_19 = arith.constant 0 : index
    %c512 = arith.constant 512 : index
    %c0_20 = arith.constant 0 : index
    %48 = vector.load %arg1[%c0_19, %c512, %c0_20] : memref<1x1024x1xf32, #tpu.memory_space<vmem>>, vector<1x112x1xf32>
    %49 = vector.shape_cast %48 : vector<1x112x1xf32> to vector<112x1xf32>
    %50 = vector.extract_strided_slice %0 {offsets = [3, 0], sizes = [1, 32], strides = [1, 1]} : vector<9x32xf32> to vector<1x32xf32>
    %51 = vector.broadcast %49 : vector<112x1xf32> to vector<112x32xf32>
    %52 = vector.broadcast %50 : vector<1x32xf32> to vector<112x32xf32>
    %53 = arith.mulf %51, %52 : vector<112x32xf32>
    %54 = arith.addf %47, %53 : vector<112x32xf32>
    %c0_21 = arith.constant 0 : index
    %c640 = arith.constant 640 : index
    %c0_22 = arith.constant 0 : index
    %55 = vector.load %arg1[%c0_21, %c640, %c0_22] : memref<1x1024x1xf32, #tpu.memory_space<vmem>>, vector<1x112x1xf32>
    %56 = vector.shape_cast %55 : vector<1x112x1xf32> to vector<112x1xf32>
    %57 = vector.extract_strided_slice %0 {offsets = [4, 0], sizes = [1, 32], strides = [1, 1]} : vector<9x32xf32> to vector<1x32xf32>
    %58 = vector.broadcast %56 : vector<112x1xf32> to vector<112x32xf32>
    %59 = vector.broadcast %57 : vector<1x32xf32> to vector<112x32xf32>
    %60 = arith.mulf %58, %59 : vector<112x32xf32>
    %61 = arith.addf %54, %60 : vector<112x32xf32>
    %c0_23 = arith.constant 0 : index
    %c768 = arith.constant 768 : index
    %c0_24 = arith.constant 0 : index
    %62 = vector.load %arg1[%c0_23, %c768, %c0_24] : memref<1x1024x1xf32, #tpu.memory_space<vmem>>, vector<1x112x1xf32>
    %63 = vector.shape_cast %62 : vector<1x112x1xf32> to vector<112x1xf32>
    %64 = vector.extract_strided_slice %0 {offsets = [5, 0], sizes = [1, 32], strides = [1, 1]} : vector<9x32xf32> to vector<1x32xf32>
    %65 = vector.broadcast %63 : vector<112x1xf32> to vector<112x32xf32>
    %66 = vector.broadcast %64 : vector<1x32xf32> to vector<112x32xf32>
    %67 = arith.mulf %65, %66 : vector<112x32xf32>
    %68 = arith.addf %61, %67 : vector<112x32xf32>
    %c0_25 = arith.constant 0 : index
    %c8 = arith.constant 8 : index
    %c0_26 = arith.constant 0 : index
    %69 = vector.load %arg1[%c0_25, %c8, %c0_26] : memref<1x1024x1xf32, #tpu.memory_space<vmem>>, vector<1x112x1xf32>
    %70 = vector.shape_cast %69 : vector<1x112x1xf32> to vector<112x1xf32>
    %71 = vector.extract_strided_slice %0 {offsets = [6, 0], sizes = [1, 32], strides = [1, 1]} : vector<9x32xf32> to vector<1x32xf32>
    %72 = vector.broadcast %70 : vector<112x1xf32> to vector<112x32xf32>
    %73 = vector.broadcast %71 : vector<1x32xf32> to vector<112x32xf32>
    %74 = arith.mulf %72, %73 : vector<112x32xf32>
    %75 = arith.addf %68, %74 : vector<112x32xf32>
    %c0_27 = arith.constant 0 : index
    %c136 = arith.constant 136 : index
    %c0_28 = arith.constant 0 : index
    %76 = vector.load %arg1[%c0_27, %c136, %c0_28] : memref<1x1024x1xf32, #tpu.memory_space<vmem>>, vector<1x112x1xf32>
    %77 = vector.shape_cast %76 : vector<1x112x1xf32> to vector<112x1xf32>
    %78 = vector.extract_strided_slice %0 {offsets = [7, 0], sizes = [1, 32], strides = [1, 1]} : vector<9x32xf32> to vector<1x32xf32>
    %79 = vector.broadcast %77 : vector<112x1xf32> to vector<112x32xf32>
    %80 = vector.broadcast %78 : vector<1x32xf32> to vector<112x32xf32>
    %81 = arith.mulf %79, %80 : vector<112x32xf32>
    %82 = arith.addf %75, %81 : vector<112x32xf32>
    %c0_29 = arith.constant 0 : index
    %c264 = arith.constant 264 : index
    %c0_30 = arith.constant 0 : index
    %83 = vector.load %arg1[%c0_29, %c264, %c0_30] : memref<1x1024x1xf32, #tpu.memory_space<vmem>>, vector<1x112x1xf32>
    %84 = vector.shape_cast %83 : vector<1x112x1xf32> to vector<112x1xf32>
    %85 = vector.extract_strided_slice %0 {offsets = [8, 0], sizes = [1, 32], strides = [1, 1]} : vector<9x32xf32> to vector<1x32xf32>
    %86 = vector.broadcast %84 : vector<112x1xf32> to vector<112x32xf32>
    %87 = vector.broadcast %85 : vector<1x32xf32> to vector<112x32xf32>
    %88 = arith.mulf %86, %87 : vector<112x32xf32>
    %89 = arith.addf %82, %88 : vector<112x32xf32>
    %cst_31 = arith.constant 0.000000e+00 : f32
    %90 = vector.broadcast %cst_31 : f32 to vector<112x32xf32>
    %c0_32 = arith.constant 0 : index
    %c128_33 = arith.constant 128 : index
    %c0_34 = arith.constant 0 : index
    %91 = vector.load %arg1[%c0_32, %c128_33, %c0_34] : memref<1x1024x1xf32, #tpu.memory_space<vmem>>, vector<1x112x1xf32>
    %92 = vector.shape_cast %91 : vector<1x112x1xf32> to vector<112x1xf32>
    %93 = vector.extract_strided_slice %0 {offsets = [0, 0], sizes = [1, 32], strides = [1, 1]} : vector<9x32xf32> to vector<1x32xf32>
    %94 = vector.broadcast %92 : vector<112x1xf32> to vector<112x32xf32>
    %95 = vector.broadcast %93 : vector<1x32xf32> to vector<112x32xf32>
    %96 = arith.mulf %94, %95 : vector<112x32xf32>
    %97 = arith.addf %90, %96 : vector<112x32xf32>
    %c0_35 = arith.constant 0 : index
    %c256_36 = arith.constant 256 : index
    %c0_37 = arith.constant 0 : index
    %98 = vector.load %arg1[%c0_35, %c256_36, %c0_37] : memref<1x1024x1xf32, #tpu.memory_space<vmem>>, vector<1x112x1xf32>
    %99 = vector.shape_cast %98 : vector<1x112x1xf32> to vector<112x1xf32>
    %100 = vector.extract_strided_slice %0 {offsets = [1, 0], sizes = [1, 32], strides = [1, 1]} : vector<9x32xf32> to vector<1x32xf32>
    %101 = vector.broadcast %99 : vector<112x1xf32> to vector<112x32xf32>
    %102 = vector.broadcast %100 : vector<1x32xf32> to vector<112x32xf32>
    %103 = arith.mulf %101, %102 : vector<112x32xf32>
    %104 = arith.addf %97, %103 : vector<112x32xf32>
    %c0_38 = arith.constant 0 : index
    %c384 = arith.constant 384 : index
    %c0_39 = arith.constant 0 : index
    %105 = vector.load %arg1[%c0_38, %c384, %c0_39] : memref<1x1024x1xf32, #tpu.memory_space<vmem>>, vector<1x112x1xf32>
    %106 = vector.shape_cast %105 : vector<1x112x1xf32> to vector<112x1xf32>
    %107 = vector.extract_strided_slice %0 {offsets = [2, 0], sizes = [1, 32], strides = [1, 1]} : vector<9x32xf32> to vector<1x32xf32>
    %108 = vector.broadcast %106 : vector<112x1xf32> to vector<112x32xf32>
    %109 = vector.broadcast %107 : vector<1x32xf32> to vector<112x32xf32>
    %110 = arith.mulf %108, %109 : vector<112x32xf32>
    %111 = arith.addf %104, %110 : vector<112x32xf32>
    %c0_40 = arith.constant 0 : index
    %c640_41 = arith.constant 640 : index
    %c0_42 = arith.constant 0 : index
    %112 = vector.load %arg1[%c0_40, %c640_41, %c0_42] : memref<1x1024x1xf32, #tpu.memory_space<vmem>>, vector<1x112x1xf32>
    %113 = vector.shape_cast %112 : vector<1x112x1xf32> to vector<112x1xf32>
    %114 = vector.extract_strided_slice %0 {offsets = [3, 0], sizes = [1, 32], strides = [1, 1]} : vector<9x32xf32> to vector<1x32xf32>
    %115 = vector.broadcast %113 : vector<112x1xf32> to vector<112x32xf32>
    %116 = vector.broadcast %114 : vector<1x32xf32> to vector<112x32xf32>
    %117 = arith.mulf %115, %116 : vector<112x32xf32>
    %118 = arith.addf %111, %117 : vector<112x32xf32>
    %c0_43 = arith.constant 0 : index
    %c768_44 = arith.constant 768 : index
    %c0_45 = arith.constant 0 : index
    %119 = vector.load %arg1[%c0_43, %c768_44, %c0_45] : memref<1x1024x1xf32, #tpu.memory_space<vmem>>, vector<1x112x1xf32>
    %120 = vector.shape_cast %119 : vector<1x112x1xf32> to vector<112x1xf32>
    %121 = vector.extract_strided_slice %0 {offsets = [4, 0], sizes = [1, 32], strides = [1, 1]} : vector<9x32xf32> to vector<1x32xf32>
    %122 = vector.broadcast %120 : vector<112x1xf32> to vector<112x32xf32>
    %123 = vector.broadcast %121 : vector<1x32xf32> to vector<112x32xf32>
    %124 = arith.mulf %122, %123 : vector<112x32xf32>
    %125 = arith.addf %118, %124 : vector<112x32xf32>
    %c0_46 = arith.constant 0 : index
    %c896 = arith.constant 896 : index
    %c0_47 = arith.constant 0 : index
    %126 = vector.load %arg1[%c0_46, %c896, %c0_47] : memref<1x1024x1xf32, #tpu.memory_space<vmem>>, vector<1x112x1xf32>
    %127 = vector.shape_cast %126 : vector<1x112x1xf32> to vector<112x1xf32>
    %128 = vector.extract_strided_slice %0 {offsets = [5, 0], sizes = [1, 32], strides = [1, 1]} : vector<9x32xf32> to vector<1x32xf32>
    %129 = vector.broadcast %127 : vector<112x1xf32> to vector<112x32xf32>
    %130 = vector.broadcast %128 : vector<1x32xf32> to vector<112x32xf32>
    %131 = arith.mulf %129, %130 : vector<112x32xf32>
    %132 = arith.addf %125, %131 : vector<112x32xf32>
    %c0_48 = arith.constant 0 : index
    %c136_49 = arith.constant 136 : index
    %c0_50 = arith.constant 0 : index
    %133 = vector.load %arg1[%c0_48, %c136_49, %c0_50] : memref<1x1024x1xf32, #tpu.memory_space<vmem>>, vector<1x112x1xf32>
    %134 = vector.shape_cast %133 : vector<1x112x1xf32> to vector<112x1xf32>
    %135 = vector.extract_strided_slice %0 {offsets = [6, 0], sizes = [1, 32], strides = [1, 1]} : vector<9x32xf32> to vector<1x32xf32>
    %136 = vector.broadcast %134 : vector<112x1xf32> to vector<112x32xf32>
    %137 = vector.broadcast %135 : vector<1x32xf32> to vector<112x32xf32>
    %138 = arith.mulf %136, %137 : vector<112x32xf32>
    %139 = arith.addf %132, %138 : vector<112x32xf32>
    %c0_51 = arith.constant 0 : index
    %c264_52 = arith.constant 264 : index
    %c0_53 = arith.constant 0 : index
    %140 = vector.load %arg1[%c0_51, %c264_52, %c0_53] : memref<1x1024x1xf32, #tpu.memory_space<vmem>>, vector<1x112x1xf32>
    %141 = vector.shape_cast %140 : vector<1x112x1xf32> to vector<112x1xf32>
    %142 = vector.extract_strided_slice %0 {offsets = [7, 0], sizes = [1, 32], strides = [1, 1]} : vector<9x32xf32> to vector<1x32xf32>
    %143 = vector.broadcast %141 : vector<112x1xf32> to vector<112x32xf32>
    %144 = vector.broadcast %142 : vector<1x32xf32> to vector<112x32xf32>
    %145 = arith.mulf %143, %144 : vector<112x32xf32>
    %146 = arith.addf %139, %145 : vector<112x32xf32>
    %c0_54 = arith.constant 0 : index
    %c392 = arith.constant 392 : index
    %c0_55 = arith.constant 0 : index
    %147 = vector.load %arg1[%c0_54, %c392, %c0_55] : memref<1x1024x1xf32, #tpu.memory_space<vmem>>, vector<1x112x1xf32>
    %148 = vector.shape_cast %147 : vector<1x112x1xf32> to vector<112x1xf32>
    %149 = vector.extract_strided_slice %0 {offsets = [8, 0], sizes = [1, 32], strides = [1, 1]} : vector<9x32xf32> to vector<1x32xf32>
    %150 = vector.broadcast %148 : vector<112x1xf32> to vector<112x32xf32>
    %151 = vector.broadcast %149 : vector<1x32xf32> to vector<112x32xf32>
    %152 = arith.mulf %150, %151 : vector<112x32xf32>
    %153 = arith.addf %146, %152 : vector<112x32xf32>
    %154 = arith.maximumf %89, %153 : vector<112x32xf32>
    %cst_56 = arith.constant 0.000000e+00 : f32
    %155 = vector.broadcast %cst_56 : f32 to vector<112x32xf32>
    %c0_57 = arith.constant 0 : index
    %c512_58 = arith.constant 512 : index
    %c0_59 = arith.constant 0 : index
    %156 = vector.load %arg1[%c0_57, %c512_58, %c0_59] : memref<1x1024x1xf32, #tpu.memory_space<vmem>>, vector<1x112x1xf32>
    %157 = vector.shape_cast %156 : vector<1x112x1xf32> to vector<112x1xf32>
    %158 = vector.extract_strided_slice %0 {offsets = [0, 0], sizes = [1, 32], strides = [1, 1]} : vector<9x32xf32> to vector<1x32xf32>
    %159 = vector.broadcast %157 : vector<112x1xf32> to vector<112x32xf32>
    %160 = vector.broadcast %158 : vector<1x32xf32> to vector<112x32xf32>
    %161 = arith.mulf %159, %160 : vector<112x32xf32>
    %162 = arith.addf %155, %161 : vector<112x32xf32>
    %c0_60 = arith.constant 0 : index
    %c640_61 = arith.constant 640 : index
    %c0_62 = arith.constant 0 : index
    %163 = vector.load %arg1[%c0_60, %c640_61, %c0_62] : memref<1x1024x1xf32, #tpu.memory_space<vmem>>, vector<1x112x1xf32>
    %164 = vector.shape_cast %163 : vector<1x112x1xf32> to vector<112x1xf32>
    %165 = vector.extract_strided_slice %0 {offsets = [1, 0], sizes = [1, 32], strides = [1, 1]} : vector<9x32xf32> to vector<1x32xf32>
    %166 = vector.broadcast %164 : vector<112x1xf32> to vector<112x32xf32>
    %167 = vector.broadcast %165 : vector<1x32xf32> to vector<112x32xf32>
    %168 = arith.mulf %166, %167 : vector<112x32xf32>
    %169 = arith.addf %162, %168 : vector<112x32xf32>
    %c0_63 = arith.constant 0 : index
    %c768_64 = arith.constant 768 : index
    %c0_65 = arith.constant 0 : index
    %170 = vector.load %arg1[%c0_63, %c768_64, %c0_65] : memref<1x1024x1xf32, #tpu.memory_space<vmem>>, vector<1x112x1xf32>
    %171 = vector.shape_cast %170 : vector<1x112x1xf32> to vector<112x1xf32>
    %172 = vector.extract_strided_slice %0 {offsets = [2, 0], sizes = [1, 32], strides = [1, 1]} : vector<9x32xf32> to vector<1x32xf32>
    %173 = vector.broadcast %171 : vector<112x1xf32> to vector<112x32xf32>
    %174 = vector.broadcast %172 : vector<1x32xf32> to vector<112x32xf32>
    %175 = arith.mulf %173, %174 : vector<112x32xf32>
    %176 = arith.addf %169, %175 : vector<112x32xf32>
    %c0_66 = arith.constant 0 : index
    %c8_67 = arith.constant 8 : index
    %c0_68 = arith.constant 0 : index
    %177 = vector.load %arg1[%c0_66, %c8_67, %c0_68] : memref<1x1024x1xf32, #tpu.memory_space<vmem>>, vector<1x112x1xf32>
    %178 = vector.shape_cast %177 : vector<1x112x1xf32> to vector<112x1xf32>
    %179 = vector.extract_strided_slice %0 {offsets = [3, 0], sizes = [1, 32], strides = [1, 1]} : vector<9x32xf32> to vector<1x32xf32>
    %180 = vector.broadcast %178 : vector<112x1xf32> to vector<112x32xf32>
    %181 = vector.broadcast %179 : vector<1x32xf32> to vector<112x32xf32>
    %182 = arith.mulf %180, %181 : vector<112x32xf32>
    %183 = arith.addf %176, %182 : vector<112x32xf32>
    %c0_69 = arith.constant 0 : index
    %c136_70 = arith.constant 136 : index
    %c0_71 = arith.constant 0 : index
    %184 = vector.load %arg1[%c0_69, %c136_70, %c0_71] : memref<1x1024x1xf32, #tpu.memory_space<vmem>>, vector<1x112x1xf32>
    %185 = vector.shape_cast %184 : vector<1x112x1xf32> to vector<112x1xf32>
    %186 = vector.extract_strided_slice %0 {offsets = [4, 0], sizes = [1, 32], strides = [1, 1]} : vector<9x32xf32> to vector<1x32xf32>
    %187 = vector.broadcast %185 : vector<112x1xf32> to vector<112x32xf32>
    %188 = vector.broadcast %186 : vector<1x32xf32> to vector<112x32xf32>
    %189 = arith.mulf %187, %188 : vector<112x32xf32>
    %190 = arith.addf %183, %189 : vector<112x32xf32>
    %c0_72 = arith.constant 0 : index
    %c264_73 = arith.constant 264 : index
    %c0_74 = arith.constant 0 : index
    %191 = vector.load %arg1[%c0_72, %c264_73, %c0_74] : memref<1x1024x1xf32, #tpu.memory_space<vmem>>, vector<1x112x1xf32>
    %192 = vector.shape_cast %191 : vector<1x112x1xf32> to vector<112x1xf32>
    %193 = vector.extract_strided_slice %0 {offsets = [5, 0], sizes = [1, 32], strides = [1, 1]} : vector<9x32xf32> to vector<1x32xf32>
    %194 = vector.broadcast %192 : vector<112x1xf32> to vector<112x32xf32>
    %195 = vector.broadcast %193 : vector<1x32xf32> to vector<112x32xf32>
    %196 = arith.mulf %194, %195 : vector<112x32xf32>
    %197 = arith.addf %190, %196 : vector<112x32xf32>
    %c0_75 = arith.constant 0 : index
    %c520 = arith.constant 520 : index
    %c0_76 = arith.constant 0 : index
    %198 = vector.load %arg1[%c0_75, %c520, %c0_76] : memref<1x1024x1xf32, #tpu.memory_space<vmem>>, vector<1x112x1xf32>
    %199 = vector.shape_cast %198 : vector<1x112x1xf32> to vector<112x1xf32>
    %200 = vector.extract_strided_slice %0 {offsets = [6, 0], sizes = [1, 32], strides = [1, 1]} : vector<9x32xf32> to vector<1x32xf32>
    %201 = vector.broadcast %199 : vector<112x1xf32> to vector<112x32xf32>
    %202 = vector.broadcast %200 : vector<1x32xf32> to vector<112x32xf32>
    %203 = arith.mulf %201, %202 : vector<112x32xf32>
    %204 = arith.addf %197, %203 : vector<112x32xf32>
    %c0_77 = arith.constant 0 : index
    %c648 = arith.constant 648 : index
    %c0_78 = arith.constant 0 : index
    %205 = vector.load %arg1[%c0_77, %c648, %c0_78] : memref<1x1024x1xf32, #tpu.memory_space<vmem>>, vector<1x112x1xf32>
    %206 = vector.shape_cast %205 : vector<1x112x1xf32> to vector<112x1xf32>
    %207 = vector.extract_strided_slice %0 {offsets = [7, 0], sizes = [1, 32], strides = [1, 1]} : vector<9x32xf32> to vector<1x32xf32>
    %208 = vector.broadcast %206 : vector<112x1xf32> to vector<112x32xf32>
    %209 = vector.broadcast %207 : vector<1x32xf32> to vector<112x32xf32>
    %210 = arith.mulf %208, %209 : vector<112x32xf32>
    %211 = arith.addf %204, %210 : vector<112x32xf32>
    %c0_79 = arith.constant 0 : index
    %c776 = arith.constant 776 : index
    %c0_80 = arith.constant 0 : index
    %212 = vector.load %arg1[%c0_79, %c776, %c0_80] : memref<1x1024x1xf32, #tpu.memory_space<vmem>>, vector<1x112x1xf32>
    %213 = vector.shape_cast %212 : vector<1x112x1xf32> to vector<112x1xf32>
    %214 = vector.extract_strided_slice %0 {offsets = [8, 0], sizes = [1, 32], strides = [1, 1]} : vector<9x32xf32> to vector<1x32xf32>
    %215 = vector.broadcast %213 : vector<112x1xf32> to vector<112x32xf32>
    %216 = vector.broadcast %214 : vector<1x32xf32> to vector<112x32xf32>
    %217 = arith.mulf %215, %216 : vector<112x32xf32>
    %218 = arith.addf %211, %217 : vector<112x32xf32>
    %cst_81 = arith.constant 0.000000e+00 : f32
    %219 = vector.broadcast %cst_81 : f32 to vector<112x32xf32>
    %c0_82 = arith.constant 0 : index
    %c640_83 = arith.constant 640 : index
    %c0_84 = arith.constant 0 : index
    %220 = vector.load %arg1[%c0_82, %c640_83, %c0_84] : memref<1x1024x1xf32, #tpu.memory_space<vmem>>, vector<1x112x1xf32>
    %221 = vector.shape_cast %220 : vector<1x112x1xf32> to vector<112x1xf32>
    %222 = vector.extract_strided_slice %0 {offsets = [0, 0], sizes = [1, 32], strides = [1, 1]} : vector<9x32xf32> to vector<1x32xf32>
    %223 = vector.broadcast %221 : vector<112x1xf32> to vector<112x32xf32>
    %224 = vector.broadcast %222 : vector<1x32xf32> to vector<112x32xf32>
    %225 = arith.mulf %223, %224 : vector<112x32xf32>
    %226 = arith.addf %219, %225 : vector<112x32xf32>
    %c0_85 = arith.constant 0 : index
    %c768_86 = arith.constant 768 : index
    %c0_87 = arith.constant 0 : index
    %227 = vector.load %arg1[%c0_85, %c768_86, %c0_87] : memref<1x1024x1xf32, #tpu.memory_space<vmem>>, vector<1x112x1xf32>
    %228 = vector.shape_cast %227 : vector<1x112x1xf32> to vector<112x1xf32>
    %229 = vector.extract_strided_slice %0 {offsets = [1, 0], sizes = [1, 32], strides = [1, 1]} : vector<9x32xf32> to vector<1x32xf32>
    %230 = vector.broadcast %228 : vector<112x1xf32> to vector<112x32xf32>
    %231 = vector.broadcast %229 : vector<1x32xf32> to vector<112x32xf32>
    %232 = arith.mulf %230, %231 : vector<112x32xf32>
    %233 = arith.addf %226, %232 : vector<112x32xf32>
    %c0_88 = arith.constant 0 : index
    %c896_89 = arith.constant 896 : index
    %c0_90 = arith.constant 0 : index
    %234 = vector.load %arg1[%c0_88, %c896_89, %c0_90] : memref<1x1024x1xf32, #tpu.memory_space<vmem>>, vector<1x112x1xf32>
    %235 = vector.shape_cast %234 : vector<1x112x1xf32> to vector<112x1xf32>
    %236 = vector.extract_strided_slice %0 {offsets = [2, 0], sizes = [1, 32], strides = [1, 1]} : vector<9x32xf32> to vector<1x32xf32>
    %237 = vector.broadcast %235 : vector<112x1xf32> to vector<112x32xf32>
    %238 = vector.broadcast %236 : vector<1x32xf32> to vector<112x32xf32>
    %239 = arith.mulf %237, %238 : vector<112x32xf32>
    %240 = arith.addf %233, %239 : vector<112x32xf32>
    %c0_91 = arith.constant 0 : index
    %c136_92 = arith.constant 136 : index
    %c0_93 = arith.constant 0 : index
    %241 = vector.load %arg1[%c0_91, %c136_92, %c0_93] : memref<1x1024x1xf32, #tpu.memory_space<vmem>>, vector<1x112x1xf32>
    %242 = vector.shape_cast %241 : vector<1x112x1xf32> to vector<112x1xf32>
    %243 = vector.extract_strided_slice %0 {offsets = [3, 0], sizes = [1, 32], strides = [1, 1]} : vector<9x32xf32> to vector<1x32xf32>
    %244 = vector.broadcast %242 : vector<112x1xf32> to vector<112x32xf32>
    %245 = vector.broadcast %243 : vector<1x32xf32> to vector<112x32xf32>
    %246 = arith.mulf %244, %245 : vector<112x32xf32>
    %247 = arith.addf %240, %246 : vector<112x32xf32>
    %c0_94 = arith.constant 0 : index
    %c264_95 = arith.constant 264 : index
    %c0_96 = arith.constant 0 : index
    %248 = vector.load %arg1[%c0_94, %c264_95, %c0_96] : memref<1x1024x1xf32, #tpu.memory_space<vmem>>, vector<1x112x1xf32>
    %249 = vector.shape_cast %248 : vector<1x112x1xf32> to vector<112x1xf32>
    %250 = vector.extract_strided_slice %0 {offsets = [4, 0], sizes = [1, 32], strides = [1, 1]} : vector<9x32xf32> to vector<1x32xf32>
    %251 = vector.broadcast %249 : vector<112x1xf32> to vector<112x32xf32>
    %252 = vector.broadcast %250 : vector<1x32xf32> to vector<112x32xf32>
    %253 = arith.mulf %251, %252 : vector<112x32xf32>
    %254 = arith.addf %247, %253 : vector<112x32xf32>
    %c0_97 = arith.constant 0 : index
    %c392_98 = arith.constant 392 : index
    %c0_99 = arith.constant 0 : index
    %255 = vector.load %arg1[%c0_97, %c392_98, %c0_99] : memref<1x1024x1xf32, #tpu.memory_space<vmem>>, vector<1x112x1xf32>
    %256 = vector.shape_cast %255 : vector<1x112x1xf32> to vector<112x1xf32>
    %257 = vector.extract_strided_slice %0 {offsets = [5, 0], sizes = [1, 32], strides = [1, 1]} : vector<9x32xf32> to vector<1x32xf32>
    %258 = vector.broadcast %256 : vector<112x1xf32> to vector<112x32xf32>
    %259 = vector.broadcast %257 : vector<1x32xf32> to vector<112x32xf32>
    %260 = arith.mulf %258, %259 : vector<112x32xf32>
    %261 = arith.addf %254, %260 : vector<112x32xf32>
    %c0_100 = arith.constant 0 : index
    %c648_101 = arith.constant 648 : index
    %c0_102 = arith.constant 0 : index
    %262 = vector.load %arg1[%c0_100, %c648_101, %c0_102] : memref<1x1024x1xf32, #tpu.memory_space<vmem>>, vector<1x112x1xf32>
    %263 = vector.shape_cast %262 : vector<1x112x1xf32> to vector<112x1xf32>
    %264 = vector.extract_strided_slice %0 {offsets = [6, 0], sizes = [1, 32], strides = [1, 1]} : vector<9x32xf32> to vector<1x32xf32>
    %265 = vector.broadcast %263 : vector<112x1xf32> to vector<112x32xf32>
    %266 = vector.broadcast %264 : vector<1x32xf32> to vector<112x32xf32>
    %267 = arith.mulf %265, %266 : vector<112x32xf32>
    %268 = arith.addf %261, %267 : vector<112x32xf32>
    %c0_103 = arith.constant 0 : index
    %c776_104 = arith.constant 776 : index
    %c0_105 = arith.constant 0 : index
    %269 = vector.load %arg1[%c0_103, %c776_104, %c0_105] : memref<1x1024x1xf32, #tpu.memory_space<vmem>>, vector<1x112x1xf32>
    %270 = vector.shape_cast %269 : vector<1x112x1xf32> to vector<112x1xf32>
    %271 = vector.extract_strided_slice %0 {offsets = [7, 0], sizes = [1, 32], strides = [1, 1]} : vector<9x32xf32> to vector<1x32xf32>
    %272 = vector.broadcast %270 : vector<112x1xf32> to vector<112x32xf32>
    %273 = vector.broadcast %271 : vector<1x32xf32> to vector<112x32xf32>
    %274 = arith.mulf %272, %273 : vector<112x32xf32>
    %275 = arith.addf %268, %274 : vector<112x32xf32>
    %c0_106 = arith.constant 0 : index
    %c904 = arith.constant 904 : index
    %c0_107 = arith.constant 0 : index
    %276 = vector.load %arg1[%c0_106, %c904, %c0_107] : memref<1x1024x1xf32, #tpu.memory_space<vmem>>, vector<1x112x1xf32>
    %277 = vector.shape_cast %276 : vector<1x112x1xf32> to vector<112x1xf32>
    %278 = vector.extract_strided_slice %0 {offsets = [8, 0], sizes = [1, 32], strides = [1, 1]} : vector<9x32xf32> to vector<1x32xf32>
    %279 = vector.broadcast %277 : vector<112x1xf32> to vector<112x32xf32>
    %280 = vector.broadcast %278 : vector<1x32xf32> to vector<112x32xf32>
    %281 = arith.mulf %279, %280 : vector<112x32xf32>
    %282 = arith.addf %275, %281 : vector<112x32xf32>
    %283 = arith.maximumf %218, %282 : vector<112x32xf32>
    %284 = arith.maximumf %154, %283 : vector<112x32xf32>
    %cst_108 = arith.constant 0.000000e+00 : f32
    %285 = vector.broadcast %cst_108 : f32 to vector<112x32xf32>
    %c0_109 = arith.constant 0 : index
    %c256_110 = arith.constant 256 : index
    %c0_111 = arith.constant 0 : index
    %286 = vector.load %arg1[%c0_109, %c256_110, %c0_111] : memref<1x1024x1xf32, #tpu.memory_space<vmem>>, vector<1x112x1xf32>
    %287 = vector.shape_cast %286 : vector<1x112x1xf32> to vector<112x1xf32>
    %288 = vector.extract_strided_slice %0 {offsets = [0, 0], sizes = [1, 32], strides = [1, 1]} : vector<9x32xf32> to vector<1x32xf32>
    %289 = vector.broadcast %287 : vector<112x1xf32> to vector<112x32xf32>
    %290 = vector.broadcast %288 : vector<1x32xf32> to vector<112x32xf32>
    %291 = arith.mulf %289, %290 : vector<112x32xf32>
    %292 = arith.addf %285, %291 : vector<112x32xf32>
    %c0_112 = arith.constant 0 : index
    %c384_113 = arith.constant 384 : index
    %c0_114 = arith.constant 0 : index
    %293 = vector.load %arg1[%c0_112, %c384_113, %c0_114] : memref<1x1024x1xf32, #tpu.memory_space<vmem>>, vector<1x112x1xf32>
    %294 = vector.shape_cast %293 : vector<1x112x1xf32> to vector<112x1xf32>
    %295 = vector.extract_strided_slice %0 {offsets = [1, 0], sizes = [1, 32], strides = [1, 1]} : vector<9x32xf32> to vector<1x32xf32>
    %296 = vector.broadcast %294 : vector<112x1xf32> to vector<112x32xf32>
    %297 = vector.broadcast %295 : vector<1x32xf32> to vector<112x32xf32>
    %298 = arith.mulf %296, %297 : vector<112x32xf32>
    %299 = arith.addf %292, %298 : vector<112x32xf32>
    %c0_115 = arith.constant 0 : index
    %c1 = arith.constant 1 : index
    %c0_116 = arith.constant 0 : index
    %300 = vector.load %arg1[%c0_115, %c1, %c0_116] : memref<1x1024x1xf32, #tpu.memory_space<vmem>>, vector<1x112x1xf32>
    %301 = vector.shape_cast %300 : vector<1x112x1xf32> to vector<112x1xf32>
    %302 = vector.extract_strided_slice %0 {offsets = [2, 0], sizes = [1, 32], strides = [1, 1]} : vector<9x32xf32> to vector<1x32xf32>
    %303 = vector.broadcast %301 : vector<112x1xf32> to vector<112x32xf32>
    %304 = vector.broadcast %302 : vector<1x32xf32> to vector<112x32xf32>
    %305 = arith.mulf %303, %304 : vector<112x32xf32>
    %306 = arith.addf %299, %305 : vector<112x32xf32>
    %c0_117 = arith.constant 0 : index
    %c768_118 = arith.constant 768 : index
    %c0_119 = arith.constant 0 : index
    %307 = vector.load %arg1[%c0_117, %c768_118, %c0_119] : memref<1x1024x1xf32, #tpu.memory_space<vmem>>, vector<1x112x1xf32>
    %308 = vector.shape_cast %307 : vector<1x112x1xf32> to vector<112x1xf32>
    %309 = vector.extract_strided_slice %0 {offsets = [3, 0], sizes = [1, 32], strides = [1, 1]} : vector<9x32xf32> to vector<1x32xf32>
    %310 = vector.broadcast %308 : vector<112x1xf32> to vector<112x32xf32>
    %311 = vector.broadcast %309 : vector<1x32xf32> to vector<112x32xf32>
    %312 = arith.mulf %310, %311 : vector<112x32xf32>
    %313 = arith.addf %306, %312 : vector<112x32xf32>
    %c0_120 = arith.constant 0 : index
    %c896_121 = arith.constant 896 : index
    %c0_122 = arith.constant 0 : index
    %314 = vector.load %arg1[%c0_120, %c896_121, %c0_122] : memref<1x1024x1xf32, #tpu.memory_space<vmem>>, vector<1x112x1xf32>
    %315 = vector.shape_cast %314 : vector<1x112x1xf32> to vector<112x1xf32>
    %316 = vector.extract_strided_slice %0 {offsets = [4, 0], sizes = [1, 32], strides = [1, 1]} : vector<9x32xf32> to vector<1x32xf32>
    %317 = vector.broadcast %315 : vector<112x1xf32> to vector<112x32xf32>
    %318 = vector.broadcast %316 : vector<1x32xf32> to vector<112x32xf32>
    %319 = arith.mulf %317, %318 : vector<112x32xf32>
    %320 = arith.addf %313, %319 : vector<112x32xf32>
    %c0_123 = arith.constant 0 : index
    %c513 = arith.constant 513 : index
    %c0_124 = arith.constant 0 : index
    %321 = vector.load %arg1[%c0_123, %c513, %c0_124] : memref<1x1024x1xf32, #tpu.memory_space<vmem>>, vector<1x112x1xf32>
    %322 = vector.shape_cast %321 : vector<1x112x1xf32> to vector<112x1xf32>
    %323 = vector.extract_strided_slice %0 {offsets = [5, 0], sizes = [1, 32], strides = [1, 1]} : vector<9x32xf32> to vector<1x32xf32>
    %324 = vector.broadcast %322 : vector<112x1xf32> to vector<112x32xf32>
    %325 = vector.broadcast %323 : vector<1x32xf32> to vector<112x32xf32>
    %326 = arith.mulf %324, %325 : vector<112x32xf32>
    %327 = arith.addf %320, %326 : vector<112x32xf32>
    %c0_125 = arith.constant 0 : index
    %c264_126 = arith.constant 264 : index
    %c0_127 = arith.constant 0 : index
    %328 = vector.load %arg1[%c0_125, %c264_126, %c0_127] : memref<1x1024x1xf32, #tpu.memory_space<vmem>>, vector<1x112x1xf32>
    %329 = vector.shape_cast %328 : vector<1x112x1xf32> to vector<112x1xf32>
    %330 = vector.extract_strided_slice %0 {offsets = [6, 0], sizes = [1, 32], strides = [1, 1]} : vector<9x32xf32> to vector<1x32xf32>
    %331 = vector.broadcast %329 : vector<112x1xf32> to vector<112x32xf32>
    %332 = vector.broadcast %330 : vector<1x32xf32> to vector<112x32xf32>
    %333 = arith.mulf %331, %332 : vector<112x32xf32>
    %334 = arith.addf %327, %333 : vector<112x32xf32>
    %c0_128 = arith.constant 0 : index
    %c392_129 = arith.constant 392 : index
    %c0_130 = arith.constant 0 : index
    %335 = vector.load %arg1[%c0_128, %c392_129, %c0_130] : memref<1x1024x1xf32, #tpu.memory_space<vmem>>, vector<1x112x1xf32>
    %336 = vector.shape_cast %335 : vector<1x112x1xf32> to vector<112x1xf32>
    %337 = vector.extract_strided_slice %0 {offsets = [7, 0], sizes = [1, 32], strides = [1, 1]} : vector<9x32xf32> to vector<1x32xf32>
    %338 = vector.broadcast %336 : vector<112x1xf32> to vector<112x32xf32>
    %339 = vector.broadcast %337 : vector<1x32xf32> to vector<112x32xf32>
    %340 = arith.mulf %338, %339 : vector<112x32xf32>
    %341 = arith.addf %334, %340 : vector<112x32xf32>
    %c0_131 = arith.constant 0 : index
    %c9 = arith.constant 9 : index
    %c0_132 = arith.constant 0 : index
    %342 = vector.load %arg1[%c0_131, %c9, %c0_132] : memref<1x1024x1xf32, #tpu.memory_space<vmem>>, vector<1x112x1xf32>
    %343 = vector.shape_cast %342 : vector<1x112x1xf32> to vector<112x1xf32>
    %344 = vector.extract_strided_slice %0 {offsets = [8, 0], sizes = [1, 32], strides = [1, 1]} : vector<9x32xf32> to vector<1x32xf32>
    %345 = vector.broadcast %343 : vector<112x1xf32> to vector<112x32xf32>
    %346 = vector.broadcast %344 : vector<1x32xf32> to vector<112x32xf32>
    %347 = arith.mulf %345, %346 : vector<112x32xf32>
    %348 = arith.addf %341, %347 : vector<112x32xf32>
    %cst_133 = arith.constant 0.000000e+00 : f32
    %349 = vector.broadcast %cst_133 : f32 to vector<112x32xf32>
    %c0_134 = arith.constant 0 : index
    %c384_135 = arith.constant 384 : index
    %c0_136 = arith.constant 0 : index
    %350 = vector.load %arg1[%c0_134, %c384_135, %c0_136] : memref<1x1024x1xf32, #tpu.memory_space<vmem>>, vector<1x112x1xf32>
    %351 = vector.shape_cast %350 : vector<1x112x1xf32> to vector<112x1xf32>
    %352 = vector.extract_strided_slice %0 {offsets = [0, 0], sizes = [1, 32], strides = [1, 1]} : vector<9x32xf32> to vector<1x32xf32>
    %353 = vector.broadcast %351 : vector<112x1xf32> to vector<112x32xf32>
    %354 = vector.broadcast %352 : vector<1x32xf32> to vector<112x32xf32>
    %355 = arith.mulf %353, %354 : vector<112x32xf32>
    %356 = arith.addf %349, %355 : vector<112x32xf32>
    %c0_137 = arith.constant 0 : index
    %c1_138 = arith.constant 1 : index
    %c0_139 = arith.constant 0 : index
    %357 = vector.load %arg1[%c0_137, %c1_138, %c0_139] : memref<1x1024x1xf32, #tpu.memory_space<vmem>>, vector<1x112x1xf32>
    %358 = vector.shape_cast %357 : vector<1x112x1xf32> to vector<112x1xf32>
    %359 = vector.extract_strided_slice %0 {offsets = [1, 0], sizes = [1, 32], strides = [1, 1]} : vector<9x32xf32> to vector<1x32xf32>
    %360 = vector.broadcast %358 : vector<112x1xf32> to vector<112x32xf32>
    %361 = vector.broadcast %359 : vector<1x32xf32> to vector<112x32xf32>
    %362 = arith.mulf %360, %361 : vector<112x32xf32>
    %363 = arith.addf %356, %362 : vector<112x32xf32>
    %c0_140 = arith.constant 0 : index
    %c129 = arith.constant 129 : index
    %c0_141 = arith.constant 0 : index
    %364 = vector.load %arg1[%c0_140, %c129, %c0_141] : memref<1x1024x1xf32, #tpu.memory_space<vmem>>, vector<1x112x1xf32>
    %365 = vector.shape_cast %364 : vector<1x112x1xf32> to vector<112x1xf32>
    %366 = vector.extract_strided_slice %0 {offsets = [2, 0], sizes = [1, 32], strides = [1, 1]} : vector<9x32xf32> to vector<1x32xf32>
    %367 = vector.broadcast %365 : vector<112x1xf32> to vector<112x32xf32>
    %368 = vector.broadcast %366 : vector<1x32xf32> to vector<112x32xf32>
    %369 = arith.mulf %367, %368 : vector<112x32xf32>
    %370 = arith.addf %363, %369 : vector<112x32xf32>
    %c0_142 = arith.constant 0 : index
    %c896_143 = arith.constant 896 : index
    %c0_144 = arith.constant 0 : index
    %371 = vector.load %arg1[%c0_142, %c896_143, %c0_144] : memref<1x1024x1xf32, #tpu.memory_space<vmem>>, vector<1x112x1xf32>
    %372 = vector.shape_cast %371 : vector<1x112x1xf32> to vector<112x1xf32>
    %373 = vector.extract_strided_slice %0 {offsets = [3, 0], sizes = [1, 32], strides = [1, 1]} : vector<9x32xf32> to vector<1x32xf32>
    %374 = vector.broadcast %372 : vector<112x1xf32> to vector<112x32xf32>
    %375 = vector.broadcast %373 : vector<1x32xf32> to vector<112x32xf32>
    %376 = arith.mulf %374, %375 : vector<112x32xf32>
    %377 = arith.addf %370, %376 : vector<112x32xf32>
    %c0_145 = arith.constant 0 : index
    %c513_146 = arith.constant 513 : index
    %c0_147 = arith.constant 0 : index
    %378 = vector.load %arg1[%c0_145, %c513_146, %c0_147] : memref<1x1024x1xf32, #tpu.memory_space<vmem>>, vector<1x112x1xf32>
    %379 = vector.shape_cast %378 : vector<1x112x1xf32> to vector<112x1xf32>
    %380 = vector.extract_strided_slice %0 {offsets = [4, 0], sizes = [1, 32], strides = [1, 1]} : vector<9x32xf32> to vector<1x32xf32>
    %381 = vector.broadcast %379 : vector<112x1xf32> to vector<112x32xf32>
    %382 = vector.broadcast %380 : vector<1x32xf32> to vector<112x32xf32>
    %383 = arith.mulf %381, %382 : vector<112x32xf32>
    %384 = arith.addf %377, %383 : vector<112x32xf32>
    %c0_148 = arith.constant 0 : index
    %c641 = arith.constant 641 : index
    %c0_149 = arith.constant 0 : index
    %385 = vector.load %arg1[%c0_148, %c641, %c0_149] : memref<1x1024x1xf32, #tpu.memory_space<vmem>>, vector<1x112x1xf32>
    %386 = vector.shape_cast %385 : vector<1x112x1xf32> to vector<112x1xf32>
    %387 = vector.extract_strided_slice %0 {offsets = [5, 0], sizes = [1, 32], strides = [1, 1]} : vector<9x32xf32> to vector<1x32xf32>
    %388 = vector.broadcast %386 : vector<112x1xf32> to vector<112x32xf32>
    %389 = vector.broadcast %387 : vector<1x32xf32> to vector<112x32xf32>
    %390 = arith.mulf %388, %389 : vector<112x32xf32>
    %391 = arith.addf %384, %390 : vector<112x32xf32>
    %c0_150 = arith.constant 0 : index
    %c392_151 = arith.constant 392 : index
    %c0_152 = arith.constant 0 : index
    %392 = vector.load %arg1[%c0_150, %c392_151, %c0_152] : memref<1x1024x1xf32, #tpu.memory_space<vmem>>, vector<1x112x1xf32>
    %393 = vector.shape_cast %392 : vector<1x112x1xf32> to vector<112x1xf32>
    %394 = vector.extract_strided_slice %0 {offsets = [6, 0], sizes = [1, 32], strides = [1, 1]} : vector<9x32xf32> to vector<1x32xf32>
    %395 = vector.broadcast %393 : vector<112x1xf32> to vector<112x32xf32>
    %396 = vector.broadcast %394 : vector<1x32xf32> to vector<112x32xf32>
    %397 = arith.mulf %395, %396 : vector<112x32xf32>
    %398 = arith.addf %391, %397 : vector<112x32xf32>
    %c0_153 = arith.constant 0 : index
    %c9_154 = arith.constant 9 : index
    %c0_155 = arith.constant 0 : index
    %399 = vector.load %arg1[%c0_153, %c9_154, %c0_155] : memref<1x1024x1xf32, #tpu.memory_space<vmem>>, vector<1x112x1xf32>
    %400 = vector.shape_cast %399 : vector<1x112x1xf32> to vector<112x1xf32>
    %401 = vector.extract_strided_slice %0 {offsets = [7, 0], sizes = [1, 32], strides = [1, 1]} : vector<9x32xf32> to vector<1x32xf32>
    %402 = vector.broadcast %400 : vector<112x1xf32> to vector<112x32xf32>
    %403 = vector.broadcast %401 : vector<1x32xf32> to vector<112x32xf32>
    %404 = arith.mulf %402, %403 : vector<112x32xf32>
    %405 = arith.addf %398, %404 : vector<112x32xf32>
    %c0_156 = arith.constant 0 : index
    %c137 = arith.constant 137 : index
    %c0_157 = arith.constant 0 : index
    %406 = vector.load %arg1[%c0_156, %c137, %c0_157] : memref<1x1024x1xf32, #tpu.memory_space<vmem>>, vector<1x112x1xf32>
    %407 = vector.shape_cast %406 : vector<1x112x1xf32> to vector<112x1xf32>
    %408 = vector.extract_strided_slice %0 {offsets = [8, 0], sizes = [1, 32], strides = [1, 1]} : vector<9x32xf32> to vector<1x32xf32>
    %409 = vector.broadcast %407 : vector<112x1xf32> to vector<112x32xf32>
    %410 = vector.broadcast %408 : vector<1x32xf32> to vector<112x32xf32>
    %411 = arith.mulf %409, %410 : vector<112x32xf32>
    %412 = arith.addf %405, %411 : vector<112x32xf32>
    %413 = arith.maximumf %348, %412 : vector<112x32xf32>
    %cst_158 = arith.constant 0.000000e+00 : f32
    %414 = vector.broadcast %cst_158 : f32 to vector<112x32xf32>
    %c0_159 = arith.constant 0 : index
    %c768_160 = arith.constant 768 : index
    %c0_161 = arith.constant 0 : index
    %415 = vector.load %arg1[%c0_159, %c768_160, %c0_161] : memref<1x1024x1xf32, #tpu.memory_space<vmem>>, vector<1x112x1xf32>
    %416 = vector.shape_cast %415 : vector<1x112x1xf32> to vector<112x1xf32>
    %417 = vector.extract_strided_slice %0 {offsets = [0, 0], sizes = [1, 32], strides = [1, 1]} : vector<9x32xf32> to vector<1x32xf32>
    %418 = vector.broadcast %416 : vector<112x1xf32> to vector<112x32xf32>
    %419 = vector.broadcast %417 : vector<1x32xf32> to vector<112x32xf32>
    %420 = arith.mulf %418, %419 : vector<112x32xf32>
    %421 = arith.addf %414, %420 : vector<112x32xf32>
    %c0_162 = arith.constant 0 : index
    %c896_163 = arith.constant 896 : index
    %c0_164 = arith.constant 0 : index
    %422 = vector.load %arg1[%c0_162, %c896_163, %c0_164] : memref<1x1024x1xf32, #tpu.memory_space<vmem>>, vector<1x112x1xf32>
    %423 = vector.shape_cast %422 : vector<1x112x1xf32> to vector<112x1xf32>
    %424 = vector.extract_strided_slice %0 {offsets = [1, 0], sizes = [1, 32], strides = [1, 1]} : vector<9x32xf32> to vector<1x32xf32>
    %425 = vector.broadcast %423 : vector<112x1xf32> to vector<112x32xf32>
    %426 = vector.broadcast %424 : vector<1x32xf32> to vector<112x32xf32>
    %427 = arith.mulf %425, %426 : vector<112x32xf32>
    %428 = arith.addf %421, %427 : vector<112x32xf32>
    %c0_165 = arith.constant 0 : index
    %c513_166 = arith.constant 513 : index
    %c0_167 = arith.constant 0 : index
    %429 = vector.load %arg1[%c0_165, %c513_166, %c0_167] : memref<1x1024x1xf32, #tpu.memory_space<vmem>>, vector<1x112x1xf32>
    %430 = vector.shape_cast %429 : vector<1x112x1xf32> to vector<112x1xf32>
    %431 = vector.extract_strided_slice %0 {offsets = [2, 0], sizes = [1, 32], strides = [1, 1]} : vector<9x32xf32> to vector<1x32xf32>
    %432 = vector.broadcast %430 : vector<112x1xf32> to vector<112x32xf32>
    %433 = vector.broadcast %431 : vector<1x32xf32> to vector<112x32xf32>
    %434 = arith.mulf %432, %433 : vector<112x32xf32>
    %435 = arith.addf %428, %434 : vector<112x32xf32>
    %c0_168 = arith.constant 0 : index
    %c264_169 = arith.constant 264 : index
    %c0_170 = arith.constant 0 : index
    %436 = vector.load %arg1[%c0_168, %c264_169, %c0_170] : memref<1x1024x1xf32, #tpu.memory_space<vmem>>, vector<1x112x1xf32>
    %437 = vector.shape_cast %436 : vector<1x112x1xf32> to vector<112x1xf32>
    %438 = vector.extract_strided_slice %0 {offsets = [3, 0], sizes = [1, 32], strides = [1, 1]} : vector<9x32xf32> to vector<1x32xf32>
    %439 = vector.broadcast %437 : vector<112x1xf32> to vector<112x32xf32>
    %440 = vector.broadcast %438 : vector<1x32xf32> to vector<112x32xf32>
    %441 = arith.mulf %439, %440 : vector<112x32xf32>
    %442 = arith.addf %435, %441 : vector<112x32xf32>
    %c0_171 = arith.constant 0 : index
    %c392_172 = arith.constant 392 : index
    %c0_173 = arith.constant 0 : index
    %443 = vector.load %arg1[%c0_171, %c392_172, %c0_173] : memref<1x1024x1xf32, #tpu.memory_space<vmem>>, vector<1x112x1xf32>
    %444 = vector.shape_cast %443 : vector<1x112x1xf32> to vector<112x1xf32>
    %445 = vector.extract_strided_slice %0 {offsets = [4, 0], sizes = [1, 32], strides = [1, 1]} : vector<9x32xf32> to vector<1x32xf32>
    %446 = vector.broadcast %444 : vector<112x1xf32> to vector<112x32xf32>
    %447 = vector.broadcast %445 : vector<1x32xf32> to vector<112x32xf32>
    %448 = arith.mulf %446, %447 : vector<112x32xf32>
    %449 = arith.addf %442, %448 : vector<112x32xf32>
    %c0_174 = arith.constant 0 : index
    %c9_175 = arith.constant 9 : index
    %c0_176 = arith.constant 0 : index
    %450 = vector.load %arg1[%c0_174, %c9_175, %c0_176] : memref<1x1024x1xf32, #tpu.memory_space<vmem>>, vector<1x112x1xf32>
    %451 = vector.shape_cast %450 : vector<1x112x1xf32> to vector<112x1xf32>
    %452 = vector.extract_strided_slice %0 {offsets = [5, 0], sizes = [1, 32], strides = [1, 1]} : vector<9x32xf32> to vector<1x32xf32>
    %453 = vector.broadcast %451 : vector<112x1xf32> to vector<112x32xf32>
    %454 = vector.broadcast %452 : vector<1x32xf32> to vector<112x32xf32>
    %455 = arith.mulf %453, %454 : vector<112x32xf32>
    %456 = arith.addf %449, %455 : vector<112x32xf32>
    %c0_177 = arith.constant 0 : index
    %c776_178 = arith.constant 776 : index
    %c0_179 = arith.constant 0 : index
    %457 = vector.load %arg1[%c0_177, %c776_178, %c0_179] : memref<1x1024x1xf32, #tpu.memory_space<vmem>>, vector<1x112x1xf32>
    %458 = vector.shape_cast %457 : vector<1x112x1xf32> to vector<112x1xf32>
    %459 = vector.extract_strided_slice %0 {offsets = [6, 0], sizes = [1, 32], strides = [1, 1]} : vector<9x32xf32> to vector<1x32xf32>
    %460 = vector.broadcast %458 : vector<112x1xf32> to vector<112x32xf32>
    %461 = vector.broadcast %459 : vector<1x32xf32> to vector<112x32xf32>
    %462 = arith.mulf %460, %461 : vector<112x32xf32>
    %463 = arith.addf %456, %462 : vector<112x32xf32>
    %c0_180 = arith.constant 0 : index
    %c904_181 = arith.constant 904 : index
    %c0_182 = arith.constant 0 : index
    %464 = vector.load %arg1[%c0_180, %c904_181, %c0_182] : memref<1x1024x1xf32, #tpu.memory_space<vmem>>, vector<1x112x1xf32>
    %465 = vector.shape_cast %464 : vector<1x112x1xf32> to vector<112x1xf32>
    %466 = vector.extract_strided_slice %0 {offsets = [7, 0], sizes = [1, 32], strides = [1, 1]} : vector<9x32xf32> to vector<1x32xf32>
    %467 = vector.broadcast %465 : vector<112x1xf32> to vector<112x32xf32>
    %468 = vector.broadcast %466 : vector<1x32xf32> to vector<112x32xf32>
    %469 = arith.mulf %467, %468 : vector<112x32xf32>
    %470 = arith.addf %463, %469 : vector<112x32xf32>
    %c0_183 = arith.constant 0 : index
    %c521 = arith.constant 521 : index
    %c0_184 = arith.constant 0 : index
    %471 = vector.load %arg1[%c0_183, %c521, %c0_184] : memref<1x1024x1xf32, #tpu.memory_space<vmem>>, vector<1x112x1xf32>
    %472 = vector.shape_cast %471 : vector<1x112x1xf32> to vector<112x1xf32>
    %473 = vector.extract_strided_slice %0 {offsets = [8, 0], sizes = [1, 32], strides = [1, 1]} : vector<9x32xf32> to vector<1x32xf32>
    %474 = vector.broadcast %472 : vector<112x1xf32> to vector<112x32xf32>
    %475 = vector.broadcast %473 : vector<1x32xf32> to vector<112x32xf32>
    %476 = arith.mulf %474, %475 : vector<112x32xf32>
    %477 = arith.addf %470, %476 : vector<112x32xf32>
    %cst_185 = arith.constant 0.000000e+00 : f32
    %478 = vector.broadcast %cst_185 : f32 to vector<112x32xf32>
    %c0_186 = arith.constant 0 : index
    %c896_187 = arith.constant 896 : index
    %c0_188 = arith.constant 0 : index
    %479 = vector.load %arg1[%c0_186, %c896_187, %c0_188] : memref<1x1024x1xf32, #tpu.memory_space<vmem>>, vector<1x112x1xf32>
    %480 = vector.shape_cast %479 : vector<1x112x1xf32> to vector<112x1xf32>
    %481 = vector.extract_strided_slice %0 {offsets = [0, 0], sizes = [1, 32], strides = [1, 1]} : vector<9x32xf32> to vector<1x32xf32>
    %482 = vector.broadcast %480 : vector<112x1xf32> to vector<112x32xf32>
    %483 = vector.broadcast %481 : vector<1x32xf32> to vector<112x32xf32>
    %484 = arith.mulf %482, %483 : vector<112x32xf32>
    %485 = arith.addf %478, %484 : vector<112x32xf32>
    %c0_189 = arith.constant 0 : index
    %c513_190 = arith.constant 513 : index
    %c0_191 = arith.constant 0 : index
    %486 = vector.load %arg1[%c0_189, %c513_190, %c0_191] : memref<1x1024x1xf32, #tpu.memory_space<vmem>>, vector<1x112x1xf32>
    %487 = vector.shape_cast %486 : vector<1x112x1xf32> to vector<112x1xf32>
    %488 = vector.extract_strided_slice %0 {offsets = [1, 0], sizes = [1, 32], strides = [1, 1]} : vector<9x32xf32> to vector<1x32xf32>
    %489 = vector.broadcast %487 : vector<112x1xf32> to vector<112x32xf32>
    %490 = vector.broadcast %488 : vector<1x32xf32> to vector<112x32xf32>
    %491 = arith.mulf %489, %490 : vector<112x32xf32>
    %492 = arith.addf %485, %491 : vector<112x32xf32>
    %c0_192 = arith.constant 0 : index
    %c641_193 = arith.constant 641 : index
    %c0_194 = arith.constant 0 : index
    %493 = vector.load %arg1[%c0_192, %c641_193, %c0_194] : memref<1x1024x1xf32, #tpu.memory_space<vmem>>, vector<1x112x1xf32>
    %494 = vector.shape_cast %493 : vector<1x112x1xf32> to vector<112x1xf32>
    %495 = vector.extract_strided_slice %0 {offsets = [2, 0], sizes = [1, 32], strides = [1, 1]} : vector<9x32xf32> to vector<1x32xf32>
    %496 = vector.broadcast %494 : vector<112x1xf32> to vector<112x32xf32>
    %497 = vector.broadcast %495 : vector<1x32xf32> to vector<112x32xf32>
    %498 = arith.mulf %496, %497 : vector<112x32xf32>
    %499 = arith.addf %492, %498 : vector<112x32xf32>
    %c0_195 = arith.constant 0 : index
    %c392_196 = arith.constant 392 : index
    %c0_197 = arith.constant 0 : index
    %500 = vector.load %arg1[%c0_195, %c392_196, %c0_197] : memref<1x1024x1xf32, #tpu.memory_space<vmem>>, vector<1x112x1xf32>
    %501 = vector.shape_cast %500 : vector<1x112x1xf32> to vector<112x1xf32>
    %502 = vector.extract_strided_slice %0 {offsets = [3, 0], sizes = [1, 32], strides = [1, 1]} : vector<9x32xf32> to vector<1x32xf32>
    %503 = vector.broadcast %501 : vector<112x1xf32> to vector<112x32xf32>
    %504 = vector.broadcast %502 : vector<1x32xf32> to vector<112x32xf32>
    %505 = arith.mulf %503, %504 : vector<112x32xf32>
    %506 = arith.addf %499, %505 : vector<112x32xf32>
    %c0_198 = arith.constant 0 : index
    %c9_199 = arith.constant 9 : index
    %c0_200 = arith.constant 0 : index
    %507 = vector.load %arg1[%c0_198, %c9_199, %c0_200] : memref<1x1024x1xf32, #tpu.memory_space<vmem>>, vector<1x112x1xf32>
    %508 = vector.shape_cast %507 : vector<1x112x1xf32> to vector<112x1xf32>
    %509 = vector.extract_strided_slice %0 {offsets = [4, 0], sizes = [1, 32], strides = [1, 1]} : vector<9x32xf32> to vector<1x32xf32>
    %510 = vector.broadcast %508 : vector<112x1xf32> to vector<112x32xf32>
    %511 = vector.broadcast %509 : vector<1x32xf32> to vector<112x32xf32>
    %512 = arith.mulf %510, %511 : vector<112x32xf32>
    %513 = arith.addf %506, %512 : vector<112x32xf32>
    %c0_201 = arith.constant 0 : index
    %c137_202 = arith.constant 137 : index
    %c0_203 = arith.constant 0 : index
    %514 = vector.load %arg1[%c0_201, %c137_202, %c0_203] : memref<1x1024x1xf32, #tpu.memory_space<vmem>>, vector<1x112x1xf32>
    %515 = vector.shape_cast %514 : vector<1x112x1xf32> to vector<112x1xf32>
    %516 = vector.extract_strided_slice %0 {offsets = [5, 0], sizes = [1, 32], strides = [1, 1]} : vector<9x32xf32> to vector<1x32xf32>
    %517 = vector.broadcast %515 : vector<112x1xf32> to vector<112x32xf32>
    %518 = vector.broadcast %516 : vector<1x32xf32> to vector<112x32xf32>
    %519 = arith.mulf %517, %518 : vector<112x32xf32>
    %520 = arith.addf %513, %519 : vector<112x32xf32>
    %c0_204 = arith.constant 0 : index
    %c904_205 = arith.constant 904 : index
    %c0_206 = arith.constant 0 : index
    %521 = vector.load %arg1[%c0_204, %c904_205, %c0_206] : memref<1x1024x1xf32, #tpu.memory_space<vmem>>, vector<1x112x1xf32>
    %522 = vector.shape_cast %521 : vector<1x112x1xf32> to vector<112x1xf32>
    %523 = vector.extract_strided_slice %0 {offsets = [6, 0], sizes = [1, 32], strides = [1, 1]} : vector<9x32xf32> to vector<1x32xf32>
    %524 = vector.broadcast %522 : vector<112x1xf32> to vector<112x32xf32>
    %525 = vector.broadcast %523 : vector<1x32xf32> to vector<112x32xf32>
    %526 = arith.mulf %524, %525 : vector<112x32xf32>
    %527 = arith.addf %520, %526 : vector<112x32xf32>
    %c0_207 = arith.constant 0 : index
    %c521_208 = arith.constant 521 : index
    %c0_209 = arith.constant 0 : index
    %528 = vector.load %arg1[%c0_207, %c521_208, %c0_209] : memref<1x1024x1xf32, #tpu.memory_space<vmem>>, vector<1x112x1xf32>
    %529 = vector.shape_cast %528 : vector<1x112x1xf32> to vector<112x1xf32>
    %530 = vector.extract_strided_slice %0 {offsets = [7, 0], sizes = [1, 32], strides = [1, 1]} : vector<9x32xf32> to vector<1x32xf32>
    %531 = vector.broadcast %529 : vector<112x1xf32> to vector<112x32xf32>
    %532 = vector.broadcast %530 : vector<1x32xf32> to vector<112x32xf32>
    %533 = arith.mulf %531, %532 : vector<112x32xf32>
    %534 = arith.addf %527, %533 : vector<112x32xf32>
    %c0_210 = arith.constant 0 : index
    %c649 = arith.constant 649 : index
    %c0_211 = arith.constant 0 : index
    %535 = vector.load %arg1[%c0_210, %c649, %c0_211] : memref<1x1024x1xf32, #tpu.memory_space<vmem>>, vector<1x112x1xf32>
    %536 = vector.shape_cast %535 : vector<1x112x1xf32> to vector<112x1xf32>
    %537 = vector.extract_strided_slice %0 {offsets = [8, 0], sizes = [1, 32], strides = [1, 1]} : vector<9x32xf32> to vector<1x32xf32>
    %538 = vector.broadcast %536 : vector<112x1xf32> to vector<112x32xf32>
    %539 = vector.broadcast %537 : vector<1x32xf32> to vector<112x32xf32>
    %540 = arith.mulf %538, %539 : vector<112x32xf32>
    %541 = arith.addf %534, %540 : vector<112x32xf32>
    %542 = arith.maximumf %477, %541 : vector<112x32xf32>
    %543 = arith.maximumf %413, %542 : vector<112x32xf32>
    %544 = vector.broadcast %1 : vector<1x32xf32> to vector<112x32xf32>
    %545 = arith.addf %284, %544 : vector<112x32xf32>
    %cst_212 = arith.constant 0.000000e+00 : f32
    %546 = vector.broadcast %cst_212 : f32 to vector<112x32xf32>
    %547 = arith.maximumf %545, %546 : vector<112x32xf32>
    %548 = vector.broadcast %25 : vector<112x1xf32> to vector<112x32xf32>
    %549 = arith.mulf %547, %548 : vector<112x32xf32>
    %550 = vector.broadcast %1 : vector<1x32xf32> to vector<112x32xf32>
    %551 = arith.addf %543, %550 : vector<112x32xf32>
    %cst_213 = arith.constant 0.000000e+00 : f32
    %552 = vector.broadcast %cst_213 : f32 to vector<112x32xf32>
    %553 = arith.maximumf %551, %552 : vector<112x32xf32>
    %554 = vector.broadcast %25 : vector<112x1xf32> to vector<112x32xf32>
    %555 = arith.mulf %553, %554 : vector<112x32xf32>
    %cst_214 = arith.constant 0.000000e+00 : bf16
    %556 = vector.broadcast %cst_214 : bf16 to vector<136x32xbf16>
    %c0_215 = arith.constant 0 : index
    %c0_216 = arith.constant 0 : index
    %557 = vector.load %arg7[%c0_215, %c0_216] : memref<136x32xbf16, #tpu.memory_space<vmem>>, vector<136x32xbf16>
    tpu.vector_store %arg7[%c0_215, %c0_216], %556 {strides = array<i32>} : memref<136x32xbf16, #tpu.memory_space<vmem>>, vector<136x32xbf16>,
    %cst_217 = arith.constant 0.000000e+00 : bf16
    %558 = vector.broadcast %cst_217 : bf16 to vector<136x32xbf16>
    %c0_218 = arith.constant 0 : index
    %c0_219 = arith.constant 0 : index
    %559 = vector.load %arg8[%c0_218, %c0_219] : memref<136x32xbf16, #tpu.memory_space<vmem>>, vector<136x32xbf16>
    tpu.vector_store %arg8[%c0_218, %c0_219], %558 {strides = array<i32>} : memref<136x32xbf16, #tpu.memory_space<vmem>>, vector<136x32xbf16>,
    %560 = arith.truncf %549 : vector<112x32xf32> to vector<112x32xbf16>
    %c8_220 = arith.constant 8 : index
    %c0_221 = arith.constant 0 : index
    %561 = vector.load %arg8[%c8_220, %c0_221] : memref<136x32xbf16, #tpu.memory_space<vmem>>, vector<112x32xbf16>
    tpu.vector_store %arg8[%c8_220, %c0_221], %560 {strides = array<i32>} : memref<136x32xbf16, #tpu.memory_space<vmem>>, vector<112x32xbf16>,
    %562 = arith.truncf %555 : vector<112x32xf32> to vector<112x32xbf16>
    %c9_222 = arith.constant 9 : index
    %c0_223 = arith.constant 0 : index
    %563 = vector.load %arg7[%c9_222, %c0_223] : memref<136x32xbf16, #tpu.memory_space<vmem>>, vector<112x32xbf16>
    tpu.vector_store %arg7[%c9_222, %c0_223], %562 {strides = array<i32>} : memref<136x32xbf16, #tpu.memory_space<vmem>>, vector<112x32xbf16>,
    %c0_224 = arith.constant 0 : index
    %c0_225 = arith.constant 0 : index
    %564 = vector.load %arg7[%c0_224, %c0_225] : memref<136x32xbf16, #tpu.memory_space<vmem>>, vector<112x32xbf16>
    %c0_226 = arith.constant 0 : index
    %c0_227 = arith.constant 0 : index
    %565 = vector.load %arg8[%c0_226, %c0_227] : memref<136x32xbf16, #tpu.memory_space<vmem>>, vector<112x32xbf16>
    %c1_228 = arith.constant 1 : index
    %c0_229 = arith.constant 0 : index
    %566 = vector.load %arg7[%c1_228, %c0_229] : memref<136x32xbf16, #tpu.memory_space<vmem>>, vector<112x32xbf16>
    %c0_230 = arith.constant 0 : index
    %c0_231 = arith.constant 0 : index
    %567 = vector.load %arg8[%c0_230, %c0_231] : memref<136x32xbf16, #tpu.memory_space<vmem>>, vector<112x32xbf16>
    %c1_232 = arith.constant 1 : index
    %c0_233 = arith.constant 0 : index
    %568 = vector.load %arg7[%c1_232, %c0_233] : memref<136x32xbf16, #tpu.memory_space<vmem>>, vector<112x32xbf16>
    %c1_234 = arith.constant 1 : index
    %c0_235 = arith.constant 0 : index
    %569 = vector.load %arg8[%c1_234, %c0_235] : memref<136x32xbf16, #tpu.memory_space<vmem>>, vector<112x32xbf16>
    %c8_236 = arith.constant 8 : index
    %c0_237 = arith.constant 0 : index
    %570 = vector.load %arg7[%c8_236, %c0_237] : memref<136x32xbf16, #tpu.memory_space<vmem>>, vector<112x32xbf16>
    %c8_238 = arith.constant 8 : index
    %c0_239 = arith.constant 0 : index
    %571 = vector.load %arg8[%c8_238, %c0_239] : memref<136x32xbf16, #tpu.memory_space<vmem>>, vector<112x32xbf16>
    %c9_240 = arith.constant 9 : index
    %c0_241 = arith.constant 0 : index
    %572 = vector.load %arg7[%c9_240, %c0_241] : memref<136x32xbf16, #tpu.memory_space<vmem>>, vector<112x32xbf16>
    %c8_242 = arith.constant 8 : index
    %c0_243 = arith.constant 0 : index
    %573 = vector.load %arg8[%c8_242, %c0_243] : memref<136x32xbf16, #tpu.memory_space<vmem>>, vector<112x32xbf16>
    %c9_244 = arith.constant 9 : index
    %c0_245 = arith.constant 0 : index
    %574 = vector.load %arg7[%c9_244, %c0_245] : memref<136x32xbf16, #tpu.memory_space<vmem>>, vector<112x32xbf16>
    %c9_246 = arith.constant 9 : index
    %c0_247 = arith.constant 0 : index
    %575 = vector.load %arg8[%c9_246, %c0_247] : memref<136x32xbf16, #tpu.memory_space<vmem>>, vector<112x32xbf16>
    %c16 = arith.constant 16 : index
    %c0_248 = arith.constant 0 : index
    %576 = vector.load %arg7[%c16, %c0_248] : memref<136x32xbf16, #tpu.memory_space<vmem>>, vector<112x32xbf16>
    %c16_249 = arith.constant 16 : index
    %c0_250 = arith.constant 0 : index
    %577 = vector.load %arg8[%c16_249, %c0_250] : memref<136x32xbf16, #tpu.memory_space<vmem>>, vector<112x32xbf16>
    %c17 = arith.constant 17 : index
    %c0_251 = arith.constant 0 : index
    %578 = vector.load %arg7[%c17, %c0_251] : memref<136x32xbf16, #tpu.memory_space<vmem>>, vector<112x32xbf16>
    %c16_252 = arith.constant 16 : index
    %c0_253 = arith.constant 0 : index
    %579 = vector.load %arg8[%c16_252, %c0_253] : memref<136x32xbf16, #tpu.memory_space<vmem>>, vector<112x32xbf16>
    %c17_254 = arith.constant 17 : index
    %c0_255 = arith.constant 0 : index
    %580 = vector.load %arg7[%c17_254, %c0_255] : memref<136x32xbf16, #tpu.memory_space<vmem>>, vector<112x32xbf16>
    %c17_256 = arith.constant 17 : index
    %c0_257 = arith.constant 0 : index
    %581 = vector.load %arg8[%c17_256, %c0_257] : memref<136x32xbf16, #tpu.memory_space<vmem>>, vector<112x32xbf16>
    %582 = tpu.concatenate %564, %565, %566, %570, %571, %572, %576, %577, %578 in 1 : vector<112x32xbf16>, vector<112x32xbf16>, vector<112x32xbf16>, vector<112x32xbf16>, vector<112x32xbf16>, vector<112x32xbf16>, vector<112x32xbf16>, vector<112x32xbf16>, vector<112x32xbf16> -> vector<112x288xbf16>
    %583 = tpu.concatenate %567, %568, %569, %573, %574, %575, %579, %580, %581 in 1 : vector<112x32xbf16>, vector<112x32xbf16>, vector<112x32xbf16>, vector<112x32xbf16>, vector<112x32xbf16>, vector<112x32xbf16>, vector<112x32xbf16>, vector<112x32xbf16>, vector<112x32xbf16> -> vector<112x288xbf16>
    %cst_258 = arith.constant dense<0.000000e+00> : vector<112x64xf32>
    %584 = tpu.matmul %582, %3, %cst_258 {dimension_numbers = #tpu.dot_dimension_numbers<[1], [0], [0], [1], [0, 0, 1, 1], [], []>} : vector<112x288xbf16>, vector<288x64xbf16>, vector<112x64xf32> -> vector<112x64xf32>
    %cst_259 = arith.constant dense<0.000000e+00> : vector<112x64xf32>
    %585 = tpu.matmul %583, %3, %cst_259 {dimension_numbers = #tpu.dot_dimension_numbers<[1], [0], [0], [1], [0, 0, 1, 1], [], []>} : vector<112x288xbf16>, vector<288x64xbf16>, vector<112x64xf32> -> vector<112x64xf32>
    %586 = arith.maximumf %584, %585 : vector<112x64xf32>
    %587 = vector.extract_strided_slice %586 {offsets = [0, 0], sizes = [104, 64], strides = [1, 1]} : vector<112x64xf32> to vector<104x64xf32>
    %588 = vector.extract_strided_slice %586 {offsets = [8, 0], sizes = [104, 64], strides = [1, 1]} : vector<112x64xf32> to vector<104x64xf32>
    %589 = arith.maximumf %587, %588 : vector<104x64xf32>
    %590 = vector.broadcast %2 : vector<1x64xf32> to vector<104x64xf32>
    %591 = arith.addf %589, %590 : vector<104x64xf32>
    %cst_260 = arith.constant 0.000000e+00 : f32
    %592 = vector.broadcast %cst_260 : f32 to vector<104x64xf32>
    %593 = arith.maximumf %591, %592 : vector<104x64xf32>
    %594 = arith.truncf %593 : vector<104x64xf32> to vector<104x64xbf16>
    %c0_261 = arith.constant 0 : index
    %c0_262 = arith.constant 0 : index
    %c0_263 = arith.constant 0 : index
    %595 = vector.load %arg6[%c0_261, %c0_262, %c0_263] : memref<1x104x64xbf16, #tpu.memory_space<vmem>>, vector<1x104x64xbf16>
    %596 = vector.shape_cast %595 : vector<1x104x64xbf16> to vector<104x64xbf16>
    %597 = vector.shape_cast %594 : vector<104x64xbf16> to vector<1x104x64xbf16>
    tpu.vector_store %arg6[%c0_261, %c0_262, %c0_263], %597 {strides = array<i32>} : memref<1x104x64xbf16, #tpu.memory_space<vmem>>, vector<1x104x64xbf16>,
    return
  }
  func.func @transform_0(%arg0: i32) -> (i32, i32, i32) {
    %c0_i32 = arith.constant 0 : i32
    %c0_i32_0 = arith.constant 0 : i32
    %c0_i32_1 = arith.constant 0 : i32
    return %arg0, %c0_i32, %c0_i32_0 : i32, i32, i32
  }
  func.func @transform_1(%arg0: i32) -> (i32, i32) {
    %c0_i32 = arith.constant 0 : i32
    %c0_i32_0 = arith.constant 0 : i32
    %c0_i32_1 = arith.constant 0 : i32
    return %c0_i32, %c0_i32_0 : i32, i32
  }
  func.func @transform_2(%arg0: i32) -> (i32, i32) {
    %c0_i32 = arith.constant 0 : i32
    %c0_i32_0 = arith.constant 0 : i32
    %c0_i32_1 = arith.constant 0 : i32
    return %c0_i32, %c0_i32_0 : i32, i32
  }
  func.func @transform_3(%arg0: i32) -> (i32, i32) {
    %c0_i32 = arith.constant 0 : i32
    %c0_i32_0 = arith.constant 0 : i32
    %c0_i32_1 = arith.constant 0 : i32
    return %c0_i32, %c0_i32_0 : i32, i32
  }
  func.func @transform_4(%arg0: i32) -> (i32, i32) {
    %c0_i32 = arith.constant 0 : i32
    %c0_i32_0 = arith.constant 0 : i32
    %c0_i32_1 = arith.constant 0 : i32
    return %c0_i32, %c0_i32_0 : i32, i32
  }
  func.func @transform_5(%arg0: i32) -> (i32, i32, i32) {
    %c0_i32 = arith.constant 0 : i32
    %c0_i32_0 = arith.constant 0 : i32
    %c0_i32_1 = arith.constant 0 : i32
    return %arg0, %c0_i32, %c0_i32_0 : i32, i32, i32
  }
}

module attributes {stable_mosaic.version = 11 : i64} {
  func.func @_fc_kernel(%arg0: i32, %arg1: memref<2x6656xbf16, #tpu.memory_space<vmem>>, %arg2: memref<6656x128xbf16, #tpu.memory_space<vmem>>, %arg3: memref<1x128xf32, #tpu.memory_space<vmem>>, %arg4: memref<128x128xbf16, #tpu.memory_space<vmem>>, %arg5: memref<1x128xf32, #tpu.memory_space<vmem>>, %arg6: memref<2x128xf32, #tpu.memory_space<vmem>>) attributes {dimension_semantics = [#tpu.dimension_semantics<parallel>], iteration_bounds = array<i64: 1>, scalar_prefetch = 0 : i64, scratch_operands = 0 : i64, tpu.core_type = #tpu.core_type<tc>, window_params = [{transform_indices = @transform_0, window_bounds = array<i64: 2, 6656>}, {pipeline_mode = #tpu.pipeline_mode<synchronous>, transform_indices = @transform_1, window_bounds = array<i64: 6656, 128>}, {pipeline_mode = #tpu.pipeline_mode<synchronous>, transform_indices = @transform_2, window_bounds = array<i64: 1, 128>}, {pipeline_mode = #tpu.pipeline_mode<synchronous>, transform_indices = @transform_3, window_bounds = array<i64: 128, 128>}, {pipeline_mode = #tpu.pipeline_mode<synchronous>, transform_indices = @transform_4, window_bounds = array<i64: 1, 128>}, {transform_indices = @transform_5, window_bounds = array<i64: 2, 128>}]} {
    %c0 = arith.constant 0 : index
    %c0_0 = arith.constant 0 : index
    %0 = vector.load %arg1[%c0, %c0_0] : memref<2x6656xbf16, #tpu.memory_space<vmem>>, vector<2x6656xbf16>
    %c0_1 = arith.constant 0 : index
    %c0_2 = arith.constant 0 : index
    %1 = vector.load %arg2[%c0_1, %c0_2] : memref<6656x128xbf16, #tpu.memory_space<vmem>>, vector<6656x128xbf16>
    %cst = arith.constant dense<0.000000e+00> : vector<2x128xf32>
    %2 = tpu.matmul %0, %1, %cst {dimension_numbers = #tpu.dot_dimension_numbers<[1], [0], [0], [1], [0, 0, 1, 1], [], []>} : vector<2x6656xbf16>, vector<6656x128xbf16>, vector<2x128xf32> -> vector<2x128xf32>
    %c0_3 = arith.constant 0 : index
    %c0_4 = arith.constant 0 : index
    %3 = vector.load %arg3[%c0_3, %c0_4] : memref<1x128xf32, #tpu.memory_space<vmem>>, vector<1x128xf32>
    %4 = vector.broadcast %3 : vector<1x128xf32> to vector<2x128xf32>
    %5 = arith.addf %2, %4 : vector<2x128xf32>
    %cst_5 = arith.constant 0.000000e+00 : f32
    %6 = vector.broadcast %cst_5 : f32 to vector<2x128xf32>
    %7 = arith.maximumf %5, %6 : vector<2x128xf32>
    %8 = arith.truncf %7 : vector<2x128xf32> to vector<2x128xbf16>
    %c0_6 = arith.constant 0 : index
    %c0_7 = arith.constant 0 : index
    %9 = vector.load %arg4[%c0_6, %c0_7] : memref<128x128xbf16, #tpu.memory_space<vmem>>, vector<128x128xbf16>
    %cst_8 = arith.constant dense<0.000000e+00> : vector<2x128xf32>
    %10 = tpu.matmul %8, %9, %cst_8 {dimension_numbers = #tpu.dot_dimension_numbers<[1], [0], [0], [1], [0, 0, 1, 1], [], []>} : vector<2x128xbf16>, vector<128x128xbf16>, vector<2x128xf32> -> vector<2x128xf32>
    %c0_9 = arith.constant 0 : index
    %c0_10 = arith.constant 0 : index
    %11 = vector.load %arg5[%c0_9, %c0_10] : memref<1x128xf32, #tpu.memory_space<vmem>>, vector<1x128xf32>
    %12 = vector.broadcast %11 : vector<1x128xf32> to vector<2x128xf32>
    %13 = arith.addf %10, %12 : vector<2x128xf32>
    %c0_11 = arith.constant 0 : index
    %c0_12 = arith.constant 0 : index
    %14 = vector.load %arg6[%c0_11, %c0_12] : memref<2x128xf32, #tpu.memory_space<vmem>>, vector<2x128xf32>
    tpu.vector_store %arg6[%c0_11, %c0_12], %13 {strides = array<i32>} : memref<2x128xf32, #tpu.memory_space<vmem>>, vector<2x128xf32>,
    return
  }
  func.func @transform_0(%arg0: i32) -> (i32, i32) {
    %c0_i32 = arith.constant 0 : i32
    %c0_i32_0 = arith.constant 0 : i32
    return %arg0, %c0_i32 : i32, i32
  }
  func.func @transform_1(%arg0: i32) -> (i32, i32) {
    %c0_i32 = arith.constant 0 : i32
    %c0_i32_0 = arith.constant 0 : i32
    %c0_i32_1 = arith.constant 0 : i32
    return %c0_i32, %c0_i32_0 : i32, i32
  }
  func.func @transform_2(%arg0: i32) -> (i32, i32) {
    %c0_i32 = arith.constant 0 : i32
    %c0_i32_0 = arith.constant 0 : i32
    %c0_i32_1 = arith.constant 0 : i32
    return %c0_i32, %c0_i32_0 : i32, i32
  }
  func.func @transform_3(%arg0: i32) -> (i32, i32) {
    %c0_i32 = arith.constant 0 : i32
    %c0_i32_0 = arith.constant 0 : i32
    %c0_i32_1 = arith.constant 0 : i32
    return %c0_i32, %c0_i32_0 : i32, i32
  }
  func.func @transform_4(%arg0: i32) -> (i32, i32) {
    %c0_i32 = arith.constant 0 : i32
    %c0_i32_0 = arith.constant 0 : i32
    %c0_i32_1 = arith.constant 0 : i32
    return %c0_i32, %c0_i32_0 : i32, i32
  }
  func.func @transform_5(%arg0: i32) -> (i32, i32) {
    %c0_i32 = arith.constant 0 : i32
    %c0_i32_0 = arith.constant 0 : i32
    return %arg0, %c0_i32 : i32, i32
  }
}

</mosaic_0001>

<bundles_post_ra>
// kernel: cnn_forward.3
= control target key start
LH: loop header
LB: loop body
LE: loop exit
PB: predicated region body
PF: predicated region fallthrough
CT: control target
= control target key end

     0   :  { %v879_v28 = vlaneseq  ;;  %v6393_v36 = vmov 1966171168   ;;  %s7814_s0 = inlined_call_operand.vmem [shape: bf16[2,6656], index: 0, kind: input, shape index: {}]   ;;  %s7815_s1 = inlined_call_operand.vmem [shape: bf16[6656,128], index: 1, kind: input, shape index: {}]   ;;  %s7816_s2 = inlined_call_operand.vmem [shape: f32[1,128], index: 2, kind: input, shape index: {}]   ;;  %s7817_s3 = inlined_call_operand.vmem [shape: bf16[128,128], index: 3, kind: input, shape index: {}]   ;;  %s7818_s4 = inlined_call_operand.vmem [shape: f32[1,128], index: 4, kind: input, shape index: {}]   ;;  %s7819_s5 = inlined_call_operand.hbm [shape: f32[2,128], index: 5, kind: output, shape index: {}]  }
   0x1   :  { %v5941_v0 = vld [vmem:[%s7815_s1 + $0x78] sm:$0xff]   ;;  %v5945_v4 = vld [vmem:[%s7815_s1 + $0x70] sm:$0xff]   ;;  %v5949_v8 = vld [vmem:[%s7815_s1 + $0x68] sm:$0xff]   ;;  %v877_v37 = vunpack.c.l.s4 %v6393_v36 }
   0x2   :  { %v5942_v1 = vld [vmem:[%s7815_s1 + $0xf8] sm:$0xff]   ;;  %5336 = vmatprep.subr.bf16.mxu0 %v5941_v0  ;;  %v5946_v5 = vld [vmem:[%s7815_s1 + $0xf0] sm:$0xff]   ;;  %v5950_v9 = vld [vmem:[%s7815_s1 + $0xe8] sm:$0xff]   ;;  %v880_v33 = vshrl.u32 %v879_v28, 7 }
   0x3   :  { %v5943_v2 = vld [vmem:[%s7815_s1 + $0x38] sm:$0xff]   ;;  %5358 = vmatprep.subr.bf16.mxu1 %v5942_v1  ;;  %v5947_v6 = vld [vmem:[%s7815_s1 + $0x30] sm:$0xff]   ;;  %v5951_v10 = vld [vmem:[%s7815_s1 + $0x28] sm:$0xff]   ;;  %v878_v40 = vunpack.c.0.s8 %v877_v37 }
   0x4   :  { %v5944_v3 = vld [vmem:[%s7815_s1 + $0xb8] sm:$0xff]   ;;  %5337 = vmatpush3.bf16.msra.mxu0 %v5943_v2  ;;  %v5948_v7 = vld [vmem:[%s7815_s1 + $0xb0] sm:$0xff]   ;;  %v5952_v11 = vld [vmem:[%s7815_s1 + $0xa8] sm:$0xff]  }
   0x5   :  { %5359 = vmatpush3.bf16.msra.mxu1 %v5944_v3  ;;  %5338 = vmatprep.subr.bf16.mxu0 %v5945_v4  ;;  %v5953_v12 = vld [vmem:[%s7815_s1 + $0x60] sm:$0xff]   ;;  %v5957_v16 = vld [vmem:[%s7815_s1 + $0x58] sm:$0xff]   ;;  %v5961_v20 = vld [vmem:[%s7815_s1 + $0x50] sm:$0xff]   ;;  %v6532_v41 = vsub.s32 %v878_v40, %v880_v33 }
   0x6   :  { %5360 = vmatprep.subr.bf16.mxu1 %v5946_v5  ;;  %v5954_v13 = vld [vmem:[%s7815_s1 + $0xe0] sm:$0xff]   ;;  %v5958_v17 = vld [vmem:[%s7815_s1 + $0xd8] sm:$0xff]   ;;  %v5962_v21 = vld [vmem:[%s7815_s1 + $0xd0] sm:$0xff]  }
   0x7   :  { %v5955_v14 = vld [vmem:[%s7815_s1 + $0x20] sm:$0xff]   ;;  %v5959_v18 = vld [vmem:[%s7815_s1 + $0x18] sm:$0xff]   ;;  %v5963_v22 = vld [vmem:[%s7815_s1 + $0x10] sm:$0xff]  }
   0x8   :  { %5339 = vmatpush3.bf16.msra.mxu0 %v5947_v6  ;;  %v5956_v15 = vld [vmem:[%s7815_s1 + $0xa0] sm:$0xff]   ;;  %v5960_v19 = vld [vmem:[%s7815_s1 + $0x98] sm:$0xff]   ;;  %v5964_v23 = vld [vmem:[%s7815_s1 + $0x90] sm:$0xff]  }
   0x9   :  { %5361 = vmatpush3.bf16.msra.mxu1 %v5948_v7  ;;  %5340 = vmatprep.subr.bf16.mxu0 %v5949_v8  ;;  %v5965_v24 = vld [vmem:[%s7815_s1 + $0x48] sm:$0xff]   ;;  %v5969_v29 = vld [vmem:[%s7815_s1 + $0x40] sm:$0xff]   ;;  %v5974_v35 = vld [vmem:[%s7815_s1 + $0x178] sm:$0xff]  }
   0xa   :  { %5362 = vmatprep.subr.bf16.mxu1 %v5950_v9  ;;  %v5966_v25 = vld [vmem:[%s7815_s1 + $0xc8] sm:$0xff]   ;;  %v5970_v30 = vld [vmem:[%s7815_s1 + $0xc0] sm:$0xff]   ;;  %v5975_v38 = vld [vmem:[%s7815_s1 + $0x1f8] sm:$0xff]  }
   0xb   :  { %v5967_v26 = vld [vmem:[%s7815_s1 + $0x8] sm:$0xff]   ;;  %v5971_v31 = vld [vmem:[%s7815_s1] sm:$0xff]   ;;  %v5976_v47 = vld [vmem:[%s7815_s1 + $0x138] sm:$0xff]  }
   0xc   :  { %5341 = vmatpush3.bf16.msra.mxu0 %v5951_v10  ;;  %v5968_v27 = vld [vmem:[%s7815_s1 + $0x88] sm:$0xff]   ;;  %v5972_v32 = vld [vmem:[%s7815_s1 + $0x80] sm:$0xff]   ;;  %v5977_v49 = vld [vmem:[%s7815_s1 + $0x1b8] sm:$0xff]  }
   0xd   :  { %5363 = vmatpush3.bf16.msra.mxu1 %v5952_v11  ;;  %5342 = vmatprep.subr.bf16.mxu0 %v5953_v12  ;;  %v22_v34 = vld [vmem:[%s7814_s0] sm:$0xff]  ;;  %v5978_v52 = vld [vmem:[%s7815_s1 + $0x170] sm:$0xff]   ;;  %v5982_v58 = vld [vmem:[%s7815_s1 + $0x168] sm:$0xff]  }
   0xe   :  { %5364 = vmatprep.subr.bf16.mxu1 %v5954_v13  ;;  %v875_v39 = vcombine.high %v22_v34, %v22_v34  ;;  %v882_v42 = vrot.slane %v22_v34, %v6532_v41  ;;  %v5979_v54 = vld [vmem:[%s7815_s1 + $0x1f0] sm:$0xff]   ;;  %v5983_v59 = vld [vmem:[%s7815_s1 + $0x1e8] sm:$0xff]   ;;  %v5986_v62 = vld [vmem:[%s7815_s1 + $0x160] sm:$0xff]  }
   0xf   :  { %v5980_v55 = vld [vmem:[%s7815_s1 + $0x130] sm:$0xff]   ;;  %v5984_v60 = vld [vmem:[%s7815_s1 + $0x128] sm:$0xff]   ;;  %v5987_v63 = vld [vmem:[%s7815_s1 + $0x1e0] sm:$0xff]  }
  0x10   :  { %5343 = vmatpush3.bf16.msra.mxu0 %v5955_v14  ;;  %v6536_v43 = vrot.slane %v875_v39, %v6532_v41  ;;  %v890_v44 = vcombine.high %v882_v42, %v882_v42  ;;  %v898_v45 = vrot.slane %v882_v42, %v6532_v41  ;;  %v5981_v57 = vld [vmem:[%s7815_s1 + $0x1b0] sm:$0xff]   ;;  %v5985_v61 = vld [vmem:[%s7815_s1 + $0x1a8] sm:$0xff]   ;;  %v5988_v0 = vld [vmem:[%s7815_s1 + $0x120] sm:$0xff]  }
  0x11   :  { %5365 = vmatpush3.bf16.msra.mxu1 %v5956_v15  ;;  %5344 = vmatprep.subr.bf16.mxu0 %v5957_v16  ;;  %v5989_v1 = vld [vmem:[%s7815_s1 + $0x1a0] sm:$0xff]   ;;  %v5990_v2 = vld [vmem:[%s7815_s1 + $0x158] sm:$0xff]   ;;  %v5994_v6 = vld [vmem:[%s7815_s1 + $0x150] sm:$0xff]  }
  0x12   :  { %5366 = vmatprep.subr.bf16.mxu1 %v5958_v17  ;;  %v891_v46 = vcombine.high %v6536_v43, %v6536_v43  ;;  %v912_v48 = vrot.slane %v890_v44, %v6532_v41  ;;  %v920_v51 = vcombine.high %v898_v45, %v898_v45  ;;  %v5991_v3 = vld [vmem:[%s7815_s1 + $0x1d8] sm:$0xff]   ;;  %v5995_v7 = vld [vmem:[%s7815_s1 + $0x1d0] sm:$0xff]   ;;  %v5998_v10 = vld [vmem:[%s7815_s1 + $0x148] sm:$0xff]  }
  0x13   :  { %v5992_v4 = vld [vmem:[%s7815_s1 + $0x118] sm:$0xff]   ;;  %v5996_v8 = vld [vmem:[%s7815_s1 + $0x110] sm:$0xff]   ;;  %v5999_v11 = vld [vmem:[%s7815_s1 + $0x1c8] sm:$0xff]  }
  0x14   :  { %5345 = vmatpush3.bf16.msra.mxu0 %v5959_v18  ;;  %v919_v50 = vrot.slane %v891_v46, %v6532_v41  ;;  %3773 = vmatprep.mubr.bf16.mxu0 %v912_v48  ;;  %v922_v53 = vcombine.high %v912_v48, %v912_v48  ;;  %v5993_v5 = vld [vmem:[%s7815_s1 + $0x198] sm:$0xff]   ;;  %v5997_v9 = vld [vmem:[%s7815_s1 + $0x190] sm:$0xff]   ;;  %v6000_v12 = vld [vmem:[%s7815_s1 + $0x108] sm:$0xff]   ;;  %v905_v18 = vrot.slane %v6536_v43, %v6532_v41 }
  0x15   :  { %5367 = vmatpush3.bf16.msra.mxu1 %v5960_v19  ;;  %5346 = vmatprep.subr.bf16.mxu0 %v5961_v20  ;;  %v6001_v13 = vld [vmem:[%s7815_s1 + $0x188] sm:$0xff]   ;;  %v6002_v14 = vld [vmem:[%s7815_s1 + $0x140] sm:$0xff]   ;;  %v6006_v19 = vld [vmem:[%s7815_s1 + $0x278] sm:$0xff]  }
  0x16   :  { %5368 = vmatprep.subr.bf16.mxu1 %v5962_v21  ;;  %v923_v56 = vcombine.high %v919_v50, %v919_v50  ;;  %3813 = vmatprep.mubr.bf16.mxu1 %v922_v53  ;;  %v6003_v15 = vld [vmem:[%s7815_s1 + $0x1c0] sm:$0xff]   ;;  %v6007_v20 = vld [vmem:[%s7815_s1 + $0x2f8] sm:$0xff]   ;;  %v6014_v28 = vld [vmem:[%s7815_s1 + $0x268] sm:$0xff]  }
  0x17   :  { %v6004_v16 = vld [vmem:[%s7815_s1 + $0x100] sm:$0xff]   ;;  %v6008_v21 = vld [vmem:[%s7815_s1 + $0x238] sm:$0xff]   ;;  %v6026_v40 = vld [vmem:[%s7815_s1 + $0x250] sm:$0xff]  }
  0x18   :  { %5347 = vmatpush3.bf16.msra.mxu0 %v5963_v22  ;;  %v6005_v17 = vld [vmem:[%s7815_s1 + $0x180] sm:$0xff]   ;;  %v6009_v22 = vld [vmem:[%s7815_s1 + $0x2b8] sm:$0xff]   ;;  %v6027_v42 = vld [vmem:[%s7815_s1 + $0x2d0] sm:$0xff]  }
  0x19   :  { %5369 = vmatpush3.bf16.msra.mxu1 %v5964_v23  ;;  %5348 = vmatprep.subr.bf16.mxu0 %v5965_v24  ;;  %v921_v23 = vcombine.high %v905_v18, %v905_v18  ;;  %v6010_v24 = vld [vmem:[%s7815_s1 + $0x270] sm:$0xff]   ;;  %v6019_v33 = vld [vmem:[%s7815_s1 + $0x2e0] sm:$0xff]   ;;  %v6022_v36 = vld [vmem:[%s7815_s1 + $0x258] sm:$0xff]  }
  0x1a   :  { %5370 = vmatprep.subr.bf16.mxu1 %v5966_v25  ;;  %v6011_v25 = vld [vmem:[%s7815_s1 + $0x2f0] sm:$0xff]   ;;  %v6020_v34 = vld [vmem:[%s7815_s1 + $0x220] sm:$0xff]   ;;  %v6023_v37 = vld [vmem:[%s7815_s1 + $0x2d8] sm:$0xff]  }
  0x1b   :  { %v6025_v39 = vld [vmem:[%s7815_s1 + $0x298] sm:$0xff]   ;;  %v6028_v43 = vld [vmem:[%s7815_s1 + $0x210] sm:$0xff]   ;;  %v23_v46 = vld [vmem:[%s7814_s0 + $0x8] sm:$0xff] }
  0x1c   :  { %5349 = vmatpush3.bf16.msra.mxu0 %v5967_v26  ;;  %v6012_v26 = vld [vmem:[%s7815_s1 + $0x230] sm:$0xff]   ;;  %v931_v48 = vrot.slane %v23_v46, %v6532_v41 }
  0x1d   :  { %5371 = vmatpush3.bf16.msra.mxu1 %v5968_v27  ;;  %5350 = vmatprep.subr.bf16.mxu0 %v5969_v29  ;;  %v6013_v27 = vld [vmem:[%s7815_s1 + $0x2b0] sm:$0xff]   ;;  %v6015_v29 = vld [vmem:[%s7815_s1 + $0x2e8] sm:$0xff]  }
  0x1e   :  { %5372 = vmatprep.subr.bf16.mxu1 %v5970_v30  ;;  %v6016_v30 = vld [vmem:[%s7815_s1 + $0x228] sm:$0xff]   ;;  %v6029_v44 = vld [vmem:[%s7815_s1 + $0x290] sm:$0xff]  }
  0x20   :  { %5351 = vmatpush3.bf16.msra.mxu0 %v5971_v31  ;;  %v6017_v31 = vld [vmem:[%s7815_s1 + $0x2a8] sm:$0xff]  }
  0x21   :  { %5373 = vmatpush3.bf16.msra.mxu1 %v5972_v32  ;;  %5380 = vmatprep.subr.bf16.mxu0 %v5974_v35  ;;  %v6018_v32 = vld [vmem:[%s7815_s1 + $0x260] sm:$0xff]  }
  0x22   :  { %5402 = vmatprep.subr.bf16.mxu1 %v5975_v38  ;;  %v6021_v35 = vld [vmem:[%s7815_s1 + $0x2a0] sm:$0xff]   ;;  %v6024_v38 = vld [vmem:[%s7815_s1 + $0x218] sm:$0xff]  }
  0x23   :  { %3774 = vmatmul.mubr.bf16.vlgmr.msra.gmra.mxu0 %v898_v45  ;;  %v6030_v45 = vld [vmem:[%s7815_s1 + $0x248] sm:$0xff]  }
  0x24   :  { %5381 = vmatpush3.bf16.msra.mxu0 %v5976_v47  ;;  %3814 = vmatmul.mubr.bf16.vlgmr.msra.gmra.mxu1 %v920_v51  ;;  %v6031_v47 = vld [vmem:[%s7815_s1 + $0x2c8] sm:$0xff]  }
  0x25   :  { %5382 = vmatprep.subr.bf16.mxu0 %v5978_v52  ;;  %5403 = vmatpush3.bf16.msra.mxu1 %v5977_v49  ;;  %v924_v49 = vcombine.high %v23_v46, %v23_v46  ;;  %v6033_v51 = vld [vmem:[%s7815_s1 + $0x288] sm:$0xff]   ;;  %v939_v52 = vcombine.high %v931_v48, %v931_v48 }
  0x26   :  { %3853 = vmatprep.mubr.bf16.mxu0 %v919_v50  ;;  %5404 = vmatprep.subr.bf16.mxu1 %v5979_v54  ;;  %v6032_v50 = vld [vmem:[%s7815_s1 + $0x208] sm:$0xff]   ;;  %v6034_v54 = vld [vmem:[%s7815_s1 + $0x240] sm:$0xff]  }
  0x27   :  { %3893 = vmatprep.mubr.bf16.mxu1 %v923_v56  ;;  %v6724_v53 = vrot.slane %v924_v49, %v6532_v41  ;;  %v961_v56 = vrot.slane %v939_v52, %v6532_v41  ;;  %v6081_v46 = vld [vmem:[%s7815_s1 + $0x428] sm:$0xff]   ;;  %v6084_v49 = vld [vmem:[%s7815_s1 + $0x4e0] sm:$0xff]   ;;  %v6087_v52 = vld [vmem:[%s7815_s1 + $0x458] sm:$0xff]  }
  0x28   :  { %5383 = vmatpush3.bf16.msra.mxu0 %v5980_v55  ;;  %v6035_v55 = vld [vmem:[%s7815_s1 + $0x2c0] sm:$0xff]  }
  0x29   :  { %5384 = vmatprep.subr.bf16.mxu0 %v5982_v58  ;;  %5405 = vmatpush3.bf16.msra.mxu1 %v5981_v57  ;;  %v940_v57 = vcombine.high %v6724_v53, %v6724_v53  ;;  %v6036_v58 = vld [vmem:[%s7815_s1 + $0x200] sm:$0xff]  }
  0x2a   :  { %5406 = vmatprep.subr.bf16.mxu1 %v5983_v59  ;;  %v6037_v59 = vld [vmem:[%s7815_s1 + $0x280] sm:$0xff]  }
  0x2c   :  { %5385 = vmatpush3.bf16.msra.mxu0 %v5984_v60  ;;  %v971_v60 = vcombine.high %v961_v56, %v961_v56 }
  0x2d   :  { %5386 = vmatprep.subr.bf16.mxu0 %v5986_v62  ;;  %5407 = vmatpush3.bf16.msra.mxu1 %v5985_v61  ;;  %v947_v61 = vrot.slane %v931_v48, %v6532_v41  ;;  %v6038_v62 = vld [vmem:[%s7815_s1 + $0x378] sm:$0xff]   ;;  %v6083_v48 = vld [vmem:[%s7815_s1 + $0x460] sm:$0xff]  }
  0x2e   :  { %5408 = vmatprep.subr.bf16.mxu1 %v5987_v63  ;;  %v6039_v63 = vld [vmem:[%s7815_s1 + $0x3f8] sm:$0xff]  }
  0x30   :  { %5387 = vmatpush3.bf16.msra.mxu0 %v5988_v0  ;;  %v968_v0 = vrot.slane %v940_v57, %v6532_v41  ;;  %v6092_v57 = vld [vmem:[%s7815_s1 + $0x4d0] sm:$0xff]  }
  0x31   :  { %5388 = vmatprep.subr.bf16.mxu0 %v5990_v2  ;;  %5409 = vmatpush3.bf16.msra.mxu1 %v5989_v1  ;;  %v6040_v1 = vld [vmem:[%s7815_s1 + $0x338] sm:$0xff]  }
  0x32   :  { %5410 = vmatprep.subr.bf16.mxu1 %v5991_v3  ;;  %v6041_v2 = vld [vmem:[%s7815_s1 + $0x3b8] sm:$0xff]   ;;  %v969_v3 = vcombine.high %v947_v61, %v947_v61 }
  0x34   :  { %5389 = vmatpush3.bf16.msra.mxu0 %v5992_v4  ;;  %v6042_v4 = vld [vmem:[%s7815_s1 + $0x370] sm:$0xff]  }
  0x35   :  { %5390 = vmatprep.subr.bf16.mxu0 %v5994_v6  ;;  %5411 = vmatpush3.bf16.msra.mxu1 %v5993_v5  ;;  %v6043_v5 = vld [vmem:[%s7815_s1 + $0x3f0] sm:$0xff]   ;;  %v972_v6 = vcombine.high %v968_v0, %v968_v0 }
  0x36   :  { %5412 = vmatprep.subr.bf16.mxu1 %v5995_v7  ;;  %v6044_v7 = vld [vmem:[%s7815_s1 + $0x330] sm:$0xff]  }
  0x38   :  { %5391 = vmatpush3.bf16.msra.mxu0 %v5996_v8  ;;  %v6045_v8 = vld [vmem:[%s7815_s1 + $0x3b0] sm:$0xff]  }
  0x39   :  { %5392 = vmatprep.subr.bf16.mxu0 %v5998_v10  ;;  %5413 = vmatpush3.bf16.msra.mxu1 %v5997_v9  ;;  %v6046_v9 = vld [vmem:[%s7815_s1 + $0x368] sm:$0xff]  }
  0x3a   :  { %5414 = vmatprep.subr.bf16.mxu1 %v5999_v11  ;;  %v6047_v10 = vld [vmem:[%s7815_s1 + $0x3e8] sm:$0xff]  }
  0x3b   :  { %v6048_v11 = vld [vmem:[%s7815_s1 + $0x328] sm:$0xff]  }
  0x3c   :  { %5393 = vmatpush3.bf16.msra.mxu0 %v6000_v12  ;;  %v6049_v12 = vld [vmem:[%s7815_s1 + $0x3a8] sm:$0xff]  }
  0x3d   :  { %5394 = vmatprep.subr.bf16.mxu0 %v6002_v14  ;;  %5415 = vmatpush3.bf16.msra.mxu1 %v6001_v13  ;;  %v6050_v13 = vld [vmem:[%s7815_s1 + $0x360] sm:$0xff]  }
  0x3e   :  { %5416 = vmatprep.subr.bf16.mxu1 %v6003_v15  ;;  %v6051_v14 = vld [vmem:[%s7815_s1 + $0x3e0] sm:$0xff]  }
  0x3f   :  { %v6052_v15 = vld [vmem:[%s7815_s1 + $0x320] sm:$0xff]  }
  0x40   :  { %5395 = vmatpush3.bf16.msra.mxu0 %v6004_v16  ;;  %v6053_v16 = vld [vmem:[%s7815_s1 + $0x3a0] sm:$0xff]  }
  0x41   :  { %5424 = vmatprep.subr.bf16.mxu0 %v6006_v19  ;;  %5417 = vmatpush3.bf16.msra.mxu1 %v6005_v17  ;;  %v6054_v17 = vld [vmem:[%s7815_s1 + $0x358] sm:$0xff]  }
  0x42   :  { %5446 = vmatprep.subr.bf16.mxu1 %v6007_v20  ;;  %v6056_v19 = vld [vmem:[%s7815_s1 + $0x318] sm:$0xff]  }
  0x43   :  { %3854 = vmatmul.mubr.bf16.vlgmr.msra.gmra.mxu0 %v905_v18  ;;  %v6055_v18 = vld [vmem:[%s7815_s1 + $0x3d8] sm:$0xff]  }
  0x44   :  { %5425 = vmatpush3.bf16.msra.mxu0 %v6008_v21  ;;  %3894 = vmatmul.mubr.bf16.vlgmr.msra.gmra.mxu1 %v921_v23  ;;  %v6057_v20 = vld [vmem:[%s7815_s1 + $0x398] sm:$0xff]   ;;  %v6058_v21 = vld [vmem:[%s7815_s1 + $0x350] sm:$0xff]  }
  0x45   :  { %5426 = vmatprep.subr.bf16.mxu0 %v6010_v24  ;;  %5447 = vmatpush3.bf16.msra.mxu1 %v6009_v22  ;;  %v6059_v22 = vld [vmem:[%s7815_s1 + $0x3d0] sm:$0xff]  }
  0x46   :  { %5448 = vmatprep.subr.bf16.mxu1 %v6011_v25  ;;  %3933 = vmatprep.mubr.bf16.mxu0 %v961_v56  ;;  %v6060_v23 = vld [vmem:[%s7815_s1 + $0x310] sm:$0xff]   ;;  %v6062_v25 = vld [vmem:[%s7815_s1 + $0x348] sm:$0xff]  }
  0x47   :  { %3973 = vmatprep.mubr.bf16.mxu1 %v971_v60  ;;  %v6061_v24 = vld [vmem:[%s7815_s1 + $0x390] sm:$0xff]   ;;  %v6095_v60 = vld [vmem:[%s7815_s1 + $0x448] sm:$0xff]  }
  0x48   :  { %5427 = vmatpush3.bf16.msra.mxu0 %v6012_v26  ;;  %v6063_v26 = vld [vmem:[%s7815_s1 + $0x3c8] sm:$0xff]   ;;  %v6091_v56 = vld [vmem:[%s7815_s1 + $0x450] sm:$0xff]  }
  0x49   :  { %5428 = vmatprep.subr.bf16.mxu0 %v6014_v28  ;;  %5449 = vmatpush3.bf16.msra.mxu1 %v6013_v27  ;;  %v6064_v27 = vld [vmem:[%s7815_s1 + $0x308] sm:$0xff]  }
  0x4a   :  { %5450 = vmatprep.subr.bf16.mxu1 %v6015_v29  ;;  %v6065_v28 = vld [vmem:[%s7815_s1 + $0x388] sm:$0xff]   ;;  %v6066_v29 = vld [vmem:[%s7815_s1 + $0x340] sm:$0xff]  }
  0x4c   :  { %5429 = vmatpush3.bf16.msra.mxu0 %v6016_v30  ;;  %v6067_v30 = vld [vmem:[%s7815_s1 + $0x3c0] sm:$0xff]  }
  0x4d   :  { %5430 = vmatprep.subr.bf16.mxu0 %v6018_v32  ;;  %5451 = vmatpush3.bf16.msra.mxu1 %v6017_v31  ;;  %v6068_v31 = vld [vmem:[%s7815_s1 + $0x300] sm:$0xff]  }
  0x4e   :  { %5452 = vmatprep.subr.bf16.mxu1 %v6019_v33  ;;  %v6069_v32 = vld [vmem:[%s7815_s1 + $0x380] sm:$0xff]   ;;  %v954_v33 = vrot.slane %v6724_v53, %v6532_v41  ;;  %v6088_v53 = vld [vmem:[%s7815_s1 + $0x4d8] sm:$0xff]  }
  0x50   :  { %5431 = vmatpush3.bf16.msra.mxu0 %v6020_v34  ;;  %v6071_v34 = vld [vmem:[%s7815_s1 + $0x478] sm:$0xff]  }
  0x51   :  { %5432 = vmatprep.subr.bf16.mxu0 %v6022_v36  ;;  %5453 = vmatpush3.bf16.msra.mxu1 %v6021_v35  ;;  %v6072_v35 = vld [vmem:[%s7815_s1 + $0x4f8] sm:$0xff]  }
  0x52   :  { %5454 = vmatprep.subr.bf16.mxu1 %v6023_v37  ;;  %v6073_v36 = vld [vmem:[%s7815_s1 + $0x438] sm:$0xff]  }
  0x53   :  { %v6074_v37 = vld [vmem:[%s7815_s1 + $0x4b8] sm:$0xff]  }
  0x54   :  { %5433 = vmatpush3.bf16.msra.mxu0 %v6024_v38  ;;  %v970_v38 = vcombine.high %v954_v33, %v954_v33 }
  0x55   :  { %5434 = vmatprep.subr.bf16.mxu0 %v6026_v40  ;;  %5455 = vmatpush3.bf16.msra.mxu1 %v6025_v39  ;;  %v6075_v39 = vld [vmem:[%s7815_s1 + $0x470] sm:$0xff]  }
  0x56   :  { %5456 = vmatprep.subr.bf16.mxu1 %v6027_v42  ;;  %v6076_v40 = vld [vmem:[%s7815_s1 + $0x4f0] sm:$0xff]  }
  0x57   :  { %v6077_v42 = vld [vmem:[%s7815_s1 + $0x430] sm:$0xff]  }
  0x58   :  { %5435 = vmatpush3.bf16.msra.mxu0 %v6028_v43  ;;  %v6078_v43 = vld [vmem:[%s7815_s1 + $0x4b0] sm:$0xff]  }
  0x59   :  { %5436 = vmatprep.subr.bf16.mxu0 %v6030_v45  ;;  %5457 = vmatpush3.bf16.msra.mxu1 %v6029_v44  ;;  %v6079_v44 = vld [vmem:[%s7815_s1 + $0x468] sm:$0xff]  }
  0x5a   :  { %5458 = vmatprep.subr.bf16.mxu1 %v6031_v47  ;;  %v6080_v45 = vld [vmem:[%s7815_s1 + $0x4e8] sm:$0xff]  }
  0x5b   :  { %v6082_v47 = vld [vmem:[%s7815_s1 + $0x4a8] sm:$0xff]  }
  0x5c   :  { %5437 = vmatpush3.bf16.msra.mxu0 %v6032_v50  ;;  %v6085_v50 = vld [vmem:[%s7815_s1 + $0x420] sm:$0xff]  }
  0x5d   :  { %5438 = vmatprep.subr.bf16.mxu0 %v6034_v54  ;;  %5459 = vmatpush3.bf16.msra.mxu1 %v6033_v51  ;;  %v6086_v51 = vld [vmem:[%s7815_s1 + $0x4a0] sm:$0xff]   ;;  %v6089_v54 = vld [vmem:[%s7815_s1 + $0x418] sm:$0xff]  }
  0x5e   :  { %5460 = vmatprep.subr.bf16.mxu1 %v6035_v55  ;;  %v6090_v55 = vld [vmem:[%s7815_s1 + $0x498] sm:$0xff]  }
  0x60   :  { %5439 = vmatpush3.bf16.msra.mxu0 %v6036_v58  ;;  %v6093_v58 = vld [vmem:[%s7815_s1 + $0x410] sm:$0xff]  }
  0x61   :  { %5468 = vmatprep.subr.bf16.mxu0 %v6038_v62  ;;  %5461 = vmatpush3.bf16.msra.mxu1 %v6037_v59  ;;  %v6094_v59 = vld [vmem:[%s7815_s1 + $0x490] sm:$0xff]   ;;  %v6096_v62 = vld [vmem:[%s7815_s1 + $0x4c8] sm:$0xff]  }
  0x62   :  { %5490 = vmatprep.subr.bf16.mxu1 %v6039_v63 }
  0x63   :  { %3934 = vmatmul.mubr.bf16.vlgmr.msra.gmra.mxu0 %v947_v61  ;;  %v24_v61 = vld [vmem:[%s7814_s0 + $0x10] sm:$0xff] }
  0x64   :  { %5469 = vmatpush3.bf16.msra.mxu0 %v6040_v1  ;;  %4013 = vmatprep.mubr.bf16.mxu0 %v968_v0  ;;  %v980_v63 = vrot.slane %v24_v61, %v6532_v41  ;;  %v973_v0 = vcombine.high %v24_v61, %v24_v61  ;;  %v6097_v1 = vld [vmem:[%s7815_s1 + $0x408] sm:$0xff]  }
  0x65   :  { %3974 = vmatmul.mubr.bf16.vlgmr.msra.gmra.mxu1 %v969_v3  ;;  %5470 = vmatprep.subr.bf16.mxu0 %v6042_v4  ;;  %v6146_v61 = vld [vmem:[%s7815_s1 + $0x628] sm:$0xff]  }
  0x66   :  { %5491 = vmatpush3.bf16.msra.mxu1 %v6041_v2  ;;  %4053 = vmatprep.mubr.bf16.mxu1 %v972_v6  ;;  %v6098_v2 = vld [vmem:[%s7815_s1 + $0x488] sm:$0xff]   ;;  %v988_v3 = vcombine.high %v980_v63, %v980_v63  ;;  %v6930_v4 = vrot.slane %v973_v0, %v6532_v41  ;;  %v6100_v6 = vld [vmem:[%s7815_s1 + $0x4c0] sm:$0xff]  }
  0x67   :  { %5492 = vmatprep.subr.bf16.mxu1 %v6043_v5  ;;  %v6099_v5 = vld [vmem:[%s7815_s1 + $0x440] sm:$0xff]  }
  0x68   :  { %5471 = vmatpush3.bf16.msra.mxu0 %v6044_v7  ;;  %v1010_v7 = vrot.slane %v988_v3, %v6532_v41  ;;  %v6149_v0 = vld [vmem:[%s7815_s1 + $0x6e0] sm:$0xff]   ;;  %v6152_v3 = vld [vmem:[%s7815_s1 + $0x658] sm:$0xff]  }
  0x69   :  { %5472 = vmatprep.subr.bf16.mxu0 %v6046_v9  ;;  %v6101_v9 = vld [vmem:[%s7815_s1 + $0x400] sm:$0xff]  }
  0x6a   :  { %5493 = vmatpush3.bf16.msra.mxu1 %v6045_v8  ;;  %v989_v8 = vcombine.high %v6930_v4, %v6930_v4 }
  0x6b   :  { %5494 = vmatprep.subr.bf16.mxu1 %v6047_v10  ;;  %v6102_v10 = vld [vmem:[%s7815_s1 + $0x480] sm:$0xff]  }
  0x6c   :  { %5473 = vmatpush3.bf16.msra.mxu0 %v6048_v11  ;;  %v1020_v11 = vcombine.high %v1010_v7, %v1010_v7 }
  0x6d   :  { %5474 = vmatprep.subr.bf16.mxu0 %v6050_v13  ;;  %v6103_v13 = vld [vmem:[%s7815_s1 + $0x578] sm:$0xff]  }
  0x6e   :  { %5495 = vmatpush3.bf16.msra.mxu1 %v6049_v12  ;;  %v996_v12 = vrot.slane %v980_v63, %v6532_v41  ;;  %v6148_v63 = vld [vmem:[%s7815_s1 + $0x660] sm:$0xff]  }
  0x6f   :  { %5496 = vmatprep.subr.bf16.mxu1 %v6051_v14  ;;  %v6104_v14 = vld [vmem:[%s7815_s1 + $0x5f8] sm:$0xff]  }
  0x70   :  { %5475 = vmatpush3.bf16.msra.mxu0 %v6052_v15  ;;  %v1017_v15 = vrot.slane %v989_v8, %v6532_v41  ;;  %v6157_v8 = vld [vmem:[%s7815_s1 + $0x6d0] sm:$0xff]  }
  0x71   :  { %5476 = vmatprep.subr.bf16.mxu0 %v6054_v17  ;;  %v6106_v17 = vld [vmem:[%s7815_s1 + $0x5b8] sm:$0xff]  }
  0x72   :  { %5497 = vmatpush3.bf16.msra.mxu1 %v6053_v16  ;;  %v6105_v16 = vld [vmem:[%s7815_s1 + $0x538] sm:$0xff]  }
  0x73   :  { %5498 = vmatprep.subr.bf16.mxu1 %v6055_v18  ;;  %v1018_v18 = vcombine.high %v996_v12, %v996_v12 }
  0x74   :  { %5477 = vmatpush3.bf16.msra.mxu0 %v6056_v19  ;;  %v6107_v19 = vld [vmem:[%s7815_s1 + $0x570] sm:$0xff]  }
  0x75   :  { %5478 = vmatprep.subr.bf16.mxu0 %v6058_v21  ;;  %v1021_v21 = vcombine.high %v1017_v15, %v1017_v15 }
  0x76   :  { %5499 = vmatpush3.bf16.msra.mxu1 %v6057_v20  ;;  %v6108_v20 = vld [vmem:[%s7815_s1 + $0x5f0] sm:$0xff]  }
  0x77   :  { %5500 = vmatprep.subr.bf16.mxu1 %v6059_v22  ;;  %v6109_v22 = vld [vmem:[%s7815_s1 + $0x530] sm:$0xff]  }
  0x78   :  { %5479 = vmatpush3.bf16.msra.mxu0 %v6060_v23  ;;  %v6110_v23 = vld [vmem:[%s7815_s1 + $0x5b0] sm:$0xff]  }
  0x79   :  { %5480 = vmatprep.subr.bf16.mxu0 %v6062_v25  ;;  %v6112_v25 = vld [vmem:[%s7815_s1 + $0x5e8] sm:$0xff]  }
  0x7a   :  { %5501 = vmatpush3.bf16.msra.mxu1 %v6061_v24  ;;  %v6111_v24 = vld [vmem:[%s7815_s1 + $0x568] sm:$0xff]  }
  0x7b   :  { %5502 = vmatprep.subr.bf16.mxu1 %v6063_v26  ;;  %v6113_v26 = vld [vmem:[%s7815_s1 + $0x528] sm:$0xff]  }
  0x7c   :  { %5481 = vmatpush3.bf16.msra.mxu0 %v6064_v27  ;;  %v6114_v27 = vld [vmem:[%s7815_s1 + $0x5a8] sm:$0xff]  }
  0x7d   :  { %5482 = vmatprep.subr.bf16.mxu0 %v6066_v29  ;;  %v6116_v29 = vld [vmem:[%s7815_s1 + $0x5e0] sm:$0xff]  }
  0x7e   :  { %5503 = vmatpush3.bf16.msra.mxu1 %v6065_v28  ;;  %v6115_v28 = vld [vmem:[%s7815_s1 + $0x560] sm:$0xff]  }
  0x7f   :  { %5504 = vmatprep.subr.bf16.mxu1 %v6067_v30  ;;  %v6117_v30 = vld [vmem:[%s7815_s1 + $0x520] sm:$0xff]  }
  0x80   :  { %5483 = vmatpush3.bf16.msra.mxu0 %v6068_v31  ;;  %v6118_v31 = vld [vmem:[%s7815_s1 + $0x5a0] sm:$0xff]  }
  0x81   :  { %5512 = vmatprep.subr.bf16.mxu0 %v6071_v34  ;;  %v6121_v34 = vld [vmem:[%s7815_s1 + $0x518] sm:$0xff]  }
  0x82   :  { %5505 = vmatpush3.bf16.msra.mxu1 %v6069_v32  ;;  %v6119_v32 = vld [vmem:[%s7815_s1 + $0x558] sm:$0xff]  }
  0x83   :  { %4014 = vmatmul.mubr.bf16.vlgmr.msra.gmra.mxu0 %v954_v33  ;;  %5534 = vmatprep.subr.bf16.mxu1 %v6072_v35  ;;  %v6120_v33 = vld [vmem:[%s7815_s1 + $0x5d8] sm:$0xff]  }
  0x84   :  { %5513 = vmatpush3.bf16.msra.mxu0 %v6073_v36  ;;  %4093 = vmatprep.mubr.bf16.mxu0 %v1010_v7  ;;  %v6122_v35 = vld [vmem:[%s7815_s1 + $0x598] sm:$0xff]   ;;  %v6123_v36 = vld [vmem:[%s7815_s1 + $0x550] sm:$0xff]  }
  0x85   :  { %4054 = vmatmul.mubr.bf16.vlgmr.msra.gmra.mxu1 %v970_v38  ;;  %5514 = vmatprep.subr.bf16.mxu0 %v6075_v39  ;;  %v6125_v38 = vld [vmem:[%s7815_s1 + $0x510] sm:$0xff]  }
  0x86   :  { %5535 = vmatpush3.bf16.msra.mxu1 %v6074_v37  ;;  %4133 = vmatprep.mubr.bf16.mxu1 %v1020_v11  ;;  %v6124_v37 = vld [vmem:[%s7815_s1 + $0x5d0] sm:$0xff]   ;;  %v6160_v11 = vld [vmem:[%s7815_s1 + $0x648] sm:$0xff]  }
  0x87   :  { %5536 = vmatprep.subr.bf16.mxu1 %v6076_v40  ;;  %v6126_v39 = vld [vmem:[%s7815_s1 + $0x590] sm:$0xff]   ;;  %v6127_v40 = vld [vmem:[%s7815_s1 + $0x548] sm:$0xff]  }
  0x88   :  { %5515 = vmatpush3.bf16.msra.mxu0 %v6077_v42  ;;  %v6128_v42 = vld [vmem:[%s7815_s1 + $0x5c8] sm:$0xff]   ;;  %v6156_v7 = vld [vmem:[%s7815_s1 + $0x650] sm:$0xff]  }
  0x89   :  { %5516 = vmatprep.subr.bf16.mxu0 %v6079_v44  ;;  %v6130_v44 = vld [vmem:[%s7815_s1 + $0x588] sm:$0xff]  }
  0x8a   :  { %5537 = vmatpush3.bf16.msra.mxu1 %v6078_v43  ;;  %v6129_v43 = vld [vmem:[%s7815_s1 + $0x508] sm:$0xff]  }
  0x8b   :  { %5538 = vmatprep.subr.bf16.mxu1 %v6080_v45  ;;  %v6131_v45 = vld [vmem:[%s7815_s1 + $0x540] sm:$0xff]  }
  0x8c   :  { %5517 = vmatpush3.bf16.msra.mxu0 %v6081_v46  ;;  %v6132_v46 = vld [vmem:[%s7815_s1 + $0x5c0] sm:$0xff]  }
  0x8d   :  { %5518 = vmatprep.subr.bf16.mxu0 %v6083_v48  ;;  %v6134_v48 = vld [vmem:[%s7815_s1 + $0x580] sm:$0xff]  }
  0x8e   :  { %5539 = vmatpush3.bf16.msra.mxu1 %v6082_v47  ;;  %v6133_v47 = vld [vmem:[%s7815_s1 + $0x500] sm:$0xff]  }
  0x8f   :  { %5540 = vmatprep.subr.bf16.mxu1 %v6084_v49  ;;  %v1003_v49 = vrot.slane %v6930_v4, %v6532_v41  ;;  %v6153_v4 = vld [vmem:[%s7815_s1 + $0x6d8] sm:$0xff]  }
  0x90   :  { %5519 = vmatpush3.bf16.msra.mxu0 %v6085_v50  ;;  %v6136_v50 = vld [vmem:[%s7815_s1 + $0x678] sm:$0xff]  }
  0x91   :  { %5520 = vmatprep.subr.bf16.mxu0 %v6087_v52  ;;  %v6138_v52 = vld [vmem:[%s7815_s1 + $0x638] sm:$0xff]  }
  0x92   :  { %5541 = vmatpush3.bf16.msra.mxu1 %v6086_v51  ;;  %v6137_v51 = vld [vmem:[%s7815_s1 + $0x6f8] sm:$0xff]  }
  0x93   :  { %5542 = vmatprep.subr.bf16.mxu1 %v6088_v53  ;;  %v6139_v53 = vld [vmem:[%s7815_s1 + $0x6b8] sm:$0xff]  }
  0x94   :  { %5521 = vmatpush3.bf16.msra.mxu0 %v6089_v54  ;;  %v1019_v54 = vcombine.high %v1003_v49, %v1003_v49 }
  0x95   :  { %5522 = vmatprep.subr.bf16.mxu0 %v6091_v56  ;;  %v6141_v56 = vld [vmem:[%s7815_s1 + $0x6f0] sm:$0xff]  }
  0x96   :  { %5543 = vmatpush3.bf16.msra.mxu1 %v6090_v55  ;;  %v6140_v55 = vld [vmem:[%s7815_s1 + $0x670] sm:$0xff]  }
  0x97   :  { %5544 = vmatprep.subr.bf16.mxu1 %v6092_v57  ;;  %v6142_v57 = vld [vmem:[%s7815_s1 + $0x630] sm:$0xff]  }
  0x98   :  { %5523 = vmatpush3.bf16.msra.mxu0 %v6093_v58  ;;  %v6143_v58 = vld [vmem:[%s7815_s1 + $0x6b0] sm:$0xff]  }
  0x99   :  { %5524 = vmatprep.subr.bf16.mxu0 %v6095_v60  ;;  %v6145_v60 = vld [vmem:[%s7815_s1 + $0x6e8] sm:$0xff]  }
  0x9a   :  { %5545 = vmatpush3.bf16.msra.mxu1 %v6094_v59  ;;  %v6144_v59 = vld [vmem:[%s7815_s1 + $0x668] sm:$0xff]  }
  0x9b   :  { %5546 = vmatprep.subr.bf16.mxu1 %v6096_v62  ;;  %v6147_v62 = vld [vmem:[%s7815_s1 + $0x6a8] sm:$0xff]  }
  0x9c   :  { %5525 = vmatpush3.bf16.msra.mxu0 %v6097_v1  ;;  %v6150_v1 = vld [vmem:[%s7815_s1 + $0x620] sm:$0xff]  }
  0x9d   :  { %5526 = vmatprep.subr.bf16.mxu0 %v6099_v5  ;;  %v6154_v5 = vld [vmem:[%s7815_s1 + $0x618] sm:$0xff]  }
  0x9e   :  { %5547 = vmatpush3.bf16.msra.mxu1 %v6098_v2  ;;  %v6151_v2 = vld [vmem:[%s7815_s1 + $0x6a0] sm:$0xff]  }
  0x9f   :  { %5548 = vmatprep.subr.bf16.mxu1 %v6100_v6  ;;  %v6155_v6 = vld [vmem:[%s7815_s1 + $0x698] sm:$0xff]  }
  0xa0   :  { %5527 = vmatpush3.bf16.msra.mxu0 %v6101_v9  ;;  %v6158_v9 = vld [vmem:[%s7815_s1 + $0x610] sm:$0xff]  }
  0xa1   :  { %5556 = vmatprep.subr.bf16.mxu0 %v6103_v13  ;;  %v6161_v13 = vld [vmem:[%s7815_s1 + $0x6c8] sm:$0xff]  }
  0xa2   :  { %5549 = vmatpush3.bf16.msra.mxu1 %v6102_v10  ;;  %v6159_v10 = vld [vmem:[%s7815_s1 + $0x690] sm:$0xff]  }
  0xa3   :  { %4094 = vmatmul.mubr.bf16.vlgmr.msra.gmra.mxu0 %v996_v12  ;;  %5578 = vmatprep.subr.bf16.mxu1 %v6104_v14  ;;  %v25_v12 = vld [vmem:[%s7814_s0 + $0x18] sm:$0xff] }
  0xa4   :  { %5557 = vmatpush3.bf16.msra.mxu0 %v6105_v16  ;;  %4173 = vmatprep.mubr.bf16.mxu0 %v1017_v15  ;;  %v1029_v14 = vrot.slane %v25_v12, %v6532_v41  ;;  %v1022_v15 = vcombine.high %v25_v12, %v25_v12  ;;  %v6162_v16 = vld [vmem:[%s7815_s1 + $0x608] sm:$0xff]   ;;  %v6199_v12 = vld [vmem:[%s7815_s1 + $0x780] sm:$0xff]  }
  0xa5   :  { %4134 = vmatmul.mubr.bf16.vlgmr.msra.gmra.mxu1 %v1018_v18  ;;  %5558 = vmatprep.subr.bf16.mxu0 %v6107_v19 }
  0xa6   :  { %5579 = vmatpush3.bf16.msra.mxu1 %v6106_v17  ;;  %4213 = vmatprep.mubr.bf16.mxu1 %v1021_v21  ;;  %v6164_v17 = vld [vmem:[%s7815_s1 + $0x640] sm:$0xff]   ;;  %v1037_v18 = vcombine.high %v1029_v14, %v1029_v14  ;;  %v7136_v19 = vrot.slane %v1022_v15, %v6532_v41  ;;  %v6202_v15 = vld [vmem:[%s7815_s1 + $0x8f8] sm:$0xff]  }
  0xa7   :  { %5580 = vmatprep.subr.bf16.mxu1 %v6108_v20  ;;  %v6163_v20 = vld [vmem:[%s7815_s1 + $0x688] sm:$0xff]   ;;  %v6165_v21 = vld [vmem:[%s7815_s1 + $0x6c0] sm:$0xff]  }
  0xa8   :  { %5559 = vmatpush3.bf16.msra.mxu0 %v6109_v22  ;;  %v6166_v22 = vld [vmem:[%s7815_s1 + $0x600] sm:$0xff]  }
  0xa9   :  { %5560 = vmatprep.subr.bf16.mxu0 %v6111_v24  ;;  %v1038_v24 = vcombine.high %v7136_v19, %v7136_v19 }
  0xaa   :  { %5581 = vmatpush3.bf16.msra.mxu1 %v6110_v23  ;;  %v1059_v23 = vrot.slane %v1037_v18, %v6532_v41 }
  0xab   :  { %5582 = vmatprep.subr.bf16.mxu1 %v6112_v25  ;;  %v6167_v25 = vld [vmem:[%s7815_s1 + $0x680] sm:$0xff]  }
  0xac   :  { %5561 = vmatpush3.bf16.msra.mxu0 %v6113_v26  ;;  %v1069_v26 = vcombine.high %v1059_v23, %v1059_v23 }
  0xad   :  { %5562 = vmatprep.subr.bf16.mxu0 %v6115_v28  ;;  %v6168_v28 = vld [vmem:[%s7815_s1 + $0x778] sm:$0xff]  }
  0xae   :  { %5583 = vmatpush3.bf16.msra.mxu1 %v6114_v27  ;;  %v1045_v27 = vrot.slane %v1029_v14, %v6532_v41  ;;  %v6201_v14 = vld [vmem:[%s7815_s1 + $0x878] sm:$0xff]  }
  0xaf   :  { %5584 = vmatprep.subr.bf16.mxu1 %v6116_v29  ;;  %v6169_v29 = vld [vmem:[%s7815_s1 + $0x7f8] sm:$0xff]  }
  0xb0   :  { %5563 = vmatpush3.bf16.msra.mxu0 %v6117_v30  ;;  %v1066_v30 = vrot.slane %v1038_v24, %v6532_v41 }
  0xb1   :  { %5564 = vmatprep.subr.bf16.mxu0 %v6119_v32  ;;  %v6171_v32 = vld [vmem:[%s7815_s1 + $0x7b8] sm:$0xff]  }
  0xb2   :  { %5585 = vmatpush3.bf16.msra.mxu1 %v6118_v31  ;;  %v6170_v31 = vld [vmem:[%s7815_s1 + $0x738] sm:$0xff]  }
  0xb3   :  { %5586 = vmatprep.subr.bf16.mxu1 %v6120_v33  ;;  %v1067_v33 = vcombine.high %v1045_v27, %v1045_v27 }
  0xb4   :  { %5565 = vmatpush3.bf16.msra.mxu0 %v6121_v34  ;;  %v6172_v34 = vld [vmem:[%s7815_s1 + $0x770] sm:$0xff]  }
  0xb5   :  { %5566 = vmatprep.subr.bf16.mxu0 %v6123_v36  ;;  %v1070_v36 = vcombine.high %v1066_v30, %v1066_v30 }
  0xb6   :  { %5587 = vmatpush3.bf16.msra.mxu1 %v6122_v35  ;;  %v6173_v35 = vld [vmem:[%s7815_s1 + $0x7f0] sm:$0xff]  }
  0xb7   :  { %5588 = vmatprep.subr.bf16.mxu1 %v6124_v37 }
  0xb8   :  { %5567 = vmatpush3.bf16.msra.mxu0 %v6125_v38  ;;  %v4909_v38 = vld [vmem:[%s7816_s2] ss:$0 sm:$0xff] }
  0xb9   :  { %5568 = vmatprep.subr.bf16.mxu0 %v6127_v40  ;;  %v6175_v40 = vld [vmem:[%s7815_s1 + $0x7b0] sm:$0xff]  }
  0xba   :  { %5589 = vmatpush3.bf16.msra.mxu1 %v6126_v39  ;;  %v6174_v39 = vld [vmem:[%s7815_s1 + $0x730] sm:$0xff]  }
  0xbb   :  { %5590 = vmatprep.subr.bf16.mxu1 %v6128_v42 }
  0xbc   :  { %5569 = vmatpush3.bf16.msra.mxu0 %v6129_v43 }
  0xbd   :  { %5570 = vmatprep.subr.bf16.mxu0 %v6131_v45 }
  0xbe   :  { %5591 = vmatpush3.bf16.msra.mxu1 %v6130_v44  ;;  %v6176_v44 = vld [vmem:[%s7815_s1 + $0x768] sm:$0xff]  }
  0xbf   :  { %5592 = vmatprep.subr.bf16.mxu1 %v6132_v46  ;;  %v6177_v46 = vld [vmem:[%s7815_s1 + $0x7e8] sm:$0xff]  }
  0xc0   :  { %5571 = vmatpush3.bf16.msra.mxu0 %v6133_v47 }
  0xc1   :  { %5600 = vmatprep.subr.bf16.mxu0 %v6136_v50 }
  0xc2   :  { %5593 = vmatpush3.bf16.msra.mxu1 %v6134_v48 }
  0xc3   :  { %4174 = vmatmul.mubr.bf16.vlgmr.msra.gmra.mxu0 %v1003_v49  ;;  %5622 = vmatprep.subr.bf16.mxu1 %v6137_v51  ;;  %v6178_v49 = vld [vmem:[%s7815_s1 + $0x728] sm:$0xff]  }
  0xc4   :  { %5601 = vmatpush3.bf16.msra.mxu0 %v6138_v52  ;;  %4253 = vmatprep.mubr.bf16.mxu0 %v1059_v23  ;;  %v6179_v52 = vld [vmem:[%s7815_s1 + $0x7a8] sm:$0xff]   ;;  %v6208_v23 = vld [vmem:[%s7815_s1 + $0x8b0] sm:$0xff]  }
  0xc5   :  { %4214 = vmatmul.mubr.bf16.vlgmr.msra.gmra.mxu1 %v1019_v54  ;;  %5602 = vmatprep.subr.bf16.mxu0 %v6140_v55  ;;  %v6180_v55 = vld [vmem:[%s7815_s1 + $0x760] sm:$0xff]  }
  0xc6   :  { %5623 = vmatpush3.bf16.msra.mxu1 %v6139_v53  ;;  %4293 = vmatprep.mubr.bf16.mxu1 %v1069_v26  ;;  %v6209_v26 = vld [vmem:[%s7815_s1 + $0x868] sm:$0xff]  }
  0xc7   :  { %5624 = vmatprep.subr.bf16.mxu1 %v6141_v56 }
  0xc8   :  { %5603 = vmatpush3.bf16.msra.mxu0 %v6142_v57  ;;  %v6181_v57 = vld [vmem:[%s7815_s1 + $0x7e0] sm:$0xff]  }
  0xc9   :  { %5604 = vmatprep.subr.bf16.mxu0 %v6144_v59  ;;  %v6182_v59 = vld [vmem:[%s7815_s1 + $0x720] sm:$0xff]  }
  0xca   :  { %5625 = vmatpush3.bf16.msra.mxu1 %v6143_v58 }
  0xcb   :  { %5626 = vmatprep.subr.bf16.mxu1 %v6145_v60  ;;  %v6183_v60 = vld [vmem:[%s7815_s1 + $0x7a0] sm:$0xff]  }
  0xcc   :  { %5605 = vmatpush3.bf16.msra.mxu0 %v6146_v61  ;;  %v6184_v61 = vld [vmem:[%s7815_s1 + $0x758] sm:$0xff]  }
  0xcd   :  { %5606 = vmatprep.subr.bf16.mxu0 %v6148_v63  ;;  %v6186_v63 = vld [vmem:[%s7815_s1 + $0x718] sm:$0xff]  }
  0xce   :  { %5627 = vmatpush3.bf16.msra.mxu1 %v6147_v62  ;;  %v6185_v62 = vld [vmem:[%s7815_s1 + $0x7d8] sm:$0xff]  }
  0xcf   :  { %5628 = vmatprep.subr.bf16.mxu1 %v6149_v0  ;;  %v6187_v0 = vld [vmem:[%s7815_s1 + $0x798] sm:$0xff]  }
  0xd0   :  { %5607 = vmatpush3.bf16.msra.mxu0 %v6150_v1  ;;  %v6188_v1 = vld [vmem:[%s7815_s1 + $0x750] sm:$0xff]  }
  0xd1   :  { %5608 = vmatprep.subr.bf16.mxu0 %v6152_v3  ;;  %v6190_v3 = vld [vmem:[%s7815_s1 + $0x710] sm:$0xff]  }
  0xd2   :  { %5629 = vmatpush3.bf16.msra.mxu1 %v6151_v2  ;;  %v6189_v2 = vld [vmem:[%s7815_s1 + $0x7d0] sm:$0xff]  }
  0xd3   :  { %5630 = vmatprep.subr.bf16.mxu1 %v6153_v4  ;;  %v6191_v4 = vld [vmem:[%s7815_s1 + $0x790] sm:$0xff]  }
  0xd4   :  { %5609 = vmatpush3.bf16.msra.mxu0 %v6154_v5  ;;  %v6192_v5 = vld [vmem:[%s7815_s1 + $0x748] sm:$0xff]  }
  0xd5   :  { %5610 = vmatprep.subr.bf16.mxu0 %v6156_v7  ;;  %v6194_v7 = vld [vmem:[%s7815_s1 + $0x708] sm:$0xff]  }
  0xd6   :  { %5631 = vmatpush3.bf16.msra.mxu1 %v6155_v6  ;;  %v6193_v6 = vld [vmem:[%s7815_s1 + $0x7c8] sm:$0xff]  }
  0xd7   :  { %5632 = vmatprep.subr.bf16.mxu1 %v6157_v8  ;;  %v6195_v8 = vld [vmem:[%s7815_s1 + $0x788] sm:$0xff]  }
  0xd8   :  { %5611 = vmatpush3.bf16.msra.mxu0 %v6158_v9  ;;  %v6196_v9 = vld [vmem:[%s7815_s1 + $0x740] sm:$0xff]  }
  0xd9   :  { %5612 = vmatprep.subr.bf16.mxu0 %v6160_v11  ;;  %v6198_v11 = vld [vmem:[%s7815_s1 + $0x700] sm:$0xff]  }
  0xda   :  { %5633 = vmatpush3.bf16.msra.mxu1 %v6159_v10  ;;  %v6197_v10 = vld [vmem:[%s7815_s1 + $0x7c0] sm:$0xff]  }
  0xdb   :  { %5634 = vmatprep.subr.bf16.mxu1 %v6161_v13  ;;  %v1052_v13 = vrot.slane %v7136_v19, %v6532_v41  ;;  %v6205_v19 = vld [vmem:[%s7815_s1 + $0x870] sm:$0xff]  }
  0xdc   :  { %5613 = vmatpush3.bf16.msra.mxu0 %v6162_v16  ;;  %v6203_v16 = vld [vmem:[%s7815_s1 + $0x838] sm:$0xff]  }
  0xdd   :  { %5614 = vmatprep.subr.bf16.mxu0 %v6164_v17  ;;  %v6204_v17 = vld [vmem:[%s7815_s1 + $0x8b8] sm:$0xff]   ;;  %v1068_v18 = vcombine.high %v1052_v13, %v1052_v13 }
  0xde   :  { %5635 = vmatpush3.bf16.msra.mxu1 %v6163_v20  ;;  %v6206_v20 = vld [vmem:[%s7815_s1 + $0x8f0] sm:$0xff]  }
  0xdf   :  { %5636 = vmatprep.subr.bf16.mxu1 %v6165_v21 }
  0xe0   :  { %5615 = vmatpush3.bf16.msra.mxu0 %v6166_v22  ;;  %v6207_v22 = vld [vmem:[%s7815_s1 + $0x830] sm:$0xff]  }
  0xe1   :  { %5644 = vmatprep.subr.bf16.mxu0 %v6168_v28  ;;  %v6210_v28 = vld [vmem:[%s7815_s1 + $0x8e8] sm:$0xff]  }
  0xe2   :  { %5637 = vmatpush3.bf16.msra.mxu1 %v6167_v25 }
  0xe3   :  { %v5352_v37 = vpop.f32.mrf.mxu0  ;;  %4254 = vmatmul.mubr.bf16.vlgmr.msra.gmra.mxu0 %v1045_v27  ;;  %5666 = vmatprep.subr.bf16.mxu1 %v6169_v29 }
  0xe4   :  { %5645 = vmatpush3.bf16.msra.mxu0 %v6170_v31  ;;  %4333 = vmatprep.mubr.bf16.mxu0 %v1066_v30  ;;  %v5374_v42 = vpop.f32.mrf.mxu1  ;;  %v6211_v31 = vld [vmem:[%s7815_s1 + $0x828] sm:$0xff]  }
  0xe5   :  { %4294 = vmatmul.mubr.bf16.vlgmr.msra.gmra.mxu1 %v1067_v33  ;;  %v5353_v43 = vpop.f32.mrf.mxu0  ;;  %5646 = vmatprep.subr.bf16.mxu0 %v6172_v34  ;;  %v6212_v34 = vld [vmem:[%s7815_s1 + $0x8a8] sm:$0xff]  }
  0xe6   :  { %5667 = vmatpush3.bf16.msra.mxu1 %v6171_v32  ;;  %v5354_v45 = vadd.f32 %v5353_v43, %v5352_v37  ;;  %4373 = vmatprep.mubr.bf16.mxu1 %v1070_v36  ;;  %v5375_v47 = vpop.f32.mrf.mxu1  ;;  %v6213_v37 = vld [vmem:[%s7815_s1 + $0x860] sm:$0xff]  }
  0xe7   :  { %v5355_v48 = vpop.f32.mrf.mxu0  ;;  %5668 = vmatprep.subr.bf16.mxu1 %v6173_v35  ;;  %v5376_v51 = vadd.f32 %v5375_v47, %v5374_v42  ;;  %v6215_v42 = vld [vmem:[%s7815_s1 + $0x820] sm:$0xff]   ;;  %v6220_v47 = vld [vmem:[%s7815_s1 + $0x898] sm:$0xff]  }
  0xe8   :  { %v3776_v50 = vadd.f32 %v5354_v45, %v4909_v38  ;;  %5647 = vmatpush3.bf16.msra.mxu0 %v6174_v39  ;;  %v5377_v53 = vpop.f32.mrf.mxu1  ;;  %v6214_v39 = vld [vmem:[%s7815_s1 + $0x8e0] sm:$0xff]   ;;  %v6218_v45 = vld [vmem:[%s7815_s1 + $0x8d8] sm:$0xff]   ;;  %v6221_v48 = vld [vmem:[%s7815_s1 + $0x850] sm:$0xff]  }
  0xe9   :  { %v5356_v54 = vpop.f32.mrf.mxu0  ;;  %5648 = vmatprep.subr.bf16.mxu0 %v6176_v44  ;;  %v6216_v43 = vld [vmem:[%s7815_s1 + $0x8a0] sm:$0xff]   ;;  %v6217_v44 = vld [vmem:[%s7815_s1 + $0x858] sm:$0xff]   ;;  %v6226_v53 = vld [vmem:[%s7815_s1 + $0x8c8] sm:$0xff]  }
  0xea   :  { %v7197_v56 = vadd.f32 %v5376_v51, %v3776_v50  ;;  %5669 = vmatpush3.bf16.msra.mxu1 %v6175_v40  ;;  %v5378_v58 = vpop.f32.mrf.mxu1  ;;  %v6223_v50 = vld [vmem:[%s7815_s1 + $0x810] sm:$0xff]   ;;  %v26_v54 = vld [vmem:[%s7814_s0 + $0x20] sm:$0xff] }
  0xeb   :  { %5670 = vmatprep.subr.bf16.mxu1 %v6177_v46  ;;  %v6219_v46 = vld [vmem:[%s7815_s1 + $0x818] sm:$0xff]   ;;  %v6224_v51 = vld [vmem:[%s7815_s1 + $0x890] sm:$0xff]   ;;  %v6228_v58 = vld [vmem:[%s7815_s1 + $0x888] sm:$0xff]  }
  0xec   :  { %5649 = vmatpush3.bf16.msra.mxu0 %v6178_v49  ;;  %v6222_v49 = vld [vmem:[%s7815_s1 + $0x8d0] sm:$0xff]  }
  0xed   :  { %5650 = vmatprep.subr.bf16.mxu0 %v6180_v55  ;;  %v6227_v55 = vld [vmem:[%s7815_s1 + $0x808] sm:$0xff]  }
  0xee   :  { %5671 = vmatpush3.bf16.msra.mxu1 %v6179_v52  ;;  %v6225_v52 = vld [vmem:[%s7815_s1 + $0x848] sm:$0xff]  }
  0xef   :  { %5672 = vmatprep.subr.bf16.mxu1 %v6181_v57  ;;  %v1071_v57 = vcombine.high %v26_v54, %v26_v54 }
  0xf0   :  { %5651 = vmatpush3.bf16.msra.mxu0 %v6182_v59  ;;  %v6229_v59 = vld [vmem:[%s7815_s1 + $0x840] sm:$0xff]  }
  0xf1   :  { %5652 = vmatprep.subr.bf16.mxu0 %v6184_v61  ;;  %v7353_v61 = vrot.slane %v1071_v57, %v6532_v41  ;;  %v6269_v57 = vld [vmem:[%s7815_s1 + $0xab8] sm:$0xff]  }
  0xf2   :  { %5673 = vmatpush3.bf16.msra.mxu1 %v6183_v60 }
  0xf3   :  { %5674 = vmatprep.subr.bf16.mxu1 %v6185_v62  ;;  %v6230_v62 = vld [vmem:[%s7815_s1 + $0x8c0] sm:$0xff]  }
  0xf4   :  { %5653 = vmatpush3.bf16.msra.mxu0 %v6186_v63  ;;  %v6231_v63 = vld [vmem:[%s7815_s1 + $0x800] sm:$0xff]  }
  0xf5   :  { %5654 = vmatprep.subr.bf16.mxu0 %v6188_v1  ;;  %v1087_v1 = vcombine.high %v7353_v61, %v7353_v61 }
  0xf6   :  { %5675 = vmatpush3.bf16.msra.mxu1 %v6187_v0 }
  0xf7   :  { %5676 = vmatprep.subr.bf16.mxu1 %v6189_v2  ;;  %v6232_v2 = vld [vmem:[%s7815_s1 + $0x880] sm:$0xff]  }
  0xf8   :  { %5655 = vmatpush3.bf16.msra.mxu0 %v6190_v3 }
  0xf9   :  { %5656 = vmatprep.subr.bf16.mxu0 %v6192_v5  ;;  %v6233_v5 = vld [vmem:[%s7815_s1 + $0x978] sm:$0xff]  }
  0xfa   :  { %5677 = vmatpush3.bf16.msra.mxu1 %v6191_v4 }
  0xfb   :  { %5678 = vmatprep.subr.bf16.mxu1 %v6193_v6  ;;  %v6234_v6 = vld [vmem:[%s7815_s1 + $0x9f8] sm:$0xff]  }
  0xfc   :  { %5657 = vmatpush3.bf16.msra.mxu0 %v6194_v7  ;;  %v1115_v7 = vrot.slane %v1087_v1, %v6532_v41 }
  0xfd   :  { %5658 = vmatprep.subr.bf16.mxu0 %v6196_v9  ;;  %v6236_v9 = vld [vmem:[%s7815_s1 + $0x9b8] sm:$0xff]  }
  0xfe   :  { %5679 = vmatpush3.bf16.msra.mxu1 %v6195_v8  ;;  %v6235_v8 = vld [vmem:[%s7815_s1 + $0x938] sm:$0xff]  }
  0xff   :  { %5680 = vmatprep.subr.bf16.mxu1 %v6197_v10 }
 0x100   :  { %5659 = vmatpush3.bf16.msra.mxu0 %v6198_v11  ;;  %v6237_v11 = vld [vmem:[%s7815_s1 + $0x970] sm:$0xff]  }
 0x101   :  { %5688 = vmatprep.subr.bf16.mxu0 %v6201_v14 }
 0x102   :  { %5681 = vmatpush3.bf16.msra.mxu1 %v6199_v12  ;;  %v6238_v12 = vld [vmem:[%s7815_s1 + $0x9f0] sm:$0xff]  }
 0x103   :  { %v5396_v21 = vpop.f32.mrf.mxu0  ;;  %4334 = vmatmul.mubr.bf16.vlgmr.msra.gmra.mxu0 %v1052_v13  ;;  %5710 = vmatprep.subr.bf16.mxu1 %v6202_v15  ;;  %v1119_v13 = vcombine.high %v1115_v7, %v1115_v7  ;;  %v6239_v15 = vld [vmem:[%s7815_s1 + $0x930] sm:$0xff]  }
 0x104   :  { %5689 = vmatpush3.bf16.msra.mxu0 %v6203_v16  ;;  %v5418_v24 = vpop.f32.mrf.mxu1  ;;  %v6240_v16 = vld [vmem:[%s7815_s1 + $0x9b0] sm:$0xff]  }
 0x105   :  { %4374 = vmatmul.mubr.bf16.vlgmr.msra.gmra.mxu1 %v1068_v18  ;;  %v5397_v25 = vpop.f32.mrf.mxu0  ;;  %5690 = vmatprep.subr.bf16.mxu0 %v6205_v19  ;;  %v6241_v19 = vld [vmem:[%s7815_s1 + $0x968] sm:$0xff]  }
 0x106   :  { %5711 = vmatpush3.bf16.msra.mxu1 %v6204_v17  ;;  %v5398_v27 = vadd.f32 %v5397_v25, %v5396_v21  ;;  %v5419_v29 = vpop.f32.mrf.mxu1  ;;  %v6242_v21 = vld [vmem:[%s7815_s1 + $0x9e8] sm:$0xff]  }
 0x107   :  { %v5399_v30 = vpop.f32.mrf.mxu0  ;;  %5712 = vmatprep.subr.bf16.mxu1 %v6206_v20  ;;  %v5420_v33 = vadd.f32 %v5419_v29, %v5418_v24  ;;  %v6243_v24 = vld [vmem:[%s7815_s1 + $0x928] sm:$0xff]  }
 0x108   :  { %v3856_v32 = vadd.f32 %v5398_v27, %v7197_v56  ;;  %5691 = vmatpush3.bf16.msra.mxu0 %v6207_v22  ;;  %v5421_v35 = vpop.f32.mrf.mxu1  ;;  %v1078_v56 = vrot.slane %v26_v54, %v6532_v41  ;;  %v6244_v27 = vld [vmem:[%s7815_s1 + $0x9a8] sm:$0xff]   ;;  %v6245_v30 = vld [vmem:[%s7815_s1 + $0x960] sm:$0xff]   ;;  %v6266_v54 = vld [vmem:[%s7815_s1 + $0xa78] sm:$0xff]  }
 0x109   :  { %v5400_v36 = vpop.f32.mrf.mxu0  ;;  %5692 = vmatprep.subr.bf16.mxu0 %v6209_v26  ;;  %v6248_v35 = vld [vmem:[%s7815_s1 + $0x9a0] sm:$0xff]  }
 0x10a   :  { %v7298_v38 = vadd.f32 %v5420_v33, %v3856_v32  ;;  %5713 = vmatpush3.bf16.msra.mxu1 %v6208_v23  ;;  %v5422_v40 = vpop.f32.mrf.mxu1  ;;  %v1086_v60 = vcombine.high %v1078_v56, %v1078_v56  ;;  %v1094_v4 = vrot.slane %v1078_v56, %v6532_v41  ;;  %v6246_v32 = vld [vmem:[%s7815_s1 + $0x9e0] sm:$0xff]   ;;  %v6249_v36 = vld [vmem:[%s7815_s1 + $0x958] sm:$0xff]  }
 0x10b   :  { %5714 = vmatprep.subr.bf16.mxu1 %v6210_v28  ;;  %v6253_v40 = vld [vmem:[%s7815_s1 + $0x950] sm:$0xff]   ;;  %v6268_v56 = vld [vmem:[%s7815_s1 + $0xa38] sm:$0xff]  }
 0x10c   :  { %5693 = vmatpush3.bf16.msra.mxu0 %v6211_v31  ;;  %v1108_v0 = vrot.slane %v1086_v60, %v6532_v41  ;;  %v1116_v10 = vcombine.high %v1094_v4, %v1094_v4  ;;  %v6271_v60 = vld [vmem:[%s7815_s1 + $0xaf0] sm:$0xff]  }
 0x10d   :  { %5694 = vmatprep.subr.bf16.mxu0 %v6213_v37  ;;  %v6250_v37 = vld [vmem:[%s7815_s1 + $0x9d8] sm:$0xff]  }
 0x10e   :  { %5715 = vmatpush3.bf16.msra.mxu1 %v6212_v34  ;;  %4413 = vmatprep.mubr.bf16.mxu0 %v1108_v0  ;;  %v1118_v3 = vcombine.high %v1108_v0, %v1108_v0  ;;  %v6247_v34 = vld [vmem:[%s7815_s1 + $0x920] sm:$0xff]  }
 0x10f   :  { %5716 = vmatprep.subr.bf16.mxu1 %v6214_v39  ;;  %v6252_v39 = vld [vmem:[%s7815_s1 + $0x998] sm:$0xff]  }
 0x110   :  { %5695 = vmatpush3.bf16.msra.mxu0 %v6215_v42  ;;  %4453 = vmatprep.mubr.bf16.mxu1 %v1118_v3  ;;  %v6254_v42 = vld [vmem:[%s7815_s1 + $0x9d0] sm:$0xff]  }
 0x111   :  { %5696 = vmatprep.subr.bf16.mxu0 %v6217_v44  ;;  %v6256_v44 = vld [vmem:[%s7815_s1 + $0x990] sm:$0xff]  }
 0x112   :  { %5717 = vmatpush3.bf16.msra.mxu1 %v6216_v43  ;;  %v6255_v43 = vld [vmem:[%s7815_s1 + $0x910] sm:$0xff]  }
 0x113   :  { %5718 = vmatprep.subr.bf16.mxu1 %v6218_v45  ;;  %v6257_v45 = vld [vmem:[%s7815_s1 + $0x948] sm:$0xff]  }
 0x114   :  { %5697 = vmatpush3.bf16.msra.mxu0 %v6219_v46  ;;  %v6258_v46 = vld [vmem:[%s7815_s1 + $0x9c8] sm:$0xff]  }
 0x115   :  { %5698 = vmatprep.subr.bf16.mxu0 %v6221_v48  ;;  %v6260_v48 = vld [vmem:[%s7815_s1 + $0x988] sm:$0xff]  }
 0x116   :  { %5719 = vmatpush3.bf16.msra.mxu1 %v6220_v47  ;;  %v6259_v47 = vld [vmem:[%s7815_s1 + $0x908] sm:$0xff]  }
 0x117   :  { %5720 = vmatprep.subr.bf16.mxu1 %v6222_v49  ;;  %v6261_v49 = vld [vmem:[%s7815_s1 + $0x940] sm:$0xff]  }
 0x118   :  { %5699 = vmatpush3.bf16.msra.mxu0 %v6223_v50  ;;  %v6262_v50 = vld [vmem:[%s7815_s1 + $0x9c0] sm:$0xff]  }
 0x119   :  { %5700 = vmatprep.subr.bf16.mxu0 %v6225_v52  ;;  %v6264_v52 = vld [vmem:[%s7815_s1 + $0x980] sm:$0xff]  }
 0x11a   :  { %5721 = vmatpush3.bf16.msra.mxu1 %v6224_v51  ;;  %v6263_v51 = vld [vmem:[%s7815_s1 + $0x900] sm:$0xff]  }
 0x11b   :  { %5722 = vmatprep.subr.bf16.mxu1 %v6226_v53  ;;  %v1101_v53 = vrot.slane %v7353_v61, %v6532_v41 }
 0x11c   :  { %5701 = vmatpush3.bf16.msra.mxu0 %v6227_v55  ;;  %v6267_v55 = vld [vmem:[%s7815_s1 + $0xaf8] sm:$0xff]  }
 0x11d   :  { %5702 = vmatprep.subr.bf16.mxu0 %v6229_v59  ;;  %v6270_v59 = vld [vmem:[%s7815_s1 + $0xa70] sm:$0xff]  }
 0x11e   :  { %5723 = vmatpush3.bf16.msra.mxu1 %v6228_v58  ;;  %v1117_v58 = vcombine.high %v1101_v53, %v1101_v53 }
 0x11f   :  { %5724 = vmatprep.subr.bf16.mxu1 %v6230_v62  ;;  %v6272_v62 = vld [vmem:[%s7815_s1 + $0xa30] sm:$0xff]  }
 0x120   :  { %5703 = vmatpush3.bf16.msra.mxu0 %v6231_v63  ;;  %v6273_v63 = vld [vmem:[%s7815_s1 + $0xab0] sm:$0xff]  }
 0x121   :  { %5732 = vmatprep.subr.bf16.mxu0 %v6233_v5 }
 0x122   :  { %5725 = vmatpush3.bf16.msra.mxu1 %v6232_v2  ;;  %v6274_v2 = vld [vmem:[%s7815_s1 + $0xa68] sm:$0xff]  }
 0x123   :  { %v5440_v14 = vpop.f32.mrf.mxu0  ;;  %4414 = vmatmul.mubr.bf16.vlgmr.msra.gmra.mxu0 %v1094_v4  ;;  %5754 = vmatprep.subr.bf16.mxu1 %v6234_v6  ;;  %v6275_v4 = vld [vmem:[%s7815_s1 + $0xae8] sm:$0xff]  }
 0x124   :  { %5733 = vmatpush3.bf16.msra.mxu0 %v6235_v8  ;;  %4493 = vmatprep.mubr.bf16.mxu0 %v1115_v7  ;;  %v6276_v7 = vld [vmem:[%s7815_s1 + $0xa28] sm:$0xff]  }
 0x125   :  { %v5462_v17 = vpop.f32.mrf.mxu1  ;;  %4454 = vmatmul.mubr.bf16.vlgmr.msra.gmra.mxu1 %v1116_v10  ;;  %v5441_v18 = vpop.f32.mrf.mxu0  ;;  %5734 = vmatprep.subr.bf16.mxu0 %v6237_v11  ;;  %v6277_v10 = vld [vmem:[%s7815_s1 + $0xaa8] sm:$0xff]  }
 0x126   :  { %5755 = vmatpush3.bf16.msra.mxu1 %v6236_v9  ;;  %v5442_v20 = vadd.f32 %v5441_v18, %v5440_v14  ;;  %4533 = vmatprep.mubr.bf16.mxu1 %v1119_v13  ;;  %v6278_v13 = vld [vmem:[%s7815_s1 + $0xa60] sm:$0xff]  }
 0x127   :  { %v5463_v22 = vpop.f32.mrf.mxu1  ;;  %v5443_v23 = vpop.f32.mrf.mxu0  ;;  %5756 = vmatprep.subr.bf16.mxu1 %v6238_v12  ;;  %v6281_v18 = vld [vmem:[%s7815_s1 + $0xaa0] sm:$0xff]  }
 0x128   :  { %v3936_v25 = vadd.f32 %v5442_v20, %v7298_v38  ;;  %v5464_v26 = vadd.f32 %v5463_v22, %v5462_v17  ;;  %5735 = vmatpush3.bf16.msra.mxu0 %v6239_v15  ;;  %v6251_v38 = vld [vmem:[%s7815_s1 + $0x918] sm:$0xff]   ;;  %v6279_v15 = vld [vmem:[%s7815_s1 + $0xae0] sm:$0xff]   ;;  %v6286_v23 = vld [vmem:[%s7815_s1 + $0xa50] sm:$0xff]  }
 0x129   :  { %v5465_v28 = vpop.f32.mrf.mxu1  ;;  %v5444_v29 = vpop.f32.mrf.mxu0  ;;  %5736 = vmatprep.subr.bf16.mxu0 %v6241_v19  ;;  %v6280_v17 = vld [vmem:[%s7815_s1 + $0xa20] sm:$0xff]   ;;  %v6282_v19 = vld [vmem:[%s7815_s1 + $0xa58] sm:$0xff]  }
 0x12a   :  { %v7409_v31 = vadd.f32 %v5464_v26, %v3936_v25  ;;  %5757 = vmatpush3.bf16.msra.mxu1 %v6240_v16  ;;  %v6283_v20 = vld [vmem:[%s7815_s1 + $0xad8] sm:$0xff]   ;;  %v6288_v25 = vld [vmem:[%s7815_s1 + $0xa10] sm:$0xff]   ;;  %v6291_v28 = vld [vmem:[%s7815_s1 + $0xac8] sm:$0xff]  }
 0x12b   :  { %v5466_v33 = vpop.f32.mrf.mxu1  ;;  %5758 = vmatprep.subr.bf16.mxu1 %v6242_v21  ;;  %v6284_v21 = vld [vmem:[%s7815_s1 + $0xa18] sm:$0xff]   ;;  %v6289_v26 = vld [vmem:[%s7815_s1 + $0xa90] sm:$0xff]   ;;  %v6292_v29 = vld [vmem:[%s7815_s1 + $0xa08] sm:$0xff]  }
 0x12c   :  { %5737 = vmatpush3.bf16.msra.mxu0 %v6243_v24  ;;  %v6285_v22 = vld [vmem:[%s7815_s1 + $0xa98] sm:$0xff]   ;;  %v6287_v24 = vld [vmem:[%s7815_s1 + $0xad0] sm:$0xff]  }
 0x12d   :  { %5738 = vmatprep.subr.bf16.mxu0 %v6245_v30  ;;  %v27_v30 = vld [vmem:[%s7814_s0 + $0x28] sm:$0xff] }
 0x12e   :  { %5759 = vmatpush3.bf16.msra.mxu1 %v6244_v27  ;;  %v6290_v27 = vld [vmem:[%s7815_s1 + $0xa48] sm:$0xff]   ;;  %v1120_v33 = vcombine.high %v27_v30, %v27_v30 }
 0x12f   :  { %5760 = vmatprep.subr.bf16.mxu1 %v6246_v32  ;;  %v1127_v32 = vrot.slane %v27_v30, %v6532_v41  ;;  %v6332_v30 = vld [vmem:[%s7815_s1 + $0xcf8] sm:$0xff]  }
 0x130   :  { %5739 = vmatpush3.bf16.msra.mxu0 %v6247_v34  ;;  %v6294_v34 = vld [vmem:[%s7815_s1 + $0xa40] sm:$0xff]  }
 0x131   :  { %5740 = vmatprep.subr.bf16.mxu0 %v6249_v36  ;;  %v1135_v36 = vcombine.high %v1127_v32, %v1127_v32 }
 0x132   :  { %5761 = vmatpush3.bf16.msra.mxu1 %v6248_v35  ;;  %v6295_v35 = vld [vmem:[%s7815_s1 + $0xac0] sm:$0xff]  }
 0x133   :  { %5762 = vmatprep.subr.bf16.mxu1 %v6250_v37  ;;  %v7568_v37 = vrot.slane %v1120_v33, %v6532_v41 }
 0x134   :  { %5741 = vmatpush3.bf16.msra.mxu0 %v6251_v38  ;;  %v6296_v38 = vld [vmem:[%s7815_s1 + $0xa00] sm:$0xff]  }
 0x135   :  { %5742 = vmatprep.subr.bf16.mxu0 %v6253_v40  ;;  %v1157_v40 = vrot.slane %v1135_v36, %v6532_v41 }
 0x136   :  { %5763 = vmatpush3.bf16.msra.mxu1 %v6252_v39  ;;  %v6297_v39 = vld [vmem:[%s7815_s1 + $0xa80] sm:$0xff]  }
 0x137   :  { %5764 = vmatprep.subr.bf16.mxu1 %v6254_v42  ;;  %v1136_v42 = vcombine.high %v7568_v37, %v7568_v37 }
 0x138   :  { %5743 = vmatpush3.bf16.msra.mxu0 %v6255_v43  ;;  %v1143_v43 = vrot.slane %v1127_v32, %v6532_v41  ;;  %v6334_v32 = vld [vmem:[%s7815_s1 + $0xcb8] sm:$0xff]  }
 0x139   :  { %5744 = vmatprep.subr.bf16.mxu0 %v6257_v45  ;;  %v1167_v45 = vcombine.high %v1157_v40, %v1157_v40 }
 0x13a   :  { %5765 = vmatpush3.bf16.msra.mxu1 %v6256_v44  ;;  %v6298_v44 = vld [vmem:[%s7815_s1 + $0xb78] sm:$0xff]  }
 0x13b   :  { %5766 = vmatprep.subr.bf16.mxu1 %v6258_v46  ;;  %v6299_v46 = vld [vmem:[%s7815_s1 + $0xbf8] sm:$0xff]  }
 0x13c   :  { %5745 = vmatpush3.bf16.msra.mxu0 %v6259_v47  ;;  %v1164_v47 = vrot.slane %v1136_v42, %v6532_v41  ;;  %v6339_v42 = vld [vmem:[%s7815_s1 + $0xc68] sm:$0xff]  }
 0x13d   :  { %5746 = vmatprep.subr.bf16.mxu0 %v6261_v49  ;;  %v6301_v49 = vld [vmem:[%s7815_s1 + $0xbb8] sm:$0xff]  }
 0x13e   :  { %5767 = vmatpush3.bf16.msra.mxu1 %v6260_v48  ;;  %v6300_v48 = vld [vmem:[%s7815_s1 + $0xb38] sm:$0xff]  }
 0x13f   :  { %5768 = vmatprep.subr.bf16.mxu1 %v6262_v50  ;;  %v1165_v50 = vcombine.high %v1143_v43, %v1143_v43 }
 0x140   :  { %5747 = vmatpush3.bf16.msra.mxu0 %v6263_v51  ;;  %v6302_v51 = vld [vmem:[%s7815_s1 + $0xb70] sm:$0xff]  }
 0x141   :  { %5776 = vmatprep.subr.bf16.mxu0 %v6266_v54 }
 0x142   :  { %5769 = vmatpush3.bf16.msra.mxu1 %v6264_v52  ;;  %v6303_v52 = vld [vmem:[%s7815_s1 + $0xbf0] sm:$0xff]  }
 0x143   :  { %v5484_v61 = vpop.f32.mrf.mxu0  ;;  %4494 = vmatmul.mubr.bf16.vlgmr.msra.gmra.mxu0 %v1101_v53  ;;  %5798 = vmatprep.subr.bf16.mxu1 %v6267_v55  ;;  %v1168_v53 = vcombine.high %v1164_v47, %v1164_v47  ;;  %v6304_v55 = vld [vmem:[%s7815_s1 + $0xb30] sm:$0xff]  }
 0x144   :  { %5777 = vmatpush3.bf16.msra.mxu0 %v6268_v56  ;;  %4573 = vmatprep.mubr.bf16.mxu0 %v1157_v40  ;;  %v6305_v56 = vld [vmem:[%s7815_s1 + $0xbb0] sm:$0xff]  }
 0x145   :  { %v5506_v0 = vpop.f32.mrf.mxu1  ;;  %4534 = vmatmul.mubr.bf16.vlgmr.msra.gmra.mxu1 %v1117_v58  ;;  %v5485_v1 = vpop.f32.mrf.mxu0  ;;  %5778 = vmatprep.subr.bf16.mxu0 %v6270_v59  ;;  %v6306_v59 = vld [vmem:[%s7815_s1 + $0xb68] sm:$0xff]  }
 0x146   :  { %5799 = vmatpush3.bf16.msra.mxu1 %v6269_v57  ;;  %v5486_v3 = vadd.f32 %v5485_v1, %v5484_v61  ;;  %4613 = vmatprep.mubr.bf16.mxu1 %v1167_v45  ;;  %v6307_v61 = vld [vmem:[%s7815_s1 + $0xbe8] sm:$0xff]  }
 0x147   :  { %v5507_v5 = vpop.f32.mrf.mxu1  ;;  %v5487_v6 = vpop.f32.mrf.mxu0  ;;  %5800 = vmatprep.subr.bf16.mxu1 %v6271_v60 }
 0x148   :  { %v4016_v8 = vadd.f32 %v5486_v3, %v7409_v31  ;;  %v5508_v9 = vadd.f32 %v5507_v5, %v5506_v0  ;;  %5779 = vmatpush3.bf16.msra.mxu0 %v6272_v62  ;;  %v6293_v31 = vld [vmem:[%s7815_s1 + $0xa88] sm:$0xff]   ;;  %v6310_v6 = vld [vmem:[%s7815_s1 + $0xb60] sm:$0xff]  }
 0x149   :  { %v5509_v11 = vpop.f32.mrf.mxu1  ;;  %v5488_v12 = vpop.f32.mrf.mxu0  ;;  %5780 = vmatprep.subr.bf16.mxu0 %v6274_v2  ;;  %v6308_v0 = vld [vmem:[%s7815_s1 + $0xb28] sm:$0xff]  }
 0x14a   :  { %v7510_v14 = vadd.f32 %v5508_v9, %v4016_v8  ;;  %5801 = vmatpush3.bf16.msra.mxu1 %v6273_v63  ;;  %v6309_v3 = vld [vmem:[%s7815_s1 + $0xba8] sm:$0xff]   ;;  %v6311_v8 = vld [vmem:[%s7815_s1 + $0xbe0] sm:$0xff]   ;;  %v6314_v12 = vld [vmem:[%s7815_s1 + $0xb58] sm:$0xff]  }
 0x14b   :  { %v5510_v16 = vpop.f32.mrf.mxu1  ;;  %5802 = vmatprep.subr.bf16.mxu1 %v6275_v4  ;;  %v6313_v11 = vld [vmem:[%s7815_s1 + $0xba0] sm:$0xff]  }
 0x14c   :  { %5781 = vmatpush3.bf16.msra.mxu0 %v6276_v7  ;;  %v6318_v16 = vld [vmem:[%s7815_s1 + $0xb50] sm:$0xff]  }
 0x14d   :  { %5782 = vmatprep.subr.bf16.mxu0 %v6278_v13  ;;  %v6315_v13 = vld [vmem:[%s7815_s1 + $0xbd8] sm:$0xff]  }
 0x14e   :  { %5803 = vmatpush3.bf16.msra.mxu1 %v6277_v10  ;;  %v6312_v10 = vld [vmem:[%s7815_s1 + $0xb20] sm:$0xff]  }
 0x14f   :  { %5804 = vmatprep.subr.bf16.mxu1 %v6279_v15  ;;  %v6317_v15 = vld [vmem:[%s7815_s1 + $0xb98] sm:$0xff]  }
 0x150   :  { %5783 = vmatpush3.bf16.msra.mxu0 %v6280_v17  ;;  %v6319_v17 = vld [vmem:[%s7815_s1 + $0xbd0] sm:$0xff]  }
 0x151   :  { %5784 = vmatprep.subr.bf16.mxu0 %v6282_v19  ;;  %v6321_v19 = vld [vmem:[%s7815_s1 + $0xb90] sm:$0xff]  }
 0x152   :  { %5805 = vmatpush3.bf16.msra.mxu1 %v6281_v18  ;;  %v6320_v18 = vld [vmem:[%s7815_s1 + $0xb10] sm:$0xff]  }
 0x153   :  { %5806 = vmatprep.subr.bf16.mxu1 %v6283_v20  ;;  %v6322_v20 = vld [vmem:[%s7815_s1 + $0xb48] sm:$0xff]  }
 0x154   :  { %5785 = vmatpush3.bf16.msra.mxu0 %v6284_v21  ;;  %v6323_v21 = vld [vmem:[%s7815_s1 + $0xbc8] sm:$0xff]  }
 0x155   :  { %5786 = vmatprep.subr.bf16.mxu0 %v6286_v23  ;;  %v6325_v23 = vld [vmem:[%s7815_s1 + $0xb88] sm:$0xff]  }
 0x156   :  { %5807 = vmatpush3.bf16.msra.mxu1 %v6285_v22  ;;  %v6324_v22 = vld [vmem:[%s7815_s1 + $0xb08] sm:$0xff]  }
 0x157   :  { %5808 = vmatprep.subr.bf16.mxu1 %v6287_v24  ;;  %v6326_v24 = vld [vmem:[%s7815_s1 + $0xb40] sm:$0xff]  }
 0x158   :  { %5787 = vmatpush3.bf16.msra.mxu0 %v6288_v25  ;;  %v6327_v25 = vld [vmem:[%s7815_s1 + $0xbc0] sm:$0xff]  }
 0x159   :  { %5788 = vmatprep.subr.bf16.mxu0 %v6290_v27  ;;  %v6329_v27 = vld [vmem:[%s7815_s1 + $0xb80] sm:$0xff]  }
 0x15a   :  { %5809 = vmatpush3.bf16.msra.mxu1 %v6289_v26  ;;  %v6328_v26 = vld [vmem:[%s7815_s1 + $0xb00] sm:$0xff]  }
 0x15b   :  { %5810 = vmatprep.subr.bf16.mxu1 %v6291_v28  ;;  %v1150_v28 = vrot.slane %v7568_v37, %v6532_v41  ;;  %v6337_v37 = vld [vmem:[%s7815_s1 + $0xc30] sm:$0xff]  }
 0x15c   :  { %5789 = vmatpush3.bf16.msra.mxu0 %v6292_v29  ;;  %v6331_v29 = vld [vmem:[%s7815_s1 + $0xc78] sm:$0xff]  }
 0x15d   :  { %5790 = vmatprep.subr.bf16.mxu0 %v6294_v34  ;;  %v1166_v33 = vcombine.high %v1150_v28, %v1150_v28  ;;  %v6335_v34 = vld [vmem:[%s7815_s1 + $0xc70] sm:$0xff]  }
 0x15e   :  { %5811 = vmatpush3.bf16.msra.mxu1 %v6293_v31  ;;  %v6333_v31 = vld [vmem:[%s7815_s1 + $0xc38] sm:$0xff]  }
 0x15f   :  { %5812 = vmatprep.subr.bf16.mxu1 %v6295_v35  ;;  %v6336_v35 = vld [vmem:[%s7815_s1 + $0xcf0] sm:$0xff]  }
 0x160   :  { %5791 = vmatpush3.bf16.msra.mxu0 %v6296_v38  ;;  %v6338_v38 = vld [vmem:[%s7815_s1 + $0xcb0] sm:$0xff]  }
 0x161   :  { %5820 = vmatprep.subr.bf16.mxu0 %v6298_v44  ;;  %v6340_v44 = vld [vmem:[%s7815_s1 + $0xce8] sm:$0xff]  }
 0x162   :  { %5813 = vmatpush3.bf16.msra.mxu1 %v6297_v39 }
 0x163   :  { %v5528_v54 = vpop.f32.mrf.mxu0  ;;  %4574 = vmatmul.mubr.bf16.vlgmr.msra.gmra.mxu0 %v1143_v43  ;;  %5842 = vmatprep.subr.bf16.mxu1 %v6299_v46 }
 0x164   :  { %5821 = vmatpush3.bf16.msra.mxu0 %v6300_v48  ;;  %4653 = vmatprep.mubr.bf16.mxu0 %v1164_v47  ;;  %v6341_v47 = vld [vmem:[%s7815_s1 + $0xc28] sm:$0xff]  }
 0x165   :  { %v5550_v57 = vpop.f32.mrf.mxu1  ;;  %4614 = vmatmul.mubr.bf16.vlgmr.msra.gmra.mxu1 %v1165_v50  ;;  %v5529_v58 = vpop.f32.mrf.mxu0  ;;  %5822 = vmatprep.subr.bf16.mxu0 %v6302_v51  ;;  %v6342_v50 = vld [vmem:[%s7815_s1 + $0xca8] sm:$0xff]  }
 0x166   :  { %5843 = vmatpush3.bf16.msra.mxu1 %v6301_v49  ;;  %v5530_v60 = vadd.f32 %v5529_v58, %v5528_v54  ;;  %4693 = vmatprep.mubr.bf16.mxu1 %v1168_v53  ;;  %v6343_v53 = vld [vmem:[%s7815_s1 + $0xc60] sm:$0xff]  }
 0x167   :  { %v5551_v62 = vpop.f32.mrf.mxu1  ;;  %v5531_v63 = vpop.f32.mrf.mxu0  ;;  %5844 = vmatprep.subr.bf16.mxu1 %v6303_v52  ;;  %v6346_v58 = vld [vmem:[%s7815_s1 + $0xca0] sm:$0xff]  }
 0x168   :  { %v4096_v1 = vadd.f32 %v5530_v60, %v7510_v14  ;;  %v5552_v2 = vadd.f32 %v5551_v62, %v5550_v57  ;;  %5823 = vmatpush3.bf16.msra.mxu0 %v6304_v55  ;;  %v6316_v14 = vld [vmem:[%s7815_s1 + $0xb18] sm:$0xff]   ;;  %v6344_v55 = vld [vmem:[%s7815_s1 + $0xce0] sm:$0xff]   ;;  %v6351_v63 = vld [vmem:[%s7815_s1 + $0xc50] sm:$0xff]  }
 0x169   :  { %v5553_v4 = vpop.f32.mrf.mxu1  ;;  %v5532_v5 = vpop.f32.mrf.mxu0  ;;  %5824 = vmatprep.subr.bf16.mxu0 %v6306_v59  ;;  %v6345_v57 = vld [vmem:[%s7815_s1 + $0xc20] sm:$0xff]   ;;  %v6347_v59 = vld [vmem:[%s7815_s1 + $0xc58] sm:$0xff]  }
 0x16a   :  { %v7621_v7 = vadd.f32 %v5552_v2, %v4096_v1  ;;  %5845 = vmatpush3.bf16.msra.mxu1 %v6305_v56  ;;  %v6348_v60 = vld [vmem:[%s7815_s1 + $0xcd8] sm:$0xff]   ;;  %v6353_v1 = vld [vmem:[%s7815_s1 + $0xc10] sm:$0xff]   ;;  %v6356_v4 = vld [vmem:[%s7815_s1 + $0xcc8] sm:$0xff]  }
 0x16b   :  { %v5554_v9 = vpop.f32.mrf.mxu1  ;;  %5846 = vmatprep.subr.bf16.mxu1 %v6307_v61  ;;  %v6349_v61 = vld [vmem:[%s7815_s1 + $0xc18] sm:$0xff]   ;;  %v6354_v2 = vld [vmem:[%s7815_s1 + $0xc90] sm:$0xff]   ;;  %v6357_v5 = vld [vmem:[%s7815_s1 + $0xc08] sm:$0xff]  }
 0x16c   :  { %5825 = vmatpush3.bf16.msra.mxu0 %v6308_v0  ;;  %v6350_v62 = vld [vmem:[%s7815_s1 + $0xc98] sm:$0xff]   ;;  %v6352_v0 = vld [vmem:[%s7815_s1 + $0xcd0] sm:$0xff]  }
 0x16d   :  { %5826 = vmatprep.subr.bf16.mxu0 %v6310_v6  ;;  %v6359_v6 = vld [vmem:[%s7815_s1 + $0xc40] sm:$0xff]  }
 0x16e   :  { %5847 = vmatpush3.bf16.msra.mxu1 %v6309_v3  ;;  %v6355_v3 = vld [vmem:[%s7815_s1 + $0xc48] sm:$0xff]  }
 0x16f   :  { %5848 = vmatprep.subr.bf16.mxu1 %v6311_v8  ;;  %v6358_v8 = vld [vmem:[%s7815_s1 + $0xc88] sm:$0xff]  }
 0x170   :  { %5827 = vmatpush3.bf16.msra.mxu0 %v6312_v10  ;;  %v6360_v10 = vld [vmem:[%s7815_s1 + $0xcc0] sm:$0xff]  }
 0x171   :  { %5828 = vmatprep.subr.bf16.mxu0 %v6314_v12 }
 0x172   :  { %5849 = vmatpush3.bf16.msra.mxu1 %v6313_v11  ;;  %v6361_v11 = vld [vmem:[%s7815_s1 + $0xc00] sm:$0xff]  }
 0x173   :  { %5850 = vmatprep.subr.bf16.mxu1 %v6315_v13 }
 0x174   :  { %5829 = vmatpush3.bf16.msra.mxu0 %v6316_v14 }
 0x175   :  { %5830 = vmatprep.subr.bf16.mxu0 %v6318_v16 }
 0x176   :  { %5851 = vmatpush3.bf16.msra.mxu1 %v6317_v15 }
 0x177   :  { %5852 = vmatprep.subr.bf16.mxu1 %v6319_v17 }
 0x178   :  { %5831 = vmatpush3.bf16.msra.mxu0 %v6320_v18 }
 0x179   :  { %5832 = vmatprep.subr.bf16.mxu0 %v6322_v20 }
 0x17a   :  { %5853 = vmatpush3.bf16.msra.mxu1 %v6321_v19 }
 0x17b   :  { %5854 = vmatprep.subr.bf16.mxu1 %v6323_v21 }
 0x17c   :  { %5833 = vmatpush3.bf16.msra.mxu0 %v6324_v22 }
 0x17d   :  { %5834 = vmatprep.subr.bf16.mxu0 %v6326_v24 }
 0x17e   :  { %5855 = vmatpush3.bf16.msra.mxu1 %v6325_v23 }
 0x17f   :  { %5856 = vmatprep.subr.bf16.mxu1 %v6327_v25 }
 0x180   :  { %5835 = vmatpush3.bf16.msra.mxu0 %v6328_v26 }
 0x181   :  { %5864 = vmatprep.subr.bf16.mxu0 %v6331_v29 }
 0x182   :  { %5857 = vmatpush3.bf16.msra.mxu1 %v6329_v27 }
 0x183   :  { %v5572_v36 = vpop.f32.mrf.mxu0  ;;  %4654 = vmatmul.mubr.bf16.vlgmr.msra.gmra.mxu0 %v1150_v28  ;;  %5886 = vmatprep.subr.bf16.mxu1 %v6332_v30 }
 0x184   :  { %5865 = vmatpush3.bf16.msra.mxu0 %v6333_v31 }
 0x185   :  { %v5594_v39 = vpop.f32.mrf.mxu1  ;;  %4694 = vmatmul.mubr.bf16.vlgmr.msra.gmra.mxu1 %v1166_v33  ;;  %v5573_v40 = vpop.f32.mrf.mxu0  ;;  %5866 = vmatprep.subr.bf16.mxu0 %v6335_v34 }
 0x186   :  { %5887 = vmatpush3.bf16.msra.mxu1 %v6334_v32  ;;  %v5574_v43 = vadd.f32 %v5573_v40, %v5572_v36 }
 0x187   :  { %v5595_v45 = vpop.f32.mrf.mxu1  ;;  %v5575_v46 = vpop.f32.mrf.mxu0  ;;  %5888 = vmatprep.subr.bf16.mxu1 %v6336_v35 }
 0x188   :  { %v4176_v48 = vadd.f32 %v5574_v43, %v7621_v7  ;;  %v5596_v49 = vadd.f32 %v5595_v45, %v5594_v39  ;;  %5867 = vmatpush3.bf16.msra.mxu0 %v6337_v37  ;;  %v4910_v7 = vld.sshfl [vmem:[%s7814_s0 + $0x30] sm:$0x33 pattern:$0x75316420] }
 0x189   :  { %v5597_v51 = vpop.f32.mrf.mxu1  ;;  %v5576_v52 = vpop.f32.mrf.mxu0  ;;  %5868 = vmatprep.subr.bf16.mxu0 %v6339_v42  ;;  %v1176_v9 = vcombine.high %v4910_v7, %v4910_v7  ;;  %v1183_v14 = vrot.slane %v4910_v7, %v6532_v41 }
 0x18a   :  { %v4216_v54 = vadd.f32 %v5596_v49, %v4176_v48  ;;  %5889 = vmatpush3.bf16.msra.mxu1 %v6338_v38 }
 0x18b   :  { %v5598_v56 = vpop.f32.mrf.mxu1  ;;  %5890 = vmatprep.subr.bf16.mxu1 %v6340_v44  ;;  %v1190_v12 = vrot.slane %v1176_v9, %v6532_v41 }
 0x18c   :  { %5869 = vmatpush3.bf16.msra.mxu0 %v6341_v47 }
 0x18d   :  { %5870 = vmatprep.subr.bf16.mxu0 %v6343_v53  ;;  %4733 = vmatprep.mubr.bf16.mxu0 %v1190_v12  ;;  %v1192_v13 = vcombine.high %v1190_v12, %v1190_v12 }
 0x18e   :  { %5891 = vmatpush3.bf16.msra.mxu1 %v6342_v50 }
 0x18f   :  { %5892 = vmatprep.subr.bf16.mxu1 %v6344_v55 }
 0x190   :  { %5871 = vmatpush3.bf16.msra.mxu0 %v6345_v57 }
 0x191   :  { %5872 = vmatprep.subr.bf16.mxu0 %v6347_v59 }
 0x192   :  { %5893 = vmatpush3.bf16.msra.mxu1 %v6346_v58 }
 0x193   :  { %5894 = vmatprep.subr.bf16.mxu1 %v6348_v60 }
 0x194   :  { %5873 = vmatpush3.bf16.msra.mxu0 %v6349_v61 }
 0x195   :  { %5874 = vmatprep.subr.bf16.mxu0 %v6351_v63 }
 0x196   :  { %5895 = vmatpush3.bf16.msra.mxu1 %v6350_v62 }
 0x197   :  { %5896 = vmatprep.subr.bf16.mxu1 %v6352_v0 }
 0x198   :  { %5875 = vmatpush3.bf16.msra.mxu0 %v6353_v1 }
 0x199   :  { %5876 = vmatprep.subr.bf16.mxu0 %v6355_v3 }
 0x19a   :  { %5897 = vmatpush3.bf16.msra.mxu1 %v6354_v2 }
 0x19b   :  { %5898 = vmatprep.subr.bf16.mxu1 %v6356_v4 }
 0x19c   :  { %5877 = vmatpush3.bf16.msra.mxu0 %v6357_v5 }
 0x19d   :  { %5878 = vmatprep.subr.bf16.mxu0 %v6359_v6 }
 0x19e   :  { %10 = vsyncpa [#allocation3], 0  ;;  %5899 = vmatpush3.bf16.msra.mxu1 %v6358_v8  ;;  %v6362_v15 = vld [vmem:[%s7815_s1 + $0xc80] sm:$0xff]   ;;  %4773 = vmatprep.mubr.bf16.mxu1 %v1192_v13  ;;  %v1191_v16 = vcombine.high %v1183_v14, %v1183_v14  ;;  %v6363_v40 = vld [vmem:[%s7817_s3 + $0x38] sm:$0xff]   ;;  %v6394_v42 = vmov 0.0   ;;  %vm6395_vm0 = vmmov 0  }
 0x19f   :  { %5900 = vmatprep.subr.bf16.mxu1 %v6360_v10  ;;  %v6364_v43 = vld [vmem:[%s7817_s3 + $0x30] sm:$0xff]   ;;  %v6365_v44 = vld [vmem:[%s7817_s3 + $0x28] sm:$0xff]   ;;  %v6366_v45 = vld [vmem:[%s7817_s3 + $0x20] sm:$0xff]   ;;  %s6396_s16 = smov [#allocation2]  }
 0x1a0   :  { %5879 = vmatpush3.bf16.msra.mxu0 %v6361_v11  ;;  %v6367_v46 = vld [vmem:[%s7817_s3 + $0x18] sm:$0xff]   ;;  %v6368_v50 = vld [vmem:[%s7817_s3 + $0x10] sm:$0xff]   ;;  %v6369_v58 = vld [vmem:[%s7817_s3 + $0x8] sm:$0xff]   ;;  %s4901_s17 = sshll.u32 %s6396_s16, 4  ;;  %s4902_s17 = int_to_ptr.vmem [resolvable:$true] %s4901_s17 }
 0x1a1   :  { %5917 = vmatprep.subr.bf16.mxu0 %v6394_v42  ;;  %v6370_v61 = vld [vmem:[%s7817_s3] sm:$0xff]   ;;  %s6371_s18 = scalar_lea.vmem %s4902_s17, 32  ;;  %p6376_p1 = scmp.lt.s32.totalorder %s4902_s17, %s4902_s17 }
 0x1a2   :  { %5901 = vmatpush3.bf16.msra.mxu1 %v6362_v15  ;;  %p6372_p0 = scmp.ne.s32.totalorder %s4902_s17, %s6371_s18  ;;  %p6377_p2 = scmp.lt.s32.totalorder %s6371_s18, %s6371_s18 }
 0x1a3   :  { %v5616_v17 = vpop.f32.mrf.mxu0  ;;  %4734 = vmatmul.mubr.bf16.vlgmr.msra.gmra.mxu0 %v1183_v14 }
 0x1a4   :  { %5918 = vmatpush3.bf16.msra.mxu0 %v6363_v40  ;;  %5933 = vmatprep.mubr.msk.bf16.mxu0 %vm6395_vm0, %v6394_v42  ;;  %p6378_p3 = por %p6377_p2, %p6376_p1 }
 0x1a5   :  { %v5638_v18 = vpop.f32.mrf.mxu1  ;;  %4774 = vmatmul.mubr.bf16.vlgmr.msra.gmra.mxu1 %v1191_v16  ;;  %v5617_v19 = vpop.f32.mrf.mxu0  ;;  %5919 = vmatprep.subr.bf16.mxu0 %v6394_v42 }
 0x1a6   :  { %v5618_v20 = vadd.f32 %v5617_v19, %v5616_v17  ;;  %p6379_p4 = pnand %p6378_p3, %p6372_p0 }
 0x1a7   :  { %v5639_v21 = vpop.f32.mrf.mxu1  ;;  %v5619_v22 = vpop.f32.mrf.mxu0 }
 0x1a8   :  { %v4256_v41 = vadd.f32 %v5618_v20, %v4216_v54  ;;  %v5640_v23 = vadd.f32 %v5639_v21, %v5638_v18  ;;  %5920 = vmatpush3.bf16.msra.mxu0 %v6364_v43 }
 0x1a9   :  { %v5641_v24 = vpop.f32.mrf.mxu1  ;;  %v5620_v25 = vpop.f32.mrf.mxu0  ;;  %5921 = vmatprep.subr.bf16.mxu0 %v6394_v42 }
 0x1aa   :  { %v4296_v26 = vadd.f32 %v5640_v23, %v4256_v41 }
 0x1ab   :  { %v5642_v27 = vpop.f32.mrf.mxu1 }
 0x1ac   :  { %5922 = vmatpush3.bf16.msra.mxu0 %v6365_v44 }
 0x1ad   :  { %5923 = vmatprep.subr.bf16.mxu0 %v6394_v42 }
 0x1b0   :  { %5924 = vmatpush3.bf16.msra.mxu0 %v6366_v45 }
 0x1b1   :  { %5925 = vmatprep.subr.bf16.mxu0 %v6394_v42 }
 0x1b4   :  { %5926 = vmatpush3.bf16.msra.mxu0 %v6367_v46 }
 0x1b5   :  { %5927 = vmatprep.subr.bf16.mxu0 %v6394_v42 }
 0x1b8   :  { %5928 = vmatpush3.bf16.msra.mxu0 %v6368_v50 }
 0x1b9   :  { %5929 = vmatprep.subr.bf16.mxu0 %v6394_v42 }
 0x1bc   :  { %5930 = vmatpush3.bf16.msra.mxu0 %v6369_v58 }
 0x1bd   :  { %5931 = vmatprep.subr.bf16.mxu0 %v6394_v42 }
 0x1c0   :  { %5932 = vmatpush3.bf16.msra.mxu0 %v6370_v61 }
 0x1c3   :  { %v5660_v28 = vpop.f32.mrf.mxu0 }
 0x1c5   :  { %v5682_v29 = vpop.f32.mrf.mxu1  ;;  %v5661_v30 = vpop.f32.mrf.mxu0 }
 0x1c6   :  { %v5662_v31 = vadd.f32 %v5661_v30, %v5660_v28 }
 0x1c7   :  { %v5683_v32 = vpop.f32.mrf.mxu1  ;;  %v5663_v33 = vpop.f32.mrf.mxu0 }
 0x1c8   :  { %v4336_v34 = vadd.f32 %v5662_v31, %v4296_v26  ;;  %v5684_v35 = vadd.f32 %v5683_v32, %v5682_v29 }
 0x1c9   :  { %v5685_v36 = vpop.f32.mrf.mxu1  ;;  %v5664_v37 = vpop.f32.mrf.mxu0 }
 0x1ca   :  { %v4376_v38 = vadd.f32 %v5684_v35, %v4336_v34 }
 0x1cb   :  { %v5686_v39 = vpop.f32.mrf.mxu1 }
 0x1e3   :  { %v5704_v47 = vpop.f32.mrf.mxu0 }
 0x1e5   :  { %v5726_v48 = vpop.f32.mrf.mxu1  ;;  %v5705_v49 = vpop.f32.mrf.mxu0 }
 0x1e6   :  { %v5706_v51 = vadd.f32 %v5705_v49, %v5704_v47 }
 0x1e7   :  { %v5727_v52 = vpop.f32.mrf.mxu1  ;;  %v5707_v53 = vpop.f32.mrf.mxu0 }
 0x1e8   :  { %v4416_v54 = vadd.f32 %v5706_v51, %v4376_v38  ;;  %v5728_v55 = vadd.f32 %v5727_v52, %v5726_v48  ;;  %v5327_v48 = vld [vmem:[%s7818_s4] ss:$0 sm:$0xff] }
 0x1e9   :  { %v5729_v56 = vpop.f32.mrf.mxu1  ;;  %v5708_v57 = vpop.f32.mrf.mxu0 }
 0x1ea   :  { %v4456_v59 = vadd.f32 %v5728_v55, %v4416_v54 }
 0x1eb   :  { %v5730_v60 = vpop.f32.mrf.mxu1 }
 0x203   :  { %v5748_v62 = vpop.f32.mrf.mxu0 }
 0x205   :  { %v5770_v63 = vpop.f32.mrf.mxu1  ;;  %v5749_v0 = vpop.f32.mrf.mxu0 }
 0x206   :  { %v5750_v1 = vadd.f32 %v5749_v0, %v5748_v62 }
 0x207   :  { %v5771_v2 = vpop.f32.mrf.mxu1  ;;  %v5751_v3 = vpop.f32.mrf.mxu0 }
 0x208   :  { %v4496_v4 = vadd.f32 %v5750_v1, %v4456_v59  ;;  %v5772_v5 = vadd.f32 %v5771_v2, %v5770_v63 }
 0x209   :  { %v5773_v6 = vpop.f32.mrf.mxu1  ;;  %v5752_v7 = vpop.f32.mrf.mxu0 }
 0x20a   :  { %v4536_v8 = vadd.f32 %v5772_v5, %v4496_v4 }
 0x20b   :  { %v5774_v9 = vpop.f32.mrf.mxu1 }
 0x223   :  { %v5792_v10 = vpop.f32.mrf.mxu0 }
 0x225   :  { %v5814_v11 = vpop.f32.mrf.mxu1  ;;  %v5793_v12 = vpop.f32.mrf.mxu0 }
 0x226   :  { %v5794_v25 = vadd.f32 %v5793_v12, %v5792_v10 }
 0x227   :  { %v5815_v13 = vpop.f32.mrf.mxu1  ;;  %v5795_v14 = vpop.f32.mrf.mxu0 }
 0x228   :  { %v4576_v26 = vadd.f32 %v5794_v25, %v4536_v8  ;;  %v5816_v27 = vadd.f32 %v5815_v13, %v5814_v11 }
 0x229   :  { %v5817_v15 = vpop.f32.mrf.mxu1  ;;  %v5796_v16 = vpop.f32.mrf.mxu0 }
 0x22a   :  { %v4616_v29 = vadd.f32 %v5816_v27, %v4576_v26 }
 0x22b   :  { %v5818_v17 = vpop.f32.mrf.mxu1 }
 0x243   :  { %v5836_v18 = vpop.f32.mrf.mxu0 }
 0x245   :  { %v5858_v19 = vpop.f32.mrf.mxu1  ;;  %v5837_v20 = vpop.f32.mrf.mxu0 }
 0x246   :  { %v5838_v28 = vadd.f32 %v5837_v20, %v5836_v18 }
 0x247   :  { %v5859_v21 = vpop.f32.mrf.mxu1  ;;  %v5839_v22 = vpop.f32.mrf.mxu0 }
 0x248   :  { %v4656_v30 = vadd.f32 %v5838_v28, %v4616_v29  ;;  %v5860_v31 = vadd.f32 %v5859_v21, %v5858_v19 }
 0x249   :  { %v5861_v41 = vpop.f32.mrf.mxu1  ;;  %v5840_v23 = vpop.f32.mrf.mxu0 }
 0x24a   :  { %v4696_v35 = vadd.f32 %v5860_v31, %v4656_v30 }
 0x24b   :  { %v5862_v24 = vpop.f32.mrf.mxu1 }
 0x263   :  { %v5880_v32 = vpop.f32.mrf.mxu0 }
 0x265   :  { %v5902_v33 = vpop.f32.mrf.mxu1  ;;  %v5881_v34 = vpop.f32.mrf.mxu0 }
 0x266   :  { %v5882_v36 = vadd.f32 %v5881_v34, %v5880_v32 }
 0x267   :  { %v5903_v37 = vpop.f32.mrf.mxu1  ;;  %v5883_v38 = vpop.f32.mrf.mxu0 }
 0x268   :  { %v4736_v39 = vadd.f32 %v5882_v36, %v4696_v35  ;;  %v5904_v40 = vadd.f32 %v5903_v37, %v5902_v33 }
 0x269   :  { %v5905_v42 = vpop.f32.mrf.mxu1  ;;  %v5884_v43 = vpop.f32.mrf.mxu0 }
 0x26a   :  { %v4776_v44 = vadd.f32 %v5904_v40, %v4736_v39 }
 0x26b   :  { %v5906_v45 = vpop.f32.mrf.mxu1 }
 0x26c   :  { %v4781_v46 = vmax.f32 %v4776_v44, 0.0 }
 0x26e   :  { %v4782_v47 = vpack.c.bf16 %v4781_v46, %v4781_v46 }
 0x270   :  { %5934 = vmatmul.mubr.bf16.vlgmr.msra.gmra.mxu0 %v4782_v47 }
 0x330   :  { %v4888_v49 = vpop.f32.mrf.mxu0 }
 0x331   :  { %v4889_v50 = vadd.f32 %v5327_v48, %v4888_v49 }
 0x332   :  { %v5935_v51 = vpop.f32.mrf.mxu0 }
 0x333   :  { %4894 = vst [vmem:[#allocation2] sm:$0x3] %v4889_v50 }
 0x334   :  { %v4891_v52 = vpop.f32.mrf.mxu0 }
 0x335   :  { %6382 = shalt.err (!%p6379_p4)
}
 0x336   :  { %4904 = dma.vmem_to_hbm [thread:$0]  %s4902_s17, 32, %s7819_s5, [#allocation3]   ;;  %v5936_v53 = vpop.f32.mrf.mxu0 }
 0x337   :  { %6391 = dma.done.wait [#allocation3], 32  }
 0x338   :  { %6392 = vsyncadd [#allocation3], 4294967264 }
 0x339   :  { %4908 = vsyncpa [#allocation3], 1 }

// kernel: cnn_forward.2
= control target key start
LH: loop header
LB: loop body
LE: loop exit
PB: predicated region body
PF: predicated region fallthrough
CT: control target
= control target key end

     0   :  { %s7002_s18 = smov 0   ;;  %s13865_s0 = inlined_call_operand.vmem [shape: f32[2,1024,1], index: 0, kind: input, shape index: {}]   ;;  %s13866_s1 = inlined_call_operand.vmem [shape: f32[9,32], index: 1, kind: input, shape index: {}]   ;;  %s13867_s2 = inlined_call_operand.vmem [shape: f32[1,32], index: 2, kind: input, shape index: {}]   ;;  %s13868_s3 = inlined_call_operand.vmem [shape: bf16[288,64], index: 3, kind: input, shape index: {}]   ;;  %s13869_s4 = inlined_call_operand.vmem [shape: f32[1,64], index: 4, kind: input, shape index: {}]   ;;  %s13870_s5 = inlined_call_operand.vmem [shape: bf16[2,104,64], index: 5, kind: output, shape index: {}]  }
   0x1 LB: > { %s6511_s19 = sadd.s32 4294967295, %s6963_s18   ;;  %p6515_p0 = scmp.ge.s32.totalorder %s6963_s18, 1  ;;  %s6963_s18 = sphi %s7002_s18, %s15_s18  }
   0x2   : > { %p187_p1 = scmp.lt.s32.totalorder %s6963_s18, 3 }
   0x4   : > { %p188_p2 = pnand %p6515_p0, %p187_p1 }
   0x6   : > { %191 = sbr.rel (%p188_p2) target bundleno = 1371 (0x55b), region = 40 }
   0xb   : > { %p215_p3 = scmp.lt.s32.totalorder %s6511_s19, 1  ;;  %v13871_v0 = vmov 0   ;;  %vm4719_vm0 = vcmask 257024   ;;  %vm6968_vm12 = vmmov 0   ;;  %s6969_s15 = smov 32  }
   0xc   : > { %6894 = vset.pattern.permute.xlu1 %v13871_v0  ;;  %6893 = vset.pattern.permute.xlu0 %v13871_v0  ;;  %vm4866_vm14 = vsmask.f32 256  ;;  %vm4867_vm15 = vsmask.f32 4368  ;;  %s6970_s30 = smov 64   ;;  %s6971_s6 = smov 96  }
   0xd   : > { %s15393_s19 = smov (!%p215_p3, %s6511_s19), 1 }
   0xe   : > { %s6633_s20 = sshll.u32 %s15393_s19, 10  ;;  %s6877_s17 = smul.u32 52, %s15393_s19 }
   0xf   : > { %s7018_s23 = scalar_lea.vmem %s13865_s0, %s6633_s20 }
  0x10   : > { %v7021_v1 = vld [vmem:[%s7018_s23 + $0x10] sm:$0xff]  ;;  %v477_v2 = vld [vmem:[%s7018_s23] sm:$0xff]  ;;  %v7026_v3 = vld [vmem:[%s7018_s23 + $0x18] sm:$0xff]  ;;  %s13796_s22 = scalar_lea.vmem %s13870_s5, %s6877_s17 }
  0x11   : > { %503 = vperm.xlu1 %6894, %v7021_v1   ;;  %493 = vperm.xlu0 %6893, %v477_v2   ;;  %v7029_v4 = vld [vmem:[%s7018_s23 + $0x8] sm:$0xff]  ;;  %v7037_v6 = vld [vmem:[%s7018_s23 + $0x20] sm:$0xff]  ;;  %v7042_v7 = vld [vmem:[%s7018_s23 + $0x38] sm:$0xff] }
  0x12   : > { %v7034_v5 = vld [vmem:[%s7018_s23 + $0x28] sm:$0xff]  ;;  %v7045_v8 = vld [vmem:[%s7018_s23 + $0x30] sm:$0xff]  ;;  %v7053_v10 = vld [vmem:[%s7018_s23 + $0x40] sm:$0xff] }
  0x13   : > { %v7050_v9 = vld [vmem:[%s7018_s23 + $0x48] sm:$0xff]  ;;  %v7058_v11 = vld [vmem:[%s7018_s23 + $0x58] sm:$0xff]  ;;  %v7061_v12 = vld [vmem:[%s7018_s23 + $0x50] sm:$0xff] }
  0x14   : > { %v7066_v13 = vld [vmem:[%s7018_s23 + $0x68] sm:$0xff]  ;;  %v7069_v14 = vld [vmem:[%s7018_s23 + $0x60] sm:$0xff]  ;;  %v7079_v17 = vld [vmem:[%s7018_s23 + $0x98] sm:$0xff] }
  0x15   : > { %508 = vperm.xlu1 %6894, %v7026_v3   ;;  %498 = vperm.xlu0 %6893, %v7029_v4   ;;  %v7074_v15 = vld [vmem:[%s7018_s23 + $0x88] sm:$0xff]  ;;  %v593_v16 = vld [vmem:[%s7018_s23 + $0x80] sm:$0xff]  ;;  %v7082_v18 = vld [vmem:[%s7018_s23 + $0x90] sm:$0xff] }
  0x16   : > { %v7087_v19 = vld [vmem:[%s7018_s23 + $0xa8] sm:$0xff]  ;;  %v7090_v20 = vld [vmem:[%s7018_s23 + $0xa0] sm:$0xff]  ;;  %v7095_v21 = vld [vmem:[%s7018_s23 + $0xb8] sm:$0xff] }
  0x17   : > { %v7098_v22 = vld [vmem:[%s7018_s23 + $0xb0] sm:$0xff]  ;;  %v7103_v23 = vld [vmem:[%s7018_s23 + $0xc8] sm:$0xff]  ;;  %v7106_v24 = vld [vmem:[%s7018_s23 + $0xc0] sm:$0xff] }
  0x18   : > { %v7111_v25 = vld [vmem:[%s7018_s23 + $0xd8] sm:$0xff]  ;;  %v7114_v26 = vld [vmem:[%s7018_s23 + $0xd0] sm:$0xff]  ;;  %v7119_v27 = vld [vmem:[%s7018_s23 + $0xe8] sm:$0xff] }
  0x19   : > { %518 = vperm.xlu1 %6894, %v7034_v5   ;;  %513 = vperm.xlu0 %6893, %v7037_v6   ;;  %v7122_v28 = vld [vmem:[%s7018_s23 + $0xe0] sm:$0xff]  ;;  %v7127_v29 = vld [vmem:[%s7018_s23 + $0x108] sm:$0xff]  ;;  %v7132_v31 = vld [vmem:[%s7018_s23 + $0x118] sm:$0xff] }
  0x1a   : > { %v709_v30 = vld [vmem:[%s7018_s23 + $0x100] sm:$0xff]  ;;  %v7135_v32 = vld [vmem:[%s7018_s23 + $0x110] sm:$0xff]  ;;  %v7140_v33 = vld [vmem:[%s7018_s23 + $0x128] sm:$0xff] }
  0x1b   : > { %v7143_v34 = vld [vmem:[%s7018_s23 + $0x120] sm:$0xff]  ;;  %v7148_v35 = vld [vmem:[%s7018_s23 + $0x138] sm:$0xff]  ;;  %v7151_v36 = vld [vmem:[%s7018_s23 + $0x130] sm:$0xff] }
  0x1c   : > { %v7156_v37 = vld [vmem:[%s7018_s23 + $0x148] sm:$0xff]  ;;  %v7159_v38 = vld [vmem:[%s7018_s23 + $0x140] sm:$0xff]  ;;  %v7164_v39 = vld [vmem:[%s7018_s23 + $0x158] sm:$0xff] }
  0x1d   : > { %528 = vperm.xlu1 %6894, %v7042_v7   ;;  %523 = vperm.xlu0 %6893, %v7045_v8   ;;  %14072 = vst [vmem:[#allocation4_spill] sm:$0xff] %v7164_v39  ;;  %v7167_v40 = vld [vmem:[%s7018_s23 + $0x150] sm:$0xff]  ;;  %v7172_v41 = vld [vmem:[%s7018_s23 + $0x168] sm:$0xff]  ;;  %v7175_v42 = vld [vmem:[%s7018_s23 + $0x160] sm:$0xff] }
  0x1e   : > { %14073 = vst [vmem:[#allocation5_spill] sm:$0xff] %v7172_v41  ;;  %14074 = vst [vmem:[#allocation6_spill] sm:$0xff] %v7175_v42  ;;  %v826_v43 = vld [vmem:[%s7018_s23 + $0x208] sm:$0xff]  ;;  %v825_v44 = vld [vmem:[%s7018_s23 + $0x200] sm:$0xff] }
  0x1f   : > { %v828_v45 = vld [vmem:[%s7018_s23 + $0x218] sm:$0xff]  ;;  %v827_v46 = vld [vmem:[%s7018_s23 + $0x210] sm:$0xff]  ;;  %v830_v47 = vld [vmem:[%s7018_s23 + $0x228] sm:$0xff] }
  0x20   : > { %v829_v48 = vld [vmem:[%s7018_s23 + $0x220] sm:$0xff]  ;;  %v832_v49 = vld [vmem:[%s7018_s23 + $0x238] sm:$0xff]  ;;  %v831_v50 = vld [vmem:[%s7018_s23 + $0x230] sm:$0xff] }
  0x21   : > { %538 = vperm.xlu1 %6894, %v7050_v9   ;;  %533 = vperm.xlu0 %6893, %v7053_v10   ;;  %v834_v51 = vld [vmem:[%s7018_s23 + $0x248] sm:$0xff]  ;;  %v833_v52 = vld [vmem:[%s7018_s23 + $0x240] sm:$0xff]  ;;  %v836_v53 = vld [vmem:[%s7018_s23 + $0x258] sm:$0xff] }
  0x22   : > { %v835_v54 = vld [vmem:[%s7018_s23 + $0x250] sm:$0xff]  ;;  %v838_v55 = vld [vmem:[%s7018_s23 + $0x268] sm:$0xff]  ;;  %v837_v56 = vld [vmem:[%s7018_s23 + $0x260] sm:$0xff] }
  0x23   : > { %v942_v57 = vld [vmem:[%s7018_s23 + $0x288] sm:$0xff]  ;;  %v941_v58 = vld [vmem:[%s7018_s23 + $0x280] sm:$0xff]  ;;  %v944_v59 = vld [vmem:[%s7018_s23 + $0x298] sm:$0xff] }
  0x24   : > { %v943_v60 = vld [vmem:[%s7018_s23 + $0x290] sm:$0xff]  ;;  %v946_v61 = vld [vmem:[%s7018_s23 + $0x2a8] sm:$0xff]  ;;  %v945_v62 = vld [vmem:[%s7018_s23 + $0x2a0] sm:$0xff] }
  0x25   : > { %548 = vperm.xlu1 %6894, %v7058_v11   ;;  %543 = vperm.xlu0 %6893, %v7061_v12   ;;  %v948_v63 = vld [vmem:[%s7018_s23 + $0x2b8] sm:$0xff]  ;;  %v947_v2 = vld [vmem:[%s7018_s23 + $0x2b0] sm:$0xff] }
  0x29   : > { %558 = vperm.xlu1 %6894, %v7066_v13   ;;  %553 = vperm.xlu0 %6893, %v7069_v14  }
  0x2d   : > { %614 = vperm.xlu1 %6894, %v7074_v15   ;;  %609 = vperm.xlu0 %6893, %v593_v16  }
  0x31   : > { %624 = vperm.xlu1 %6894, %v7079_v17   ;;  %619 = vperm.xlu0 %6893, %v7082_v18  }
  0x35   : > { %634 = vperm.xlu1 %6894, %v7087_v19   ;;  %629 = vperm.xlu0 %6893, %v7090_v20  }
  0x39   : > { %644 = vperm.xlu1 %6894, %v7095_v21   ;;  %639 = vperm.xlu0 %6893, %v7098_v22  }
  0x3d   : > { %654 = vperm.xlu1 %6894, %v7103_v23   ;;  %649 = vperm.xlu0 %6893, %v7106_v24  }
  0x41   : > { %664 = vperm.xlu1 %6894, %v7111_v25   ;;  %659 = vperm.xlu0 %6893, %v7114_v26  }
  0x45   : > { %674 = vperm.xlu1 %6894, %v7119_v27   ;;  %669 = vperm.xlu0 %6893, %v7122_v28  }
  0x49   : > { %730 = vperm.xlu1 %6894, %v7127_v29   ;;  %725 = vperm.xlu0 %6893, %v709_v30  }
  0x4d   : > { %740 = vperm.xlu1 %6894, %v7132_v31   ;;  %735 = vperm.xlu0 %6893, %v7135_v32  }
  0x51   : > { %750 = vperm.xlu1 %6894, %v7140_v33   ;;  %745 = vperm.xlu0 %6893, %v7143_v34  }
  0x55   : > { %760 = vperm.xlu1 %6894, %v7148_v35   ;;  %755 = vperm.xlu0 %6893, %v7151_v36  }
  0x59   : > { %770 = vperm.xlu1 %6894, %v7156_v37   ;;  %765 = vperm.xlu0 %6893, %v7159_v38  }
  0x5d   : > { %780 = vperm.xlu1 %6894, %v7164_v39   ;;  %775 = vperm.xlu0 %6893, %v7167_v40   ;;  %v1070_v39 = vld [vmem:[%s7018_s23 + $0x368] sm:$0xff] }
  0x61   : > { %790 = vperm.xlu1 %6894, %v7172_v41   ;;  %785 = vperm.xlu0 %6893, %v7175_v42   ;;  %v1069_v42 = vld [vmem:[%s7018_s23 + $0x360] sm:$0xff] }
  0x65   : > { %846 = vperm.xlu1 %6894, %v826_v43   ;;  %841 = vperm.xlu0 %6893, %v825_v44   ;;  %v950_v43 = vld [vmem:[%s7018_s23 + $0x2c8] sm:$0xff]  ;;  %v949_v44 = vld [vmem:[%s7018_s23 + $0x2c0] sm:$0xff] }
  0x69   : > { %856 = vperm.xlu1 %6894, %v828_v45   ;;  %851 = vperm.xlu0 %6893, %v827_v46  }
  0x6d   : > { %866 = vperm.xlu1 %6894, %v830_v47   ;;  %861 = vperm.xlu0 %6893, %v829_v48   ;;  %v952_v47 = vld [vmem:[%s7018_s23 + $0x2d8] sm:$0xff]  ;;  %v951_v48 = vld [vmem:[%s7018_s23 + $0x2d0] sm:$0xff] }
  0x71   : > { %876 = vperm.xlu1 %6894, %v832_v49   ;;  %871 = vperm.xlu0 %6893, %v831_v50  }
  0x75   : > { %886 = vperm.xlu1 %6894, %v834_v51   ;;  %881 = vperm.xlu0 %6893, %v833_v52   ;;  %v954_v51 = vld [vmem:[%s7018_s23 + $0x2e8] sm:$0xff]  ;;  %v953_v52 = vld [vmem:[%s7018_s23 + $0x2e0] sm:$0xff] }
  0x79   : > { %896 = vperm.xlu1 %6894, %v836_v53   ;;  %891 = vperm.xlu0 %6893, %v835_v54  }
  0x7d   : > { %906 = vperm.xlu1 %6894, %v838_v55   ;;  %901 = vperm.xlu0 %6893, %v837_v56   ;;  %v1058_v55 = vld [vmem:[%s7018_s23 + $0x308] sm:$0xff]  ;;  %v1057_v56 = vld [vmem:[%s7018_s23 + $0x300] sm:$0xff] }
  0x81   : > { %962 = vperm.xlu1 %6894, %v942_v57   ;;  %957 = vperm.xlu0 %6893, %v941_v58  }
  0x85   : > { %972 = vperm.xlu1 %6894, %v944_v59   ;;  %967 = vperm.xlu0 %6893, %v943_v60   ;;  %v1060_v59 = vld [vmem:[%s7018_s23 + $0x318] sm:$0xff]  ;;  %v1059_v60 = vld [vmem:[%s7018_s23 + $0x310] sm:$0xff] }
  0x89   : > { %982 = vperm.xlu1 %6894, %v946_v61   ;;  %977 = vperm.xlu0 %6893, %v945_v62  }
  0x8c   : > { %v7201_v16 = vpop.permute.xlu1 %503  ;;  %v7203_v30 = vpop.permute.xlu0 %493 }
  0x8d   : > { %992 = vperm.xlu1 %6894, %v948_v63   ;;  %987 = vperm.xlu0 %6893, %v947_v2   ;;  %v1062_v63 = vld [vmem:[%s7018_s23 + $0x328] sm:$0xff]  ;;  %v1061_v2 = vld [vmem:[%s7018_s23 + $0x320] sm:$0xff] }
  0x90   : > { %v7207_v45 = vpop.permute.xlu1 %508  ;;  %v7209_v46 = vpop.permute.xlu0 %498 }
  0x91   : > { %1002 = vperm.xlu1 %6894, %v950_v43   ;;  %997 = vperm.xlu0 %6893, %v949_v44  }
  0x94   : > { %v7213_v49 = vpop.permute.xlu1 %518  ;;  %v7215_v50 = vpop.permute.xlu0 %513 }
  0x95   : > { %1012 = vperm.xlu1 %6894, %v952_v47   ;;  %1007 = vperm.xlu0 %6893, %v951_v48   ;;  %v1064_v47 = vld [vmem:[%s7018_s23 + $0x338] sm:$0xff]  ;;  %v1063_v48 = vld [vmem:[%s7018_s23 + $0x330] sm:$0xff] }
  0x98   : > { %v7219_v53 = vpop.permute.xlu1 %528  ;;  %v7221_v54 = vpop.permute.xlu0 %523 }
  0x99   : > { %1022 = vperm.xlu1 %6894, %v954_v51   ;;  %1017 = vperm.xlu0 %6893, %v953_v52  }
  0x9c   : > { %v7225_v57 = vpop.permute.xlu1 %538  ;;  %v7227_v58 = vpop.permute.xlu0 %533 }
  0x9d   : > { %1078 = vperm.xlu1 %6894, %v1058_v55   ;;  %1073 = vperm.xlu0 %6893, %v1057_v56   ;;  %v1066_v55 = vld [vmem:[%s7018_s23 + $0x348] sm:$0xff]  ;;  %v1065_v56 = vld [vmem:[%s7018_s23 + $0x340] sm:$0xff] }
  0xa0   : > { %v7231_v61 = vpop.permute.xlu1 %548  ;;  %v7233_v62 = vpop.permute.xlu0 %543 }
  0xa1   : > { %1088 = vperm.xlu1 %6894, %v1060_v59   ;;  %1083 = vperm.xlu0 %6893, %v1059_v60  }
  0xa4   : > { %v7237_v43 = vpop.permute.xlu1 %558  ;;  %v7239_v44 = vpop.permute.xlu0 %553 }
  0xa5   : > { %14075 = vst [vmem:[#allocation7_spill] sm:$0xff] %v7239_v44  ;;  %1098 = vperm.xlu1 %6894, %v1062_v63   ;;  %1093 = vperm.xlu0 %6893, %v1061_v2   ;;  %v1068_v63 = vld [vmem:[%s7018_s23 + $0x358] sm:$0xff]  ;;  %v1067_v2 = vld [vmem:[%s7018_s23 + $0x350] sm:$0xff] }
  0xa8   : > { %v7243_v51 = vpop.permute.xlu1 %614  ;;  %v7245_v52 = vpop.permute.xlu0 %609 }
  0xa9   : > { %1108 = vperm.xlu1 %6894, %v1064_v47   ;;  %1103 = vperm.xlu0 %6893, %v1063_v48  }
  0xac   : > { %v7249_v59 = vpop.permute.xlu1 %624  ;;  %v7251_v60 = vpop.permute.xlu0 %619 }
  0xad   : > { %1118 = vperm.xlu1 %6894, %v1066_v55   ;;  %1113 = vperm.xlu0 %6893, %v1065_v56  }
  0xb0   : > { %v7255_v0 = vpop.permute.xlu1 %634  ;;  %v7257_v41 = vpop.permute.xlu0 %629 }
  0xb1   : > { %1128 = vperm.xlu1 %6894, %v1068_v63   ;;  %1123 = vperm.xlu0 %6893, %v1067_v2  }
  0xb4   : > { %v7261_v47 = vpop.permute.xlu1 %644  ;;  %v7263_v48 = vpop.permute.xlu0 %639 }
  0xb5   : > { %1138 = vperm.xlu1 %6894, %v1070_v39   ;;  %1133 = vperm.xlu0 %6893, %v1069_v42  }
  0xb8   : > { %v7265_v44 = vpop.permute.xlu1 %654  ;;  %v7267_v55 = vpop.permute.xlu0 %649 }
  0xb9   : > { %1194 = vperm.xlu1 %6894, %v7021_v1   ;;  %1189 = vperm.xlu0 %6893, %v7029_v4  }
  0xbc   : > { %v7271_v56 = vpop.permute.xlu1 %664  ;;  %v7273_v63 = vpop.permute.xlu0 %659 }
  0xbd   : > { %1204 = vperm.xlu1 %6894, %v7037_v6   ;;  %1199 = vperm.xlu0 %6893, %v7026_v3  }
  0xc0   : > { %v7277_v2 = vpop.permute.xlu1 %674  ;;  %v7279_v39 = vpop.permute.xlu0 %669 }
  0xc1   : > { %1214 = vperm.xlu1 %6894, %v7045_v8   ;;  %1209 = vperm.xlu0 %6893, %v7034_v5   ;;  %v1186_v5 = vld [vmem:[%s7018_s23 + $0x70] sm:$0xff] }
  0xc4   : > { %v7283_v1 = vpop.permute.xlu1 %730  ;;  %v7285_v4 = vpop.permute.xlu0 %725 }
  0xc5   : > { %1224 = vperm.xlu1 %6894, %v7053_v10   ;;  %1219 = vperm.xlu0 %6893, %v7042_v7  }
  0xc8   : > { %v7289_v6 = vpop.permute.xlu1 %740  ;;  %v7291_v3 = vpop.permute.xlu0 %735 }
  0xc9   : > { %14076 = vst [vmem:[#allocation8_spill] sm:$0xff] %v7291_v3  ;;  %1234 = vperm.xlu1 %6894, %v7061_v12   ;;  %1229 = vperm.xlu0 %6893, %v7050_v9  }
  0xcc   : > { %v7295_v42 = vpop.permute.xlu1 %750  ;;  %v7297_v8 = vpop.permute.xlu0 %745 }
  0xcd   : > { %1244 = vperm.xlu1 %6894, %v7069_v14   ;;  %1239 = vperm.xlu0 %6893, %v7058_v11  }
  0xd0   : > { %v7302_v10 = vpop.permute.xlu1 %760  ;;  %v7304_v7 = vpop.permute.xlu0 %755 }
  0xd1   : > { %1254 = vperm.xlu1 %6894, %v1186_v5   ;;  %1249 = vperm.xlu0 %6893, %v7066_v13  }
  0xd4   : > { %v7307_v3 = vpop.permute.xlu1 %770  ;;  %v7309_v12 = vpop.permute.xlu0 %765 }
  0xd5   : > { %1310 = vperm.xlu1 %6894, %v7082_v18   ;;  %1305 = vperm.xlu0 %6893, %v7074_v15  }
  0xd8   : > { %v7313_v9 = vpop.permute.xlu1 %780  ;;  %v7315_v14 = vpop.permute.xlu0 %775 }
  0xd9   : > { %1320 = vperm.xlu1 %6894, %v7090_v20   ;;  %1315 = vperm.xlu0 %6893, %v7079_v17  }
  0xdc   : > { %v7319_v11 = vpop.permute.xlu1 %790  ;;  %v7321_v13 = vpop.permute.xlu0 %785 }
  0xdd   : > { %1330 = vperm.xlu1 %6894, %v7098_v22   ;;  %1325 = vperm.xlu0 %6893, %v7087_v19   ;;  %v1302_v19 = vld [vmem:[%s7018_s23 + $0xf0] sm:$0xff] }
  0xe0   : > { %v7325_v18 = vpop.permute.xlu1 %846  ;;  %v7327_v15 = vpop.permute.xlu0 %841 }
  0xe1   : > { %1340 = vperm.xlu1 %6894, %v7106_v24   ;;  %1335 = vperm.xlu0 %6893, %v7095_v21  }
  0xe4   : > { %v7331_v20 = vpop.permute.xlu1 %856  ;;  %v7333_v17 = vpop.permute.xlu0 %851 }
  0xe5   : > { %14077 = vst [vmem:[#allocation9_spill] sm:$0xff] %v7331_v20  ;;  %14078 = vst [vmem:[#allocation10_spill] sm:$0xff] %v7333_v17  ;;  %1350 = vperm.xlu1 %6894, %v7114_v26   ;;  %1345 = vperm.xlu0 %6893, %v7103_v23   ;;  %v266_v17 = vlaneseq }
  0xe8   : > { %v7337_v5 = vpop.permute.xlu1 %866  ;;  %v7339_v22 = vpop.permute.xlu0 %861 }
  0xe9   : > { %14079 = vst [vmem:[#allocation11_spill] sm:$0xff] %v7337_v5  ;;  %14080 = vst [vmem:[#allocation12_spill] sm:$0xff] %v7339_v22  ;;  %1360 = vperm.xlu1 %6894, %v7122_v28   ;;  %1355 = vperm.xlu0 %6893, %v7111_v25   ;;  %v7355_v28 = vshrl.u32 %v266_v17, 7 }
  0xeb   : > { %14085 = vst [vmem:[#allocation17_spill] sm:$0xff] %v7355_v28  ;;  %v679_v17 = vsub.s32 1, %v7355_v28 }
  0xec   : > { %v7344_v24 = vpop.permute.xlu1 %876  ;;  %v7346_v21 = vpop.permute.xlu0 %871 }
  0xed   : > { %14081 = vst [vmem:[#allocation13_spill] sm:$0xff] %v7344_v24  ;;  %14082 = vst [vmem:[#allocation14_spill] sm:$0xff] %v7346_v21  ;;  %1370 = vperm.xlu1 %6894, %v1302_v19   ;;  %1365 = vperm.xlu0 %6893, %v7119_v27   ;;  %v563_v27 = vsub.s32 0, %v7355_v28  ;;  %v7367_v19 = vld [vmem:[%s13866_s1] sm:$0xff]  ;;  %v1259_v24 = vsub.s32 6, %v7355_v28 }
  0xf0   : > { %v7349_v26 = vpop.permute.xlu1 %886  ;;  %v7351_v23 = vpop.permute.xlu0 %881 }
  0xf1   : > { %14083 = vst [vmem:[#allocation15_spill] sm:$0xff] %v7349_v26  ;;  %14084 = vst [vmem:[#allocation16_spill] sm:$0xff] %v7351_v23  ;;  %1426 = vperm.xlu1 %6894, %v7135_v32   ;;  %1421 = vperm.xlu0 %6893, %v7127_v29  }
  0xf4   : > { %v7357_v25 = vpop.permute.xlu1 %896  ;;  %v7359_v22 = vpop.permute.xlu0 %891 }
  0xf5   : > { %14086 = vst [vmem:[#allocation18_spill] sm:$0xff] %v7357_v25  ;;  %14087 = vst [vmem:[#allocation19_spill] sm:$0xff] %v7359_v22  ;;  %1436 = vperm.xlu1 %6894, %v7143_v34   ;;  %1431 = vperm.xlu0 %6893, %v7132_v31   ;;  %v795_v22 = vsub.s32 2, %v7355_v28  ;;  %v7378_v31 = vrot.slane %v7367_v19, %v563_v27  ;;  %v911_v34 = vsub.s32 3, %v7355_v28  ;;  %v1027_v25 = vsub.s32 4, %v7355_v28 }
  0xf7   : > { %14090 = vst [vmem:[#allocation22_spill] sm:$0xff] %v7378_v31  ;;  %v567_v27 = vmul.f32 %v7378_v31, %v7201_v16  ;;  %v569_v16 = vmul.f32 %v7378_v31, %v7215_v50  ;;  %v574_v50 = vmul.f32 %v7378_v31, %v7225_v57  ;;  %v7470_v5 = vmul.f32 %v7249_v59, %v7378_v31 }
  0xf8   : > { %v7369_v32 = vpop.permute.xlu1 %906  ;;  %v7371_v29 = vpop.permute.xlu0 %901 }
  0xf9   : > { %14088 = vst [vmem:[#allocation20_spill] sm:$0xff] %v7369_v32  ;;  %14089 = vst [vmem:[#allocation21_spill] sm:$0xff] %v7371_v29  ;;  %1446 = vperm.xlu1 %6894, %v7151_v36   ;;  %1441 = vperm.xlu0 %6893, %v7140_v33   ;;  %v7387_v29 = vrot.slane %v7367_v19, %v679_v17  ;;  %v1143_v36 = vsub.s32 5, %v7355_v28  ;;  %v7392_v33 = vrot.slane %v7367_v19, %v795_v22 }
  0xfa   : > { %v7403_v17 = vrot.slane %v7367_v19, %v1027_v25  ;;  %v566_v22 = vmul.f32 %v7378_v31, %v7209_v46  ;;  %v572_v25 = vmul.f32 %v7378_v31, %v7219_v53  ;;  %v573_v53 = vmul.f32 %v7378_v31, %v7227_v58 }
  0xfb   : > { %14093 = vst [vmem:[#allocation25_spill] sm:$0xff] %v7387_v29  ;;  %14094 = vst [vmem:[#allocation26_spill] sm:$0xff] %v7392_v33  ;;  %v7425_v46 = vrot.slane %v7367_v19, %v1143_v36  ;;  %v578_v36 = vmul.f32 %v7378_v31, %v7237_v43  ;;  %v683_v57 = vmul.f32 %v7387_v29, %v7251_v60 }
  0xfc   : > { %v7382_v23 = vpop.permute.xlu1 %962  ;;  %v7384_v32 = vpop.permute.xlu0 %957  ;;  %14096 = vst [vmem:[#allocation28_spill] sm:$0xff] %v7403_v17 }
  0xfd   : > { %14091 = vst [vmem:[#allocation23_spill] sm:$0xff] %v7382_v23  ;;  %14092 = vst [vmem:[#allocation24_spill] sm:$0xff] %v7384_v32  ;;  %1456 = vperm.xlu1 %6894, %v7159_v38   ;;  %1451 = vperm.xlu0 %6893, %v7148_v35   ;;  %v565_v23 = vmul.f32 %v7378_v31, %v7203_v30  ;;  %v7400_v32 = vrot.slane %v7367_v19, %v911_v34 }
  0xfe   : > { %v568_v38 = vmul.f32 %v7378_v31, %v7207_v45  ;;  %v570_v35 = vmul.f32 %v7378_v31, %v7213_v49  ;;  %v682_v34 = vmul.f32 %v7387_v29, %v7243_v51  ;;  %v681_v45 = vmul.f32 %v7387_v29, %v7245_v52  ;;  %14099 = vst [vmem:[#allocation31_spill] sm:$0xff] %v7425_v46  ;;  %v14100_v46 = vld [vmem:[#allocation7_spill] sm:$0xff] }
  0xff   : > { %14095 = vst [vmem:[#allocation27_spill] sm:$0xff] %v7400_v32  ;;  %v571_v49 = vmul.f32 %v7378_v31, %v7221_v54  ;;  %v684_v54 = vmul.f32 %v7387_v29, %v7249_v59  ;;  %v577_v58 = vmul.f32 %v7378_v31, %v14100_v46  ;;  %v7464_v46 = vmul.f32 %v7245_v52, %v7378_v31  ;;  %v14104_v52 = vld [vmem:[#allocation4_spill] sm:$0xff] }
 0x100   : > { %v7413_v26 = vpop.permute.xlu1 %972  ;;  %v7415_v30 = vpop.permute.xlu0 %967  ;;  %v7458_v17 = vadd.f32 %v682_v34, %v566_v22  ;;  %v7460_v21 = vadd.f32 %v681_v45, %v565_v23  ;;  %v688_v23 = vmul.f32 %v7387_v29, %v7261_v47  ;;  %v687_v22 = vmul.f32 %v7387_v29, %v7263_v48  ;;  %v1418_v34 = vld [vmem:[%s7018_s23 + $0x170] sm:$0xff] }
 0x101   : > { %14097 = vst [vmem:[#allocation29_spill] sm:$0xff] %v7413_v26  ;;  %14098 = vst [vmem:[#allocation30_spill] sm:$0xff] %v7415_v30  ;;  %1466 = vperm.xlu1 %6894, %v7167_v40   ;;  %v576_v30 = vmul.f32 %v7378_v31, %v7231_v61  ;;  %1461 = vperm.xlu0 %6893, %v7156_v37   ;;  %v575_v40 = vmul.f32 %v7378_v31, %v7233_v62 }
 0x102   : > { %v7448_v61 = vmul.f32 %v7243_v51, %v7378_v31  ;;  %v686_v37 = vmul.f32 %v7387_v29, %v7255_v0  ;;  %v685_v62 = vmul.f32 %v7387_v29, %v7257_v41  ;;  %v14103_v51 = vld [vmem:[#allocation6_spill] sm:$0xff]  ;;  %v7482_v45 = vadd.f32 %v684_v54, %v568_v38 }
 0x103   : > { %v7488_v59 = vmul.f32 %v7255_v0, %v7378_v31  ;;  %v7508_v0 = vmul.f32 %v7261_v47, %v7378_v31  ;;  %v694_v47 = vmul.f32 %v7387_v29, %v7277_v2 }
 0x104   : > { %v7454_v43 = vpop.permute.xlu1 %982  ;;  %v7456_v26 = vpop.permute.xlu0 %977  ;;  %v7494_v20 = vadd.f32 %v685_v62, %v569_v16  ;;  %v7517_v16 = vrot.slane %v7367_v19, %v1259_v24  ;;  %v691_v62 = vmul.f32 %v7387_v29, %v7273_v63  ;;  %v7535_v24 = vmul.f32 %v7265_v44, %v7378_v31 }
 0x105   : > { %14101 = vst [vmem:[#allocation7_spill] sm:$0xff] %v7454_v43  ;;  %14102 = vst [vmem:[#allocation32_spill] sm:$0xff] %v7456_v26  ;;  %1476 = vperm.xlu1 %6894, %v14103_v51   ;;  %v7474_v43 = vmul.f32 %v7251_v60, %v7378_v31  ;;  %1471 = vperm.xlu0 %6893, %v14104_v52   ;;  %v7484_v51 = vadd.f32 %v683_v57, %v567_v27 }
 0x106   : > { %v690_v60 = vmul.f32 %v7387_v29, %v7265_v44  ;;  %v7492_v26 = vadd.f32 %v686_v37, %v570_v35  ;;  %v7498_v52 = vmul.f32 %v7257_v41, %v7378_v31  ;;  %v689_v27 = vmul.f32 %v7387_v29, %v7267_v55  ;;  %14107 = vst [vmem:[#allocation33_spill] sm:$0xff] %v7517_v16 }
 0x107   : > { %v7512_v35 = vmul.f32 %v7263_v48, %v7378_v31  ;;  %v692_v41 = vmul.f32 %v7387_v29, %v7271_v56  ;;  %v7519_v57 = vadd.f32 %v688_v23, %v572_v25  ;;  %v7521_v37 = vadd.f32 %v687_v22, %v571_v49  ;;  %v7529_v48 = vld [vmem:[%s7018_s23 + $0x188] sm:$0xff]  ;;  %v1577_v23 = vld [vmem:[%s7018_s23 + $0x180] sm:$0xff] }
 0x108   : > { %v7502_v38 = vpop.permute.xlu1 %992  ;;  %v7504_v54 = vpop.permute.xlu0 %987  ;;  %v7539_v25 = vmul.f32 %v7267_v55, %v7378_v31  ;;  %v693_v49 = vmul.f32 %v7387_v29, %v7279_v39  ;;  %v7544_v22 = vadd.f32 %v689_v27, %v573_v53  ;;  %v1550_v44 = vmul.f32 %v7283_v1, %v7387_v29 }
 0x109   : > { %14105 = vst [vmem:[#allocation6_spill] sm:$0xff] %v7502_v38  ;;  %14106 = vst [vmem:[#allocation4_spill] sm:$0xff] %v7504_v54  ;;  %1486 = vperm.xlu1 %6894, %v1418_v34   ;;  %v14108_v54 = vld [vmem:[#allocation5_spill] sm:$0xff]  ;;  %v7531_v38 = vadd.f32 %v690_v60, %v574_v50  ;;  %v7548_v34 = vmul.f32 %v7271_v56, %v7378_v31  ;;  %v7552_v50 = vmul.f32 %v7273_v63, %v7378_v31 }
 0x10a   : > { %1481 = vperm.xlu0 %6893, %v14108_v54   ;;  %14109 = vst [vmem:[#allocation5_spill] sm:$0xff] %v7529_v48  ;;  %v7560_v54 = vadd.f32 %v692_v41, %v576_v30  ;;  %v798_v53 = vmul.f32 %v7392_v33, %v7283_v1  ;;  %v797_v56 = vmul.f32 %v7392_v33, %v7285_v4  ;;  %v7582_v41 = vld [vmem:[%s7018_s23 + $0x198] sm:$0xff] }
 0x10b   : > { %v1549_v63 = vmul.f32 %v7285_v4, %v7387_v29  ;;  %v7569_v27 = vadd.f32 %v691_v62, %v575_v40  ;;  %v7571_v16 = vadd.f32 %v694_v47, %v578_v36  ;;  %v7579_v30 = vmul.f32 %v7279_v39, %v7378_v31  ;;  %14112 = vst [vmem:[#allocation36_spill] sm:$0xff] %v7582_v41  ;;  %v7595_v36 = vld [vmem:[%s7018_s23 + $0x190] sm:$0xff]  ;;  %v14116_v62 = vld [vmem:[#allocation8_spill] sm:$0xff] }
 0x10c   : > { %v7556_v55 = vpop.permute.xlu1 %1002  ;;  %v7558_v60 = vpop.permute.xlu0 %997  ;;  %v800_v40 = vmul.f32 %v7392_v33, %v7289_v6  ;;  %v7598_v39 = vadd.f32 %v1550_v44, %v7448_v61  ;;  %v1551_v47 = vmul.f32 %v14116_v62, %v7387_v29  ;;  %v7617_v61 = vmul.f32 %v7289_v6, %v7378_v31 }
 0x10d   : > { %14110 = vst [vmem:[#allocation34_spill] sm:$0xff] %v7556_v55  ;;  %14111 = vst [vmem:[#allocation35_spill] sm:$0xff] %v7558_v60  ;;  %1598 = vperm.xlu1 %6894, %v7529_v48   ;;  %v7575_v60 = vmul.f32 %v7277_v2, %v7378_v31  ;;  %v7584_v55 = vadd.f32 %v693_v49, %v577_v58  ;;  %v7588_v48 = vmul.f32 %v7283_v1, %v7378_v31 }
 0x10e   : > { %1593 = vperm.xlu0 %6893, %v1577_v23   ;;  %v1552_v2 = vmul.f32 %v7289_v6, %v7387_v29  ;;  %14114 = vst [vmem:[#allocation38_spill] sm:$0xff] %v7598_v39  ;;  %v7602_v58 = vmul.f32 %v7285_v4, %v7378_v31  ;;  %v799_v1 = vmul.f32 %v7392_v33, %v14116_v62  ;;  %14118 = vst [vmem:[#allocation40_spill] sm:$0xff] %v7617_v61 }
 0x10f   : > { %14113 = vst [vmem:[#allocation37_spill] sm:$0xff] %v7588_v48  ;;  %v7613_v48 = vadd.f32 %v1549_v63, %v7464_v46  ;;  %v7620_v4 = vadd.f32 %v798_v53, %v7458_v17  ;;  %v7623_v44 = vadd.f32 %v797_v56, %v7460_v21  ;;  %v1554_v39 = vmul.f32 %v7295_v42, %v7387_v29  ;;  %v7636_v17 = vld [vmem:[%s7018_s23 + $0x1a8] sm:$0xff]  ;;  %v7649_v63 = vld [vmem:[%s7018_s23 + $0x1a0] sm:$0xff] }
 0x110   : > { %14115 = vst [vmem:[#allocation39_spill] sm:$0xff] %v7602_v58  ;;  %v7608_v49 = vpop.permute.xlu1 %1012  ;;  %v7610_v23 = vpop.permute.xlu0 %1007  ;;  %v802_v58 = vmul.f32 %v7392_v33, %v7295_v42  ;;  %v801_v46 = vmul.f32 %v7392_v33, %v7297_v8  ;;  %v1553_v6 = vmul.f32 %v7297_v8, %v7387_v29  ;;  %14119 = vst [vmem:[#allocation41_spill] sm:$0xff] %v7636_v17  ;;  %v1375_v61 = vsub.s32 7, %v7355_v28 }
 0x111   : > { %14117 = vst [vmem:[#allocation8_spill] sm:$0xff] %v7613_v48  ;;  %1608 = vperm.xlu1 %6894, %v7582_v41   ;;  %v7639_v21 = vadd.f32 %v1552_v2, %v7470_v5  ;;  %v7643_v53 = vmul.f32 %v14116_v62, %v7378_v31  ;;  %v7646_v56 = vadd.f32 %v800_v40, %v7482_v45  ;;  %14122 = vst [vmem:[#allocation44_spill] sm:$0xff] %v7649_v63 }
 0x112   : > { %1603 = vperm.xlu0 %6893, %v7595_v36   ;;  %v7653_v48 = vadd.f32 %v1551_v47, %v7474_v43  ;;  %v7657_v41 = vmul.f32 %v7295_v42, %v7378_v31  ;;  %v1556_v5 = vmul.f32 %v7302_v10, %v7387_v29  ;;  %v7662_v2 = vadd.f32 %v799_v1, %v7484_v51 }
 0x113   : > { %14120 = vst [vmem:[#allocation42_spill] sm:$0xff] %v7639_v21  ;;  %14121 = vst [vmem:[#allocation43_spill] sm:$0xff] %v7643_v53  ;;  %v7670_v43 = vmul.f32 %v7297_v8, %v7378_v31  ;;  %v804_v62 = vmul.f32 %v7392_v33, %v7302_v10  ;;  %v803_v42 = vmul.f32 %v7392_v33, %v7304_v7 }
 0x114   : > { %14123 = vst [vmem:[#allocation45_spill] sm:$0xff] %v7653_v48  ;;  %14124 = vst [vmem:[#allocation46_spill] sm:$0xff] %v7657_v41  ;;  %v7664_v45 = vpop.permute.xlu1 %1022  ;;  %v7666_v40 = vpop.permute.xlu0 %1017  ;;  %v1555_v47 = vmul.f32 %v7304_v7, %v7387_v29  ;;  %v7680_v51 = vadd.f32 %v1554_v39, %v7488_v59  ;;  %v7683_v1 = vadd.f32 %v1553_v6, %v7498_v52  ;;  %v7702_v39 = vld [vmem:[%s7018_s23 + $0x1b0] sm:$0xff] }
 0x115   : > { %14125 = vst [vmem:[#allocation47_spill] sm:$0xff] %v7670_v43  ;;  %1618 = vperm.xlu1 %6894, %v7636_v17   ;;  %v7686_v8 = vadd.f32 %v802_v58, %v7492_v26  ;;  %v7689_v28 = vadd.f32 %v801_v46, %v7494_v20  ;;  %v7693_v43 = vld [vmem:[%s7018_s23 + $0x1b8] sm:$0xff]  ;;  %v806_v41 = vmul.f32 %v7392_v33, %v7307_v3  ;;  %14129 = vst [vmem:[#allocation51_spill] sm:$0xff] %v7702_v39 }
 0x116   : > { %14126 = vst [vmem:[#allocation48_spill] sm:$0xff] %v7680_v51  ;;  %14127 = vst [vmem:[#allocation49_spill] sm:$0xff] %v7683_v1  ;;  %1613 = vperm.xlu0 %6893, %v7649_v63   ;;  %v1558_v59 = vmul.f32 %v7307_v3, %v7387_v29  ;;  %v805_v52 = vmul.f32 %v7392_v33, %v7309_v12  ;;  %v7705_v26 = vrot.slane %v7367_v19, %v1375_v61  ;;  %v14164_v51 = vld [vmem:[#allocation19_spill] sm:$0xff] }
 0x117   : > { %14128 = vst [vmem:[#allocation50_spill] sm:$0xff] %v7693_v43  ;;  %v7708_v20 = vadd.f32 %v1556_v5, %v7508_v0  ;;  %v7712_v58 = vmul.f32 %v7302_v10, %v7378_v31  ;;  %v7716_v46 = vmul.f32 %v7304_v7, %v7378_v31  ;;  %v1557_v6 = vmul.f32 %v7309_v12, %v7387_v29 }
 0x118   : > { %14130 = vst [vmem:[#allocation52_spill] sm:$0xff] %v7705_v26  ;;  %v7720_v53 = vpop.permute.xlu1 %1078  ;;  %v7722_v1 = vpop.permute.xlu0 %1073  ;;  %v7725_v19 = vadd.f32 %v1555_v47, %v7512_v35  ;;  %v1560_v0 = vmul.f32 %v7313_v9, %v7387_v29  ;;  %v7730_v10 = vadd.f32 %v804_v62, %v7519_v57  ;;  %v7733_v7 = vadd.f32 %v803_v42, %v7521_v37  ;;  %v7750_v37 = vld [vmem:[%s7018_s23 + $0x1c8] sm:$0xff]  ;;  %v7764_v47 = vld [vmem:[%s7018_s23 + $0x1c0] sm:$0xff] }
 0x119   : > { %14131 = vst [vmem:[#allocation53_spill] sm:$0xff] %v7708_v20  ;;  %14132 = vst [vmem:[#allocation54_spill] sm:$0xff] %v7712_v58  ;;  %1628 = vperm.xlu1 %6894, %v7693_v43   ;;  %v7738_v61 = vmul.f32 %v7307_v3, %v7378_v31  ;;  %v7742_v5 = vmul.f32 %v7309_v12, %v7378_v31  ;;  %v808_v35 = vmul.f32 %v7392_v33, %v7313_v9  ;;  %v14148_v58 = vld [vmem:[#allocation9_spill] sm:$0xff] }
 0x11a   : > { %14133 = vst [vmem:[#allocation55_spill] sm:$0xff] %v7716_v46  ;;  %14134 = vst [vmem:[#allocation56_spill] sm:$0xff] %v7725_v19  ;;  %v807_v57 = vmul.f32 %v7392_v33, %v7315_v14  ;;  %1623 = vperm.xlu0 %6893, %v7702_v39   ;;  %v7753_v62 = vadd.f32 %v1558_v59, %v7535_v24  ;;  %v1559_v3 = vmul.f32 %v7315_v14, %v7387_v29 }
 0x11b   : > { %14135 = vst [vmem:[#allocation57_spill] sm:$0xff] %v7738_v61  ;;  %14136 = vst [vmem:[#allocation58_spill] sm:$0xff] %v7742_v5  ;;  %v7758_v42 = vadd.f32 %v806_v41, %v7531_v38  ;;  %v7761_v12 = vadd.f32 %v805_v52, %v7544_v22  ;;  %v7767_v5 = vadd.f32 %v1557_v6, %v7539_v25 }
 0x11c   : > { %14137 = vst [vmem:[#allocation59_spill] sm:$0xff] %v7750_v37  ;;  %14138 = vst [vmem:[#allocation60_spill] sm:$0xff] %v7753_v62  ;;  %v810_v61 = vmul.f32 %v7392_v33, %v7319_v11  ;;  %v1562_v24 = vmul.f32 %v7319_v11, %v7387_v29  ;;  %v809_v59 = vmul.f32 %v7392_v33, %v7321_v13  ;;  %v7775_v38 = vpop.permute.xlu1 %1088  ;;  %v7777_v41 = vpop.permute.xlu0 %1083  ;;  %v14161_v62 = vld [vmem:[#allocation16_spill] sm:$0xff] }
 0x11d   : > { %14139 = vst [vmem:[#allocation61_spill] sm:$0xff] %v7764_v47  ;;  %14140 = vst [vmem:[#allocation62_spill] sm:$0xff] %v7767_v5  ;;  %v7780_v22 = vadd.f32 %v1560_v0, %v7548_v34  ;;  %v7784_v25 = vmul.f32 %v7313_v9, %v7378_v31  ;;  %v7788_v52 = vmul.f32 %v7315_v14, %v7378_v31  ;;  %1638 = vperm.xlu1 %6894, %v7750_v37  }
 0x11e   : > { %v1561_v6 = vmul.f32 %v7321_v13, %v7387_v29  ;;  %v914_v46 = vmul.f32 %v7400_v32, %v7325_v18  ;;  %v913_v34 = vmul.f32 %v7400_v32, %v7327_v15  ;;  %v822_v0 = vadd.f32 %v808_v35, %v7560_v54  ;;  %1633 = vperm.xlu0 %6893, %v7764_v47   ;;  %v7817_v35 = vld [vmem:[%s7018_s23 + $0x1d0] sm:$0xff] }
 0x11f   : > { %14141 = vst [vmem:[#allocation63_spill] sm:$0xff] %v7780_v22  ;;  %14142 = vst [vmem:[#allocation64_spill] sm:$0xff] %v7784_v25  ;;  %v821_v9 = vadd.f32 %v807_v57, %v7569_v27  ;;  %v7801_v25 = vld [vmem:[%s7018_s23 + $0x1d8] sm:$0xff]  ;;  %v7804_v14 = vadd.f32 %v1559_v3, %v7552_v50  ;;  %v7812_v22 = vmul.f32 %v7321_v13, %v7378_v31 }
 0x120   : > { %14143 = vst [vmem:[#allocation65_spill] sm:$0xff] %v7788_v52  ;;  %14144 = vst [vmem:[#allocation66_spill] sm:$0xff] %v7801_v25  ;;  %v7808_v52 = vmul.f32 %v7319_v11, %v7378_v31  ;;  %v916_v54 = vmul.f32 %v7400_v32, %v14148_v58  ;;  %v7820_v27 = vadd.f32 %v1562_v24, %v7575_v60  ;;  %v14151_v57 = vld [vmem:[#allocation10_spill] sm:$0xff]  ;;  %v7828_v13 = vpop.permute.xlu0 %1093 }
 0x121   : > { %14145 = vst [vmem:[#allocation67_spill] sm:$0xff] %v7804_v14  ;;  %14147 = vst [vmem:[#allocation69_spill] sm:$0xff] %v7812_v22  ;;  %v915_v50 = vmul.f32 %v7400_v32, %v14151_v57  ;;  %v824_v3 = vadd.f32 %v810_v61, %v7571_v16  ;;  %v823_v11 = vadd.f32 %v809_v59, %v7584_v55  ;;  %1648 = vperm.xlu1 %6894, %v7801_v25   ;;  %v7872_v14 = vld [vmem:[%s7018_s23 + $0x1e0] sm:$0xff]  ;;  %v1746_v25 = vld [vmem:[%s7018_s23 + $0x388] sm:$0xff] }
 0x122   : > { %14146 = vst [vmem:[#allocation68_spill] sm:$0xff] %v7808_v52  ;;  %14149 = vst [vmem:[#allocation9_spill] sm:$0xff] %v7817_v35  ;;  %v7826_v52 = vpop.permute.xlu1 %1098  ;;  %v7831_v22 = vadd.f32 %v1561_v6, %v7579_v30  ;;  %v7835_v60 = vmul.f32 %v7325_v18, %v7378_v31  ;;  %v7839_v24 = vmul.f32 %v7327_v15, %v7378_v31  ;;  %v14155_v30 = vld [vmem:[#allocation12_spill] sm:$0xff]  ;;  %v14156_v18 = vld [vmem:[#allocation13_spill] sm:$0xff]  ;;  %1643 = vperm.xlu0 %6893, %v7817_v35  }
 0x123   : > { %14150 = vst [vmem:[#allocation70_spill] sm:$0xff] %v7820_v27  ;;  %14152 = vst [vmem:[#allocation10_spill] sm:$0xff] %v7828_v13  ;;  %v14154_v27 = vld [vmem:[#allocation11_spill] sm:$0xff]  ;;  %v7845_v55 = vadd.f32 %v914_v46, %v7620_v4  ;;  %v7848_v61 = vadd.f32 %v913_v34, %v7623_v44  ;;  %v917_v59 = vmul.f32 %v7400_v32, %v14155_v30  ;;  %v7856_v15 = vld [vmem:[%s7018_s23 + $0x1e8] sm:$0xff] }
 0x124   : > { %14153 = vst [vmem:[#allocation71_spill] sm:$0xff] %v7831_v22  ;;  %v918_v16 = vmul.f32 %v7400_v32, %v14154_v27  ;;  %v920_v6 = vmul.f32 %v7400_v32, %v14156_v18  ;;  %14157 = vst [vmem:[#allocation11_spill] sm:$0xff] %v7856_v15  ;;  %v7859_v22 = vadd.f32 %v916_v54, %v7646_v56  ;;  %v14158_v46 = vld [vmem:[#allocation14_spill] sm:$0xff]  ;;  %v14160_v54 = vld [vmem:[#allocation15_spill] sm:$0xff]  ;;  %v7898_v21 = vpop.permute.xlu0 %1103 }
 0x125   : > { %v7863_v4 = vmul.f32 %v14148_v58, %v7378_v31  ;;  %v7867_v44 = vmul.f32 %v14151_v57, %v7378_v31  ;;  %v919_v34 = vmul.f32 %v7400_v32, %v14158_v46  ;;  %14159 = vst [vmem:[#allocation12_spill] sm:$0xff] %v7872_v14  ;;  %v7875_v5 = vadd.f32 %v915_v50, %v7662_v2  ;;  %v14163_v50 = vld [vmem:[#allocation18_spill] sm:$0xff] }
 0x126   : > { %v7879_v56 = vmul.f32 %v14154_v27, %v7378_v31  ;;  %v922_v58 = vmul.f32 %v7400_v32, %v14160_v54  ;;  %v921_v57 = vmul.f32 %v7400_v32, %v14161_v62  ;;  %v7885_v19 = vpop.permute.xlu1 %1108  ;;  %v7888_v20 = vadd.f32 %v918_v16, %v7686_v8  ;;  %14165 = vst [vmem:[#allocation14_spill] sm:$0xff] %v7898_v21 }
 0x127   : > { %14162 = vst [vmem:[#allocation13_spill] sm:$0xff] %v7885_v19  ;;  %v7892_v2 = vmul.f32 %v14155_v30, %v7378_v31  ;;  %v924_v27 = vmul.f32 %v7400_v32, %v14163_v50  ;;  %v923_v48 = vmul.f32 %v7400_v32, %v14164_v51  ;;  %1658 = vperm.xlu1 %6894, %v7856_v15   ;;  %v1745_v15 = vld [vmem:[%s7018_s23 + $0x380] sm:$0xff] }
 0x128   : > { %v7902_v26 = vadd.f32 %v917_v59, %v7689_v28  ;;  %v7905_v8 = vadd.f32 %v920_v6, %v7730_v10  ;;  %v7909_v16 = vmul.f32 %v14156_v18, %v7378_v31  ;;  %v7913_v30 = vmul.f32 %v14158_v46, %v7378_v31  ;;  %1653 = vperm.xlu0 %6893, %v7872_v14   ;;  %v14166_v10 = vld [vmem:[#allocation20_spill] sm:$0xff]  ;;  %v14167_v6 = vld [vmem:[#allocation21_spill] sm:$0xff] }
 0x129   : > { %v7918_v37 = vadd.f32 %v919_v34, %v7733_v7  ;;  %v7922_v28 = vmul.f32 %v14160_v54, %v7378_v31  ;;  %v926_v59 = vmul.f32 %v7400_v32, %v14166_v10  ;;  %v925_v18 = vmul.f32 %v7400_v32, %v14167_v6 }
 0x12a   : > { %v7930_v46 = vadd.f32 %v922_v58, %v7758_v42  ;;  %v7933_v14 = vadd.f32 %v921_v57, %v7761_v12  ;;  %v7937_v7 = vmul.f32 %v14161_v62, %v7378_v31  ;;  %v7941_v34 = vmul.f32 %v14163_v50, %v7378_v31  ;;  %v7943_v54 = vpop.permute.xlu1 %1118  ;;  %v14169_v12 = vld [vmem:[#allocation23_spill] sm:$0xff]  ;;  %v7955_v62 = vpop.permute.xlu0 %1113 }
 0x12b   : > { %14168 = vst [vmem:[#allocation15_spill] sm:$0xff] %v7943_v54  ;;  %v7945_v35 = vadd.f32 %v924_v27, %v822_v0  ;;  %v7947_v43 = vadd.f32 %v923_v48, %v821_v9  ;;  %v7951_v42 = vmul.f32 %v14164_v51, %v7378_v31  ;;  %v2068_v58 = vmul.f32 %v14169_v12, %v7387_v29  ;;  %v14171_v0 = vld [vmem:[#allocation28_spill] sm:$0xff]  ;;  %v1748_v9 = vld [vmem:[%s7018_s23 + $0x398] sm:$0xff] }
 0x12c   : > { %14170 = vst [vmem:[#allocation16_spill] sm:$0xff] %v7955_v62  ;;  %1766 = vperm.xlu1 %6894, %v1746_v25   ;;  %v7959_v57 = vmul.f32 %v14166_v10, %v7378_v31  ;;  %v1030_v50 = vmul.f32 %v14171_v0, %v14169_v12  ;;  %v14172_v27 = vld [vmem:[#allocation24_spill] sm:$0xff]  ;;  %1761 = vperm.xlu0 %6893, %v1745_v15   ;;  %v1747_v62 = vld [vmem:[%s7018_s23 + $0x390] sm:$0xff] }
 0x12d   : > { %v1029_v48 = vmul.f32 %v14171_v0, %v14172_v27  ;;  %v2067_v51 = vmul.f32 %v14172_v27, %v7387_v29  ;;  %v7968_v47 = vadd.f32 %v926_v59, %v824_v3  ;;  %v7970_v17 = vadd.f32 %v925_v18, %v823_v11  ;;  %v14175_v15 = vld [vmem:[#allocation29_spill] sm:$0xff] }
 0x12e   : > { %v7974_v25 = vmul.f32 %v14167_v6, %v7378_v31  ;;  %v7978_v10 = vmul.f32 %v14169_v12, %v7400_v32  ;;  %v7983_v54 = vmul.f32 %v14169_v12, %v7378_v31  ;;  %v7987_v3 = vmul.f32 %v14172_v27, %v7400_v32  ;;  %v7995_v6 = vpop.permute.xlu1 %1128 }
 0x12f   : > { %v7991_v11 = vmul.f32 %v14172_v27, %v7378_v31  ;;  %v1032_v59 = vmul.f32 %v14171_v0, %v14175_v15  ;;  %14176 = vst [vmem:[#allocation20_spill] sm:$0xff] %v7995_v6  ;;  %v2070_v18 = vmul.f32 %v14175_v15, %v7387_v29  ;;  %v8006_v27 = vadd.f32 %v2068_v58, %v7835_v60  ;;  %v1750_v6 = vld [vmem:[%s7018_s23 + $0x3a8] sm:$0xff] }
 0x130   : > { %14173 = vst [vmem:[#allocation18_spill] sm:$0xff] %v7978_v10  ;;  %14174 = vst [vmem:[#allocation19_spill] sm:$0xff] %v7987_v3  ;;  %v14177_v10 = vld [vmem:[#allocation30_spill] sm:$0xff]  ;;  %v8003_v3 = vpop.permute.xlu0 %1123  ;;  %1776 = vperm.xlu1 %6894, %v1748_v9   ;;  %v8010_v21 = vmul.f32 %v14175_v15, %v7400_v32  ;;  %1771 = vperm.xlu0 %6893, %v1747_v62   ;;  %v8014_v63 = vadd.f32 %v1030_v50, %v7845_v55  ;;  %v14183_v55 = vld [vmem:[#allocation7_spill] sm:$0xff] }
 0x131   : > { %v1031_v12 = vmul.f32 %v14171_v0, %v14177_v10  ;;  %v2069_v39 = vmul.f32 %v14177_v10, %v7387_v29  ;;  %14178 = vst [vmem:[#allocation21_spill] sm:$0xff] %v8003_v3  ;;  %v8017_v19 = vadd.f32 %v1029_v48, %v7848_v61  ;;  %v8020_v13 = vadd.f32 %v2067_v51, %v7839_v24  ;;  %v1749_v61 = vld [vmem:[%s7018_s23 + $0x3a0] sm:$0xff]  ;;  %v14184_v50 = vld [vmem:[#allocation32_spill] sm:$0xff] }
 0x132   : > { %14179 = vst [vmem:[#allocation23_spill] sm:$0xff] %v8010_v21  ;;  %v8024_v9 = vmul.f32 %v14175_v15, %v7378_v31  ;;  %v8028_v60 = vmul.f32 %v14177_v10, %v7400_v32  ;;  %v8032_v58 = vmul.f32 %v14177_v10, %v7378_v31  ;;  %v1034_v62 = vmul.f32 %v14171_v0, %v14183_v55  ;;  %v8043_v15 = vpop.permute.xlu1 %1138 }
 0x133   : > { %v2072_v24 = vmul.f32 %v14183_v55, %v7387_v29  ;;  %v1033_v48 = vmul.f32 %v14171_v0, %v14184_v50  ;;  %v2071_v51 = vmul.f32 %v14184_v50, %v7387_v29  ;;  %14185 = vst [vmem:[#allocation7_spill] sm:$0xff] %v8043_v15  ;;  %v8050_v10 = vmul.f32 %v14183_v55, %v7400_v32 }
 0x134   : > { %14180 = vst [vmem:[#allocation24_spill] sm:$0xff] %v8024_v9  ;;  %14181 = vst [vmem:[#allocation29_spill] sm:$0xff] %v8028_v60  ;;  %v8046_v60 = vadd.f32 %v1032_v59, %v7859_v22  ;;  %v8052_v21 = vpop.permute.xlu0 %1133  ;;  %1786 = vperm.xlu1 %6894, %v1750_v6   ;;  %v8055_v3 = vadd.f32 %v2070_v18, %v7863_v4  ;;  %v8061_v9 = vadd.f32 %v2069_v39, %v7867_v44  ;;  %v14190_v4 = vld [vmem:[#allocation6_spill] sm:$0xff]  ;;  %v14191_v44 = vld [vmem:[#allocation4_spill] sm:$0xff] }
 0x135   : > { %14182 = vst [vmem:[#allocation30_spill] sm:$0xff] %v8032_v58  ;;  %14186 = vst [vmem:[#allocation32_spill] sm:$0xff] %v8050_v10  ;;  %v8058_v58 = vadd.f32 %v1031_v12, %v7875_v5  ;;  %v8065_v22 = vmul.f32 %v14183_v55, %v7378_v31  ;;  %v8069_v59 = vmul.f32 %v14184_v50, %v7400_v32  ;;  %1781 = vperm.xlu0 %6893, %v1749_v61   ;;  %v1752_v5 = vld [vmem:[%s7018_s23 + $0x3b8] sm:$0xff]  ;;  %v1751_v10 = vld [vmem:[%s7018_s23 + $0x3b0] sm:$0xff] }
 0x136   : > { %14187 = vst [vmem:[#allocation72_spill] sm:$0xff] %v8052_v21  ;;  %v8073_v6 = vmul.f32 %v14184_v50, %v7378_v31  ;;  %v1036_v18 = vmul.f32 %v14171_v0, %v14190_v4  ;;  %v2074_v39 = vmul.f32 %v14190_v4, %v7387_v29  ;;  %v1035_v12 = vmul.f32 %v14171_v0, %v14191_v44  ;;  %v8092_v61 = vpop.permute.xlu1 %1194 }
 0x137   : > { %14188 = vst [vmem:[#allocation73_spill] sm:$0xff] %v8069_v59  ;;  %v2073_v55 = vmul.f32 %v14191_v44, %v7387_v29  ;;  %v8086_v59 = vadd.f32 %v1034_v62, %v7888_v20  ;;  %v8090_v50 = vmul.f32 %v14190_v4, %v7400_v32  ;;  %14193 = vst [vmem:[#allocation4_spill] sm:$0xff] %v8092_v61 }
 0x138   : > { %14189 = vst [vmem:[#allocation74_spill] sm:$0xff] %v8073_v6  ;;  %v8095_v21 = vadd.f32 %v2072_v24, %v7879_v56  ;;  %v8098_v15 = vadd.f32 %v1033_v48, %v7902_v26  ;;  %v8101_v6 = vadd.f32 %v2071_v51, %v7892_v2  ;;  %v8105_v20 = vmul.f32 %v14190_v4, %v7378_v31  ;;  %v14197_v56 = vld [vmem:[#allocation34_spill] sm:$0xff]  ;;  %v8117_v26 = vpop.permute.xlu0 %1189  ;;  %v14199_v48 = vld [vmem:[#allocation35_spill] sm:$0xff] }
 0x139   : > { %14192 = vst [vmem:[#allocation6_spill] sm:$0xff] %v8090_v50  ;;  %v8109_v62 = vmul.f32 %v14191_v44, %v7400_v32  ;;  %v8113_v50 = vmul.f32 %v14191_v44, %v7378_v31  ;;  %v1038_v24 = vmul.f32 %v14171_v0, %v14197_v56  ;;  %14198 = vst [vmem:[#allocation34_spill] sm:$0xff] %v8117_v26  ;;  %1796 = vperm.xlu1 %6894, %v1752_v5  }
 0x13a   : > { %14194 = vst [vmem:[#allocation75_spill] sm:$0xff] %v8105_v20  ;;  %v2076_v2 = vmul.f32 %v14197_v56, %v7387_v29  ;;  %v1037_v51 = vmul.f32 %v14171_v0, %v14199_v48  ;;  %v2075_v4 = vmul.f32 %v14199_v48, %v7387_v29  ;;  %1791 = vperm.xlu0 %6893, %v1751_v10  }
 0x13b   : > { %14195 = vst [vmem:[#allocation76_spill] sm:$0xff] %v8109_v62  ;;  %14196 = vst [vmem:[#allocation77_spill] sm:$0xff] %v8113_v50  ;;  %v1754_v62 = vld [vmem:[%s7018_s23 + $0x3c8] sm:$0xff]  ;;  %v8127_v44 = vadd.f32 %v1036_v18, %v7905_v8  ;;  %v1040_v61 = vmul.f32 %v14171_v0, %v7608_v49  ;;  %v1753_v50 = vld [vmem:[%s7018_s23 + $0x3c0] sm:$0xff]  ;;  %v8133_v5 = vadd.f32 %v2074_v39, %v7909_v16 }
 0x13c   : > { %v8136_v26 = vadd.f32 %v1035_v12, %v7918_v37  ;;  %v8139_v20 = vadd.f32 %v2073_v55, %v7913_v30  ;;  %v8143_v10 = vmul.f32 %v14197_v56, %v7400_v32  ;;  %v8147_v8 = vmul.f32 %v14197_v56, %v7378_v31  ;;  %v8155_v37 = vpop.permute.xlu1 %1204  ;;  %v8165_v55 = vpop.permute.xlu0 %1199 }
 0x13d   : > { %v8151_v18 = vmul.f32 %v14199_v48, %v7400_v32  ;;  %v2078_v16 = vmul.f32 %v7608_v49, %v7387_v29  ;;  %14202 = vst [vmem:[#allocation79_spill] sm:$0xff] %v8155_v37  ;;  %v8159_v30 = vmul.f32 %v14199_v48, %v7378_v31  ;;  %v1039_v39 = vmul.f32 %v14171_v0, %v7610_v23 }
 0x13e   : > { %14200 = vst [vmem:[#allocation35_spill] sm:$0xff] %v8143_v10  ;;  %v2077_v12 = vmul.f32 %v7610_v23, %v7387_v29  ;;  %14204 = vst [vmem:[#allocation81_spill] sm:$0xff] %v8165_v55  ;;  %1806 = vperm.xlu1 %6894, %v1754_v62   ;;  %v8168_v56 = vadd.f32 %v1038_v24, %v7930_v46  ;;  %1801 = vperm.xlu0 %6893, %v1753_v50   ;;  %v1756_v10 = vld [vmem:[%s7018_s23 + $0x3d8] sm:$0xff] }
 0x13f   : > { %14201 = vst [vmem:[#allocation78_spill] sm:$0xff] %v8151_v18  ;;  %14203 = vst [vmem:[#allocation80_spill] sm:$0xff] %v8159_v30  ;;  %v8172_v18 = vmul.f32 %v7608_v49, %v7400_v32  ;;  %v8176_v48 = vadd.f32 %v2076_v2, %v7922_v28  ;;  %v8179_v37 = vadd.f32 %v1037_v51, %v7933_v14  ;;  %v1755_v28 = vld [vmem:[%s7018_s23 + $0x3d0] sm:$0xff] }
 0x140   : > { %v8182_v30 = vadd.f32 %v2075_v4, %v7937_v7  ;;  %v8186_v62 = vmul.f32 %v7608_v49, %v7378_v31  ;;  %v8190_v46 = vmul.f32 %v7610_v23, %v7400_v32  ;;  %v8194_v50 = vmul.f32 %v7610_v23, %v7378_v31  ;;  %v8206_v2 = vpop.permute.xlu1 %1214 }
 0x141   : > { %14205 = vst [vmem:[#allocation82_spill] sm:$0xff] %v8172_v18  ;;  %v8198_v24 = vadd.f32 %v1040_v61, %v7945_v35  ;;  %v1042_v14 = vmul.f32 %v14171_v0, %v7664_v45  ;;  %v2080_v49 = vmul.f32 %v7664_v45, %v7387_v29  ;;  %v1041_v7 = vmul.f32 %v14171_v0, %v7666_v40  ;;  %v8217_v61 = vpop.permute.xlu0 %1209 }
 0x142   : > { %14206 = vst [vmem:[#allocation83_spill] sm:$0xff] %v8190_v46  ;;  %14207 = vst [vmem:[#allocation84_spill] sm:$0xff] %v8206_v2  ;;  %v8209_v51 = vadd.f32 %v2078_v16, %v7941_v34  ;;  %v8213_v23 = vmul.f32 %v7664_v45, %v7400_v32  ;;  %v2079_v35 = vmul.f32 %v7666_v40, %v7387_v29  ;;  %1816 = vperm.xlu1 %6894, %v1756_v10   ;;  %v1758_v10 = vld [vmem:[%s7018_s23 + $0x3e8] sm:$0xff] }
 0x143   : > { %14209 = vst [vmem:[#allocation86_spill] sm:$0xff] %v8217_v61  ;;  %v8220_v4 = vadd.f32 %v1039_v39, %v7947_v43  ;;  %v8223_v46 = vadd.f32 %v2077_v12, %v7951_v42  ;;  %v8227_v34 = vmul.f32 %v7664_v45, %v7378_v31  ;;  %v2572_v16 = vmul.f32 %v7720_v53, %v7387_v29  ;;  %v1757_v12 = vld [vmem:[%s7018_s23 + $0x3e0] sm:$0xff] }
 0x144   : > { %14208 = vst [vmem:[#allocation85_spill] sm:$0xff] %v8213_v23  ;;  %v14211_v23 = vld [vmem:[#allocation31_spill] sm:$0xff]  ;;  %v2096_v61 = vmul.f32 %v7720_v53, %v7392_v33  ;;  %1811 = vperm.xlu0 %6893, %v1755_v28   ;;  %v8238_v43 = vmul.f32 %v7666_v40, %v7400_v32  ;;  %v8242_v42 = vmul.f32 %v7666_v40, %v7378_v31  ;;  %v8251_v28 = vpop.permute.xlu1 %1224 }
 0x145   : > { %14210 = vst [vmem:[#allocation87_spill] sm:$0xff] %v8227_v34  ;;  %v1146_v18 = vmul.f32 %v14211_v23, %v7720_v53  ;;  %v2571_v45 = vmul.f32 %v7722_v1, %v7387_v29  ;;  %v1145_v39 = vmul.f32 %v14211_v23, %v7722_v1  ;;  %v2095_v2 = vmul.f32 %v7722_v1, %v7392_v33 }
 0x146   : > { %14212 = vst [vmem:[#allocation88_spill] sm:$0xff] %v8238_v43  ;;  %14213 = vst [vmem:[#allocation89_spill] sm:$0xff] %v8242_v42  ;;  %v8254_v55 = vadd.f32 %v1042_v14, %v7968_v47  ;;  %v8257_v43 = vadd.f32 %v2080_v49, %v7959_v57  ;;  %v8260_v40 = vadd.f32 %v1041_v7, %v7970_v17  ;;  %v8264_v42 = vpop.permute.xlu0 %1219  ;;  %1826 = vperm.xlu1 %6894, %v1758_v10  }
 0x147   : > { %14214 = vst [vmem:[#allocation90_spill] sm:$0xff] %v8251_v28  ;;  %v1148_v31 = vmul.f32 %v14211_v23, %v7775_v38  ;;  %v8267_v34 = vadd.f32 %v2079_v35, %v7974_v25  ;;  %v8271_v28 = vmul.f32 %v7720_v53, %v14171_v0  ;;  %v8275_v47 = vmul.f32 %v7722_v1, %v14171_v0 }
 0x148   : > { %v8278_v17 = vadd.f32 %v2096_v61, %v8006_v27  ;;  %v8281_v57 = vadd.f32 %v1146_v18, %v8014_v63  ;;  %v2098_v14 = vmul.f32 %v7775_v38, %v7392_v33  ;;  %1821 = vperm.xlu0 %6893, %v1757_v12   ;;  %v8286_v25 = vadd.f32 %v2572_v16, %v7983_v54  ;;  %v8305_v61 = vpop.permute.xlu1 %1234  ;;  %v14224_v12 = vld [vmem:[#allocation10_spill] sm:$0xff] }
 0x149   : > { %14215 = vst [vmem:[#allocation91_spill] sm:$0xff] %v8271_v28  ;;  %14216 = vst [vmem:[#allocation92_spill] sm:$0xff] %v8275_v47  ;;  %v2574_v49 = vmul.f32 %v7775_v38, %v7387_v29  ;;  %v2573_v7 = vmul.f32 %v7777_v41, %v7387_v29  ;;  %v8293_v35 = vadd.f32 %v1145_v39, %v8017_v19  ;;  %v14223_v39 = vld [vmem:[#allocation5_spill] sm:$0xff] }
 0x14a   : > { %14217 = vst [vmem:[#allocation93_spill] sm:$0xff] %v8286_v25  ;;  %v8296_v27 = vadd.f32 %v2571_v45, %v7991_v11  ;;  %v8299_v63 = vadd.f32 %v2095_v2, %v8020_v13  ;;  %v1147_v18 = vmul.f32 %v14211_v23, %v7777_v41  ;;  %v2097_v54 = vmul.f32 %v7777_v41, %v7392_v33  ;;  %v8314_v11 = vpop.permute.xlu0 %1229 }
 0x14b   : > { %v8309_v16 = vmul.f32 %v7720_v53, %v7400_v32  ;;  %v8312_v19 = vadd.f32 %v1148_v31, %v8046_v60  ;;  %1934 = vperm.xlu1 %6894, %v7595_v36   ;;  %v8319_v13 = vmul.f32 %v7775_v38, %v14171_v0  ;;  %v8323_v2 = vmul.f32 %v7777_v41, %v14171_v0 }
 0x14c   : > { %14218 = vst [vmem:[#allocation94_spill] sm:$0xff] %v8296_v27  ;;  %v8327_v10 = vmul.f32 %v7722_v1, %v7400_v32  ;;  %v2576_v31 = vmul.f32 %v7826_v52, %v7387_v29  ;;  %v8332_v60 = vadd.f32 %v2098_v14, %v8055_v3  ;;  %v1150_v36 = vmul.f32 %v14211_v23, %v7826_v52  ;;  %v14225_v27 = vld [vmem:[#allocation24_spill] sm:$0xff]  ;;  %v8357_v47 = vpop.permute.xlu1 %1244 }
 0x14d   : > { %14219 = vst [vmem:[#allocation95_spill] sm:$0xff] %v8309_v16  ;;  %14220 = vst [vmem:[#allocation96_spill] sm:$0xff] %v8319_v13  ;;  %v2100_v45 = vmul.f32 %v7826_v52, %v7392_v33  ;;  %1929 = vperm.xlu0 %6893, %v14223_v39   ;;  %v2575_v16 = vmul.f32 %v14224_v12, %v7387_v29  ;;  %v8344_v25 = vadd.f32 %v2574_v49, %v14225_v27  ;;  %v14230_v49 = vld [vmem:[#allocation13_spill] sm:$0xff] }
 0x14e   : > { %14221 = vst [vmem:[#allocation97_spill] sm:$0xff] %v8323_v2  ;;  %14222 = vst [vmem:[#allocation98_spill] sm:$0xff] %v8327_v10  ;;  %v1149_v10 = vmul.f32 %v14211_v23, %v14224_v12  ;;  %v14227_v2 = vld [vmem:[#allocation30_spill] sm:$0xff]  ;;  %v8350_v14 = vadd.f32 %v1147_v18, %v8058_v58  ;;  %v8353_v13 = vadd.f32 %v2097_v54, %v8061_v9 }
 0x14f   : > { %14226 = vst [vmem:[#allocation5_spill] sm:$0xff] %v8344_v25  ;;  %v8347_v3 = vadd.f32 %v2573_v7, %v14227_v2  ;;  %v2099_v39 = vmul.f32 %v14224_v12, %v7392_v33  ;;  %v8361_v28 = vmul.f32 %v7775_v38, %v7400_v32  ;;  %v1152_v27 = vmul.f32 %v14211_v23, %v14230_v49  ;;  %v8365_v7 = vpop.permute.xlu0 %1239  ;;  %v14232_v2 = vld [vmem:[#allocation44_spill] sm:$0xff] }
 0x150   : > { %14231 = vst [vmem:[#allocation30_spill] sm:$0xff] %v8365_v7  ;;  %1944 = vperm.xlu1 %6894, %v14232_v2   ;;  %v8370_v9 = vmul.f32 %v7826_v52, %v14171_v0  ;;  %v8374_v58 = vmul.f32 %v14224_v12, %v14171_v0  ;;  %v8378_v18 = vmul.f32 %v7777_v41, %v7400_v32 }
 0x151   : > { %14228 = vst [vmem:[#allocation10_spill] sm:$0xff] %v8347_v3  ;;  %14229 = vst [vmem:[#allocation24_spill] sm:$0xff] %v8361_v28  ;;  %v8381_v54 = vadd.f32 %v1150_v36, %v8086_v59  ;;  %v8384_v28 = vadd.f32 %v2100_v45, %v8095_v21  ;;  %v2102_v2 = vmul.f32 %v14230_v49, %v7392_v33  ;;  %v14236_v3 = vld [vmem:[#allocation36_spill] sm:$0xff]  ;;  %v14239_v36 = vld [vmem:[#allocation74_spill] sm:$0xff] }
 0x152   : > { %14233 = vst [vmem:[#allocation13_spill] sm:$0xff] %v8370_v9  ;;  %14234 = vst [vmem:[#allocation44_spill] sm:$0xff] %v8374_v58  ;;  %1939 = vperm.xlu0 %6893, %v14236_v3   ;;  %v8390_v25 = vadd.f32 %v2576_v31, %v8065_v22  ;;  %v2578_v58 = vmul.f32 %v14230_v49, %v7387_v29  ;;  %v8395_v9 = vadd.f32 %v1149_v10, %v8098_v15  ;;  %v8409_v31 = vpop.permute.xlu1 %1254 }
 0x153   : > { %14235 = vst [vmem:[#allocation99_spill] sm:$0xff] %v8378_v18  ;;  %v14238_v18 = vld [vmem:[#allocation14_spill] sm:$0xff]  ;;  %v8400_v21 = vadd.f32 %v2575_v16, %v14239_v36  ;;  %v8405_v3 = vadd.f32 %v2099_v39, %v8101_v6  ;;  %14241 = vst [vmem:[#allocation74_spill] sm:$0xff] %v8409_v31  ;;  %v8413_v15 = vmul.f32 %v7826_v52, %v7400_v32  ;;  %v8418_v16 = vpop.permute.xlu0 %1249  ;;  %v14245_v36 = vld [vmem:[#allocation51_spill] sm:$0xff] }
 0x154   : > { %14237 = vst [vmem:[#allocation36_spill] sm:$0xff] %v8390_v25  ;;  %v1151_v59 = vmul.f32 %v14211_v23, %v14238_v18  ;;  %v2577_v45 = vmul.f32 %v14238_v18, %v7387_v29  ;;  %v2101_v22 = vmul.f32 %v14238_v18, %v7392_v33  ;;  %v8416_v10 = vadd.f32 %v1152_v27, %v8127_v44  ;;  %v14254_v31 = vld [vmem:[#allocation75_spill] sm:$0xff] }
 0x155   : > { %14240 = vst [vmem:[#allocation14_spill] sm:$0xff] %v8400_v21  ;;  %14242 = vst [vmem:[#allocation100_spill] sm:$0xff] %v8413_v15  ;;  %1954 = vperm.xlu1 %6894, %v14245_v36   ;;  %v8423_v6 = vmul.f32 %v14230_v49, %v14171_v0  ;;  %v8427_v39 = vmul.f32 %v14238_v18, %v14171_v0  ;;  %v8431_v21 = vmul.f32 %v14224_v12, %v7400_v32  ;;  %v14249_v15 = vld [vmem:[#allocation15_spill] sm:$0xff] }
 0x156   : > { %14243 = vst [vmem:[#allocation101_spill] sm:$0xff] %v8416_v10  ;;  %14244 = vst [vmem:[#allocation102_spill] sm:$0xff] %v8418_v16  ;;  %v2580_v44 = vmul.f32 %v14249_v15, %v7387_v29  ;;  %v8436_v27 = vadd.f32 %v2102_v2, %v8133_v5  ;;  %v1154_v36 = vmul.f32 %v14211_v23, %v14249_v15  ;;  %v14253_v16 = vld [vmem:[#allocation16_spill] sm:$0xff] }
 0x157   : > { %14246 = vst [vmem:[#allocation51_spill] sm:$0xff] %v8423_v6  ;;  %14247 = vst [vmem:[#allocation103_spill] sm:$0xff] %v8427_v39  ;;  %v2104_v25 = vmul.f32 %v14249_v15, %v7392_v33  ;;  %v14251_v6 = vld [vmem:[#allocation41_spill] sm:$0xff]  ;;  %v8444_v39 = vadd.f32 %v1151_v59, %v8136_v26  ;;  %v8449_v10 = vadd.f32 %v2578_v58, %v14254_v31  ;;  %v8462_v59 = vpop.permute.xlu1 %1310  ;;  %v14260_v58 = vld [vmem:[#allocation20_spill] sm:$0xff] }
 0x158   : > { %14248 = vst [vmem:[#allocation104_spill] sm:$0xff] %v8431_v21  ;;  %14250 = vst [vmem:[#allocation15_spill] sm:$0xff] %v8436_v27  ;;  %1949 = vperm.xlu0 %6893, %v14251_v6   ;;  %v1153_v21 = vmul.f32 %v14211_v23, %v14253_v16  ;;  %v8453_v5 = vmul.f32 %v14230_v49, %v7400_v32  ;;  %v2579_v2 = vmul.f32 %v14253_v16, %v7387_v29  ;;  %v14258_v6 = vld [vmem:[#allocation77_spill] sm:$0xff] }
 0x159   : > { %14252 = vst [vmem:[#allocation41_spill] sm:$0xff] %v8444_v39  ;;  %14255 = vst [vmem:[#allocation16_spill] sm:$0xff] %v8449_v10  ;;  %v8458_v27 = vadd.f32 %v2101_v22, %v8139_v20  ;;  %v2103_v26 = vmul.f32 %v14253_v16, %v7392_v33  ;;  %v8465_v39 = vadd.f32 %v2577_v45, %v14258_v6  ;;  %v8469_v10 = vpop.permute.xlu0 %1305 }
 0x15a   : > { %14256 = vst [vmem:[#allocation75_spill] sm:$0xff] %v8453_v5  ;;  %14257 = vst [vmem:[#allocation105_spill] sm:$0xff] %v8462_v59  ;;  %v1156_v31 = vmul.f32 %v14211_v23, %v14260_v58  ;;  %v14262_v5 = vld [vmem:[#allocation61_spill] sm:$0xff]  ;;  %v8474_v7 = vmul.f32 %v14249_v15, %v14171_v0  ;;  %v8478_v20 = vmul.f32 %v14253_v16, %v14171_v0 }
 0x15b   : > { %14259 = vst [vmem:[#allocation77_spill] sm:$0xff] %v8465_v39  ;;  %14261 = vst [vmem:[#allocation20_spill] sm:$0xff] %v8469_v10  ;;  %1964 = vperm.xlu1 %6894, %v14262_v5   ;;  %v8482_v22 = vmul.f32 %v14238_v18, %v7400_v32  ;;  %v8485_v45 = vadd.f32 %v1154_v36, %v8168_v56  ;;  %v8488_v6 = vadd.f32 %v2104_v25, %v8176_v48  ;;  %v14266_v39 = vld [vmem:[#allocation50_spill] sm:$0xff] }
 0x15c   : > { %14263 = vst [vmem:[#allocation61_spill] sm:$0xff] %v8474_v7  ;;  %14264 = vst [vmem:[#allocation106_spill] sm:$0xff] %v8478_v20  ;;  %v2106_v5 = vmul.f32 %v14260_v58, %v7392_v33  ;;  %1959 = vperm.xlu0 %6893, %v14266_v39   ;;  %v8494_v7 = vadd.f32 %v2580_v44, %v8147_v8  ;;  %v2582_v20 = vmul.f32 %v14260_v58, %v7387_v29  ;;  %v8514_v44 = vpop.permute.xlu1 %1320 }
 0x15d   : > { %14265 = vst [vmem:[#allocation107_spill] sm:$0xff] %v8482_v22  ;;  %v8499_v10 = vadd.f32 %v1153_v21, %v8179_v37  ;;  %v14268_v22 = vld [vmem:[#allocation21_spill] sm:$0xff]  ;;  %v8505_v48 = vmul.f32 %v14249_v15, %v7400_v32  ;;  %v8510_v39 = vadd.f32 %v2103_v26, %v8182_v30  ;;  %14270 = vst [vmem:[#allocation108_spill] sm:$0xff] %v8514_v44  ;;  %v14271_v37 = vld [vmem:[#allocation80_spill] sm:$0xff] }
 0x15e   : > { %14267 = vst [vmem:[#allocation50_spill] sm:$0xff] %v8494_v7  ;;  %v1155_v56 = vmul.f32 %v14211_v23, %v14268_v22  ;;  %v2581_v25 = vmul.f32 %v14268_v22, %v7387_v29  ;;  %v2105_v8 = vmul.f32 %v14268_v22, %v7392_v33  ;;  %v8517_v21 = vadd.f32 %v2579_v2, %v14271_v37  ;;  %v8522_v7 = vpop.permute.xlu0 %1315  ;;  %v14278_v2 = vld [vmem:[#allocation7_spill] sm:$0xff] }
 0x15f   : > { %14269 = vst [vmem:[#allocation21_spill] sm:$0xff] %v8505_v48  ;;  %v8520_v36 = vadd.f32 %v1156_v31, %v8198_v24  ;;  %14273 = vst [vmem:[#allocation109_spill] sm:$0xff] %v8522_v7  ;;  %v14274_v48 = vld [vmem:[#allocation9_spill] sm:$0xff]  ;;  %v8527_v59 = vmul.f32 %v14260_v58, %v14171_v0  ;;  %v8531_v30 = vmul.f32 %v14268_v22, %v14171_v0 }
 0x160   : > { %14272 = vst [vmem:[#allocation80_spill] sm:$0xff] %v8517_v21  ;;  %1974 = vperm.xlu1 %6894, %v14274_v48   ;;  %v8535_v26 = vmul.f32 %v14253_v16, %v7400_v32  ;;  %v2584_v24 = vmul.f32 %v14278_v2, %v7387_v29  ;;  %v8540_v31 = vadd.f32 %v2106_v5, %v8209_v51  ;;  %v14279_v21 = vld [vmem:[#allocation59_spill] sm:$0xff] }
 0x161   : > { %14275 = vst [vmem:[#allocation9_spill] sm:$0xff] %v8527_v59  ;;  %14276 = vst [vmem:[#allocation110_spill] sm:$0xff] %v8531_v30  ;;  %v1158_v48 = vmul.f32 %v14211_v23, %v14278_v2  ;;  %v2108_v37 = vmul.f32 %v14278_v2, %v7392_v33  ;;  %1969 = vperm.xlu0 %6893, %v14279_v21   ;;  %v8548_v30 = vadd.f32 %v1155_v56, %v8220_v4  ;;  %v14280_v59 = vld [vmem:[#allocation72_spill] sm:$0xff]  ;;  %v8566_v56 = vpop.permute.xlu1 %1330 }
 0x162   : > { %14277 = vst [vmem:[#allocation111_spill] sm:$0xff] %v8535_v26  ;;  %v1157_v26 = vmul.f32 %v14211_v23, %v14280_v59  ;;  %v8553_v7 = vadd.f32 %v2582_v20, %v8186_v62  ;;  %v8557_v51 = vmul.f32 %v14260_v58, %v7400_v32  ;;  %v2583_v5 = vmul.f32 %v14280_v59, %v7387_v29  ;;  %v14285_v62 = vld [vmem:[#allocation4_spill] sm:$0xff]  ;;  %v14286_v20 = vld [vmem:[#allocation33_spill] sm:$0xff]  ;;  %v8573_v23 = vpop.permute.xlu0 %1325 }
 0x163   : > { %v8562_v44 = vadd.f32 %v2105_v8, %v8223_v46  ;;  %v2107_v4 = vmul.f32 %v14280_v59, %v7392_v33  ;;  %14283 = vst [vmem:[#allocation72_spill] sm:$0xff] %v8566_v56  ;;  %v8569_v21 = vadd.f32 %v2581_v25, %v8194_v50  ;;  %14287 = vst [vmem:[#allocation4_spill] sm:$0xff] %v8573_v23  ;;  %v14293_v33 = vld [vmem:[#allocation87_spill] sm:$0xff] }
 0x164   : > { %14281 = vst [vmem:[#allocation7_spill] sm:$0xff] %v8553_v7  ;;  %14282 = vst [vmem:[#allocation59_spill] sm:$0xff] %v8557_v51  ;;  %v1262_v7 = vmul.f32 %v14286_v20, %v14285_v62  ;;  %v14288_v51 = vld [vmem:[#allocation12_spill] sm:$0xff]  ;;  %v8578_v29 = vmul.f32 %v14278_v2, %v14171_v0  ;;  %v8582_v46 = vmul.f32 %v14280_v59, %v14171_v0 }
 0x165   : > { %14284 = vst [vmem:[#allocation112_spill] sm:$0xff] %v8569_v21  ;;  %1984 = vperm.xlu1 %6894, %v14288_v51   ;;  %v8586_v8 = vmul.f32 %v14268_v22, %v7400_v32  ;;  %v2124_v50 = vmul.f32 %v14285_v62, %v7400_v32  ;;  %v8591_v25 = vadd.f32 %v1158_v48, %v8254_v55  ;;  %v14292_v21 = vld [vmem:[#allocation66_spill] sm:$0xff]  ;;  %v8615_v48 = vpop.permute.xlu1 %1340 }
 0x166   : > { %14289 = vst [vmem:[#allocation12_spill] sm:$0xff] %v8578_v29  ;;  %14290 = vst [vmem:[#allocation113_spill] sm:$0xff] %v8582_v46  ;;  %v8594_v51 = vadd.f32 %v2108_v37, %v8257_v43  ;;  %1979 = vperm.xlu0 %6893, %v14292_v21   ;;  %v1926_v29 = vld [vmem:[%s7018_s23 + $0x1f0] sm:$0xff]  ;;  %v8599_v23 = vadd.f32 %v2584_v24, %v14293_v33  ;;  %v14295_v46 = vld [vmem:[#allocation34_spill] sm:$0xff]  ;;  %v8606_v62 = vadd.f32 %v1157_v26, %v8260_v40 }
 0x167   : > { %14291 = vst [vmem:[#allocation114_spill] sm:$0xff] %v8586_v8  ;;  %v1261_v56 = vmul.f32 %v14286_v20, %v14295_v46  ;;  %v2123_v8 = vmul.f32 %v14295_v46, %v7400_v32  ;;  %v8610_v55 = vmul.f32 %v14278_v2, %v7400_v32  ;;  %v8613_v43 = vadd.f32 %v2107_v4, %v8267_v34  ;;  %v14297_v33 = vld [vmem:[#allocation89_spill] sm:$0xff]  ;;  %v14300_v21 = vld [vmem:[#allocation22_spill] sm:$0xff]  ;;  %v8631_v46 = vpop.permute.xlu0 %1335 }
 0x168   : > { %14294 = vst [vmem:[#allocation66_spill] sm:$0xff] %v8599_v23  ;;  %v8618_v24 = vadd.f32 %v2583_v5, %v14297_v33  ;;  %v8622_v37 = vmul.f32 %v14280_v59, %v7400_v32  ;;  %v8626_v40 = vmul.f32 %v7720_v53, %v14300_v21  ;;  %v8629_v26 = vadd.f32 %v1262_v7, %v8281_v57  ;;  %v14305_v57 = vld [vmem:[#allocation79_spill] sm:$0xff] }
 0x169   : > { %14296 = vst [vmem:[#allocation87_spill] sm:$0xff] %v8610_v55  ;;  %1994 = vperm.xlu1 %6894, %v1926_v29   ;;  %v8635_v34 = vmul.f32 %v7722_v1, %v14300_v21  ;;  %v8639_v5 = vmul.f32 %v7775_v38, %v14300_v21  ;;  %v8643_v4 = vmul.f32 %v7777_v41, %v14300_v21  ;;  %v14306_v33 = vld [vmem:[#allocation11_spill] sm:$0xff]  ;;  %v2208_v29 = vld [vmem:[%s7018_s23 + $0x210] sm:$0xff]  ;;  %v2207_v55 = vld [vmem:[%s7018_s23 + $0x208] sm:$0xff] }
 0x16a   : > { %14298 = vst [vmem:[#allocation34_spill] sm:$0xff] %v8618_v24  ;;  %14299 = vst [vmem:[#allocation89_spill] sm:$0xff] %v8622_v37  ;;  %v8646_v53 = vadd.f32 %v2124_v50, %v8278_v17  ;;  %v1264_v7 = vmul.f32 %v14286_v20, %v14305_v57  ;;  %1989 = vperm.xlu0 %6893, %v14306_v33   ;;  %v8654_v1 = vmul.f32 %v7826_v52, %v14300_v21  ;;  %v14309_v37 = vld [vmem:[#allocation81_spill] sm:$0xff] }
 0x16b   : > { %14301 = vst [vmem:[#allocation115_spill] sm:$0xff] %v8626_v40  ;;  %14302 = vst [vmem:[#allocation116_spill] sm:$0xff] %v8635_v34  ;;  %v8658_v38 = vmul.f32 %v14224_v12, %v14300_v21  ;;  %v8661_v41 = vadd.f32 %v1261_v56, %v8293_v35  ;;  %v8664_v17 = vadd.f32 %v2123_v8, %v8299_v63  ;;  %v14313_v56 = vld [vmem:[#allocation84_spill] sm:$0xff] }
 0x16c   : > { %14303 = vst [vmem:[#allocation117_spill] sm:$0xff] %v8639_v5  ;;  %14304 = vst [vmem:[#allocation118_spill] sm:$0xff] %v8643_v4  ;;  %v2126_v50 = vmul.f32 %v14305_v57, %v7400_v32  ;;  %v1263_v33 = vmul.f32 %v14286_v20, %v14309_v37  ;;  %v2125_v52 = vmul.f32 %v14309_v37, %v7400_v32  ;;  %v14314_v57 = vld [vmem:[#allocation86_spill] sm:$0xff] }
 0x16d   : > { %14307 = vst [vmem:[#allocation79_spill] sm:$0xff] %v8654_v1  ;;  %14308 = vst [vmem:[#allocation11_spill] sm:$0xff] %v8658_v38  ;;  %v8673_v1 = vpop.permute.xlu1 %1350  ;;  %v8677_v35 = vmul.f32 %v14230_v49, %v14300_v21  ;;  %v8681_v63 = vmul.f32 %v14238_v18, %v14300_v21  ;;  %v8685_v12 = vmul.f32 %v14249_v15, %v14300_v21  ;;  %v8693_v49 = vpop.permute.xlu0 %1345  ;;  %2228 = vperm.xlu1 %6894, %v2208_v29   ;;  %v14325_v4 = vld [vmem:[#allocation74_spill] sm:$0xff] }
 0x16e   : > { %v1266_v8 = vmul.f32 %v14286_v20, %v14313_v56  ;;  %v2128_v37 = vmul.f32 %v14313_v56, %v7400_v32  ;;  %v1265_v38 = vmul.f32 %v14286_v20, %v14314_v57  ;;  %v8697_v18 = vmul.f32 %v14253_v16, %v14300_v21  ;;  %2223 = vperm.xlu0 %6893, %v2207_v55  }
 0x16f   : > { %14310 = vst [vmem:[#allocation81_spill] sm:$0xff] %v8677_v35  ;;  %14311 = vst [vmem:[#allocation119_spill] sm:$0xff] %v8681_v63  ;;  %v8700_v63 = vadd.f32 %v1264_v7, %v8312_v19  ;;  %v2127_v15 = vmul.f32 %v14314_v57, %v7400_v32  ;;  %v8707_v56 = vmul.f32 %v14260_v58, %v14300_v21  ;;  %v2209_v19 = vld [vmem:[%s7018_s23 + $0x218] sm:$0xff] }
 0x170   : > { %14312 = vst [vmem:[#allocation120_spill] sm:$0xff] %v8685_v12  ;;  %14315 = vst [vmem:[#allocation84_spill] sm:$0xff] %v8697_v18  ;;  %v2210_v12 = vld [vmem:[%s7018_s23 + $0x220] sm:$0xff]  ;;  %v8711_v35 = vmul.f32 %v14268_v22, %v14300_v21  ;;  %v8714_v29 = vadd.f32 %v2126_v50, %v8332_v60  ;;  %v8717_v16 = vadd.f32 %v1263_v33, %v8350_v14  ;;  %v14320_v22 = vld [vmem:[#allocation90_spill] sm:$0xff] }
 0x171   : > { %14316 = vst [vmem:[#allocation86_spill] sm:$0xff] %v8707_v56  ;;  %v8722_v7 = vmul.f32 %v14278_v2, %v14300_v21  ;;  %v8726_v55 = vmul.f32 %v14280_v59, %v14300_v21  ;;  %v8729_v58 = vadd.f32 %v2125_v52, %v8353_v13  ;;  %v1268_v60 = vmul.f32 %v14286_v20, %v14320_v22  ;;  %v8737_v33 = vpop.permute.xlu1 %1360  ;;  %v8750_v57 = vpop.permute.xlu0 %1355 }
 0x172   : > { %14317 = vst [vmem:[#allocation121_spill] sm:$0xff] %v8711_v35  ;;  %v2130_v14 = vmul.f32 %v14320_v22, %v7400_v32  ;;  %v1267_v50 = vmul.f32 %v14286_v20, %v8264_v42  ;;  %v8740_v2 = vadd.f32 %v1266_v8, %v8381_v54  ;;  %v8743_v59 = vadd.f32 %v2128_v37, %v8384_v28  ;;  %v14324_v35 = vld [vmem:[#allocation41_spill] sm:$0xff] }
 0x173   : > { %14318 = vst [vmem:[#allocation122_spill] sm:$0xff] %v8722_v7  ;;  %14319 = vst [vmem:[#allocation123_spill] sm:$0xff] %v8726_v55  ;;  %v8746_v13 = vadd.f32 %v1265_v38, %v8395_v9  ;;  %v2129_v52 = vmul.f32 %v8264_v42, %v7400_v32  ;;  %2238 = vperm.xlu1 %6894, %v2210_v12   ;;  %v8753_v22 = vadd.f32 %v2127_v15, %v8405_v3  ;;  %v2212_v9 = vld [vmem:[%s7018_s23 + $0x230] sm:$0xff]  ;;  %v14321_v12 = vld [vmem:[#allocation30_spill] sm:$0xff] }
 0x174   : > { %v1270_v54 = vmul.f32 %v14286_v20, %v8305_v61  ;;  %v2132_v8 = vmul.f32 %v8305_v61, %v7400_v32  ;;  %v1269_v28 = vmul.f32 %v14286_v20, %v8314_v11  ;;  %2233 = vperm.xlu0 %6893, %v2209_v19   ;;  %v2131_v42 = vmul.f32 %v8314_v11, %v7400_v32  ;;  %v2211_v15 = vld [vmem:[%s7018_s23 + $0x228] sm:$0xff]  ;;  %v14322_v55 = vld [vmem:[#allocation101_spill] sm:$0xff]  ;;  %v14323_v7 = vld [vmem:[#allocation15_spill] sm:$0xff] }
 0x175   : > { %v1272_v38 = vmul.f32 %v14286_v20, %v8357_v47  ;;  %v2134_v3 = vmul.f32 %v8357_v47, %v7400_v32  ;;  %v1271_v37 = vmul.f32 %v14286_v20, %v14321_v12  ;;  %v8772_v61 = vadd.f32 %v1268_v60, %v14322_v55  ;;  %v8782_v18 = vpop.permute.xlu1 %1370 }
 0x176   : > { %v8775_v19 = vadd.f32 %v2130_v14, %v14323_v7  ;;  %v8778_v56 = vadd.f32 %v1267_v50, %v14324_v35  ;;  %v2133_v11 = vmul.f32 %v14321_v12, %v7400_v32  ;;  %v8785_v47 = vadd.f32 %v2129_v52, %v8458_v27  ;;  %v14326_v7 = vld [vmem:[#allocation102_spill] sm:$0xff]  ;;  %v8793_v35 = vpop.permute.xlu0 %1365 }
 0x177   : > { %v1274_v55 = vmul.f32 %v14286_v20, %v14325_v4  ;;  %v2136_v60 = vmul.f32 %v14325_v4, %v7400_v32  ;;  %v1273_v14 = vmul.f32 %v14286_v20, %v14326_v7  ;;  %2248 = vperm.xlu1 %6894, %v2212_v9   ;;  %v8796_v50 = vadd.f32 %v1270_v54, %v8485_v45  ;;  %v2214_v4 = vld [vmem:[%s7018_s23 + $0x240] sm:$0xff]  ;;  %v2213_v54 = vld [vmem:[%s7018_s23 + $0x238] sm:$0xff] }
 0x178   : > { %v8799_v12 = vadd.f32 %v2132_v8, %v8488_v6  ;;  %v8802_v27 = vadd.f32 %v1269_v28, %v8499_v10  ;;  %v2135_v52 = vmul.f32 %v14326_v7, %v7400_v32  ;;  %2243 = vperm.xlu0 %6893, %v2211_v15   ;;  %v8808_v5 = vadd.f32 %v2131_v42, %v8510_v39  ;;  %v14327_v8 = vld [vmem:[#allocation105_spill] sm:$0xff]  ;;  %v14328_v28 = vld [vmem:[#allocation52_spill] sm:$0xff] }
 0x179   : > { %v8811_v34 = vadd.f32 %v1272_v38, %v8520_v36  ;;  %v8814_v45 = vadd.f32 %v2134_v3, %v8540_v31  ;;  %v8817_v6 = vadd.f32 %v1271_v37, %v8548_v30  ;;  %v8821_v10 = vadd.f32 %v2133_v11, %v8562_v44  ;;  %v14329_v42 = vld [vmem:[#allocation20_spill] sm:$0xff]  ;;  %v8829_v38 = vpop.permute.xlu1 %1426  ;;  %v2216_v11 = vld [vmem:[%s7018_s23 + $0x250] sm:$0xff] }
 0x17a   : > { %v1378_v9 = vmul.f32 %v14328_v28, %v14327_v8  ;;  %v2152_v39 = vmul.f32 %v14327_v8, %v14171_v0  ;;  %v1377_v36 = vmul.f32 %v14328_v28, %v14329_v42  ;;  %v8832_v31 = vadd.f32 %v1274_v55, %v8591_v25  ;;  %v8842_v37 = vpop.permute.xlu0 %1421 }
 0x17b   : > { %v8835_v30 = vadd.f32 %v2136_v60, %v8594_v51  ;;  %v8838_v44 = vadd.f32 %v1273_v14, %v8606_v62  ;;  %v2151_v3 = vmul.f32 %v14329_v42, %v14171_v0  ;;  %2258 = vperm.xlu1 %6894, %v2214_v4   ;;  %v8845_v15 = vadd.f32 %v2135_v52, %v8613_v43  ;;  %v14332_v43 = vld [vmem:[#allocation108_spill] sm:$0xff]  ;;  %v14333_v14 = vld [vmem:[#allocation109_spill] sm:$0xff] }
 0x17c   : > { %v8849_v25 = vmul.f32 %v14327_v8, %v14286_v20  ;;  %v8853_v51 = vmul.f32 %v14327_v8, %v7400_v32  ;;  %v8857_v62 = vmul.f32 %v14329_v42, %v14286_v20  ;;  %2253 = vperm.xlu0 %6893, %v2213_v54   ;;  %v8862_v55 = vmul.f32 %v14329_v42, %v7400_v32  ;;  %v2215_v4 = vld [vmem:[%s7018_s23 + $0x248] sm:$0xff] }
 0x17d   : > { %v1380_v60 = vmul.f32 %v14328_v28, %v14332_v43  ;;  %v2154_v7 = vmul.f32 %v14332_v43, %v14171_v0  ;;  %v1379_v52 = vmul.f32 %v14328_v28, %v14333_v14  ;;  %v8872_v8 = vadd.f32 %v1378_v9, %v8629_v26  ;;  %v8879_v40 = vpop.permute.xlu1 %1436 }
 0x17e   : > { %14330 = vst [vmem:[#allocation90_spill] sm:$0xff] %v8857_v62  ;;  %14331 = vst [vmem:[#allocation30_spill] sm:$0xff] %v8862_v55  ;;  %v8875_v54 = vadd.f32 %v1377_v36, %v8661_v41  ;;  %v2153_v42 = vmul.f32 %v14333_v14, %v14171_v0  ;;  %v8882_v24 = vadd.f32 %v2152_v39, %v8646_v53  ;;  %v8896_v9 = vpop.permute.xlu0 %1431  ;;  %v14338_v39 = vld [vmem:[#allocation72_spill] sm:$0xff] }
 0x17f   : > { %v8886_v23 = vmul.f32 %v14332_v43, %v14286_v20  ;;  %v8890_v26 = vmul.f32 %v14332_v43, %v7400_v32  ;;  %v8894_v41 = vmul.f32 %v14333_v14, %v14286_v20  ;;  %2268 = vperm.xlu1 %6894, %v2216_v11   ;;  %v8899_v36 = vadd.f32 %v2151_v3, %v8664_v17 }
 0x180   : > { %v8903_v53 = vmul.f32 %v14333_v14, %v7400_v32  ;;  %v2156_v43 = vmul.f32 %v14338_v39, %v14171_v0  ;;  %2263 = vperm.xlu0 %6893, %v2215_v4   ;;  %v8913_v11 = vadd.f32 %v1380_v60, %v8700_v63  ;;  %v8916_v17 = vadd.f32 %v1379_v52, %v8717_v16  ;;  %v2217_v14 = vld [vmem:[%s7018_s23 + $0x258] sm:$0xff] }
 0x181   : > { %14334 = vst [vmem:[#allocation101_spill] sm:$0xff] %v8886_v23  ;;  %14335 = vst [vmem:[#allocation15_spill] sm:$0xff] %v8890_v26  ;;  %v1382_v23 = vmul.f32 %v14328_v28, %v14338_v39  ;;  %v14339_v26 = vld [vmem:[#allocation4_spill] sm:$0xff]  ;;  %v8926_v55 = vmul.f32 %v14338_v39, %v14286_v20  ;;  %v8930_v4 = vmul.f32 %v14338_v39, %v7400_v32  ;;  %v8936_v16 = vpop.permute.xlu1 %1446 }
 0x182   : > { %14336 = vst [vmem:[#allocation41_spill] sm:$0xff] %v8894_v41  ;;  %14337 = vst [vmem:[#allocation74_spill] sm:$0xff] %v8903_v53  ;;  %v1381_v62 = vmul.f32 %v14328_v28, %v14339_v26  ;;  %v2218_v41 = vld [vmem:[%s7018_s23 + $0x260] sm:$0xff]  ;;  %v2155_v3 = vmul.f32 %v14339_v26, %v14171_v0  ;;  %v8922_v53 = vadd.f32 %v2154_v7, %v8714_v29 }
 0x183   : > { %14340 = vst [vmem:[#allocation102_spill] sm:$0xff] %v8926_v55  ;;  %14341 = vst [vmem:[#allocation105_spill] sm:$0xff] %v8930_v4  ;;  %v8934_v63 = vmul.f32 %v14339_v26, %v14286_v20  ;;  %v8939_v60 = vadd.f32 %v2153_v42, %v8729_v58  ;;  %v8943_v29 = vmul.f32 %v14339_v26, %v7400_v32  ;;  %2278 = vperm.xlu1 %6894, %v2218_v41   ;;  %v2220_v55 = vld [vmem:[%s7018_s23 + $0x270] sm:$0xff] }
 0x184   : > { %v1384_v7 = vmul.f32 %v14328_v28, %v8615_v48  ;;  %v2158_v52 = vmul.f32 %v8615_v48, %v14171_v0  ;;  %v1383_v39 = vmul.f32 %v14328_v28, %v8631_v46  ;;  %v8954_v58 = vadd.f32 %v1382_v23, %v8740_v2  ;;  %2273 = vperm.xlu0 %6893, %v2217_v14   ;;  %v2219_v2 = vld [vmem:[%s7018_s23 + $0x268] sm:$0xff] }
 0x185   : > { %14342 = vst [vmem:[#allocation20_spill] sm:$0xff] %v8934_v63  ;;  %14343 = vst [vmem:[#allocation108_spill] sm:$0xff] %v8943_v29  ;;  %v8951_v63 = vpop.permute.xlu0 %1441  ;;  %v8957_v42 = vadd.f32 %v1381_v62, %v8746_v13  ;;  %v2157_v26 = vmul.f32 %v8631_v46, %v14171_v0  ;;  %v8963_v29 = vadd.f32 %v2156_v43, %v8743_v59  ;;  %v8991_v14 = vpop.permute.xlu1 %1456 }
 0x186   : > { %v8967_v4 = vmul.f32 %v8615_v48, %v14286_v20  ;;  %v8971_v41 = vmul.f32 %v8615_v48, %v7400_v32  ;;  %v8975_v23 = vmul.f32 %v8631_v46, %v14286_v20  ;;  %v8979_v13 = vadd.f32 %v2155_v3, %v8753_v22 }
 0x187   : > { %v8983_v59 = vmul.f32 %v8631_v46, %v7400_v32  ;;  %v1386_v62 = vmul.f32 %v14328_v28, %v8673_v1  ;;  %v2160_v48 = vmul.f32 %v8673_v1, %v14171_v0  ;;  %v1385_v43 = vmul.f32 %v14328_v28, %v8693_v49  ;;  %2288 = vperm.xlu1 %6894, %v2220_v55  }
 0x188   : > { %14344 = vst [vmem:[#allocation109_spill] sm:$0xff] %v8967_v4  ;;  %14345 = vst [vmem:[#allocation72_spill] sm:$0xff] %v8971_v41  ;;  %v8997_v22 = vadd.f32 %v1383_v39, %v8778_v56  ;;  %v2159_v46 = vmul.f32 %v8693_v49, %v14171_v0  ;;  %v9008_v4 = vmul.f32 %v8673_v1, %v14286_v20  ;;  %2283 = vperm.xlu0 %6893, %v2219_v2  }
 0x189   : > { %14346 = vst [vmem:[#allocation4_spill] sm:$0xff] %v8975_v23  ;;  %14347 = vst [vmem:[#allocation124_spill] sm:$0xff] %v8983_v59  ;;  %v8994_v23 = vadd.f32 %v1384_v7, %v8772_v61  ;;  %v9001_v3 = vpop.permute.xlu0 %1451  ;;  %v9004_v59 = vadd.f32 %v2158_v52, %v8775_v19  ;;  %v9012_v61 = vmul.f32 %v8673_v1, %v7400_v32  ;;  %v2320_v7 = vld [vmem:[%s7018_s23 + $0x290] sm:$0xff] }
 0x18a   : > { %14348 = vst [vmem:[#allocation125_spill] sm:$0xff] %v9008_v4  ;;  %v9016_v56 = vmul.f32 %v8693_v49, %v14286_v20  ;;  %v9020_v39 = vadd.f32 %v2157_v26, %v8785_v47  ;;  %v9024_v19 = vmul.f32 %v8693_v49, %v7400_v32  ;;  %v1388_v55 = vmul.f32 %v14328_v28, %v8737_v33  ;;  %v2319_v4 = vld [vmem:[%s7018_s23 + $0x288] sm:$0xff]  ;;  %v9041_v26 = vpop.permute.xlu1 %1466 }
 0x18b   : > { %14349 = vst [vmem:[#allocation126_spill] sm:$0xff] %v9012_v61  ;;  %v2162_v1 = vmul.f32 %v8737_v33, %v14171_v0  ;;  %v1387_v52 = vmul.f32 %v14328_v28, %v8750_v57  ;;  %v9034_v2 = vadd.f32 %v1386_v62, %v8796_v50  ;;  %v9037_v47 = vadd.f32 %v1385_v43, %v8802_v27 }
 0x18c   : > { %14350 = vst [vmem:[#allocation127_spill] sm:$0xff] %v9016_v56  ;;  %14351 = vst [vmem:[#allocation128_spill] sm:$0xff] %v9024_v19  ;;  %v2161_v49 = vmul.f32 %v8750_v57, %v14171_v0  ;;  %v9044_v56 = vadd.f32 %v2160_v48, %v8799_v12  ;;  %v9048_v19 = vmul.f32 %v8737_v33, %v14286_v20  ;;  %2340 = vperm.xlu1 %6894, %v2320_v7   ;;  %v9076_v7 = vld [vmem:[%s13866_s1 + $0x8] ss:$0 sm:$0xff] }
 0x18d   : > { %v9052_v50 = vmul.f32 %v8737_v33, %v7400_v32  ;;  %v9056_v27 = vmul.f32 %v8750_v57, %v14286_v20  ;;  %v9058_v62 = vpop.permute.xlu0 %1461  ;;  %v9061_v43 = vadd.f32 %v2159_v46, %v8808_v5  ;;  %v9065_v12 = vmul.f32 %v8750_v57, %v7400_v32  ;;  %2335 = vperm.xlu0 %6893, %v2319_v4   ;;  %v2322_v5 = vld [vmem:[%s7018_s23 + $0x2a0] sm:$0xff] }
 0x18e   : > { %14352 = vst [vmem:[#allocation129_spill] sm:$0xff] %v9048_v19  ;;  %v1390_v48 = vmul.f32 %v14328_v28, %v8782_v18  ;;  %v2164_v33 = vmul.f32 %v8782_v18, %v14171_v0  ;;  %v1389_v19 = vmul.f32 %v14328_v28, %v8793_v35  ;;  %v9080_v46 = vadd.f32 %v1388_v55, %v8811_v34  ;;  %v9099_v34 = vpop.permute.xlu1 %1476 }
 0x18f   : > { %14353 = vst [vmem:[#allocation130_spill] sm:$0xff] %v9052_v50  ;;  %14354 = vst [vmem:[#allocation131_spill] sm:$0xff] %v9056_v27  ;;  %v9083_v57 = vadd.f32 %v1387_v52, %v8817_v6  ;;  %v2163_v27 = vmul.f32 %v8793_v35, %v14171_v0  ;;  %v9089_v50 = vadd.f32 %v2162_v1, %v8814_v45  ;;  %v14358_v6 = vld [vmem:[#allocation31_spill] sm:$0xff] }
 0x190   : > { %14355 = vst [vmem:[#allocation132_spill] sm:$0xff] %v9065_v12  ;;  %v2321_v12 = vld [vmem:[%s7018_s23 + $0x298] sm:$0xff]  ;;  %v9093_v61 = vmul.f32 %v8782_v18, %v14286_v20  ;;  %v9097_v4 = vmul.f32 %v8782_v18, %v7400_v32  ;;  %v2180_v55 = vmul.f32 %v8829_v38, %v14358_v6  ;;  %v9104_v52 = vadd.f32 %v2161_v49, %v8821_v10 }
 0x191   : > { %v9108_v45 = vmul.f32 %v8793_v35, %v14286_v20  ;;  %v9112_v1 = vmul.f32 %v8793_v35, %v7400_v32  ;;  %v1494_v18 = vmul.f32 %v9076_v7, %v8829_v38  ;;  %2350 = vperm.xlu1 %6894, %v2322_v5   ;;  %v9121_v10 = vadd.f32 %v1390_v48, %v8832_v31  ;;  %v2324_v35 = vld [vmem:[%s7018_s23 + $0x2b0] sm:$0xff]  ;;  %v2323_v31 = vld [vmem:[%s7018_s23 + $0x2a8] sm:$0xff] }
 0x192   : > { %14356 = vst [vmem:[#allocation133_spill] sm:$0xff] %v9093_v61  ;;  %14357 = vst [vmem:[#allocation134_spill] sm:$0xff] %v9097_v4  ;;  %v9116_v61 = vpop.permute.xlu0 %1471  ;;  %v2179_v4 = vmul.f32 %v8842_v37, %v14358_v6  ;;  %v9124_v49 = vadd.f32 %v1389_v19, %v8838_v44  ;;  %2345 = vperm.xlu0 %6893, %v2321_v12   ;;  %v9134_v5 = vmul.f32 %v8829_v38, %v14328_v28  ;;  %v9150_v12 = vpop.permute.xlu1 %1486 }
 0x193   : > { %14359 = vst [vmem:[#allocation135_spill] sm:$0xff] %v9108_v45  ;;  %14360 = vst [vmem:[#allocation136_spill] sm:$0xff] %v9112_v1  ;;  %v1493_v45 = vmul.f32 %v9076_v7, %v8842_v37  ;;  %v9130_v1 = vadd.f32 %v2164_v33, %v8835_v30  ;;  %v9138_v41 = vmul.f32 %v8842_v37, %v14328_v28 }
 0x194   : > { %14361 = vst [vmem:[#allocation137_spill] sm:$0xff] %v9134_v5  ;;  %v9142_v44 = vadd.f32 %v2163_v27, %v8845_v15  ;;  %v9146_v19 = vmul.f32 %v8829_v38, %v14171_v0  ;;  %v1496_v30 = vmul.f32 %v9076_v7, %v8879_v40  ;;  %v9153_v48 = vadd.f32 %v2180_v55, %v8882_v24 }
 0x195   : > { %14362 = vst [vmem:[#allocation138_spill] sm:$0xff] %v9138_v41  ;;  %v2182_v33 = vmul.f32 %v8879_v40, %v14358_v6  ;;  %v9159_v15 = vmul.f32 %v8842_v37, %v14171_v0  ;;  %2360 = vperm.xlu1 %6894, %v2324_v35   ;;  %v9164_v41 = vadd.f32 %v2179_v4, %v8899_v36  ;;  %v2325_v35 = vld [vmem:[%s7018_s23 + $0x2b8] sm:$0xff] }
 0x196   : > { %14363 = vst [vmem:[#allocation139_spill] sm:$0xff] %v9153_v48  ;;  %v9161_v27 = vpop.permute.xlu0 %1481  ;;  %v9167_v5 = vadd.f32 %v1494_v18, %v8872_v8  ;;  %v9171_v24 = vmul.f32 %v8829_v38, %v14286_v20  ;;  %v9175_v55 = vmul.f32 %v8829_v38, %v7400_v32  ;;  %v1495_v48 = vmul.f32 %v9076_v7, %v8896_v9 }
 0x197   : > { %14364 = vst [vmem:[#allocation140_spill] sm:$0xff] %v9159_v15  ;;  %14365 = vst [vmem:[#allocation141_spill] sm:$0xff] %v9164_v41  ;;  %2355 = vperm.xlu0 %6893, %v2323_v31   ;;  %v2326_v15 = vld [vmem:[%s7018_s23 + $0x2c0] sm:$0xff]  ;;  %v2181_v36 = vmul.f32 %v8896_v9, %v14358_v6  ;;  %v9183_v4 = vadd.f32 %v1493_v45, %v8875_v54  ;;  %v9187_v8 = vmul.f32 %v8842_v37, %v14286_v20  ;;  %v9206_v45 = vpop.permute.xlu1 %1598 }
 0x198   : > { %14366 = vst [vmem:[#allocation142_spill] sm:$0xff] %v9167_v5  ;;  %14367 = vst [vmem:[#allocation143_spill] sm:$0xff] %v9171_v24  ;;  %v9191_v18 = vmul.f32 %v8879_v40, %v14328_v28  ;;  %v9195_v38 = vmul.f32 %v8896_v9, %v14328_v28  ;;  %v9200_v31 = vmul.f32 %v8879_v40, %v14171_v0 }
 0x199   : > { %14368 = vst [vmem:[#allocation144_spill] sm:$0xff] %v9175_v55  ;;  %14369 = vst [vmem:[#allocation145_spill] sm:$0xff] %v9183_v4  ;;  %v9204_v54 = vmul.f32 %v8842_v37, %v7400_v32  ;;  %v2184_v24 = vmul.f32 %v8936_v16, %v14358_v6  ;;  %v9215_v55 = vmul.f32 %v8896_v9, %v14171_v0  ;;  %2370 = vperm.xlu1 %6894, %v2326_v15  }
 0x19a   : > { %14370 = vst [vmem:[#allocation146_spill] sm:$0xff] %v9187_v8  ;;  %14371 = vst [vmem:[#allocation147_spill] sm:$0xff] %v9195_v38  ;;  %v9209_v8 = vadd.f32 %v2182_v33, %v8922_v53  ;;  %v9218_v41 = vadd.f32 %v1496_v30, %v8913_v11  ;;  %v1498_v37 = vmul.f32 %v9076_v7, %v8936_v16  ;;  %v2328_v30 = vld [vmem:[%s7018_s23 + $0x2d0] sm:$0xff] }
 0x19b   : > { %14372 = vst [vmem:[#allocation148_spill] sm:$0xff] %v9204_v54  ;;  %v9222_v54 = vpop.permute.xlu0 %1593  ;;  %v2183_v53 = vmul.f32 %v8951_v63, %v14358_v6  ;;  %v9228_v33 = vmul.f32 %v8879_v40, %v14286_v20  ;;  %v1497_v11 = vmul.f32 %v9076_v7, %v8951_v63  ;;  %2365 = vperm.xlu0 %6893, %v2325_v35   ;;  %v2327_v35 = vld [vmem:[%s7018_s23 + $0x2c8] sm:$0xff]  ;;  %v14520_v38 = vld [vmem:[#allocation9_spill] sm:$0xff] }
 0x19c   : > { %14373 = vst [vmem:[#allocation149_spill] sm:$0xff] %v9209_v8  ;;  %14374 = vst [vmem:[#allocation150_spill] sm:$0xff] %v9218_v41  ;;  %v9232_v8 = vmul.f32 %v8879_v40, %v7400_v32  ;;  %v9238_v41 = vadd.f32 %v2181_v36, %v8939_v60  ;;  %v9241_v15 = vadd.f32 %v1495_v48, %v8916_v17  ;;  %v9266_v36 = vpop.permute.xlu1 %1608 }
 0x19d   : > { %14375 = vst [vmem:[#allocation151_spill] sm:$0xff] %v9228_v33  ;;  %v9245_v4 = vmul.f32 %v8896_v9, %v14286_v20  ;;  %v9249_v33 = vmul.f32 %v8936_v16, %v14328_v28  ;;  %v9253_v40 = vmul.f32 %v8951_v63, %v14328_v28  ;;  %v9258_v60 = vmul.f32 %v8936_v16, %v14171_v0 }
 0x19e   : > { %14376 = vst [vmem:[#allocation152_spill] sm:$0xff] %v9232_v8  ;;  %14377 = vst [vmem:[#allocation153_spill] sm:$0xff] %v9238_v41  ;;  %v9262_v17 = vmul.f32 %v8896_v9, %v7400_v32  ;;  %v1500_v48 = vmul.f32 %v9076_v7, %v8991_v14  ;;  %v2186_v8 = vmul.f32 %v8991_v14, %v14358_v6  ;;  %2380 = vperm.xlu1 %6894, %v2328_v30   ;;  %v2329_v30 = vld [vmem:[%s7018_s23 + $0x2d8] sm:$0xff] }
 0x19f   : > { %14378 = vst [vmem:[#allocation154_spill] sm:$0xff] %v9241_v15  ;;  %14379 = vst [vmem:[#allocation155_spill] sm:$0xff] %v9245_v4  ;;  %v9269_v4 = vadd.f32 %v2184_v24, %v8963_v29  ;;  %v9275_v41 = vmul.f32 %v8951_v63, %v14171_v0  ;;  %v9277_v15 = vpop.permute.xlu0 %1603  ;;  %v9280_v9 = vadd.f32 %v2183_v53, %v8979_v13  ;;  %2375 = vperm.xlu0 %6893, %v2327_v35  }
 0x1a0   : > { %14380 = vst [vmem:[#allocation156_spill] sm:$0xff] %v9249_v33  ;;  %14381 = vst [vmem:[#allocation157_spill] sm:$0xff] %v9253_v40  ;;  %v9287_v29 = vmul.f32 %v8936_v16, %v14286_v20  ;;  %v9291_v24 = vmul.f32 %v8936_v16, %v7400_v32  ;;  %v2330_v40 = vld [vmem:[%s7018_s23 + $0x2e0] sm:$0xff]  ;;  %v2185_v13 = vmul.f32 %v9001_v3, %v14358_v6 }
 0x1a1   : > { %14382 = vst [vmem:[#allocation158_spill] sm:$0xff] %v9262_v17  ;;  %14383 = vst [vmem:[#allocation159_spill] sm:$0xff] %v9269_v4  ;;  %v9283_v17 = vadd.f32 %v1498_v37, %v8954_v58  ;;  %v1499_v4 = vmul.f32 %v9076_v7, %v9001_v3  ;;  %v9299_v53 = vadd.f32 %v1497_v11, %v8957_v42  ;;  %v9322_v11 = vpop.permute.xlu1 %1618  ;;  %v14492_v33 = vld [vmem:[#allocation51_spill] sm:$0xff] }
 0x1a2   : > { %14384 = vst [vmem:[#allocation160_spill] sm:$0xff] %v9280_v9  ;;  %14386 = vst [vmem:[#allocation162_spill] sm:$0xff] %v9287_v29  ;;  %v9303_v58 = vmul.f32 %v8951_v63, %v14286_v20  ;;  %v9307_v37 = vmul.f32 %v8991_v14, %v14328_v28  ;;  %v9311_v16 = vmul.f32 %v9001_v3, %v14328_v28  ;;  %2390 = vperm.xlu1 %6894, %v2330_v40  }
 0x1a3   : > { %14385 = vst [vmem:[#allocation161_spill] sm:$0xff] %v9283_v17  ;;  %14387 = vst [vmem:[#allocation163_spill] sm:$0xff] %v9291_v24  ;;  %v9316_v35 = vmul.f32 %v8991_v14, %v14171_v0  ;;  %v9320_v42 = vmul.f32 %v8951_v63, %v7400_v32  ;;  %v2188_v24 = vmul.f32 %v9041_v26, %v14358_v6  ;;  %2385 = vperm.xlu0 %6893, %v2329_v30   ;;  %v2331_v30 = vld [vmem:[%s7018_s23 + $0x2e8] sm:$0xff]  ;;  %v2432_v17 = vld [vmem:[%s7018_s23 + $0x310] sm:$0xff] }
 0x1a4   : > { %14388 = vst [vmem:[#allocation164_spill] sm:$0xff] %v9299_v53  ;;  %14389 = vst [vmem:[#allocation165_spill] sm:$0xff] %v9303_v58  ;;  %v9325_v58 = vadd.f32 %v2186_v8, %v9004_v59  ;;  %v9331_v29 = vmul.f32 %v9001_v3, %v14171_v0  ;;  %v9334_v9 = vadd.f32 %v1500_v48, %v8994_v23  ;;  %v2332_v48 = vld [vmem:[%s7018_s23 + $0x2f0] sm:$0xff] }
 0x1a5   : > { %14390 = vst [vmem:[#allocation166_spill] sm:$0xff] %v9307_v37  ;;  %14391 = vst [vmem:[#allocation167_spill] sm:$0xff] %v9311_v16  ;;  %v1502_v63 = vmul.f32 %v9076_v7, %v9041_v26  ;;  %v2187_v59 = vmul.f32 %v9058_v62, %v14358_v6  ;;  %v9344_v8 = vmul.f32 %v8991_v14, %v14286_v20  ;;  %v14477_v16 = vld [vmem:[#allocation6_spill] sm:$0xff] }
 0x1a6   : > { %14392 = vst [vmem:[#allocation168_spill] sm:$0xff] %v9320_v42  ;;  %14393 = vst [vmem:[#allocation169_spill] sm:$0xff] %v9325_v58  ;;  %v9338_v42 = vpop.permute.xlu0 %1613  ;;  %v9348_v58 = vmul.f32 %v8991_v14, %v7400_v32  ;;  %v1501_v23 = vmul.f32 %v9076_v7, %v9058_v62  ;;  %v9357_v40 = vadd.f32 %v1499_v4, %v8997_v22  ;;  %2400 = vperm.xlu1 %6894, %v2332_v48   ;;  %v2431_v48 = vld [vmem:[%s7018_s23 + $0x308] sm:$0xff] }
 0x1a7   : > { %14394 = vst [vmem:[#allocation170_spill] sm:$0xff] %v9334_v9  ;;  %14395 = vst [vmem:[#allocation171_spill] sm:$0xff] %v9344_v8  ;;  %v9354_v9 = vadd.f32 %v2185_v13, %v9020_v39  ;;  %v9361_v53 = vmul.f32 %v9001_v3, %v14286_v20  ;;  %v9365_v8 = vmul.f32 %v9041_v26, %v14328_v28  ;;  %v9382_v13 = vpop.permute.xlu1 %1628  ;;  %2395 = vperm.xlu0 %6893, %v2331_v30  }
 0x1a8   : > { %14396 = vst [vmem:[#allocation172_spill] sm:$0xff] %v9348_v58  ;;  %14398 = vst [vmem:[#allocation174_spill] sm:$0xff] %v9357_v40  ;;  %v9369_v14 = vmul.f32 %v9058_v62, %v14328_v28  ;;  %v9374_v39 = vmul.f32 %v9041_v26, %v14171_v0  ;;  %v9378_v22 = vmul.f32 %v9001_v3, %v7400_v32 }
 0x1a9   : > { %14397 = vst [vmem:[#allocation173_spill] sm:$0xff] %v9354_v9  ;;  %14399 = vst [vmem:[#allocation175_spill] sm:$0xff] %v9361_v53  ;;  %v1504_v4 = vmul.f32 %v9076_v7, %v9099_v34  ;;  %v9385_v53 = vadd.f32 %v2188_v24, %v9044_v56  ;;  %v2190_v58 = vmul.f32 %v9099_v34, %v14358_v6 }
 0x1aa   : > { %14400 = vst [vmem:[#allocation176_spill] sm:$0xff] %v9365_v8  ;;  %14401 = vst [vmem:[#allocation177_spill] sm:$0xff] %v9369_v14  ;;  %v9391_v9 = vmul.f32 %v9058_v62, %v14171_v0  ;;  %v9393_v40 = vpop.permute.xlu0 %1623  ;;  %v9396_v3 = vadd.f32 %v2187_v59, %v9061_v43  ;;  %v9403_v56 = vmul.f32 %v9041_v26, %v14286_v20  ;;  %2452 = vperm.xlu1 %6894, %v2432_v17   ;;  %v2436_v14 = vld [vmem:[%s7018_s23 + $0x330] sm:$0xff] }
 0x1ab   : > { %14402 = vst [vmem:[#allocation178_spill] sm:$0xff] %v9378_v22  ;;  %14403 = vst [vmem:[#allocation179_spill] sm:$0xff] %v9385_v53  ;;  %v9399_v22 = vadd.f32 %v1502_v63, %v9034_v2  ;;  %v9407_v24 = vmul.f32 %v9041_v26, %v7400_v32  ;;  %v1503_v53 = vmul.f32 %v9076_v7, %v9116_v61  ;;  %2447 = vperm.xlu0 %6893, %v2431_v48  }
 0x1ac   : > { %14404 = vst [vmem:[#allocation180_spill] sm:$0xff] %v9396_v3  ;;  %14406 = vst [vmem:[#allocation182_spill] sm:$0xff] %v9403_v56  ;;  %v2189_v43 = vmul.f32 %v9116_v61, %v14358_v6  ;;  %v9415_v59 = vadd.f32 %v1501_v23, %v9037_v47  ;;  %v9419_v2 = vmul.f32 %v9058_v62, %v14286_v20  ;;  %v14413_v23 = vld [vmem:[#allocation26_spill] sm:$0xff] }
 0x1ad   : > { %14405 = vst [vmem:[#allocation181_spill] sm:$0xff] %v9399_v22  ;;  %14407 = vst [vmem:[#allocation183_spill] sm:$0xff] %v9407_v24  ;;  %v9423_v63 = vmul.f32 %v9099_v34, %v14328_v28  ;;  %v9427_v26 = vmul.f32 %v9116_v61, %v14328_v28  ;;  %v9432_v30 = vmul.f32 %v9099_v34, %v14171_v0  ;;  %v9440_v24 = vpop.permute.xlu1 %1638 }
 0x1ae   : > { %14408 = vst [vmem:[#allocation184_spill] sm:$0xff] %v9415_v59  ;;  %14409 = vst [vmem:[#allocation185_spill] sm:$0xff] %v9419_v2  ;;  %v9436_v47 = vmul.f32 %v9058_v62, %v7400_v32  ;;  %v1662_v2 = vmul.f32 %v9206_v45, %v14413_v23  ;;  %v9443_v56 = vadd.f32 %v2190_v58, %v9089_v50 }
 0x1af   : > { %14410 = vst [vmem:[#allocation186_spill] sm:$0xff] %v9423_v63  ;;  %14411 = vst [vmem:[#allocation187_spill] sm:$0xff] %v9427_v26  ;;  %v9447_v3 = vmul.f32 %v9116_v61, %v14171_v0  ;;  %v9450_v59 = vadd.f32 %v1504_v4, %v9080_v46  ;;  %v1506_v62 = vmul.f32 %v9076_v7, %v9150_v12  ;;  %v2434_v4 = vld [vmem:[%s7018_s23 + $0x320] sm:$0xff]  ;;  %v14430_v26 = vld [vmem:[#allocation8_spill] sm:$0xff] }
 0x1b0   : > { %14412 = vst [vmem:[#allocation188_spill] sm:$0xff] %v9436_v47  ;;  %14414 = vst [vmem:[#allocation189_spill] sm:$0xff] %v9443_v56  ;;  %v9454_v47 = vpop.permute.xlu0 %1633  ;;  %v2192_v22 = vmul.f32 %v9150_v12, %v14358_v6  ;;  %v9460_v50 = vmul.f32 %v9099_v34, %v14286_v20  ;;  %v9464_v58 = vmul.f32 %v9099_v34, %v7400_v32  ;;  %2462 = vperm.xlu1 %6894, %v2434_v4  }
 0x1b1   : > { %14415 = vst [vmem:[#allocation190_spill] sm:$0xff] %v9450_v59  ;;  %v1661_v46 = vmul.f32 %v9222_v54, %v14413_v23  ;;  %v9470_v56 = vadd.f32 %v2189_v43, %v9104_v52  ;;  %v9473_v17 = vadd.f32 %v1503_v53, %v9083_v57  ;;  %v9477_v59 = vmul.f32 %v9116_v61, %v14286_v20  ;;  %v14424_v43 = vld [vmem:[#allocation38_spill] sm:$0xff] }
 0x1b2   : > { %14416 = vst [vmem:[#allocation191_spill] sm:$0xff] %v9460_v50  ;;  %14417 = vst [vmem:[#allocation192_spill] sm:$0xff] %v9464_v58  ;;  %v1505_v50 = vmul.f32 %v9076_v7, %v9161_v27  ;;  %v1664_v34 = vmul.f32 %v9266_v36, %v14413_v23  ;;  %v2433_v58 = vld [vmem:[%s7018_s23 + $0x318] sm:$0xff]  ;;  %v2191_v48 = vmul.f32 %v9161_v27, %v14358_v6 }
 0x1b3   : > { %14418 = vst [vmem:[#allocation193_spill] sm:$0xff] %v9470_v56  ;;  %14419 = vst [vmem:[#allocation194_spill] sm:$0xff] %v9473_v17  ;;  %v9488_v52 = vmul.f32 %v9116_v61, %v7400_v32  ;;  %v9492_v57 = vmul.f32 %v9150_v12, %v14328_v28  ;;  %v9496_v53 = vmul.f32 %v9161_v27, %v14328_v28  ;;  %v9499_v56 = vpop.permute.xlu1 %1648  ;;  %2457 = vperm.xlu0 %6893, %v2433_v58   ;;  %v14436_v58 = vld [vmem:[#allocation18_spill] sm:$0xff] }
 0x1b4   : > { %14420 = vst [vmem:[#allocation195_spill] sm:$0xff] %v9477_v59  ;;  %v1676_v59 = vadd.f32 %v1662_v2, %v14424_v43  ;;  %v9503_v17 = vmul.f32 %v9150_v12, %v14171_v0  ;;  %v1663_v61 = vmul.f32 %v9277_v15, %v14413_v23  ;;  %v9514_v28 = vmul.f32 %v9161_v27, %v14171_v0  ;;  %v14429_v43 = vld [vmem:[#allocation25_spill] sm:$0xff] }
 0x1b5   : > { %14421 = vst [vmem:[#allocation196_spill] sm:$0xff] %v9488_v52  ;;  %14422 = vst [vmem:[#allocation197_spill] sm:$0xff] %v9492_v57  ;;  %v9507_v52 = vpop.permute.xlu0 %1643  ;;  %v9510_v57 = vadd.f32 %v2192_v22, %v9130_v1  ;;  %v9517_v2 = vadd.f32 %v1506_v62, %v9121_v10  ;;  %v1675_v63 = vadd.f32 %v1661_v46, %v14430_v26  ;;  %v14433_v10 = vld [vmem:[#allocation42_spill] sm:$0xff]  ;;  %2472 = vperm.xlu1 %6894, %v2436_v14  }
 0x1b6   : > { %14423 = vst [vmem:[#allocation198_spill] sm:$0xff] %v9496_v53  ;;  %14425 = vst [vmem:[#allocation38_spill] sm:$0xff] %v9503_v17  ;;  %v2936_v53 = vmul.f32 %v9206_v45, %v14429_v43  ;;  %v9525_v4 = vmul.f32 %v9150_v12, %v7400_v32  ;;  %v9529_v1 = vmul.f32 %v9161_v27, %v7400_v32 }
 0x1b7   : > { %14426 = vst [vmem:[#allocation199_spill] sm:$0xff] %v9510_v57  ;;  %14427 = vst [vmem:[#allocation200_spill] sm:$0xff] %v9514_v28  ;;  %v2935_v22 = vmul.f32 %v9222_v54, %v14429_v43  ;;  %v1678_v62 = vadd.f32 %v1664_v34, %v14433_v10  ;;  %v2435_v57 = vld [vmem:[%s7018_s23 + $0x328] sm:$0xff]  ;;  %v9539_v26 = vadd.f32 %v1505_v50, %v9124_v49  ;;  %v9544_v32 = vpop.permute.xlu1 %1658 }
 0x1b8   : > { %14428 = vst [vmem:[#allocation201_spill] sm:$0xff] %v9517_v2  ;;  %14431 = vst [vmem:[#allocation8_spill] sm:$0xff] %v9525_v4  ;;  %v9536_v2 = vadd.f32 %v2191_v48, %v9142_v44  ;;  %v1704_v46 = vadd.f32 %v14436_v58, %v1676_v59  ;;  %v1666_v4 = vmul.f32 %v9322_v11, %v14413_v23  ;;  %v14440_v59 = vld [vmem:[#allocation45_spill] sm:$0xff]  ;;  %2467 = vperm.xlu0 %6893, %v2435_v57  }
 0x1b9   : > { %14432 = vst [vmem:[#allocation202_spill] sm:$0xff] %v9529_v1  ;;  %14435 = vst [vmem:[#allocation203_spill] sm:$0xff] %v9539_v26  ;;  %v9548_v1 = vmul.f32 %v9150_v12, %v14286_v20  ;;  %v9552_v34 = vmul.f32 %v9161_v27, %v14286_v20  ;;  %v9556_v49 = vmul.f32 %v9206_v45, %v14300_v21  ;;  %v9563_v10 = vpop.permute.xlu0 %1653  ;;  %v14441_v12 = vld [vmem:[#allocation19_spill] sm:$0xff] }
 0x1ba   : > { %14434 = vst [vmem:[#allocation42_spill] sm:$0xff] %v9536_v2  ;;  %v2938_v44 = vmul.f32 %v9266_v36, %v14429_v43  ;;  %v1677_v50 = vadd.f32 %v1663_v61, %v14440_v59  ;;  %v1665_v48 = vmul.f32 %v9338_v42, %v14413_v23  ;;  %v1703_v58 = vadd.f32 %v14441_v12, %v1675_v63  ;;  %v14445_v61 = vld [vmem:[#allocation23_spill] sm:$0xff]  ;;  %v2437_v63 = vld [vmem:[%s7018_s23 + $0x338] sm:$0xff] }
 0x1bb   : > { %14437 = vst [vmem:[#allocation18_spill] sm:$0xff] %v9548_v1  ;;  %14438 = vst [vmem:[#allocation204_spill] sm:$0xff] %v9552_v34  ;;  %v9568_v27 = vmul.f32 %v9222_v54, %v14300_v21  ;;  %v2937_v45 = vmul.f32 %v9277_v15, %v14429_v43  ;;  %v2438_v34 = vld [vmem:[%s7018_s23 + $0x340] sm:$0xff]  ;;  %v14443_v1 = vld [vmem:[#allocation37_spill] sm:$0xff]  ;;  %v1706_v59 = vadd.f32 %v14445_v61, %v1678_v62  ;;  %v9597_v61 = vpop.permute.xlu1 %1766 }
 0x1bc   : > { %14439 = vst [vmem:[#allocation205_spill] sm:$0xff] %v9556_v49  ;;  %v9574_v49 = vadd.f32 %v2936_v53, %v14443_v1  ;;  %v9579_v2 = vmul.f32 %v9266_v36, %v14300_v21  ;;  %v1668_v14 = vmul.f32 %v9382_v13, %v14413_v23  ;;  %v14447_v54 = vld [vmem:[#allocation39_spill] sm:$0xff]  ;;  %v9592_v53 = vmul.f32 %v9277_v15, %v14300_v21  ;;  %v14451_v1 = vld [vmem:[#allocation48_spill] sm:$0xff] }
 0x1bd   : > { %14442 = vst [vmem:[#allocation45_spill] sm:$0xff] %v9568_v27  ;;  %v9585_v12 = vadd.f32 %v2935_v22, %v14447_v54  ;;  %v14449_v27 = vld [vmem:[#allocation91_spill] sm:$0xff]  ;;  %v1680_v62 = vadd.f32 %v1666_v4, %v14451_v1  ;;  %v1667_v36 = vmul.f32 %v9393_v40, %v14413_v23  ;;  %v2940_v22 = vmul.f32 %v9322_v11, %v14429_v43  ;;  %v14454_v54 = vld [vmem:[#allocation49_spill] sm:$0xff]  ;;  %v14456_v15 = vld [vmem:[#allocation40_spill] sm:$0xff] }
 0x1be   : > { %14444 = vst [vmem:[#allocation19_spill] sm:$0xff] %v9574_v49  ;;  %14446 = vst [vmem:[#allocation37_spill] sm:$0xff] %v9579_v2  ;;  %v9588_v57 = vadd.f32 %v14449_v27, %v1704_v46  ;;  %v14453_v2 = vld [vmem:[#allocation29_spill] sm:$0xff]  ;;  %v1679_v46 = vadd.f32 %v1665_v48, %v14454_v54  ;;  %v9603_v27 = vpop.permute.xlu0 %1761  ;;  %2482 = vperm.xlu1 %6894, %v2438_v34   ;;  %v14458_v4 = vld [vmem:[#allocation92_spill] sm:$0xff]  ;;  %2477 = vperm.xlu0 %6893, %v2437_v63  }
 0x1bf   : > { %14448 = vst [vmem:[#allocation23_spill] sm:$0xff] %v9585_v12  ;;  %14450 = vst [vmem:[#allocation39_spill] sm:$0xff] %v9592_v53  ;;  %v1705_v49 = vadd.f32 %v14453_v2, %v1677_v50  ;;  %v9606_v53 = vadd.f32 %v2938_v44, %v14456_v15  ;;  %v9609_v1 = vadd.f32 %v14458_v4, %v1703_v58  ;;  %v2440_v50 = vld [vmem:[%s7018_s23 + $0x350] sm:$0xff]  ;;  %v14459_v26 = vld [vmem:[#allocation43_spill] sm:$0xff] }
 0x1c0   : > { %14452 = vst [vmem:[#allocation91_spill] sm:$0xff] %v9597_v61  ;;  %14455 = vst [vmem:[#allocation48_spill] sm:$0xff] %v9603_v27  ;;  %v2939_v12 = vmul.f32 %v9338_v42, %v14429_v43  ;;  %v1670_v2 = vmul.f32 %v9440_v24, %v14413_v23  ;;  %v9617_v20 = vadd.f32 %v2937_v45, %v14459_v26  ;;  %v14461_v48 = vld [vmem:[#allocation96_spill] sm:$0xff]  ;;  %v14464_v58 = vld [vmem:[#allocation53_spill] sm:$0xff] }
 0x1c1   : > { %14457 = vst [vmem:[#allocation29_spill] sm:$0xff] %v9606_v53  ;;  %v9620_v54 = vadd.f32 %v14461_v48, %v1706_v59  ;;  %v9624_v34 = vmul.f32 %v9322_v11, %v14300_v21  ;;  %v9628_v44 = vmul.f32 %v9338_v42, %v14300_v21  ;;  %v1682_v15 = vadd.f32 %v1668_v14, %v14464_v58  ;;  %v2439_v4 = vld [vmem:[%s7018_s23 + $0x348] sm:$0xff]  ;;  %v9638_v11 = vpop.permute.xlu1 %1776  ;;  %v14469_v42 = vld [vmem:[#allocation73_spill] sm:$0xff] }
 0x1c2   : > { %14460 = vst [vmem:[#allocation49_spill] sm:$0xff] %v9617_v20  ;;  %v14465_v53 = vld [vmem:[#allocation32_spill] sm:$0xff]  ;;  %v2942_v26 = vmul.f32 %v9382_v13, %v14429_v43  ;;  %v1669_v48 = vmul.f32 %v9454_v47, %v14413_v23  ;;  %14467 = vst [vmem:[#allocation43_spill] sm:$0xff] %v9638_v11  ;;  %v1707_v14 = vadd.f32 %v14469_v42, %v1679_v46  ;;  %2492 = vperm.xlu1 %6894, %v2440_v50   ;;  %v2442_v46 = vld [vmem:[%s7018_s23 + $0x360] sm:$0xff] }
 0x1c3   : > { %14462 = vst [vmem:[#allocation40_spill] sm:$0xff] %v9624_v34  ;;  %14463 = vst [vmem:[#allocation92_spill] sm:$0xff] %v9628_v44  ;;  %v1708_v63 = vadd.f32 %v14465_v53, %v1680_v62  ;;  %v14466_v45 = vld [vmem:[#allocation56_spill] sm:$0xff]  ;;  %v14468_v34 = vld [vmem:[#allocation97_spill] sm:$0xff]  ;;  %v2941_v58 = vmul.f32 %v9393_v40, %v14429_v43  ;;  %v9646_v53 = vpop.permute.xlu0 %1771  ;;  %2487 = vperm.xlu0 %6893, %v2439_v4   ;;  %v1710_v37 = vadd.f32 %v14477_v16, %v1682_v15 }
 0x1c4   : > { %v1681_v59 = vadd.f32 %v1667_v36, %v14466_v45  ;;  %v9641_v20 = vadd.f32 %v14468_v34, %v1705_v49  ;;  %14470 = vst [vmem:[#allocation96_spill] sm:$0xff] %v9646_v53  ;;  %v14471_v62 = vld [vmem:[#allocation46_spill] sm:$0xff]  ;;  %v9653_v36 = vmul.f32 %v9382_v13, %v14300_v21  ;;  %v14474_v45 = vld [vmem:[#allocation60_spill] sm:$0xff]  ;;  %v1672_v49 = vmul.f32 %v9499_v56, %v14413_v23  ;;  %v14475_v34 = vld [vmem:[#allocation47_spill] sm:$0xff] }
 0x1c5   : > { %v9649_v44 = vadd.f32 %v2940_v22, %v14471_v62  ;;  %v1684_v8 = vadd.f32 %v1670_v2, %v14474_v45  ;;  %v9660_v42 = vadd.f32 %v2939_v12, %v14475_v34  ;;  %v9665_v22 = vmul.f32 %v9393_v40, %v14300_v21  ;;  %v2441_v50 = vld [vmem:[%s7018_s23 + $0x358] sm:$0xff]  ;;  %v14479_v62 = vld [vmem:[#allocation13_spill] sm:$0xff]  ;;  %v14480_v4 = vld [vmem:[#allocation76_spill] sm:$0xff]  ;;  %v9677_v16 = vpop.permute.xlu1 %1786 }
 0x1c6   : > { %14473 = vst [vmem:[#allocation32_spill] sm:$0xff] %v9653_v36  ;;  %v2944_v13 = vmul.f32 %v9440_v24, %v14429_v43  ;;  %v1671_v2 = vmul.f32 %v9507_v52, %v14413_v23  ;;  %v9673_v45 = vadd.f32 %v14479_v62, %v1708_v63  ;;  %v1709_v12 = vadd.f32 %v14480_v4, %v1681_v59  ;;  %v14481_v34 = vld [vmem:[#allocation62_spill] sm:$0xff]  ;;  %v14487_v59 = vld [vmem:[#allocation55_spill] sm:$0xff] }
 0x1c7   : > { %14472 = vst [vmem:[#allocation53_spill] sm:$0xff] %v9649_v44  ;;  %14476 = vst [vmem:[#allocation56_spill] sm:$0xff] %v9660_v42  ;;  %v1683_v36 = vadd.f32 %v1669_v48, %v14481_v34  ;;  %v14483_v15 = vld [vmem:[#allocation54_spill] sm:$0xff]  ;;  %v2943_v44 = vmul.f32 %v9454_v47, %v14429_v43  ;;  %v1674_v63 = vmul.f32 %v9544_v32, %v14413_v23  ;;  %v9689_v62 = vpop.permute.xlu0 %1781  ;;  %2502 = vperm.xlu1 %6894, %v2442_v46   ;;  %v14489_v4 = vld [vmem:[#allocation35_spill] sm:$0xff] }
 0x1c8   : > { %14478 = vst [vmem:[#allocation97_spill] sm:$0xff] %v9665_v22  ;;  %14482 = vst [vmem:[#allocation73_spill] sm:$0xff] %v9677_v16  ;;  %v9680_v40 = vadd.f32 %v2942_v26, %v14483_v15  ;;  %v14485_v22 = vld [vmem:[#allocation44_spill] sm:$0xff]  ;;  %v9692_v48 = vadd.f32 %v2941_v58, %v14487_v59  ;;  %v1712_v34 = vadd.f32 %v14489_v4, %v1684_v8  ;;  %2497 = vperm.xlu0 %6893, %v2441_v50   ;;  %v14494_v46 = vld [vmem:[#allocation67_spill] sm:$0xff] }
 0x1c9   : > { %v9683_v42 = vadd.f32 %v14485_v22, %v1707_v14  ;;  %14486 = vst [vmem:[#allocation60_spill] sm:$0xff] %v9689_v62  ;;  %v9697_v26 = vmul.f32 %v9440_v24, %v14300_v21  ;;  %v14491_v14 = vld [vmem:[#allocation63_spill] sm:$0xff]  ;;  %v2946_v15 = vmul.f32 %v9499_v56, %v14429_v43  ;;  %v9704_v5 = vadd.f32 %v14492_v33, %v1710_v37  ;;  %v2443_v59 = vld [vmem:[%s7018_s23 + $0x368] sm:$0xff]  ;;  %v14495_v4 = vld [vmem:[#allocation57_spill] sm:$0xff] }
 0x1ca   : > { %14484 = vst [vmem:[#allocation46_spill] sm:$0xff] %v9680_v40  ;;  %14488 = vst [vmem:[#allocation47_spill] sm:$0xff] %v9692_v48  ;;  %v1686_v22 = vadd.f32 %v1672_v49, %v14491_v14  ;;  %v2444_v40 = vld [vmem:[%s7018_s23 + $0x370] sm:$0xff]  ;;  %v9708_v58 = vmul.f32 %v9454_v47, %v14300_v21  ;;  %v1685_v8 = vadd.f32 %v1671_v2, %v14494_v46  ;;  %v14498_v14 = vld [vmem:[#allocation78_spill] sm:$0xff]  ;;  %v9723_v47 = vpop.permute.xlu1 %1796 }
 0x1cb   : > { %14490 = vst [vmem:[#allocation6_spill] sm:$0xff] %v9697_v26  ;;  %v9713_v24 = vadd.f32 %v2944_v13, %v14495_v4  ;;  %v14497_v26 = vld [vmem:[#allocation103_spill] sm:$0xff]  ;;  %v1711_v50 = vadd.f32 %v14498_v14, %v1683_v36  ;;  %v2945_v33 = vmul.f32 %v9507_v52, %v14429_v43  ;;  %v1673_v37 = vmul.f32 %v9563_v10, %v14413_v23  ;;  %v14501_v13 = vld [vmem:[#allocation70_spill] sm:$0xff]  ;;  %v9730_v4 = vpop.permute.xlu0 %1791  ;;  %v14505_v14 = vld [vmem:[#allocation61_spill] sm:$0xff] }
 0x1cc   : > { %14493 = vst [vmem:[#allocation13_spill] sm:$0xff] %v9708_v58  ;;  %v9716_v49 = vadd.f32 %v14497_v26, %v1709_v12  ;;  %14499 = vst [vmem:[#allocation62_spill] sm:$0xff] %v9723_v47  ;;  %v9727_v2 = vmul.f32 %v9499_v56, %v14300_v21  ;;  %v1688_v46 = vadd.f32 %v1674_v63, %v14501_v13  ;;  %2512 = vperm.xlu1 %6894, %v2444_v40   ;;  %v14503_v12 = vld [vmem:[#allocation58_spill] sm:$0xff]  ;;  %v2768_v63 = vld [vmem:[%s7018_s23 + $0x390] sm:$0xff] }
 0x1cd   : > { %14496 = vst [vmem:[#allocation76_spill] sm:$0xff] %v9713_v24  ;;  %14502 = vst [vmem:[#allocation44_spill] sm:$0xff] %v9730_v4  ;;  %v2600_v36 = vmul.f32 %v9597_v61, %v14413_v23  ;;  %v9735_v26 = vadd.f32 %v2943_v44, %v14503_v12  ;;  %v9738_v58 = vadd.f32 %v14505_v14, %v1712_v34  ;;  %v14506_v24 = vld [vmem:[#allocation82_spill] sm:$0xff]  ;;  %2507 = vperm.xlu0 %6893, %v2443_v59   ;;  %v14508_v13 = vld [vmem:[#allocation64_spill] sm:$0xff] }
 0x1ce   : > { %14500 = vst [vmem:[#allocation54_spill] sm:$0xff] %v9727_v2  ;;  %v1714_v48 = vadd.f32 %v14506_v24, %v1686_v22  ;;  %v9743_v56 = vmul.f32 %v9507_v52, %v14300_v21  ;;  %v9747_v2 = vadd.f32 %v2946_v15, %v14508_v13  ;;  %v14510_v40 = vld [vmem:[#allocation83_spill] sm:$0xff]  ;;  %v2948_v44 = vmul.f32 %v9544_v32, %v14429_v43  ;;  %v2767_v12 = vld [vmem:[%s7018_s23 + $0x388] sm:$0xff]  ;;  %v14511_v24 = vld [vmem:[#allocation106_spill] sm:$0xff] }
 0x1cf   : > { %14504 = vst [vmem:[#allocation55_spill] sm:$0xff] %v9735_v26  ;;  %v1713_v28 = vadd.f32 %v14510_v40, %v1685_v8  ;;  %v1830_v34 = vmul.f32 %v9597_v61, %v14358_v6  ;;  %v2599_v22 = vmul.f32 %v9603_v27, %v14413_v23  ;;  %v9758_v52 = vadd.f32 %v14511_v24, %v1711_v50  ;;  %v14512_v59 = vld [vmem:[#allocation71_spill] sm:$0xff]  ;;  %v9763_v8 = vpop.permute.xlu1 %1806  ;;  %v14514_v13 = vld [vmem:[#allocation65_spill] sm:$0xff]  ;;  %v9775_v24 = vpop.permute.xlu0 %1801 }
 0x1d0   : > { %14507 = vst [vmem:[#allocation35_spill] sm:$0xff] %v9743_v56  ;;  %14509 = vst [vmem:[#allocation63_spill] sm:$0xff] %v9747_v2  ;;  %v1687_v14 = vadd.f32 %v1673_v37, %v14512_v59  ;;  %v2947_v15 = vmul.f32 %v9563_v10, %v14429_v43  ;;  %v9766_v40 = vadd.f32 %v2945_v33, %v14514_v13  ;;  %v14516_v56 = vld [vmem:[#allocation85_spill] sm:$0xff]  ;;  %2788 = vperm.xlu1 %6894, %v2768_v63   ;;  %v14522_v13 = vld [vmem:[#allocation110_spill] sm:$0xff] }
 0x1d1   : > { %14513 = vst [vmem:[#allocation51_spill] sm:$0xff] %v9763_v8  ;;  %v1716_v2 = vadd.f32 %v14516_v56, %v1688_v46  ;;  %v9771_v26 = vmul.f32 %v9544_v32, %v14300_v21  ;;  %v1829_v50 = vmul.f32 %v9603_v27, %v14358_v6  ;;  %14518 = vst [vmem:[#allocation103_spill] sm:$0xff] %v9775_v24  ;;  %v14519_v37 = vld [vmem:[#allocation93_spill] sm:$0xff]  ;;  %2783 = vperm.xlu0 %6893, %v2767_v12   ;;  %v2770_v32 = vld [vmem:[%s7018_s23 + $0x3a0] sm:$0xff] }
 0x1d2   : > { %14515 = vst [vmem:[#allocation67_spill] sm:$0xff] %v9766_v40  ;;  %v2614_v59 = vadd.f32 %v2600_v36, %v14519_v37  ;;  %v9779_v17 = vadd.f32 %v14520_v38, %v1714_v48  ;;  %v9783_v33 = vmul.f32 %v9563_v10, %v14300_v21  ;;  %v1832_v46 = vmul.f32 %v9638_v11, %v14358_v6  ;;  %v2769_v63 = vld [vmem:[%s7018_s23 + $0x398] sm:$0xff]  ;;  %v14524_v37 = vld [vmem:[#allocation68_spill] sm:$0xff] }
 0x1d3   : > { %14517 = vst [vmem:[#allocation57_spill] sm:$0xff] %v9771_v26  ;;  %v2602_v56 = vmul.f32 %v9638_v11, %v14413_v23  ;;  %v9791_v26 = vadd.f32 %v14522_v13, %v1713_v28  ;;  %v1844_v36 = vadd.f32 %v1830_v34, %v9588_v57  ;;  %v14523_v38 = vld [vmem:[#allocation94_spill] sm:$0xff]  ;;  %v9797_v10 = vadd.f32 %v2948_v44, %v14524_v37  ;;  %v9800_v21 = vpop.permute.xlu1 %1816  ;;  %v14529_v57 = vld [vmem:[#allocation69_spill] sm:$0xff] }
 0x1d4   : > { %14521 = vst [vmem:[#allocation78_spill] sm:$0xff] %v9783_v33  ;;  %v2613_v48 = vadd.f32 %v2599_v22, %v14523_v38  ;;  %v14526_v33 = vld [vmem:[#allocation88_spill] sm:$0xff]  ;;  %14527 = vst [vmem:[#allocation58_spill] sm:$0xff] %v9800_v21  ;;  %v2601_v12 = vmul.f32 %v9646_v53, %v14413_v23  ;;  %v9806_v28 = vmul.f32 %v9597_v61, %v14171_v0  ;;  %v9815_v38 = vpop.permute.xlu0 %1811  ;;  %2798 = vperm.xlu1 %6894, %v2770_v32  }
 0x1d5   : > { %14525 = vst [vmem:[#allocation70_spill] sm:$0xff] %v9797_v10  ;;  %v1715_v40 = vadd.f32 %v14526_v33, %v1687_v14  ;;  %v9809_v34 = vadd.f32 %v2947_v15, %v14529_v57  ;;  %v14531_v22 = vld [vmem:[#allocation12_spill] sm:$0xff]  ;;  %v1843_v44 = vadd.f32 %v1829_v50, %v9609_v1  ;;  %v2642_v14 = vadd.f32 %v8853_v51, %v2614_v59  ;;  %v2772_v57 = vld [vmem:[%s7018_s23 + $0x3b0] sm:$0xff]  ;;  %v14534_v51 = vld [vmem:[#allocation30_spill] sm:$0xff] }
 0x1d6   : > { %14528 = vst [vmem:[#allocation61_spill] sm:$0xff] %v9806_v28  ;;  %v9812_v13 = vadd.f32 %v14531_v22, %v1716_v2  ;;  %v9820_v33 = vmul.f32 %v9603_v27, %v14171_v0  ;;  %v1846_v37 = vadd.f32 %v1832_v46, %v9620_v54  ;;  %v1831_v15 = vmul.f32 %v9646_v53, %v14358_v6  ;;  %v14533_v2 = vld [vmem:[#allocation5_spill] sm:$0xff]  ;;  %v2771_v32 = vld [vmem:[%s7018_s23 + $0x3a8] sm:$0xff] }
 0x1d7   : > { %14530 = vst [vmem:[#allocation82_spill] sm:$0xff] %v9809_v34  ;;  %2793 = vperm.xlu0 %6893, %v2769_v63   ;;  %v2616_v22 = vadd.f32 %v2602_v56, %v14533_v2  ;;  %v2604_v1 = vmul.f32 %v9677_v16, %v14413_v23  ;;  %v1872_v50 = vadd.f32 %v8849_v25, %v1844_v36  ;;  %v14535_v54 = vld [vmem:[#allocation113_spill] sm:$0xff]  ;;  %v9837_v10 = vpop.permute.xlu1 %1826  ;;  %v14536_v63 = vld [vmem:[#allocation10_spill] sm:$0xff]  ;;  %v14537_v56 = vmov 0  }
 0x1d8   : > { %14532 = vst [vmem:[#allocation64_spill] sm:$0xff] %v9820_v33  ;;  %v2641_v59 = vadd.f32 %v14534_v51, %v2613_v48  ;;  %v2603_v34 = vmul.f32 %v9689_v62, %v14413_v23  ;;  %v9835_v46 = vadd.f32 %v14535_v54, %v1715_v40  ;;  %v2615_v33 = vadd.f32 %v2601_v12, %v14536_v63  ;;  %v14540_v36 = vld [vmem:[#allocation90_spill] sm:$0xff]  ;;  %v9921_v51 = vpop.permute.xlu0 %1821  ;;  %v14542_v63 = vld [vmem:[#allocation101_spill] sm:$0xff] }
 0x1d9   : > { %4739 = vst.msk [vmem:[#allocation3 + $0x8] sm:$0xf] %vm4719_vm0, %v14537_v56  ;;  %4720 = vst.msk [vmem:[#allocation2] sm:$0xf] %vm4719_vm0, %v14537_v56  ;;  %v9910_v25 = vmul.f32 %v9597_v61, %v14429_v43  ;;  %v9914_v40 = vmul.f32 %v9603_v27, %v14429_v43  ;;  %v1871_v48 = vadd.f32 %v14540_v36, %v1843_v44  ;;  %2808 = vperm.xlu1 %6894, %v2772_v57   ;;  %v2774_v27 = vld [vmem:[%s7018_s23 + $0x3c0] sm:$0xff]  ;;  %v14544_v36 = vld [vmem:[#allocation36_spill] sm:$0xff] }
 0x1da   : > { %4721 = vst.msk [vmem:[#allocation2 + $0x4] sm:$0xf] %vm4719_vm0, %v14537_v56  ;;  %4722 = vst.msk [vmem:[#allocation2 + $0x8] sm:$0xf] %vm4719_vm0, %v14537_v56  ;;  %v1834_v12 = vmul.f32 %v9677_v16, %v14358_v6  ;;  %v1833_v2 = vmul.f32 %v9689_v62, %v14358_v6  ;;  %v9924_v54 = vadd.f32 %v9146_v19, %v2642_v14  ;;  %v14543_v61 = vld [vmem:[#allocation15_spill] sm:$0xff]  ;;  %v14545_v43 = vld [vmem:[#allocation140_spill] sm:$0xff] }
 0x1db   : > { %4723 = vst.msk [vmem:[#allocation2 + $0xc] sm:$0xf] %vm4719_vm0, %v14537_v56  ;;  %4724 = vst.msk [vmem:[#allocation2 + $0x10] sm:$0xf] %vm4719_vm0, %v14537_v56  ;;  %v1845_v28 = vadd.f32 %v1831_v15, %v9641_v20  ;;  %2803 = vperm.xlu0 %6893, %v2771_v32   ;;  %v2644_v44 = vadd.f32 %v14543_v61, %v2616_v22  ;;  %v9933_v16 = vadd.f32 %v14545_v43, %v2641_v59  ;;  %v14546_v62 = vld [vmem:[#allocation14_spill] sm:$0xff]  ;;  %v14547_v14 = vld [vmem:[#allocation137_spill] sm:$0xff]  ;;  %v9945_v15 = vpop.permute.xlu1 %1934 }
 0x1dc   : > { %4725 = vst.msk [vmem:[#allocation2 + $0x14] sm:$0xf] %vm4719_vm0, %v14537_v56  ;;  %4726 = vst.msk [vmem:[#allocation2 + $0x18] sm:$0xf] %vm4719_vm0, %v14537_v56  ;;  %v2617_v53 = vadd.f32 %v2603_v34, %v14546_v62  ;;  %v2606_v19 = vmul.f32 %v9723_v47, %v14413_v23  ;;  %v1836_v20 = vmul.f32 %v9723_v47, %v14358_v6  ;;  %v14548_v43 = vld [vmem:[#allocation74_spill] sm:$0xff]  ;;  %v14554_v47 = vld [vmem:[#allocation16_spill] sm:$0xff] }
 0x1dd   : > { %4727 = vst.msk [vmem:[#allocation2 + $0x1c] sm:$0xf] %vm4719_vm0, %v14537_v56  ;;  %4728 = vst.msk [vmem:[#allocation2 + $0x20] sm:$0xf] %vm4719_vm0, %v14537_v56  ;;  %v1835_v61 = vmul.f32 %v9730_v4, %v14358_v6  ;;  %v2643_v57 = vadd.f32 %v14548_v43, %v2615_v33  ;;  %v2605_v62 = vmul.f32 %v9730_v4, %v14413_v23  ;;  %2818 = vperm.xlu1 %6894, %v2774_v27   ;;  %v14550_v59 = vld [vmem:[#allocation138_spill] sm:$0xff]  ;;  %v2776_v33 = vld [vmem:[%s7018_s23 + $0x3d0] sm:$0xff] }
 0x1de   : > { %4729 = vst.msk [vmem:[#allocation2 + $0x24] sm:$0xf] %vm4719_vm0, %v14537_v56  ;;  %4730 = vst.msk [vmem:[#allocation2 + $0x28] sm:$0xf] %vm4719_vm0, %v14537_v56  ;;  %v1848_v34 = vadd.f32 %v1834_v12, %v9673_v45  ;;  %v1847_v22 = vadd.f32 %v1833_v2, %v9683_v42  ;;  %v9963_v43 = vadd.f32 %v9200_v31, %v2644_v44  ;;  %v14552_v4 = vld [vmem:[#allocation105_spill] sm:$0xff]  ;;  %v2775_v12 = vld [vmem:[%s7018_s23 + $0x3c8] sm:$0xff] }
 0x1df   : > { %4731 = vst.msk [vmem:[#allocation2 + $0x2c] sm:$0xf] %vm4719_vm0, %v14537_v56  ;;  %4732 = vst.msk [vmem:[#allocation2 + $0x30] sm:$0xf] %vm4719_vm0, %v14537_v56  ;;  %v14553_v27 = vld [vmem:[#allocation108_spill] sm:$0xff]  ;;  %v2620_v11 = vadd.f32 %v2606_v19, %v14554_v47  ;;  %v1849_v31 = vadd.f32 %v1835_v61, %v9716_v49  ;;  %v2610_v61 = vmul.f32 %v9800_v21, %v14413_v23 }
 0x1e0   : > { %4733 = vst.msk [vmem:[#allocation2 + $0x34] sm:$0xf] %vm4719_vm0, %v14537_v56  ;;  %4734 = vst.msk [vmem:[#allocation2 + $0x38] sm:$0xf] %vm4719_vm0, %v14537_v56  ;;  %v2645_v2 = vadd.f32 %v14553_v27, %v2617_v53  ;;  %v14557_v44 = vld [vmem:[#allocation20_spill] sm:$0xff] }
 0x1e1   : > { %4735 = vst.msk [vmem:[#allocation2 + $0x3c] sm:$0xf] %vm4719_vm0, %v14537_v56  ;;  %4736 = vst.msk [vmem:[#allocation2 + $0x40] sm:$0xf] %vm4719_vm0, %v14537_v56  ;;  %v9988_v19 = vadd.f32 %v14557_v44, %v1847_v22  ;;  %2828 = vperm.xlu1 %6894, %v2776_v33   ;;  %v14558_v22 = vld [vmem:[#allocation72_spill] sm:$0xff] }
 0x1e2   : > { %4737 = vst.msk [vmem:[#allocation3] sm:$0xf] %vm4719_vm0, %v14537_v56  ;;  %4738 = vst.msk [vmem:[#allocation3 + $0x4] sm:$0xf] %vm4719_vm0, %v14537_v56  ;;  %v14560_v27 = vld [vmem:[#allocation80_spill] sm:$0xff] }
 0x1e3   : > { %4740 = vst.msk [vmem:[#allocation3 + $0xc] sm:$0xf] %vm4719_vm0, %v14537_v56  ;;  %4741 = vst.msk [vmem:[#allocation3 + $0x10] sm:$0xf] %vm4719_vm0, %v14537_v56 }
 0x1e4   : > { %4742 = vst.msk [vmem:[#allocation3 + $0x14] sm:$0xf] %vm4719_vm0, %v14537_v56  ;;  %4743 = vst.msk [vmem:[#allocation3 + $0x18] sm:$0xf] %vm4719_vm0, %v14537_v56 }
 0x1e5   : > { %4744 = vst.msk [vmem:[#allocation3 + $0x1c] sm:$0xf] %vm4719_vm0, %v14537_v56  ;;  %4745 = vst.msk [vmem:[#allocation3 + $0x20] sm:$0xf] %vm4719_vm0, %v14537_v56 }
 0x1e6   : > { %4746 = vst.msk [vmem:[#allocation3 + $0x24] sm:$0xf] %vm4719_vm0, %v14537_v56  ;;  %4747 = vst.msk [vmem:[#allocation3 + $0x28] sm:$0xf] %vm4719_vm0, %v14537_v56 }
 0x1e7   : > { %4748 = vst.msk [vmem:[#allocation3 + $0x2c] sm:$0xf] %vm4719_vm0, %v14537_v56  ;;  %4749 = vst.msk [vmem:[#allocation3 + $0x30] sm:$0xf] %vm4719_vm0, %v14537_v56 }
 0x1e8   : > { %4750 = vst.msk [vmem:[#allocation3 + $0x34] sm:$0xf] %vm4719_vm0, %v14537_v56  ;;  %4751 = vst.msk [vmem:[#allocation3 + $0x38] sm:$0xf] %vm4719_vm0, %v14537_v56 }
 0x1e9   : > { %4752 = vst.msk [vmem:[#allocation3 + $0x3c] sm:$0xf] %vm4719_vm0, %v14537_v56  ;;  %4753 = vst.msk [vmem:[#allocation3 + $0x40] sm:$0xf] %vm4719_vm0, %v14537_v56  ;;  %v1874_v56 = vadd.f32 %v14542_v63, %v1846_v37  ;;  %v9939_v37 = vadd.f32 %v14547_v14, %v1872_v50  ;;  %v14549_v50 = vld [vmem:[#allocation17_spill] sm:$0xff]  ;;  %v9956_v63 = vadd.f32 %v14550_v59, %v1871_v48 }
 0x1ea   : > { %14538 = vst [vmem:[#allocation83_spill] sm:$0xff] %v9910_v25  ;;  %14539 = vst [vmem:[#allocation106_spill] sm:$0xff] %v9914_v40  ;;  %v2618_v40 = vadd.f32 %v2604_v1, %v14544_v36  ;;  %v2773_v25 = vld [vmem:[%s7018_s23 + $0x3b8] sm:$0xff]  ;;  %v9952_v1 = vpop.permute.xlu0 %1929  ;;  %v268_v32 = vadd.s32 8, %v14549_v50  ;;  %v14551_v36 = vld [vmem:[#allocation41_spill] sm:$0xff]  ;;  %v2608_v48 = vmul.f32 %v9763_v8, %v14413_v23  ;;  %v1838_v59 = vmul.f32 %v9763_v8, %v14358_v6 }
 0x1eb   : > { %14541 = vst [vmem:[#allocation71_spill] sm:$0xff] %v9921_v51  ;;  %v9959_v14 = vadd.f32 %v14551_v36, %v1845_v28  ;;  %2813 = vperm.xlu0 %6893, %v2773_v25   ;;  %v9967_v42 = vadd.f32 %v9191_v18, %v1874_v56  ;;  %v2607_v28 = vmul.f32 %v9775_v24, %v14413_v23  ;;  %v14556_v56 = vld [vmem:[#allocation102_spill] sm:$0xff] }
 0x1ec   : > { %v2646_v45 = vadd.f32 %v14552_v4, %v2618_v40  ;;  %v1850_v25 = vadd.f32 %v1836_v20, %v9704_v5  ;;  %v9978_v4 = vpop.permute.xlu1 %1944  ;;  %v9981_v18 = vadd.f32 %v9215_v55, %v2643_v57  ;;  %v14555_v40 = vld [vmem:[#allocation77_spill] sm:$0xff]  ;;  %v9985_v47 = vadd.f32 %v14556_v56, %v1848_v34  ;;  %v14559_v36 = vld [vmem:[#allocation50_spill] sm:$0xff] }
 0x1ed   : > { %v2619_v53 = vadd.f32 %v2605_v62, %v14555_v40  ;;  %v292_v49 = vand.u32 7, %v268_v32  ;;  %v1837_v20 = vmul.f32 %v9775_v24, %v14358_v6  ;;  %v2609_v57 = vmul.f32 %v9815_v38, %v14413_v23  ;;  %v2777_v62 = vld [vmem:[%s7018_s23 + $0x3d8] sm:$0xff]  ;;  %v14561_v40 = vld [vmem:[#allocation109_spill] sm:$0xff]  ;;  %v14563_v24 = vld [vmem:[#allocation124_spill] sm:$0xff] }
 0x1ee   : > { %v9992_v5 = vpop.permute.xlu0 %1939  ;;  %v9997_v55 = vadd.f32 %v9258_v60, %v2646_v45  ;;  %v10005_v34 = vadd.f32 %v9275_v41, %v2645_v2  ;;  %v2648_v32 = vadd.f32 %v14558_v22, %v2620_v11  ;;  %v2622_v33 = vadd.f32 %v2608_v48, %v14559_v36  ;;  %v14562_v45 = vld [vmem:[#allocation4_spill] sm:$0xff]  ;;  %v6943_v48 = vld [vmem:[%s7018_s23 + $0x3e0] sm:$0xff] }
 0x1ef   : > { %2823 = vperm.xlu0 %6893, %v2775_v12   ;;  %v2621_v12 = vadd.f32 %v2607_v28, %v14560_v27  ;;  %v10011_v60 = vadd.f32 %v14561_v40, %v1850_v25  ;;  %v10014_v56 = vadd.f32 %v14562_v45, %v1849_v31  ;;  %v2647_v8 = vadd.f32 %v14563_v24, %v2619_v53  ;;  %v14566_v53 = vld [vmem:[#allocation7_spill] sm:$0xff]  ;;  %v14567_v22 = vld [vmem:[#allocation112_spill] sm:$0xff]  ;;  %v14568_v45 = vld [vmem:[#allocation126_spill] sm:$0xff] }
 0x1f0   : > { %v10016_v44 = vpop.permute.xlu1 %1954  ;;  %v1852_v41 = vadd.f32 %v1838_v59, %v9738_v58  ;;  %v1840_v11 = vmul.f32 %v9800_v21, %v14358_v6  ;;  %2838 = vperm.xlu1 %6894, %v6943_v48   ;;  %v2612_v28 = vmul.f32 %v9837_v10, %v14413_v23  ;;  %vm10027_vm1 = vcmp.eq.s32.totalorder %v292_v49, 7  ;;  %v2780_v58 = vld [vmem:[%s7018_s23 + $0x3f0] sm:$0xff]  ;;  %v2779_v27 = vld [vmem:[%s7018_s23 + $0x3e8] sm:$0xff] }
 0x1f1   : > { %v1851_v31 = vadd.f32 %v1837_v20, %v9758_v52  ;;  %v1839_v24 = vmul.f32 %v9815_v38, %v14358_v6  ;;  %v2624_v59 = vadd.f32 %v2610_v61, %v14566_v53  ;;  %v2623_v36 = vadd.f32 %v2609_v57, %v14567_v22  ;;  %v14569_v48 = vld [vmem:[#allocation128_spill] sm:$0xff] }
 0x1f2   : > { %v10022_v2 = vpop.permute.xlu0 %1949  ;;  %v10039_v40 = vadd.f32 %v9316_v35, %v2648_v32  ;;  %v2650_v49 = vadd.f32 %v14568_v45, %v2622_v33  ;;  %v2649_v21 = vadd.f32 %v14569_v48, %v2621_v12  ;;  %v2611_v52 = vmul.f32 %v9921_v51, %v14413_v23  ;;  %v14571_v33 = vld [vmem:[#allocation125_spill] sm:$0xff]  ;;  %v14573_v48 = vld [vmem:[#allocation127_spill] sm:$0xff] }
 0x1f3   : > { %2833 = vperm.xlu0 %6893, %v2777_v62   ;;  %v1842_v20 = vmul.f32 %v9837_v10, %v14358_v6  ;;  %v10050_v61 = vadd.f32 %v9331_v29, %v2647_v8  ;;  %v13992_v57 = vmov 1.0   ;;  %v285_v32 = vand.u32 7, %v14549_v50  ;;  %v14572_v29 = vld [vmem:[#allocation66_spill] sm:$0xff] }
 0x1f4   : > { %v10047_v62 = vpop.permute.xlu1 %1964  ;;  %v10055_v35 = vsel %vm10027_vm1, 0.0, %v13992_v57  ;;  %v10059_v12 = vadd.f32 %v14571_v33, %v1852_v41  ;;  %v1854_v53 = vadd.f32 %v1840_v11, %v9779_v17  ;;  %v1841_v22 = vmul.f32 %v9921_v51, %v14358_v6  ;;  %2848 = vperm.xlu1 %6894, %v2780_v58   ;;  %v10072_v57 = vld [vmem:[%s7018_s23 + $0x9] sm:$0xff]  ;;  %v14575_v41 = vld [vmem:[#allocation130_spill] sm:$0xff]  ;;  %v2963_v11 = vld [vmem:[%s7018_s23 + $0x1] sm:$0xff] }
 0x1f5   : > { %14570 = vst [vmem:[#allocation65_spill] sm:$0xff] %v10055_v35  ;;  %v2626_v8 = vadd.f32 %v2612_v28, %v14572_v29  ;;  %v10068_v23 = vadd.f32 %v14573_v48, %v1851_v31  ;;  %v1853_v25 = vadd.f32 %v1839_v24, %v9791_v26  ;;  %14574 = vst [vmem:[#allocation85_spill] sm:$0xff] %v10072_v57  ;;  %v14576_v35 = vld [vmem:[#allocation132_spill] sm:$0xff]  ;;  %v14577_v28 = vld [vmem:[#allocation34_spill] sm:$0xff]  ;;  %v269_v29 = vadd.s32 16, %v14549_v50 }
 0x1f6   : > { %v10064_v45 = vpop.permute.xlu0 %1959  ;;  %v2652_v33 = vadd.f32 %v14575_v41, %v2624_v59  ;;  %v2651_v17 = vadd.f32 %v14576_v35, %v2623_v36  ;;  %v10078_v51 = vadd.f32 %v9374_v39, %v2650_v49  ;;  %v10081_v58 = vadd.f32 %v9391_v9, %v2649_v21  ;;  %v14580_v21 = vld [vmem:[#allocation129_spill] sm:$0xff]  ;;  %v14582_v35 = vld [vmem:[#allocation131_spill] sm:$0xff]  ;;  %v14605_v50 = vld [vmem:[#allocation156_spill] sm:$0xff] }
 0x1f7   : > { %2843 = vperm.xlu0 %6893, %v2779_v27   ;;  %v2625_v31 = vadd.f32 %v2611_v52, %v14577_v28  ;;  %v1856_v26 = vadd.f32 %v1842_v20, %v9812_v13  ;;  %v1998_v24 = vmul.f32 %v9076_v7, %v9945_v15  ;;  %v1997_v59 = vmul.f32 %v9076_v7, %v9952_v1  ;;  %v14581_v52 = vld [vmem:[#allocation134_spill] sm:$0xff] }
 0x1f8   : > { %v10090_v36 = vpop.permute.xlu1 %1974  ;;  %vm10092_vm2 = vcmp.eq.s32.totalorder %v285_v32, 7  ;;  %v10097_v9 = vadd.f32 %v14580_v21, %v1854_v53  ;;  %v1855_v27 = vadd.f32 %v1841_v22, %v9835_v46  ;;  %2984 = vperm.xlu1 %6894, %v10072_v57   ;;  %v2684_v13 = vmul.f32 %v9945_v15, %v14358_v6  ;;  %v10110_v32 = vld [vmem:[%s7018_s23 + $0x19] sm:$0xff]  ;;  %v10123_v28 = vld [vmem:[%s7018_s23 + $0x11] sm:$0xff] }
 0x1f9   : > { %v2654_v20 = vadd.f32 %v14581_v52, %v2626_v8  ;;  %v10107_v48 = vadd.f32 %v14582_v35, %v1853_v25  ;;  %14583 = vst [vmem:[#allocation93_spill] sm:$0xff] %v10110_v32  ;;  %v2683_v53 = vmul.f32 %v9952_v1, %v14358_v6  ;;  %v10115_v46 = vadd.f32 %v9432_v30, %v2652_v33  ;;  %v14585_v8 = vld [vmem:[#allocation136_spill] sm:$0xff]  ;;  %v14588_v35 = vld [vmem:[#allocation133_spill] sm:$0xff] }
 0x1fa   : > { %v10100_v49 = vpop.permute.xlu0 %1969  ;;  %v10118_v22 = vadd.f32 %v9447_v3, %v2651_v17  ;;  %v2000_v41 = vmul.f32 %v9076_v7, %v9978_v4  ;;  %14584 = vst [vmem:[#allocation9_spill] sm:$0xff] %v10123_v28  ;;  %v2653_v25 = vadd.f32 %v14585_v8, %v2625_v31  ;;  %v14586_v21 = vmov 1.0   ;;  %v14591_v8 = vld [vmem:[#allocation135_spill] sm:$0xff] }
 0x1fb   : > { %2979 = vperm.xlu0 %6893, %v2963_v11   ;;  %v10129_v11 = vsel %vm10092_vm2, 0.0, %v14586_v21  ;;  %v299_v52 = vand.u32 7, %v269_v29  ;;  %v1884_v30 = vadd.f32 %v14588_v35, %v1856_v26  ;;  %v1999_v3 = vmul.f32 %v9076_v7, %v9992_v5  ;;  %v14594_v26 = vld [vmem:[#allocation38_spill] sm:$0xff]  ;;  %vm12563_vm2 = vmor %vm4866_vm14, %vm4867_vm15 }
 0x1fc   : > { %14587 = vst [vmem:[#allocation110_spill] sm:$0xff] %v10129_v11  ;;  %v10134_v33 = vpop.permute.xlu1 %1984  ;;  %v10137_v17 = vadd.f32 %v1998_v24, %v9939_v37  ;;  %v10140_v31 = vadd.f32 %v1997_v59, %v9956_v63  ;;  %v1883_v39 = vadd.f32 %v14591_v8, %v1855_v27  ;;  %2994 = vperm.xlu1 %6894, %v10110_v32   ;;  %v10157_v37 = vld [vmem:[%s13866_s1 + $0x8] ss:$0 sm:$0xff]  ;;  %v10163_v24 = vld [vmem:[%s7018_s23 + $0x29] sm:$0xff]  ;;  %v14598_v27 = vld [vmem:[#allocation147_spill] sm:$0xff] }
 0x1fd   : > { %v10147_v29 = vadd.f32 %v2684_v13, %v9924_v54  ;;  %v2686_v7 = vmul.f32 %v9978_v4, %v14358_v6  ;;  %v10152_v35 = vadd.f32 %v14594_v26, %v2654_v20  ;;  %14595 = vst [vmem:[#allocation12_spill] sm:$0xff] %v10157_v37  ;;  %v2002_v63 = vmul.f32 %v10157_v37, %v10016_v44  ;;  %v10175_v8 = vld [vmem:[%s7018_s23 + $0x21] sm:$0xff] }
 0x1fe   : > { %14589 = vst [vmem:[#allocation94_spill] sm:$0xff] %v10137_v17  ;;  %14590 = vst [vmem:[#allocation68_spill] sm:$0xff] %v10140_v31  ;;  %v10143_v57 = vpop.permute.xlu0 %1979  ;;  %v10166_v54 = vadd.f32 %v2683_v53, %v9933_v16  ;;  %v2685_v59 = vmul.f32 %v9992_v5, %v14358_v6  ;;  %v1901_v13 = vadd.f32 %v14598_v27, %v9959_v14  ;;  %v14600_v26 = vld [vmem:[#allocation200_spill] sm:$0xff]  ;;  %vm451_vm3 = vcmp.eq.s32.totalorder %v299_v52, 7 }
 0x1ff   : > { %14592 = vst [vmem:[#allocation88_spill] sm:$0xff] %v10143_v57  ;;  %14593 = vst [vmem:[#allocation69_spill] sm:$0xff] %v10147_v29  ;;  %2989 = vperm.xlu0 %6893, %v10123_v28   ;;  %v2001_v20 = vmul.f32 %v10157_v37, %v10022_v2  ;;  %v10178_v11 = vadd.f32 %v14600_v26, %v2653_v25  ;;  %v10181_v32 = vadd.f32 %v2000_v41, %v9967_v42  ;;  %v2970_v26 = vld [vmem:[%s7018_s23 + $0x39] sm:$0xff]  ;;  %v14617_v17 = vld [vmem:[#allocation176_spill] sm:$0xff]  ;;  %vm5010_vm1 = vsmask.f32 7938 }
 0x200   : > { %14596 = vst [vmem:[#allocation5_spill] sm:$0xff] %v10163_v24  ;;  %14597 = vst [vmem:[#allocation30_spill] sm:$0xff] %v10166_v54  ;;  %v10183_v16 = vpop.permute.xlu1 %1994  ;;  %v10189_v29 = vadd.f32 %v1999_v3, %v1901_v13  ;;  %v1904_v28 = vadd.f32 %v14605_v50, %v9985_v47  ;;  %3004 = vperm.xlu1 %6894, %v10163_v24   ;;  %v10197_v42 = vadd.f32 %v2686_v7, %v9963_v43  ;;  %v14607_v3 = vld [vmem:[#allocation157_spill] sm:$0xff]  ;;  %v14611_v7 = vld [vmem:[#allocation166_spill] sm:$0xff] }
 0x201   : > { %14599 = vst [vmem:[#allocation113_spill] sm:$0xff] %v10175_v8  ;;  %14601 = vst [vmem:[#allocation10_spill] sm:$0xff] %v10181_v32  ;;  %v2688_v41 = vmul.f32 %v10016_v44, %v14358_v6  ;;  %v2687_v52 = vmul.f32 %v10022_v2, %v14358_v6  ;;  %v1903_v13 = vadd.f32 %v14607_v3, %v9988_v19  ;;  %v10211_v47 = vsel %vm451_vm3, 0.0, %v14586_v21  ;;  %v10222_v3 = vld [vmem:[%s7018_s23 + $0x31] sm:$0xff] }
 0x202   : > { %14604 = vst [vmem:[#allocation90_spill] sm:$0xff] %v10189_v29  ;;  %v10193_v25 = vpop.permute.xlu0 %1989  ;;  %14606 = vst [vmem:[#allocation101_spill] sm:$0xff] %v10197_v42  ;;  %v10208_v50 = vadd.f32 %v2685_v59, %v9981_v18  ;;  %v10213_v43 = vadd.f32 %v2002_v63, %v1904_v28  ;;  %v1906_v27 = vadd.f32 %v14611_v7, %v10011_v60  ;;  %v14616_v7 = vld [vmem:[#allocation167_spill] sm:$0xff]  ;;  %v14620_v59 = vld [vmem:[#allocation177_spill] sm:$0xff] }
 0x203   : > { %2999 = vperm.xlu0 %6893, %v10175_v8   ;;  %14609 = vst [vmem:[#allocation36_spill] sm:$0xff] %v10211_v47  ;;  %v2004_v54 = vmul.f32 %v10157_v37, %v10047_v62  ;;  %v2003_v19 = vmul.f32 %v10157_v37, %v10064_v45  ;;  %14612 = vst [vmem:[#allocation14_spill] sm:$0xff] %v10222_v3  ;;  %v10226_v31 = vadd.f32 %v2001_v20, %v1903_v13  ;;  %v14621_v63 = vld [vmem:[#allocation186_spill] sm:$0xff]  ;;  %v14664_v42 = vld [vmem:[#allocation115_spill] sm:$0xff] }
 0x204   : > { %14608 = vst [vmem:[#allocation15_spill] sm:$0xff] %v10208_v50  ;;  %14610 = vst [vmem:[#allocation140_spill] sm:$0xff] %v10213_v43  ;;  %v10228_v47 = vpop.permute.xlu1 %2228  ;;  %v2690_v28 = vmul.f32 %v10047_v62, %v14358_v6  ;;  %v1905_v14 = vadd.f32 %v14616_v7, %v10014_v56  ;;  %v1908_v53 = vadd.f32 %v14617_v17, %v10059_v12  ;;  %3014 = vperm.xlu1 %6894, %v2970_v26   ;;  %v2972_v56 = vld [vmem:[%s7018_s23 + $0x49] sm:$0xff]  ;;  %v2971_v7 = vld [vmem:[%s7018_s23 + $0x41] sm:$0xff] }
 0x205   : > { %14614 = vst [vmem:[#allocation137_spill] sm:$0xff] %v10226_v31  ;;  %v10241_v20 = vadd.f32 %v2688_v41, %v9997_v55  ;;  %v10244_v13 = vadd.f32 %v2687_v52, %v10005_v34  ;;  %v1907_v32 = vadd.f32 %v14620_v59, %v10068_v23  ;;  %v1910_v18 = vadd.f32 %v14621_v63, %v10097_v9  ;;  %v14623_v55 = vld [vmem:[#allocation187_spill] sm:$0xff]  ;;  %v14624_v34 = vld [vmem:[#allocation197_spill] sm:$0xff]  ;;  %v14628_v29 = vld [vmem:[#allocation198_spill] sm:$0xff] }
 0x206   : > { %v10238_v21 = vpop.permute.xlu0 %2223  ;;  %v2689_v12 = vmul.f32 %v10064_v45, %v14358_v6  ;;  %v1909_v41 = vadd.f32 %v14623_v55, %v10107_v48  ;;  %v10259_v52 = vadd.f32 %v14624_v34, %v1884_v30  ;;  %v10264_v9 = vadd.f32 %v2004_v54, %v1906_v27  ;;  %v14630_v54 = vld [vmem:[#allocation43_spill] sm:$0xff]  ;;  %v14639_v23 = vld [vmem:[#allocation62_spill] sm:$0xff]  ;;  %vm12582_vm3 = vmand %vm4719_vm0, %vm5010_vm1 }
 0x207   : > { %14618 = vst [vmem:[#allocation74_spill] sm:$0xff] %v10241_v20  ;;  %14619 = vst [vmem:[#allocation138_spill] sm:$0xff] %v10244_v13  ;;  %3009 = vperm.xlu0 %6893, %v10222_v3   ;;  %v10266_v63 = vadd.f32 %v2003_v19, %v1905_v14  ;;  %v10269_v60 = vadd.f32 %v14628_v29, %v1883_v39  ;;  %v2006_v26 = vmul.f32 %v10157_v37, %v10090_v36  ;;  %v2974_v59 = vld [vmem:[%s7018_s23 + $0x59] sm:$0xff]  ;;  %v14670_v3 = vld [vmem:[#allocation116_spill] sm:$0xff] }
 0x208   : > { %14626 = vst [vmem:[#allocation41_spill] sm:$0xff] %v10264_v9  ;;  %v10273_v43 = vpop.permute.xlu1 %2238  ;;  %v10276_v48 = vadd.f32 %v2690_v28, %v10039_v40  ;;  %v2692_v30 = vmul.f32 %v10090_v36, %v14358_v6  ;;  %v10282_v27 = vmul.f32 %v14630_v54, %v14171_v0  ;;  %v2005_v39 = vmul.f32 %v10157_v37, %v10100_v49  ;;  %v14632_v40 = vld [vmem:[#allocation96_spill] sm:$0xff]  ;;  %v14634_v28 = vld [vmem:[#allocation73_spill] sm:$0xff]  ;;  %v14647_v50 = vld [vmem:[#allocation51_spill] sm:$0xff] }
 0x209   : > { %14627 = vst [vmem:[#allocation105_spill] sm:$0xff] %v10266_v63  ;;  %3024 = vperm.xlu1 %6894, %v2972_v56   ;;  %v2691_v14 = vmul.f32 %v10100_v49, %v14358_v6  ;;  %v10292_v19 = vmul.f32 %v14632_v40, %v14171_v0  ;;  %v10296_v55 = vmul.f32 %v14634_v28, %v14171_v0  ;;  %v14637_v56 = vld [vmem:[#allocation60_spill] sm:$0xff]  ;;  %v14665_v8 = vld [vmem:[#allocation83_spill] sm:$0xff]  ;;  %v14675_v13 = vld [vmem:[#allocation117_spill] sm:$0xff] }
 0x20a   : > { %14629 = vst [vmem:[#allocation108_spill] sm:$0xff] %v10276_v48  ;;  %14631 = vst [vmem:[#allocation16_spill] sm:$0xff] %v10282_v27  ;;  %v10286_v29 = vpop.permute.xlu0 %2233  ;;  %v2008_v34 = vmul.f32 %v10157_v37, %v10134_v33  ;;  %v10302_v27 = vadd.f32 %v2689_v12, %v10050_v61  ;;  %v10306_v31 = vmul.f32 %v14637_v56, %v14171_v0  ;;  %v14643_v12 = vld [vmem:[#allocation44_spill] sm:$0xff] }
 0x20b   : > { %14633 = vst [vmem:[#allocation77_spill] sm:$0xff] %v10292_v19  ;;  %14635 = vst [vmem:[#allocation102_spill] sm:$0xff] %v10296_v55  ;;  %3019 = vperm.xlu0 %6893, %v2971_v7   ;;  %v10310_v17 = vmul.f32 %v14639_v23, %v14171_v0  ;;  %v2007_v19 = vmul.f32 %v10157_v37, %v10143_v57  ;;  %v2973_v55 = vld [vmem:[%s7018_s23 + $0x51] sm:$0xff]  ;;  %v10326_v20 = vadd.f32 %v2692_v30, %v10078_v51  ;;  %v14649_v7 = vld [vmem:[#allocation103_spill] sm:$0xff] }
 0x20c   : > { %14636 = vst [vmem:[#allocation20_spill] sm:$0xff] %v10302_v27  ;;  %14638 = vst [vmem:[#allocation72_spill] sm:$0xff] %v10306_v31  ;;  %v10321_v27 = vmul.f32 %v14643_v12, %v14171_v0  ;;  %v10323_v31 = vpop.permute.xlu1 %2248  ;;  %v10332_v24 = vmul.f32 %v14647_v50, %v14171_v0  ;;  %v10336_v9 = vmul.f32 %v14649_v7, %v14171_v0 }
 0x20d   : > { %14640 = vst [vmem:[#allocation50_spill] sm:$0xff] %v10310_v17  ;;  %14645 = vst [vmem:[#allocation109_spill] sm:$0xff] %v10326_v20  ;;  %v10328_v17 = vadd.f32 %v2006_v26, %v1908_v53  ;;  %3034 = vperm.xlu1 %6894, %v2974_v59   ;;  %v2694_v51 = vmul.f32 %v10134_v33, %v14358_v6  ;;  %v10345_v53 = vadd.f32 %v2005_v39, %v1907_v32  ;;  %v14653_v26 = vld [vmem:[#allocation58_spill] sm:$0xff]  ;;  %v2975_v39 = vld [vmem:[%s7018_s23 + $0x61] sm:$0xff] }
 0x20e   : > { %14644 = vst [vmem:[#allocation80_spill] sm:$0xff] %v10321_v27  ;;  %14648 = vst [vmem:[#allocation124_spill] sm:$0xff] %v10332_v24  ;;  %v10338_v61 = vpop.permute.xlu0 %2243  ;;  %v10341_v27 = vadd.f32 %v2691_v14, %v10081_v58  ;;  %v10349_v30 = vmul.f32 %v14653_v26, %v14171_v0  ;;  %v2976_v24 = vld [vmem:[%s7018_s23 + $0x69] sm:$0xff]  ;;  %v10354_v63 = vadd.f32 %v2008_v34, %v1910_v18 }
 0x20f   : > { %14646 = vst [vmem:[#allocation4_spill] sm:$0xff] %v10328_v17  ;;  %14650 = vst [vmem:[#allocation7_spill] sm:$0xff] %v10336_v9  ;;  %3029 = vperm.xlu0 %6893, %v2973_v55   ;;  %v2693_v9 = vmul.f32 %v10143_v57, %v14358_v6  ;;  %v10358_v58 = vmul.f32 %v9815_v38, %v14171_v0  ;;  %v10362_v59 = vmul.f32 %v9837_v10, %v14171_v0  ;;  %v14659_v55 = vld [vmem:[#allocation25_spill] sm:$0xff] }
 0x210   : > { %14651 = vst [vmem:[#allocation112_spill] sm:$0xff] %v10341_v27  ;;  %14652 = vst [vmem:[#allocation126_spill] sm:$0xff] %v10345_v53  ;;  %v2010_v32 = vmul.f32 %v10157_v37, %v10183_v16  ;;  %v10367_v14 = vadd.f32 %v2007_v19, %v1909_v41  ;;  %v3959_v18 = vmul.f32 %v14632_v40, %v14659_v55  ;;  %v14661_v41 = vld [vmem:[#allocation71_spill] sm:$0xff]  ;;  %v10399_v17 = vld [vmem:[%s7018_s23 + $0x209] sm:$0xff] }
 0x211   : > { %14654 = vst [vmem:[#allocation128_spill] sm:$0xff] %v10349_v30  ;;  %14655 = vst [vmem:[#allocation125_spill] sm:$0xff] %v10354_v63  ;;  %v3960_v30 = vmul.f32 %v14630_v54, %v14659_v55  ;;  %v2009_v34 = vmul.f32 %v10157_v37, %v10193_v25  ;;  %v10383_v19 = vmul.f32 %v14661_v41, %v14171_v0  ;;  %3044 = vperm.xlu1 %6894, %v2976_v24   ;;  %v14671_v53 = vld [vmem:[#allocation106_spill] sm:$0xff]  ;;  %v14690_v63 = vld [vmem:[#allocation139_spill] sm:$0xff] }
 0x212   : > { %14656 = vst [vmem:[#allocation66_spill] sm:$0xff] %v10358_v58  ;;  %14657 = vst [vmem:[#allocation127_spill] sm:$0xff] %v10362_v59  ;;  %v10375_v58 = vpop.permute.xlu1 %2258  ;;  %v2696_v59 = vmul.f32 %v10183_v16, %v14358_v6  ;;  %v10385_v27 = vpop.permute.xlu0 %2253  ;;  %v10388_v20 = vadd.f32 %v2694_v51, %v10115_v46  ;;  %v10394_v57 = vadd.f32 %v14665_v8, %v14664_v42  ;;  %v3131_v8 = vld [vmem:[%s7018_s23 + $0x201] sm:$0xff] }
 0x213   : > { %14658 = vst [vmem:[#allocation130_spill] sm:$0xff] %v10367_v14  ;;  %14662 = vst [vmem:[#allocation132_spill] sm:$0xff] %v10383_v19  ;;  %v3962_v48 = vmul.f32 %v14634_v28, %v14659_v55  ;;  %3039 = vperm.xlu0 %6893, %v2975_v39   ;;  %v10402_v19 = vadd.f32 %v2693_v9, %v10118_v22  ;;  %v2695_v46 = vmul.f32 %v10193_v25, %v14358_v6  ;;  %v14677_v9 = vld [vmem:[#allocation118_spill] sm:$0xff]  ;;  %v14686_v42 = vld [vmem:[#allocation11_spill] sm:$0xff] }
 0x214   : > { %14666 = vst [vmem:[#allocation34_spill] sm:$0xff] %v10394_v57  ;;  %14667 = vst [vmem:[#allocation129_spill] sm:$0xff] %v10399_v17  ;;  %v10410_v37 = vadd.f32 %v14671_v53, %v14670_v3  ;;  %v10416_v39 = vadd.f32 %v2010_v32, %v10259_v52  ;;  %v10419_v22 = vadd.f32 %v3960_v30, %v14675_v13  ;;  %v14680_v13 = vld [vmem:[#allocation33_spill] sm:$0xff]  ;;  %v14693_v14 = vld [vmem:[#allocation120_spill] sm:$0xff] }
 0x215   : > { %14668 = vst [vmem:[#allocation134_spill] sm:$0xff] %v10402_v19  ;;  %v10422_v6 = vadd.f32 %v3959_v18, %v14677_v9  ;;  %v10427_v51 = vadd.f32 %v2696_v59, %v10152_v35  ;;  %v10430_v3 = vadd.f32 %v2009_v34, %v10269_v60  ;;  %v3961_v52 = vmul.f32 %v14637_v56, %v14659_v55  ;;  %v14681_v18 = vld [vmem:[#allocation79_spill] sm:$0xff] }
 0x216   : > { %14672 = vst [vmem:[#allocation131_spill] sm:$0xff] %v10410_v37  ;;  %14674 = vst [vmem:[#allocation136_spill] sm:$0xff] %v10416_v39  ;;  %v10424_v19 = vpop.permute.xlu1 %2268  ;;  %v3964_v53 = vmul.f32 %v14639_v23, %v14659_v55  ;;  %v2292_v30 = vmul.f32 %v10228_v47, %v14680_v13  ;;  %v10438_v32 = vpop.permute.xlu0 %2263  ;;  %3152 = vperm.xlu1 %6894, %v10399_v17   ;;  %v10442_v35 = vadd.f32 %v3962_v48, %v14681_v18  ;;  %v10451_v9 = vld [vmem:[%s7018_s23 + $0x219] sm:$0xff]  ;;  %v10461_v18 = vld [vmem:[%s7018_s23 + $0x211] sm:$0xff] }
 0x217   : > { %14676 = vst [vmem:[#allocation133_spill] sm:$0xff] %v10419_v22  ;;  %14678 = vst [vmem:[#allocation135_spill] sm:$0xff] %v10422_v6  ;;  %v3963_v60 = vmul.f32 %v14643_v12, %v14659_v55  ;;  %v3966_v59 = vmul.f32 %v14647_v50, %v14659_v55  ;;  %v2291_v34 = vmul.f32 %v10238_v21, %v14680_v13  ;;  %3147 = vperm.xlu0 %6893, %v3131_v8   ;;  %v14685_v37 = vld [vmem:[#allocation203_spill] sm:$0xff]  ;;  %v14688_v39 = vld [vmem:[#allocation81_spill] sm:$0xff] }
 0x218   : > { %14679 = vst [vmem:[#allocation38_spill] sm:$0xff] %v10430_v3  ;;  %14682 = vst [vmem:[#allocation147_spill] sm:$0xff] %v10442_v35  ;;  %v10454_v47 = vadd.f32 %v2695_v46, %v10178_v11  ;;  %v3965_v57 = vmul.f32 %v14649_v7, %v14659_v55  ;;  %v3968_v48 = vmul.f32 %v14653_v26, %v14659_v55 }
 0x219   : > { %v3967_v21 = vmul.f32 %v9815_v38, %v14659_v55  ;;  %v3970_v8 = vmul.f32 %v9837_v10, %v14659_v55  ;;  %v3969_v11 = vmul.f32 %v14661_v41, %v14659_v55  ;;  %v2294_v46 = vmul.f32 %v10273_v43, %v14680_v13  ;;  %v14691_v43 = vld [vmem:[#allocation119_spill] sm:$0xff] }
 0x21a   : > { %14683 = vst [vmem:[#allocation200_spill] sm:$0xff] %v10454_v47  ;;  %v10473_v22 = vpop.permute.xlu1 %2278  ;;  %v10478_v6 = vadd.f32 %v3961_v52, %v14686_v42  ;;  %v10481_v35 = vadd.f32 %v3964_v53, %v14688_v39  ;;  %v10484_v24 = vadd.f32 %v2292_v30, %v14690_v63  ;;  %v2293_v55 = vmul.f32 %v10286_v29, %v14680_v13  ;;  %v10488_v17 = vpop.permute.xlu0 %2273  ;;  %v14695_v42 = vld [vmem:[#allocation141_spill] sm:$0xff]  ;;  %v14696_v39 = vld [vmem:[#allocation84_spill] sm:$0xff]  ;;  %v14698_v29 = vld [vmem:[#allocation86_spill] sm:$0xff] }
 0x21b   : > { %3162 = vperm.xlu1 %6894, %v10451_v9   ;;  %v10492_v47 = vadd.f32 %v3963_v60, %v14691_v43  ;;  %v10495_v3 = vadd.f32 %v3966_v59, %v14693_v14  ;;  %v10498_v52 = vadd.f32 %v2291_v34, %v14695_v42  ;;  %3157 = vperm.xlu0 %6893, %v10461_v18   ;;  %v3136_v63 = vld [vmem:[%s7018_s23 + $0x229] sm:$0xff]  ;;  %v10515_v60 = vld [vmem:[%s7018_s23 + $0x221] sm:$0xff]  ;;  %v14703_v43 = vld [vmem:[#allocation122_spill] sm:$0xff] }
 0x21c   : > { %14687 = vst [vmem:[#allocation156_spill] sm:$0xff] %v10478_v6  ;;  %14689 = vst [vmem:[#allocation157_spill] sm:$0xff] %v10481_v35  ;;  %v10503_v53 = vadd.f32 %v3965_v57, %v14696_v39  ;;  %v10506_v30 = vadd.f32 %v3968_v48, %v14698_v29  ;;  %v10510_v35 = vmul.f32 %v9945_v15, %v14171_v0  ;;  %v14701_v59 = vld [vmem:[#allocation121_spill] sm:$0xff]  ;;  %v14705_v57 = vld [vmem:[#allocation123_spill] sm:$0xff] }
 0x21d   : > { %14692 = vst [vmem:[#allocation166_spill] sm:$0xff] %v10492_v47  ;;  %14694 = vst [vmem:[#allocation167_spill] sm:$0xff] %v10495_v3  ;;  %v2296_v14 = vmul.f32 %v10323_v31, %v14680_v13  ;;  %v10518_v34 = vadd.f32 %v3967_v21, %v14701_v59  ;;  %v10521_v42 = vadd.f32 %v3970_v8, %v14703_v43  ;;  %v14707_v48 = vld [vmem:[#allocation149_spill] sm:$0xff] }
 0x21e   : > { %14697 = vst [vmem:[#allocation176_spill] sm:$0xff] %v10503_v53  ;;  %14699 = vst [vmem:[#allocation177_spill] sm:$0xff] %v10506_v30  ;;  %v10524_v39 = vadd.f32 %v3969_v11, %v14705_v57  ;;  %v10527_v29 = vadd.f32 %v2294_v46, %v14707_v48  ;;  %v10529_v30 = vpop.permute.xlu1 %2288  ;;  %v10533_v31 = vmul.f32 %v9952_v1, %v14171_v0  ;;  %v14711_v11 = vld [vmem:[#allocation153_spill] sm:$0xff]  ;;  %v10548_v43 = vpop.permute.xlu0 %2283 }
 0x21f   : > { %14700 = vst [vmem:[#allocation186_spill] sm:$0xff] %v10510_v35  ;;  %14702 = vst [vmem:[#allocation187_spill] sm:$0xff] %v10518_v34  ;;  %v10537_v21 = vmul.f32 %v9978_v4, %v14171_v0  ;;  %v10541_v8 = vmul.f32 %v9992_v5, %v14171_v0  ;;  %v10544_v59 = vadd.f32 %v2293_v55, %v14711_v11  ;;  %3172 = vperm.xlu1 %6894, %v3136_v63   ;;  %v14715_v55 = vld [vmem:[#allocation91_spill] sm:$0xff]  ;;  %v3137_v34 = vld [vmem:[%s7018_s23 + $0x231] sm:$0xff] }
 0x220   : > { %14704 = vst [vmem:[#allocation197_spill] sm:$0xff] %v10521_v42  ;;  %14706 = vst [vmem:[#allocation198_spill] sm:$0xff] %v10524_v39  ;;  %v2295_v46 = vmul.f32 %v10338_v61, %v14680_v13  ;;  %v10552_v57 = vmul.f32 %v10016_v44, %v14171_v0  ;;  %v10556_v48 = vmul.f32 %v10022_v2, %v14171_v0  ;;  %3167 = vperm.xlu0 %6893, %v10515_v60   ;;  %v14717_v61 = vld [vmem:[#allocation48_spill] sm:$0xff] }
 0x221   : > { %14708 = vst [vmem:[#allocation43_spill] sm:$0xff] %v10533_v31  ;;  %14709 = vst [vmem:[#allocation96_spill] sm:$0xff] %v10537_v21  ;;  %v14714_v21 = vld [vmem:[#allocation27_spill] sm:$0xff]  ;;  %v10570_v63 = vmul.f32 %v9945_v15, %v14680_v13  ;;  %v3140_v3 = vld [vmem:[%s7018_s23 + $0x249] sm:$0xff] }
 0x222   : > { %14710 = vst [vmem:[#allocation73_spill] sm:$0xff] %v10541_v8  ;;  %14712 = vst [vmem:[#allocation60_spill] sm:$0xff] %v10552_v57  ;;  %v3138_v8 = vld [vmem:[%s7018_s23 + $0x239] sm:$0xff]  ;;  %v10562_v11 = vmul.f32 %v14715_v55, %v14714_v21  ;;  %v10566_v39 = vmul.f32 %v14717_v61, %v14714_v21  ;;  %v10594_v53 = vpop.permute.xlu1 %2340 }
 0x223   : > { %14713 = vst [vmem:[#allocation62_spill] sm:$0xff] %v10556_v48  ;;  %14719 = vst [vmem:[#allocation103_spill] sm:$0xff] %v10570_v63  ;;  %v14720_v57 = vld [vmem:[#allocation22_spill] sm:$0xff]  ;;  %v14722_v48 = vld [vmem:[#allocation159_spill] sm:$0xff]  ;;  %3182 = vperm.xlu1 %6894, %v3138_v8  }
 0x224   : > { %14716 = vst [vmem:[#allocation44_spill] sm:$0xff] %v10562_v11  ;;  %14718 = vst [vmem:[#allocation51_spill] sm:$0xff] %v10566_v39  ;;  %v10574_v31 = vmul.f32 %v14715_v55, %v14720_v57  ;;  %v10577_v42 = vadd.f32 %v2296_v14, %v14722_v48  ;;  %v10582_v11 = vmul.f32 %v9945_v15, %v14714_v21  ;;  %3177 = vperm.xlu0 %6893, %v3137_v34   ;;  %v3139_v34 = vld [vmem:[%s7018_s23 + $0x241] sm:$0xff] }
 0x225   : > { %v10586_v39 = vmul.f32 %v9952_v1, %v14680_v13  ;;  %v10590_v63 = vmul.f32 %v14717_v61, %v14720_v57  ;;  %v2298_v55 = vmul.f32 %v10375_v58, %v14680_v13  ;;  %v10598_v14 = vmul.f32 %v9952_v1, %v14714_v21  ;;  %v14729_v61 = vld [vmem:[#allocation160_spill] sm:$0xff] }
 0x226   : > { %14721 = vst [vmem:[#allocation58_spill] sm:$0xff] %v10574_v31  ;;  %14723 = vst [vmem:[#allocation71_spill] sm:$0xff] %v10582_v11  ;;  %v10602_v48 = vmul.f32 %v14630_v54, %v14714_v21  ;;  %v10609_v11 = vadd.f32 %v2295_v46, %v14729_v61  ;;  %v2297_v58 = vmul.f32 %v10385_v27, %v14680_v13 }
 0x227   : > { %14724 = vst [vmem:[#allocation115_spill] sm:$0xff] %v10586_v39  ;;  %14725 = vst [vmem:[#allocation83_spill] sm:$0xff] %v10590_v63  ;;  %v10606_v39 = vmul.f32 %v14632_v40, %v14714_v21  ;;  %v10613_v63 = vpop.permute.xlu0 %2335  ;;  %v10626_v46 = vmul.f32 %v9978_v4, %v14714_v21  ;;  %v10630_v27 = vmul.f32 %v9992_v5, %v14680_v13  ;;  %3192 = vperm.xlu1 %6894, %v3140_v3  }
 0x228   : > { %14726 = vst [vmem:[#allocation116_spill] sm:$0xff] %v10598_v14  ;;  %14727 = vst [vmem:[#allocation106_spill] sm:$0xff] %v10602_v48  ;;  %v10617_v14 = vmul.f32 %v9978_v4, %v14680_v13  ;;  %v10621_v48 = vmul.f32 %v14630_v54, %v14720_v57  ;;  %v10634_v8 = vmul.f32 %v14632_v40, %v14720_v57  ;;  %3187 = vperm.xlu0 %6893, %v3139_v34   ;;  %v3141_v34 = vld [vmem:[%s7018_s23 + $0x251] sm:$0xff] }
 0x229   : > { %14728 = vst [vmem:[#allocation117_spill] sm:$0xff] %v10606_v39  ;;  %14732 = vst [vmem:[#allocation79_spill] sm:$0xff] %v10626_v46  ;;  %v10638_v61 = vmul.f32 %v9992_v5, %v14714_v21  ;;  %v2300_v54 = vmul.f32 %v10424_v19, %v14680_v13  ;;  %v14740_v39 = vld [vmem:[#allocation169_spill] sm:$0xff]  ;;  %v10698_v3 = vmul.f32 %v14637_v56, %v14720_v57 }
 0x22a   : > { %14730 = vst [vmem:[#allocation118_spill] sm:$0xff] %v10617_v14  ;;  %14731 = vst [vmem:[#allocation33_spill] sm:$0xff] %v10621_v48  ;;  %v14736_v14 = vld [vmem:[#allocation52_spill] sm:$0xff] }
 0x22b   : > { %14733 = vst [vmem:[#allocation203_spill] sm:$0xff] %v10630_v27  ;;  %14734 = vst [vmem:[#allocation11_spill] sm:$0xff] %v10634_v8  ;;  %v10645_v46 = vmul.f32 %v9945_v15, %v14736_v14  ;;  %v10649_v27 = vmul.f32 %v9952_v1, %v14736_v14  ;;  %v10653_v40 = vmul.f32 %v9978_v4, %v14736_v14  ;;  %v14744_v4 = vld [vmem:[#allocation173_spill] sm:$0xff] }
 0x22c   : > { %14735 = vst [vmem:[#allocation81_spill] sm:$0xff] %v10638_v61  ;;  %v10656_v8 = vadd.f32 %v2298_v55, %v14740_v39  ;;  %v10658_v61 = vpop.permute.xlu1 %2350  ;;  %v10662_v19 = vmul.f32 %v9992_v5, %v14736_v14  ;;  %v10666_v15 = vmul.f32 %v14634_v28, %v14714_v21  ;;  %v10670_v1 = vmul.f32 %v14637_v56, %v14714_v21  ;;  %v10677_v55 = vpop.permute.xlu0 %2345 }
 0x22d   : > { %14737 = vst [vmem:[#allocation139_spill] sm:$0xff] %v10645_v46  ;;  %14738 = vst [vmem:[#allocation119_spill] sm:$0xff] %v10649_v27  ;;  %v2299_v39 = vmul.f32 %v10438_v32, %v14680_v13  ;;  %v10681_v5 = vmul.f32 %v10016_v44, %v14680_v13  ;;  %v10694_v32 = vmul.f32 %v10022_v2, %v14680_v13  ;;  %3197 = vperm.xlu0 %6893, %v3141_v34  }
 0x22e   : > { %14739 = vst [vmem:[#allocation120_spill] sm:$0xff] %v10653_v40  ;;  %14741 = vst [vmem:[#allocation141_spill] sm:$0xff] %v10662_v19  ;;  %v10673_v40 = vadd.f32 %v2297_v58, %v14744_v4  ;;  %v3142_v19 = vld [vmem:[%s7018_s23 + $0x259] sm:$0xff]  ;;  %v10690_v58 = vmul.f32 %v10016_v44, %v14714_v21  ;;  %v10702_v4 = vmul.f32 %v10022_v2, %v14714_v21 }
 0x22f   : > { %14742 = vst [vmem:[#allocation84_spill] sm:$0xff] %v10666_v15  ;;  %14743 = vst [vmem:[#allocation86_spill] sm:$0xff] %v10670_v1  ;;  %v10685_v15 = vmul.f32 %v14634_v28, %v14720_v57  ;;  %v14751_v28 = vld [vmem:[#allocation179_spill] sm:$0xff]  ;;  %v10718_v56 = vmul.f32 %v14639_v23, %v14714_v21  ;;  %3202 = vperm.xlu1 %6894, %v3142_v19   ;;  %v10762_v19 = vmul.f32 %v10047_v62, %v14171_v0 }
 0x230   : > { %14745 = vst [vmem:[#allocation121_spill] sm:$0xff] %v10681_v5  ;;  %14747 = vst [vmem:[#allocation123_spill] sm:$0xff] %v10690_v58  ;;  %v10705_v5 = vadd.f32 %v2300_v54, %v14751_v28  ;;  %v10710_v58 = vmul.f32 %v10016_v44, %v14736_v14  ;;  %v10722_v1 = vpop.permute.xlu1 %2360  ;;  %v10726_v54 = vmul.f32 %v14643_v12, %v14714_v21  ;;  %v14758_v28 = vld [vmem:[#allocation180_spill] sm:$0xff] }
 0x231   : > { %14746 = vst [vmem:[#allocation122_spill] sm:$0xff] %v10685_v15  ;;  %14748 = vst [vmem:[#allocation149_spill] sm:$0xff] %v10694_v32  ;;  %v10714_v32 = vmul.f32 %v10022_v2, %v14736_v14  ;;  %v10730_v44 = vmul.f32 %v10047_v62, %v14680_v13  ;;  %v10734_v2 = vmul.f32 %v14639_v23, %v14720_v57  ;;  %v3144_v23 = vld [vmem:[%s7018_s23 + $0x269] sm:$0xff] }
 0x232   : > { %14749 = vst [vmem:[#allocation153_spill] sm:$0xff] %v10698_v3  ;;  %14750 = vst [vmem:[#allocation27_spill] sm:$0xff] %v10702_v4  ;;  %v2302_v4 = vmul.f32 %v10473_v22, %v14680_v13  ;;  %v2301_v22 = vmul.f32 %v10488_v17, %v14680_v13  ;;  %v10758_v17 = vmul.f32 %v10064_v45, %v14714_v21  ;;  %v14802_v15 = vld [vmem:[#allocation93_spill] sm:$0xff] }
 0x233   : > { %14752 = vst [vmem:[#allocation91_spill] sm:$0xff] %v10710_v58  ;;  %14753 = vst [vmem:[#allocation48_spill] sm:$0xff] %v10714_v32  ;;  %v10741_v32 = vpop.permute.xlu0 %2355  ;;  %v2304_v34 = vmul.f32 %v10529_v30, %v14680_v13  ;;  %v10790_v30 = vmul.f32 %v14649_v7, %v14714_v21  ;;  %3212 = vperm.xlu1 %6894, %v3144_v23   ;;  %v14779_v23 = vld [vmem:[#allocation199_spill] sm:$0xff]  ;;  %v14799_v58 = vld [vmem:[#allocation113_spill] sm:$0xff] }
 0x234   : > { %14754 = vst [vmem:[#allocation22_spill] sm:$0xff] %v10718_v56  ;;  %14755 = vst [vmem:[#allocation159_spill] sm:$0xff] %v10726_v54  ;;  %v10737_v56 = vadd.f32 %v2299_v39, %v14758_v28  ;;  %v10745_v54 = vmul.f32 %v10047_v62, %v14714_v21  ;;  %v10754_v39 = vmul.f32 %v14643_v12, %v14720_v57 }
 0x235   : > { %14756 = vst [vmem:[#allocation160_spill] sm:$0xff] %v10730_v44  ;;  %14757 = vst [vmem:[#allocation169_spill] sm:$0xff] %v10734_v2  ;;  %v10749_v44 = vmul.f32 %v10064_v45, %v14680_v13  ;;  %v10766_v28 = vmul.f32 %v10064_v45, %v14171_v0  ;;  %v10773_v12 = vmul.f32 %v10047_v62, %v14736_v14 }
 0x236   : > { %14759 = vst [vmem:[#allocation173_spill] sm:$0xff] %v10745_v54  ;;  %14761 = vst [vmem:[#allocation180_spill] sm:$0xff] %v10754_v39  ;;  %v10777_v54 = vmul.f32 %v10064_v45, %v14736_v14  ;;  %v10794_v62 = vmul.f32 %v10090_v36, %v14680_v13  ;;  %v10798_v45 = vmul.f32 %v14647_v50, %v14720_v57 }
 0x237   : > { %14760 = vst [vmem:[#allocation179_spill] sm:$0xff] %v10749_v44  ;;  %14762 = vst [vmem:[#allocation206_spill] sm:$0xff] %v10758_v17  ;;  %v3143_v44 = vld [vmem:[%s7018_s23 + $0x261] sm:$0xff]  ;;  %v10781_v17 = vmul.f32 %v14647_v50, %v14714_v21  ;;  %v10817_v50 = vmul.f32 %v14649_v7, %v14720_v57  ;;  %v10840_v7 = vmul.f32 %v10100_v49, %v14736_v14 }
 0x238   : > { %14763 = vst [vmem:[#allocation207_spill] sm:$0xff] %v10762_v19  ;;  %14764 = vst [vmem:[#allocation208_spill] sm:$0xff] %v10766_v28  ;;  %v14768_v19 = vld [vmem:[#allocation189_spill] sm:$0xff]  ;;  %v10786_v28 = vpop.permute.xlu1 %2370  ;;  %3207 = vperm.xlu0 %6893, %v3143_v44   ;;  %v10836_v44 = vmul.f32 %v10090_v36, %v14736_v14 }
 0x239   : > { %14765 = vst [vmem:[#allocation209_spill] sm:$0xff] %v10773_v12  ;;  %14766 = vst [vmem:[#allocation210_spill] sm:$0xff] %v10777_v54  ;;  %v10784_v39 = vadd.f32 %v2302_v4, %v14768_v19  ;;  %v14772_v54 = vld [vmem:[#allocation193_spill] sm:$0xff]  ;;  %v2303_v4 = vmul.f32 %v10548_v43, %v14680_v13  ;;  %v10805_v19 = vpop.permute.xlu0 %2365  ;;  %v10825_v43 = vmul.f32 %v10090_v36, %v14171_v0 }
 0x23a   : > { %14767 = vst [vmem:[#allocation211_spill] sm:$0xff] %v10781_v17  ;;  %14769 = vst [vmem:[#allocation189_spill] sm:$0xff] %v10790_v30  ;;  %v10801_v12 = vadd.f32 %v2301_v22, %v14772_v54  ;;  %v10809_v30 = vmul.f32 %v10090_v36, %v14714_v21  ;;  %v10821_v54 = vmul.f32 %v10100_v49, %v14714_v21 }
 0x23b   : > { %14770 = vst [vmem:[#allocation212_spill] sm:$0xff] %v10794_v62  ;;  %14771 = vst [vmem:[#allocation213_spill] sm:$0xff] %v10798_v45  ;;  %v10813_v62 = vmul.f32 %v10100_v49, %v14680_v13  ;;  %v10829_v22 = vmul.f32 %v10100_v49, %v14171_v0  ;;  %v2712_v17 = vmul.f32 %v10594_v53, %v14680_v13 }
 0x23c   : > { %14773 = vst [vmem:[#allocation193_spill] sm:$0xff] %v10809_v30  ;;  %14775 = vst [vmem:[#allocation215_spill] sm:$0xff] %v10817_v50  ;;  %v10832_v30 = vadd.f32 %v2304_v34, %v14779_v23  ;;  %v10850_v34 = vpop.permute.xlu1 %2380  ;;  %v10854_v36 = vmul.f32 %v9815_v38, %v14714_v21  ;;  %v10858_v49 = vmul.f32 %v10134_v33, %v14680_v13  ;;  %v14785_v23 = vld [vmem:[#allocation42_spill] sm:$0xff] }
 0x23d   : > { %14774 = vst [vmem:[#allocation214_spill] sm:$0xff] %v10813_v62  ;;  %14776 = vst [vmem:[#allocation216_spill] sm:$0xff] %v10821_v54  ;;  %v10844_v62 = vmul.f32 %v14653_v26, %v14714_v21  ;;  %v2404_v54 = vmul.f32 %v10594_v53, %v14736_v14  ;;  %v10869_v53 = vmul.f32 %v14653_v26, %v14720_v57 }
 0x23e   : > { %14777 = vst [vmem:[#allocation217_spill] sm:$0xff] %v10825_v43  ;;  %14778 = vst [vmem:[#allocation218_spill] sm:$0xff] %v10829_v22  ;;  %v14787_v22 = vld [vmem:[#allocation17_spill] sm:$0xff]  ;;  %v10886_v26 = vmul.f32 %v9815_v38, %v14720_v57  ;;  %v2409_v27 = vmul.f32 %v10805_v19, %v14736_v14  ;;  %v2717_v46 = vmul.f32 %v10805_v19, %v14680_v13 }
 0x23f   : > { %14780 = vst [vmem:[#allocation199_spill] sm:$0xff] %v10836_v44  ;;  %14781 = vst [vmem:[#allocation219_spill] sm:$0xff] %v10840_v7  ;;  %v10861_v7 = vadd.f32 %v2303_v4, %v14785_v23  ;;  %v14786_v44 = vld [vmem:[#allocation9_spill] sm:$0xff]  ;;  %v270_v43 = vadd.s32 24, %v14787_v22  ;;  %v2711_v4 = vmul.f32 %v10613_v63, %v14680_v13  ;;  %v11037_v19 = vmul.f32 %v10183_v16, %v14171_v0 }
 0x240   : > { %14782 = vst [vmem:[#allocation220_spill] sm:$0xff] %v10844_v62  ;;  %14783 = vst [vmem:[#allocation221_spill] sm:$0xff] %v10854_v36  ;;  %v10863_v62 = vpop.permute.xlu0 %2375  ;;  %3320 = vperm.xlu1 %6894, %v14786_v44   ;;  %v10873_v36 = vmul.f32 %v10134_v33, %v14714_v21  ;;  %v14790_v23 = vld [vmem:[#allocation85_spill] sm:$0xff]  ;;  %v14791_v44 = vld [vmem:[#allocation88_spill] sm:$0xff]  ;;  %v10912_v45 = vpop.permute.xlu1 %2390 }
 0x241   : > { %14784 = vst [vmem:[#allocation222_spill] sm:$0xff] %v10858_v49  ;;  %14788 = vst [vmem:[#allocation42_spill] sm:$0xff] %v10869_v53  ;;  %v2403_v49 = vmul.f32 %v10613_v63, %v14736_v14  ;;  %3315 = vperm.xlu0 %6893, %v14790_v23   ;;  %v10882_v50 = vmul.f32 %v14791_v44, %v14680_v13  ;;  %v10890_v53 = vmul.f32 %v14791_v44, %v14714_v21  ;;  %v14798_v38 = vld [vmem:[#allocation69_spill] sm:$0xff] }
 0x242   : > { %14789 = vst [vmem:[#allocation9_spill] sm:$0xff] %v10873_v36  ;;  %14793 = vst [vmem:[#allocation88_spill] sm:$0xff] %v10886_v26  ;;  %v10894_v36 = vmul.f32 %v10134_v33, %v14736_v14  ;;  %v10898_v63 = vmul.f32 %v14791_v44, %v14736_v14  ;;  %v10902_v23 = vmul.f32 %v9837_v10, %v14714_v21 }
 0x243   : > { %14792 = vst [vmem:[#allocation85_spill] sm:$0xff] %v10882_v50  ;;  %14794 = vst [vmem:[#allocation223_spill] sm:$0xff] %v10890_v53  ;;  %v10905_v50 = vadd.f32 %v2404_v54, %v10484_v24  ;;  %v10908_v26 = vadd.f32 %v2712_v17, %v14798_v38  ;;  %v2406_v53 = vmul.f32 %v10658_v61, %v14736_v14  ;;  %v271_v24 = vadd.s32 32, %v14787_v22  ;;  %v14801_v38 = vld [vmem:[#allocation30_spill] sm:$0xff] }
 0x244   : > { %14795 = vst [vmem:[#allocation224_spill] sm:$0xff] %v10894_v36  ;;  %14796 = vst [vmem:[#allocation225_spill] sm:$0xff] %v10898_v63  ;;  %v272_v36 = vadd.s32 40, %v14787_v22  ;;  %v2714_v63 = vmul.f32 %v10658_v61, %v14680_v13  ;;  %v10917_v2 = vpop.permute.xlu0 %2385  ;;  %3330 = vperm.xlu1 %6894, %v14799_v58   ;;  %v10923_v17 = vmul.f32 %v14661_v41, %v14714_v21 }
 0x245   : > { %14797 = vst [vmem:[#allocation226_spill] sm:$0xff] %v10902_v23  ;;  %v306_v23 = vand.u32 7, %v270_v43  ;;  %v10926_v54 = vadd.f32 %v2403_v49, %v10498_v52  ;;  %v10929_v3 = vadd.f32 %v2711_v4, %v14801_v38  ;;  %v2405_v61 = vmul.f32 %v10677_v55, %v14736_v14  ;;  %3325 = vperm.xlu0 %6893, %v14802_v15   ;;  %v10955_v4 = vpop.permute.xlu1 %2400 }
 0x246   : > { %14800 = vst [vmem:[#allocation69_spill] sm:$0xff] %v10923_v17  ;;  %v10936_v58 = vmul.f32 %v10183_v16, %v14680_v13  ;;  %v2713_v43 = vmul.f32 %v10677_v55, %v14680_v13  ;;  %v10942_v17 = vmul.f32 %v9837_v10, %v14720_v57  ;;  %v10946_v52 = vmul.f32 %v10183_v16, %v14714_v21 }
 0x247   : > { %v10950_v49 = vmul.f32 %v10193_v25, %v14680_v13  ;;  %v10953_v15 = vadd.f32 %v2406_v53, %v10527_v29  ;;  %v320_v38 = vand.u32 7, %v272_v36  ;;  %v274_v55 = vadd.s32 56, %v14787_v22  ;;  %v14820_v29 = vld [vmem:[#allocation74_spill] sm:$0xff] }
 0x248   : > { %14803 = vst [vmem:[#allocation113_spill] sm:$0xff] %v10936_v58  ;;  %14804 = vst [vmem:[#allocation30_spill] sm:$0xff] %v10942_v17  ;;  %v10960_v10 = vmul.f32 %v14661_v41, %v14720_v57  ;;  %v14808_v58 = vld [vmem:[#allocation101_spill] sm:$0xff]  ;;  %v10965_v17 = vpop.permute.xlu0 %2395  ;;  %vm10968_vm4 = vcmp.eq.s32.totalorder %v306_v23, 7  ;;  %v313_v53 = vand.u32 7, %v271_v24  ;;  %v10974_v36 = vmul.f32 %v10193_v25, %v14714_v21 }
 0x249   : > { %14805 = vst [vmem:[#allocation93_spill] sm:$0xff] %v10946_v52  ;;  %14806 = vst [vmem:[#allocation227_spill] sm:$0xff] %v10950_v49  ;;  %v10963_v52 = vadd.f32 %v2714_v63, %v14808_v58  ;;  %v14809_v49 = vld [vmem:[#allocation14_spill] sm:$0xff]  ;;  %v10977_v41 = vadd.f32 %v2405_v61, %v10544_v59  ;;  %v2408_v57 = vmul.f32 %v10722_v1, %v14736_v14  ;;  %v14813_v58 = vld [vmem:[#allocation5_spill] sm:$0xff]  ;;  %vm11009_vm5 = vcmp.eq.s32.totalorder %v320_v38, 7 }
 0x24a   : > { %14807 = vst [vmem:[#allocation228_spill] sm:$0xff] %v10960_v10  ;;  %3340 = vperm.xlu1 %6894, %v14809_v49   ;;  %14812 = vst [vmem:[#allocation101_spill] sm:$0xff] %v10974_v36  ;;  %v2716_v63 = vmul.f32 %v10722_v1, %v14680_v13  ;;  %3335 = vperm.xlu0 %6893, %v14813_v58   ;;  %v10985_v23 = vld [vmem:[%s7018_s23 + $0x89] sm:$0xff]  ;;  %v10989_v24 = vmul.f32 %v10134_v33, %v14171_v0  ;;  %v14815_v49 = vld [vmem:[#allocation15_spill] sm:$0xff]  ;;  %v273_v1 = vadd.s32 48, %v14787_v22  ;;  %v11002_v10 = vpop.permute.xlu1 %2452  ;;  %v14816_v33 = vmov 1.0  }
 0x24b   : > { %v10992_v21 = vadd.f32 %v2713_v43, %v14815_v49  ;;  %v2407_v59 = vmul.f32 %v10741_v32, %v14736_v14  ;;  %v2715_v61 = vmul.f32 %v10741_v32, %v14680_v13  ;;  %v3467_v36 = vld [vmem:[%s7018_s23 + $0x81] sm:$0xff]  ;;  %v2410_v58 = vmul.f32 %v10786_v28, %v14736_v14  ;;  %14822 = vst [vmem:[#allocation74_spill] sm:$0xff] %v11037_v19 }
 0x24c   : > { %14814 = vst [vmem:[#allocation14_spill] sm:$0xff] %v10989_v24  ;;  %v11007_v43 = vsel %vm10968_vm4, 0.0, %v14816_v33  ;;  %v334_v32 = vand.u32 7, %v274_v55  ;;  %v2718_v24 = vmul.f32 %v10786_v28, %v14680_v13  ;;  %v11019_v48 = vpop.permute.xlu0 %2447  ;;  %vm453_vm6 = vcmp.eq.s32.totalorder %v313_v53, 7  ;;  %v11029_v55 = vld [vmem:[%s7018_s23 + $0x289] sm:$0xff]  ;;  %v14823_v53 = vld [vmem:[#allocation138_spill] sm:$0xff] }
 0x24d   : > { %14817 = vst [vmem:[#allocation5_spill] sm:$0xff] %v11007_v43  ;;  %v11023_v38 = vadd.f32 %v2408_v57, %v10577_v42  ;;  %v11026_v47 = vadd.f32 %v2716_v63, %v14820_v29  ;;  %v11033_v28 = vmul.f32 %v14791_v44, %v14171_v0  ;;  %v11040_v6 = vadd.f32 %v2407_v59, %v10609_v11  ;;  %v3635_v57 = vld [vmem:[%s7018_s23 + $0x281] sm:$0xff] }
 0x24e   : > { %3488 = vperm.xlu1 %6894, %v10985_v23   ;;  %3483 = vperm.xlu0 %6893, %v3467_v36   ;;  %v11043_v42 = vadd.f32 %v2715_v61, %v14823_v53  ;;  %v11049_v36 = vsel %vm11009_vm5, 0.0, %v14816_v33  ;;  %v327_v63 = vand.u32 7, %v273_v1  ;;  %v11052_v44 = vadd.f32 %v2410_v58, %v10656_v8  ;;  %v11056_v19 = vpop.permute.xlu1 %2462  ;;  %v14828_v61 = vld [vmem:[#allocation108_spill] sm:$0xff] }
 0x24f   : > { %14821 = vst [vmem:[#allocation15_spill] sm:$0xff] %v11033_v28  ;;  %14824 = vst [vmem:[#allocation138_spill] sm:$0xff] %v11049_v36  ;;  %v2412_v29 = vmul.f32 %v10850_v34, %v14736_v14  ;;  %v11059_v11 = vsel %vm453_vm6, 0.0, %v14816_v33  ;;  %vm11061_vm7 = vcmp.eq.s32.totalorder %v334_v32, 7  ;;  %v11066_v49 = vadd.f32 %v2718_v24, %v14828_v61  ;;  %v14829_v8 = vld [vmem:[#allocation20_spill] sm:$0xff] }
 0x250   : > { %14825 = vst [vmem:[#allocation229_spill] sm:$0xff] %v11059_v11  ;;  %v11069_v1 = vadd.f32 %v2409_v27, %v10673_v40  ;;  %v11072_v58 = vadd.f32 %v2717_v46, %v14829_v8  ;;  %v2458_v53 = vpop.permute.xlu0 %2457  ;;  %v11077_v28 = vmul.f32 %v10193_v25, %v14171_v0  ;;  %v2720_v32 = vmul.f32 %v10850_v34, %v14680_v13  ;;  %v11086_v40 = vld [vmem:[%s7018_s23 + $0x99] sm:$0xff]  ;;  %v3469_v34 = vld [vmem:[%s7018_s23 + $0x91] sm:$0xff] }
 0x251   : > { %v2411_v24 = vmul.f32 %v10863_v62, %v14736_v14  ;;  %v2719_v27 = vmul.f32 %v10863_v62, %v14680_v13  ;;  %v11090_v46 = vmul.f32 %v10183_v16, %v14736_v14  ;;  %v2414_v61 = vmul.f32 %v10912_v45, %v14736_v14  ;;  %v14840_v62 = vld [vmem:[#allocation134_spill] sm:$0xff] }
 0x252   : > { %3656 = vperm.xlu1 %6894, %v11029_v55   ;;  %14830 = vst [vmem:[#allocation108_spill] sm:$0xff] %v11077_v28  ;;  %3651 = vperm.xlu0 %6893, %v3635_v57   ;;  %v2722_v8 = vmul.f32 %v10912_v45, %v14680_v13  ;;  %v11100_v28 = vsel %vm11061_vm7, 0.0, %v14816_v33  ;;  %vm11102_vm8 = vcmp.eq.s32.totalorder %v327_v63, 7  ;;  %v11107_v16 = vadd.f32 %v2412_v29, %v10705_v5 }
 0x253   : > { %14831 = vst [vmem:[#allocation20_spill] sm:$0xff] %v11090_v46  ;;  %14832 = vst [vmem:[#allocation230_spill] sm:$0xff] %v11100_v28  ;;  %v2413_v57 = vmul.f32 %v10917_v2, %v14736_v14  ;;  %v2721_v45 = vmul.f32 %v10917_v2, %v14680_v13  ;;  %v2473_v46 = vpop.permute.xlu1 %2472  ;;  %v11115_v59 = vmul.f32 %v10193_v25, %v14736_v14  ;;  %v14836_v2 = vld [vmem:[#allocation109_spill] sm:$0xff]  ;;  %v11141_v11 = vsel %vm11102_vm8, 0.0, %v14816_v33 }
 0x254   : > { %v2416_v63 = vmul.f32 %v10955_v4, %v14736_v14  ;;  %v2724_v35 = vmul.f32 %v10955_v4, %v14680_v13  ;;  %v2415_v5 = vmul.f32 %v10965_v17, %v14736_v14  ;;  %v2723_v29 = vmul.f32 %v10965_v17, %v14680_v13  ;;  %v2468_v31 = vpop.permute.xlu0 %2467  ;;  %v11136_v4 = vld [vmem:[%s7018_s23 + $0x299] sm:$0xff]  ;;  %14838 = vst [vmem:[#allocation109_spill] sm:$0xff] %v11141_v11 }
 0x255   : > { %14835 = vst [vmem:[#allocation231_spill] sm:$0xff] %v11115_v59  ;;  %v11127_v0 = vadd.f32 %v2720_v32, %v14836_v2  ;;  %v11130_v25 = vadd.f32 %v2411_v24, %v10737_v56  ;;  %v14837_v59 = vld [vmem:[#allocation112_spill] sm:$0xff]  ;;  %v11144_v17 = vadd.f32 %v2414_v61, %v10784_v39  ;;  %v11147_v32 = vadd.f32 %v2722_v8, %v10388_v20 }
 0x256   : > { %3498 = vperm.xlu1 %6894, %v11086_v40   ;;  %v11133_v28 = vadd.f32 %v2719_v27, %v14837_v59  ;;  %3493 = vperm.xlu0 %6893, %v3469_v34   ;;  %v14839_v56 = vld [vmem:[#allocation12_spill] sm:$0xff]  ;;  %v2740_v27 = vmul.f32 %v11002_v10, %v14736_v14  ;;  %v11154_v59 = vld [vmem:[%s7018_s23 + $0x291] sm:$0xff]  ;;  %v11157_v2 = vadd.f32 %v2413_v57, %v10801_v12  ;;  %vm5158_vm4 = vsmask.f32 7424 }
 0x257   : > { %v2516_v24 = vmul.f32 %v14839_v56, %v11002_v10  ;;  %v11160_v36 = vadd.f32 %v2721_v45, %v14840_v62  ;;  %v2515_v39 = vmul.f32 %v14839_v56, %v11019_v48  ;;  %v2739_v20 = vmul.f32 %v11019_v48, %v14736_v14  ;;  %v2483_v61 = vpop.permute.xlu1 %2482  ;;  %v14841_v12 = vld [vmem:[#allocation200_spill] sm:$0xff] }
 0x258   : > { %v11167_v8 = vadd.f32 %v2416_v63, %v10832_v30  ;;  %v11170_v11 = vadd.f32 %v2724_v35, %v10427_v51  ;;  %v11173_v43 = vadd.f32 %v2415_v5, %v10861_v7  ;;  %v11176_v57 = vadd.f32 %v2723_v29, %v14841_v12  ;;  %v2478_v45 = vpop.permute.xlu0 %2477 }
 0x259   : > { %v11181_v62 = vmul.f32 %v11002_v10, %v14680_v13  ;;  %v2518_v30 = vmul.f32 %v14839_v56, %v11056_v19  ;;  %v2742_v51 = vmul.f32 %v11056_v19, %v14736_v14  ;;  %v2517_v35 = vmul.f32 %v14839_v56, %v2458_v53 }
 0x25a   : > { %3666 = vperm.xlu1 %6894, %v11136_v4   ;;  %3661 = vperm.xlu0 %6893, %v11154_v59   ;;  %v11190_v7 = vadd.f32 %v2516_v24, %v10905_v50  ;;  %v11193_v63 = vadd.f32 %v2740_v27, %v10908_v26  ;;  %v11197_v10 = vmul.f32 %v11019_v48, %v14680_v13  ;;  %vm5392_vm5 = vcmask 261120  }
 0x25b   : > { %14842 = vst [vmem:[#allocation112_spill] sm:$0xff] %v11181_v62  ;;  %v2741_v5 = vmul.f32 %v2458_v53, %v14736_v14  ;;  %v11201_v29 = vadd.f32 %v2515_v39, %v10926_v54  ;;  %v11204_v12 = vadd.f32 %v2739_v20, %v10929_v3  ;;  %v11208_v50 = vmul.f32 %v11056_v19, %v14680_v13  ;;  %v2493_v24 = vpop.permute.xlu1 %2492 }
 0x25c   : > { %14843 = vst [vmem:[#allocation12_spill] sm:$0xff] %v11197_v10  ;;  %v2520_v26 = vmul.f32 %v14839_v56, %v2473_v46  ;;  %v11212_v27 = vmul.f32 %v2458_v53, %v14680_v13  ;;  %v2744_v48 = vmul.f32 %v2473_v46, %v14736_v14  ;;  %v2519_v10 = vmul.f32 %v14839_v56, %v2468_v31  ;;  %v2488_v54 = vpop.permute.xlu0 %2487 }
 0x25d   : > { %14844 = vst [vmem:[#allocation134_spill] sm:$0xff] %v11208_v50  ;;  %v276_v39 = vadd.s32 72, %v14787_v22  ;;  %v11218_v3 = vadd.f32 %v2518_v30, %v10953_v15  ;;  %v11221_v19 = vadd.f32 %v2742_v51, %v10963_v52  ;;  %v11224_v20 = vadd.f32 %v2517_v35, %v10977_v41 }
 0x25e   : > { %14845 = vst [vmem:[#allocation200_spill] sm:$0xff] %v11212_v27  ;;  %3824 = vperm.xlu1 %6894, %v3469_v34   ;;  %v2743_v53 = vmul.f32 %v2468_v31, %v14736_v14  ;;  %3819 = vperm.xlu0 %6893, %v10985_v23   ;;  %v3806_v27 = vld [vmem:[%s7018_s23 + $0xa1] sm:$0xff]  ;;  %v11230_v50 = vadd.f32 %v2741_v5, %v10992_v21  ;;  %vm5028_vm8 = vcmask 253952  }
 0x25f   : > { %v11233_v34 = vmul.f32 %v2473_v46, %v14680_v13  ;;  %v11236_v15 = vmul.f32 %v2468_v31, %v14680_v13  ;;  %v2522_v52 = vmul.f32 %v14839_v56, %v2483_v61  ;;  %v11240_v30 = vadd.f32 %v2520_v26, %v11023_v38  ;;  %v2503_v21 = vpop.permute.xlu1 %2502 }
 0x260   : > { %v2746_v41 = vmul.f32 %v2483_v61, %v14736_v14  ;;  %v2521_v23 = vmul.f32 %v14839_v56, %v2478_v45  ;;  %v2745_v51 = vmul.f32 %v2478_v45, %v14736_v14  ;;  %v11246_v35 = vadd.f32 %v2744_v48, %v11026_v47  ;;  %v2498_v31 = vpop.permute.xlu0 %2497  ;;  %v11260_v47 = vld [vmem:[%s7018_s23 + $0xa9] sm:$0xff] }
 0x261   : > { %14846 = vst [vmem:[#allocation232_spill] sm:$0xff] %v11233_v34  ;;  %14847 = vst [vmem:[#allocation233_spill] sm:$0xff] %v11236_v15  ;;  %v11249_v46 = vadd.f32 %v2519_v10, %v11040_v6  ;;  %v348_v5 = vand.u32 7, %v276_v39  ;;  %v275_v38 = vadd.s32 64, %v14787_v22  ;;  %v11253_v26 = vadd.f32 %v2743_v53, %v11043_v42 }
 0x262   : > { %3834 = vperm.xlu1 %6894, %v3806_v27   ;;  %v2524_v15 = vmul.f32 %v14839_v56, %v2493_v24  ;;  %v2748_v34 = vmul.f32 %v2493_v24, %v14736_v14  ;;  %v2523_v62 = vmul.f32 %v14839_v56, %v2488_v54  ;;  %3829 = vperm.xlu0 %6893, %v11086_v40  }
 0x263   : > { %v11263_v6 = vadd.f32 %v2522_v52, %v11052_v44  ;;  %v11266_v10 = vmul.f32 %v2483_v61, %v14680_v13  ;;  %v11269_v48 = vmul.f32 %v2478_v45, %v14680_v13  ;;  %v2747_v42 = vmul.f32 %v2488_v54, %v14736_v14  ;;  %v2513_v52 = vpop.permute.xlu1 %2512 }
 0x264   : > { %v11273_v39 = vadd.f32 %v2746_v41, %v11066_v49  ;;  %v11276_v53 = vadd.f32 %v2521_v23, %v11069_v1  ;;  %v11279_v40 = vadd.f32 %v2745_v51, %v11072_v58  ;;  %v2526_v44 = vmul.f32 %v14839_v56, %v2503_v21  ;;  %v11304_v23 = vld [vmem:[%s7018_s23 + $0x2a9] sm:$0xff] }
 0x265   : > { %14848 = vst [vmem:[#allocation234_spill] sm:$0xff] %v11266_v10  ;;  %14849 = vst [vmem:[#allocation235_spill] sm:$0xff] %v11269_v48  ;;  %v11283_v61 = vmul.f32 %v2493_v24, %v14680_v13  ;;  %v11286_v45 = vmul.f32 %v2488_v54, %v14680_v13  ;;  %v2508_v48 = vpop.permute.xlu0 %2507  ;;  %vm11289_vm9 = vcmp.eq.s32.totalorder %v348_v5, 7  ;;  %v341_v1 = vand.u32 7, %v275_v38 }
 0x266   : > { %3508 = vperm.xlu1 %6894, %v11260_v47   ;;  %v11294_v58 = vadd.f32 %v2524_v15, %v11107_v16  ;;  %v11297_v41 = vadd.f32 %v2748_v34, %v11127_v0  ;;  %v11300_v24 = vadd.f32 %v2523_v62, %v11130_v25  ;;  %v2750_v54 = vmul.f32 %v2503_v21, %v14736_v14  ;;  %v11312_v16 = vld [vmem:[%s7018_s23 + $0x2a1] sm:$0xff] }
 0x267   : > { %14850 = vst [vmem:[#allocation236_spill] sm:$0xff] %v11283_v61  ;;  %14851 = vst [vmem:[#allocation237_spill] sm:$0xff] %v11286_v45  ;;  %3503 = vperm.xlu0 %6893, %v3806_v27   ;;  %v11307_v51 = vadd.f32 %v2747_v42, %v11133_v28  ;;  %v2525_v5 = vmul.f32 %v14839_v56, %v2498_v31  ;;  %v2749_v38 = vmul.f32 %v2498_v31, %v14736_v14  ;;  %v2789_v27 = vpop.permute.xlu1 %2788 }
 0x268   : > { %v278_v0 = vadd.s32 88, %v14787_v22  ;;  %v11316_v34 = vadd.f32 %v2526_v44, %v11144_v17  ;;  %v11319_v25 = vmul.f32 %v2503_v21, %v14680_v13  ;;  %v11322_v62 = vmul.f32 %v2498_v31, %v14680_v13 }
 0x269   : > { %v11327_v28 = vsel %vm11289_vm9, 0.0, %v14816_v33  ;;  %v2528_v15 = vmul.f32 %v14839_v56, %v2513_v52  ;;  %v2752_v42 = vmul.f32 %v2513_v52, %v14736_v14  ;;  %v2852_v45 = vmul.f32 %v14839_v56, %v2789_v27  ;;  %v2784_v17 = vpop.permute.xlu0 %2783  ;;  %vm5029_vm9 = vmand %vm5028_vm8, %vm4866_vm14 }
 0x26a   : > { %14854 = vst [vmem:[#allocation238_spill] sm:$0xff] %v11319_v25  ;;  %14855 = vst [vmem:[#allocation239_spill] sm:$0xff] %v11322_v62  ;;  %3676 = vperm.xlu1 %6894, %v11304_v23   ;;  %vm457_vm10 = vcmp.eq.s32.totalorder %v341_v1, 7  ;;  %v11334_v21 = vadd.f32 %v2750_v54, %v11147_v32  ;;  %v2527_v31 = vmul.f32 %v14839_v56, %v2508_v48  ;;  %v362_v1 = vand.u32 7, %v278_v0  ;;  %v14862_v0 = vld [vmem:[#allocation94_spill] sm:$0xff] }
 0x26b   : > { %14856 = vst [vmem:[#allocation240_spill] sm:$0xff] %v11327_v28  ;;  %v2751_v44 = vmul.f32 %v2508_v48, %v14736_v14  ;;  %v2851_v49 = vmul.f32 %v14839_v56, %v2784_v17  ;;  %3671 = vperm.xlu0 %6893, %v11312_v16   ;;  %v11341_v62 = vadd.f32 %v2525_v5, %v11157_v2  ;;  %v2799_v56 = vpop.permute.xlu1 %2798  ;;  %v11355_v28 = vsel %vm457_vm10, 0.0, %v14816_v33  ;;  %v14860_v5 = vld [vmem:[#allocation129_spill] sm:$0xff] }
 0x26c   : > { %v11344_v25 = vadd.f32 %v2749_v38, %v11160_v36  ;;  %v2866_v61 = vadd.f32 %v2852_v45, %v11193_v63  ;;  %v11348_v32 = vmul.f32 %v2513_v52, %v14680_v13  ;;  %v11351_v54 = vmul.f32 %v2508_v48, %v14680_v13  ;;  %14859 = vst [vmem:[#allocation243_spill] sm:$0xff] %v11355_v28  ;;  %v11367_v52 = vld [vmem:[%s13866_s1 + $0x8] ss:$0 sm:$0xff]  ;;  %v14861_v38 = vld [vmem:[#allocation142_spill] sm:$0xff] }
 0x26d   : > { %v2865_v10 = vadd.f32 %v2851_v49, %v11204_v12  ;;  %v11358_v2 = vadd.f32 %v2528_v15, %v11167_v8  ;;  %v11361_v36 = vadd.f32 %v2752_v42, %v11170_v11  ;;  %v2854_v48 = vmul.f32 %v11367_v52, %v2799_v56  ;;  %v2794_v12 = vpop.permute.xlu0 %2793  ;;  %v11380_v11 = vld [vmem:[%s13867_s2] ss:$0 sm:$0xff]  ;;  %v15025_v28 = vld [vmem:[#allocation58_spill] sm:$0xff] }
 0x26e   : > { %14857 = vst [vmem:[#allocation241_spill] sm:$0xff] %v11348_v32  ;;  %14858 = vst [vmem:[#allocation242_spill] sm:$0xff] %v11351_v54  ;;  %v2880_v63 = vmax.f32 %v11190_v7, %v2866_v61  ;;  %4174 = vperm.xlu1 %6894, %v10461_v18   ;;  %v11372_v45 = vadd.f32 %v2527_v31, %v11173_v43  ;;  %v11375_v8 = vadd.f32 %v2751_v44, %v11176_v57  ;;  %v14878_v54 = vld [vmem:[#allocation150_spill] sm:$0xff]  ;;  %vm5422_vm10 = vcmask 785408  }
 0x26f   : > { %v2879_v7 = vmax.f32 %v11201_v29, %v2865_v10  ;;  %v2853_v61 = vmul.f32 %v11367_v52, %v2794_v12  ;;  %4169 = vperm.xlu0 %6893, %v14860_v5   ;;  %v14863_v18 = vmax.f32 %v14861_v38, %v14862_v0  ;;  %v11389_v43 = vmul.f32 %v2789_v27, %v14736_v14  ;;  %v14867_v29 = vld [vmem:[#allocation145_spill] sm:$0xff]  ;;  %v14868_v10 = vld [vmem:[#allocation68_spill] sm:$0xff]  ;;  %v2809_v38 = vpop.permute.xlu1 %2808  ;;  %v14879_v32 = vld [vmem:[#allocation10_spill] sm:$0xff] }
 0x270   : > { %v2868_v57 = vadd.f32 %v2854_v48, %v11221_v19  ;;  %vm11392_vm11 = vcmp.eq.s32.totalorder %v362_v1, 7  ;;  %v11397_v31 = vmul.f32 %v2789_v27, %v14680_v13  ;;  %v14869_v44 = vmax.f32 %v14867_v29, %v14868_v10 }
 0x271   : > { %v2894_v15 = vmax.f32 %v14863_v18, %v2880_v63  ;;  %v11403_v5 = vmul.f32 %v2784_v17, %v14736_v14  ;;  %v2867_v63 = vadd.f32 %v2853_v61, %v11230_v50  ;;  %v11408_v19 = vmul.f32 %v2784_v17, %v14680_v13  ;;  %v2804_v48 = vpop.permute.xlu0 %2803 }
 0x272   : > { %14866 = vst [vmem:[#allocation129_spill] sm:$0xff] %v11397_v31  ;;  %v2893_v49 = vmax.f32 %v14869_v44, %v2879_v7  ;;  %v2882_v1 = vmax.f32 %v11218_v3, %v2868_v57  ;;  %v2856_v27 = vmul.f32 %v11367_v52, %v2809_v38  ;;  %4184 = vperm.xlu1 %6894, %v10515_v60   ;;  %v11420_v50 = vsel %vm11392_vm11, 0.0, %v14816_v33  ;;  %v14874_v57 = vld [vmem:[#allocation154_spill] sm:$0xff] }
 0x273   : > { %v4636_v0 = vadd.f32 %v11380_v11, %v2894_v15  ;;  %14870 = vst [vmem:[#allocation142_spill] sm:$0xff] %v11408_v19  ;;  %v2881_v18 = vmax.f32 %v11224_v20, %v2867_v63  ;;  %v2855_v29 = vmul.f32 %v11367_v52, %v2804_v48  ;;  %4179 = vperm.xlu0 %6893, %v10451_v9   ;;  %14871 = vst [vmem:[#allocation94_spill] sm:$0xff] %v11420_v50  ;;  %v14875_v9 = vld [vmem:[#allocation90_spill] sm:$0xff]  ;;  %v14877_v63 = vld [vmem:[#allocation65_spill] sm:$0xff]  ;;  %vm6442_vm11 = vcmask 519168  }
 0x274   : > { %v4635_v7 = vadd.f32 %v11380_v11, %v2893_v49  ;;  %v11423_v3 = vmul.f32 %v2799_v56, %v14736_v14  ;;  %v2870_v61 = vadd.f32 %v2856_v27, %v11246_v35  ;;  %v11427_v60 = vadd.s32 80, %v14787_v22  ;;  %v2819_v49 = vpop.permute.xlu1 %2818 }
 0x275   : > { %v4650_v17 = vmax.f32 %v4636_v0, 0.0  ;;  %v11430_v20 = vmul.f32 %v2799_v56, %v14680_v13  ;;  %v14876_v10 = vmax.f32 %v14874_v57, %v14875_v9  ;;  %v2869_v42 = vadd.f32 %v2855_v29, %v11253_v26  ;;  %v2814_v22 = vpop.permute.xlu0 %2813  ;;  %v14881_v56 = vld [vmem:[#allocation110_spill] sm:$0xff]  ;;  %v14886_v57 = vld [vmem:[#allocation164_spill] sm:$0xff]  ;;  %v14887_v9 = vld [vmem:[#allocation137_spill] sm:$0xff] }
 0x276   : > { %14872 = vst [vmem:[#allocation145_spill] sm:$0xff] %v11427_v60  ;;  %v4649_v15 = vmax.f32 %v4635_v7, 0.0  ;;  %v14880_v33 = vmax.f32 %v14878_v54, %v14879_v32  ;;  %v2884_v27 = vmax.f32 %v11240_v30, %v2870_v61  ;;  %v2858_v7 = vmul.f32 %v11367_v52, %v2819_v49  ;;  %4510 = vperm.xlu1 %6894, %v11154_v59   ;;  %v14883_v30 = vld [vmem:[#allocation161_spill] sm:$0xff]  ;;  %v14884_v54 = vld [vmem:[#allocation140_spill] sm:$0xff] }
 0x277   : > { %14873 = vst [vmem:[#allocation68_spill] sm:$0xff] %v11430_v20  ;;  %v2895_v44 = vmax.f32 %v14876_v10, %v2881_v18  ;;  %v4664_v0 = vmul.f32 %v4650_v17, %v14877_v63  ;;  %v11445_v18 = vmul.f32 %v2794_v12, %v14736_v14  ;;  %v2883_v29 = vmax.f32 %v11249_v46, %v2869_v42  ;;  %v14972_v63 = vld [vmem:[#allocation102_spill] sm:$0xff] }
 0x278   : > { %v2896_v35 = vmax.f32 %v14880_v33, %v2882_v1  ;;  %v4663_v50 = vmul.f32 %v4649_v15, %v14881_v56  ;;  %4505 = vperm.xlu0 %6893, %v11029_v55   ;;  %v11451_v33 = vmul.f32 %v2794_v12, %v14680_v13  ;;  %v14885_v1 = vmax.f32 %v14883_v30, %v14884_v54  ;;  %v2829_v46 = vpop.permute.xlu1 %2828  ;;  %v14893_v30 = vld [vmem:[#allocation170_spill] sm:$0xff]  ;;  %v14894_v54 = vld [vmem:[#allocation41_spill] sm:$0xff]  ;;  %v14967_v56 = vld [vmem:[#allocation92_spill] sm:$0xff] }
 0x279   : > { %v4637_v26 = vadd.f32 %v11380_v11, %v2895_v44  ;;  %v6635_v32 = vpack.c.bf16 %v4664_v0, %v4664_v0  ;;  %v2872_v59 = vadd.f32 %v2858_v7, %v11273_v39  ;;  %v14888_v10 = vmax.f32 %v14886_v57, %v14887_v9  ;;  %v2824_v0 = vpop.permute.xlu0 %2823 }
 0x27a   : > { %14882 = vst [vmem:[#allocation154_spill] sm:$0xff] %v11451_v33  ;;  %v2898_v17 = vmax.f32 %v14885_v1, %v2884_v27  ;;  %v6634_v61 = vpack.c.bf16 %v4663_v50, %v4663_v50  ;;  %v11463_v12 = vadd.f32 %v11380_v11, %v2896_v35  ;;  %v11466_v42 = vmul.f32 %v2809_v38, %v14736_v14  ;;  %v14889_v27 = vld [vmem:[#allocation36_spill] sm:$0xff] }
 0x27b   : > { %v4651_v15 = vmax.f32 %v4637_v26, 0.0  ;;  %v2897_v44 = vmax.f32 %v14888_v10, %v2883_v29  ;;  %4811 = vst.msk [vmem:[#allocation3 + $0x8] sm:$0xf] %vm4719_vm0, %v6635_v32  ;;  %v2886_v39 = vmax.f32 %v11263_v6, %v2872_v59  ;;  %v2857_v50 = vmul.f32 %v11367_v52, %v2814_v22  ;;  %4520 = vperm.xlu1 %6894, %v11312_v16   ;;  %v3808_v6 = vld [vmem:[%s7018_s23 + $0xb1] sm:$0xff] }
 0x27c   : > { %4810 = vst.msk [vmem:[#allocation3 + $0x4] sm:$0xf] %vm4719_vm0, %v6634_v61  ;;  %v11474_v26 = vmul.f32 %v2809_v38, %v14680_v13  ;;  %v11477_v35 = vmul.f32 %v2804_v48, %v14736_v14  ;;  %v2860_v29 = vmul.f32 %v11367_v52, %v2829_v46  ;;  %4515 = vperm.xlu0 %6893, %v11136_v4   ;;  %v2839_v57 = vpop.permute.xlu1 %2838 }
 0x27d   : > { %v4665_v7 = vmul.f32 %v4651_v15, %v14889_v27  ;;  %v11483_v32 = vadd.f32 %v11380_v11, %v2898_v17  ;;  %v11486_v16 = vmul.f32 %v2804_v48, %v14680_v13  ;;  %v14895_v1 = vmax.f32 %v14893_v30, %v14894_v54 }
 0x27e   : > { %14890 = vst [vmem:[#allocation90_spill] sm:$0xff] %v11474_v26  ;;  %14891 = vst [vmem:[#allocation150_spill] sm:$0xff] %v11477_v35  ;;  %v2871_v38 = vadd.f32 %v2857_v50, %v11279_v40  ;;  %v11493_v15 = vadd.f32 %v11380_v11, %v2897_v44  ;;  %v11496_v4 = vmul.f32 %v2819_v49, %v14736_v14 }
 0x27f   : > { %14892 = vst [vmem:[#allocation10_spill] sm:$0xff] %v11486_v16  ;;  %v2900_v59 = vmax.f32 %v14895_v1, %v2886_v39  ;;  %v6636_v61 = vpack.c.bf16 %v4665_v7, %v4665_v7  ;;  %v2874_v17 = vadd.f32 %v2860_v29, %v11297_v41  ;;  %v11501_v9 = vmul.f32 %v2819_v49, %v14680_v13  ;;  %v2834_v39 = vpop.permute.xlu0 %2833  ;;  %v11516_v49 = vld [vmem:[%s7018_s23 + $0xb9] sm:$0xff] }
 0x280   : > { %14896 = vst [vmem:[#allocation161_spill] sm:$0xff] %v11496_v4  ;;  %v2885_v10 = vmax.f32 %v11276_v53, %v2871_v38  ;;  %v2859_v40 = vmul.f32 %v11367_v52, %v2824_v0  ;;  %3844 = vperm.xlu1 %6894, %v3808_v6   ;;  %v11507_v44 = vmul.f32 %v2814_v22, %v14736_v14  ;;  %v14901_v1 = vld [vmem:[#allocation174_spill] sm:$0xff]  ;;  %v2849_v55 = vpop.permute.xlu1 %2848  ;;  %v14904_v53 = vld [vmem:[#allocation181_spill] sm:$0xff] }
 0x281   : > { %14897 = vst [vmem:[#allocation140_spill] sm:$0xff] %v11501_v9  ;;  %4812 = vst.msk [vmem:[#allocation3 + $0xc] sm:$0xf] %vm4719_vm0, %v6636_v61  ;;  %v11510_v50 = vmul.f32 %v2814_v22, %v14680_v13  ;;  %v2888_v41 = vmax.f32 %v11294_v58, %v2874_v17  ;;  %v2862_v7 = vmul.f32 %v11367_v52, %v2839_v57  ;;  %3839 = vperm.xlu0 %6893, %v11260_v47   ;;  %v14902_v58 = vld [vmem:[#allocation105_spill] sm:$0xff] }
 0x282   : > { %14898 = vst [vmem:[#allocation164_spill] sm:$0xff] %v11507_v44  ;;  %v11520_v29 = vadd.f32 %v11380_v11, %v2900_v59  ;;  %v11523_v30 = vmul.f32 %v2829_v46, %v14736_v14  ;;  %v2873_v54 = vadd.f32 %v2859_v40, %v11307_v51  ;;  %v14903_v38 = vmax.f32 %v14901_v1, %v14902_v58  ;;  %v14905_v59 = vld [vmem:[#allocation4_spill] sm:$0xff]  ;;  %v14945_v9 = vld [vmem:[#allocation205_spill] sm:$0xff] }
 0x283   : > { %14899 = vst [vmem:[#allocation137_spill] sm:$0xff] %v11510_v50  ;;  %v2876_v47 = vadd.f32 %v2862_v7, %v11334_v21  ;;  %v2861_v17 = vmul.f32 %v11367_v52, %v2834_v39  ;;  %v14906_v48 = vmax.f32 %v14904_v53, %v14905_v59  ;;  %v2864_v40 = vmul.f32 %v11367_v52, %v2849_v55  ;;  %v2844_v1 = vpop.permute.xlu0 %2843  ;;  %v14911_v53 = vld [vmem:[#allocation126_spill] sm:$0xff] }
 0x284   : > { %14900 = vst [vmem:[#allocation170_spill] sm:$0xff] %v11523_v30  ;;  %v2899_v61 = vmax.f32 %v14903_v38, %v2885_v10  ;;  %v11536_v30 = vmul.f32 %v2829_v46, %v14680_v13  ;;  %v2887_v51 = vmax.f32 %v11300_v24, %v2873_v54  ;;  %3518 = vperm.xlu1 %6894, %v11516_v49   ;;  %v11550_v46 = vld [vmem:[%s7018_s23 + $0x2b9] sm:$0xff] }
 0x285   : > { %v2902_v50 = vmax.f32 %v14906_v48, %v2888_v41  ;;  %v11542_v21 = vmul.f32 %v2824_v0, %v14736_v14  ;;  %v11545_v10 = vmul.f32 %v2824_v0, %v14680_v13  ;;  %v2890_v7 = vmax.f32 %v11316_v34, %v2876_v47  ;;  %3513 = vperm.xlu0 %6893, %v3808_v6   ;;  %v14910_v41 = vld [vmem:[#allocation184_spill] sm:$0xff]  ;;  %v11561_v0 = vld [vmem:[%s7018_s23 + $0x2b1] sm:$0xff] }
 0x286   : > { %14907 = vst [vmem:[#allocation41_spill] sm:$0xff] %v11536_v30  ;;  %v2875_v48 = vadd.f32 %v2861_v17, %v11344_v25  ;;  %v14912_v54 = vmax.f32 %v14910_v41, %v14911_v53  ;;  %v11557_v38 = vmul.f32 %v2839_v57, %v14736_v14  ;;  %v2878_v59 = vadd.f32 %v2864_v40, %v11361_v36  ;;  %v2985_v17 = vpop.permute.xlu1 %2984  ;;  %v14917_v41 = vld [vmem:[#allocation190_spill] sm:$0xff]  ;;  %v14918_v53 = vld [vmem:[#allocation125_spill] sm:$0xff] }
 0x287   : > { %14908 = vst [vmem:[#allocation174_spill] sm:$0xff] %v11542_v21  ;;  %14909 = vst [vmem:[#allocation105_spill] sm:$0xff] %v11545_v10  ;;  %v11564_v34 = vadd.f32 %v11380_v11, %v2899_v61  ;;  %v11567_v25 = vmul.f32 %v2839_v57, %v14680_v13  ;;  %v2863_v47 = vmul.f32 %v11367_v52, %v2844_v1  ;;  %v2980_v57 = vpop.permute.xlu0 %2979  ;;  %v14943_v10 = vld [vmem:[#allocation98_spill] sm:$0xff]  ;;  %v14944_v30 = vld [vmem:[#allocation29_spill] sm:$0xff] }
 0x288   : > { %v2901_v58 = vmax.f32 %v14912_v54, %v2887_v51  ;;  %14913 = vst [vmem:[#allocation181_spill] sm:$0xff] %v11557_v38  ;;  %v2889_v6 = vmax.f32 %v11341_v62, %v2875_v48  ;;  %v11572_v51 = vadd.f32 %v11380_v11, %v2902_v50  ;;  %v14919_v36 = vmax.f32 %v14917_v41, %v14918_v53  ;;  %v14921_v62 = vld [vmem:[#allocation194_spill] sm:$0xff] }
 0x289   : > { %14914 = vst [vmem:[#allocation4_spill] sm:$0xff] %v11564_v34  ;;  %14915 = vst [vmem:[#allocation184_spill] sm:$0xff] %v11567_v25  ;;  %v11578_v61 = vmul.f32 %v2834_v39, %v14736_v14  ;;  %v2892_v54 = vmax.f32 %v11358_v2, %v2878_v59  ;;  %3686 = vperm.xlu1 %6894, %v11550_v46   ;;  %v14922_v48 = vld [vmem:[#allocation130_spill] sm:$0xff]  ;;  %v11586_v50 = vmul.f32 %v2834_v39, %v14680_v13  ;;  %v14927_v2 = vld [vmem:[#allocation201_spill] sm:$0xff] }
 0x28a   : > { %14916 = vst [vmem:[#allocation126_spill] sm:$0xff] %v11572_v51  ;;  %v2904_v40 = vmax.f32 %v14919_v36, %v2890_v7  ;;  %v14923_v24 = vmax.f32 %v14921_v62, %v14922_v48  ;;  %v2877_v25 = vadd.f32 %v2863_v47, %v11375_v8  ;;  %v14925_v41 = vld [vmem:[#allocation26_spill] sm:$0xff]  ;;  %3681 = vperm.xlu0 %6893, %v11561_v0   ;;  %v14928_v59 = vld [vmem:[#allocation136_spill] sm:$0xff] }
 0x28b   : > { %14920 = vst [vmem:[#allocation190_spill] sm:$0xff] %v11578_v61  ;;  %14924 = vst [vmem:[#allocation125_spill] sm:$0xff] %v11586_v50  ;;  %v3048_v53 = vmul.f32 %v2985_v17, %v14925_v41  ;;  %v4158_v7 = vld [vmem:[%s7018_s23 + $0x231] sm:$0xff]  ;;  %v11593_v36 = vadd.f32 %v11380_v11, %v2901_v58  ;;  %v14929_v61 = vmax.f32 %v14927_v2, %v14928_v59  ;;  %v14932_v58 = vld [vmem:[#allocation19_spill] sm:$0xff]  ;;  %v2995_v50 = vpop.permute.xlu1 %2994  ;;  %v2990_v8 = vpop.permute.xlu0 %2989 }
 0x28c   : > { %v2903_v22 = vmax.f32 %v14923_v24, %v2889_v6  ;;  %v11599_v62 = vmul.f32 %v2849_v55, %v14736_v14  ;;  %v3047_v39 = vmul.f32 %v2980_v57, %v14925_v41  ;;  %v4157_v24 = vld [vmem:[%s7018_s23 + $0x229] sm:$0xff]  ;;  %v11605_v6 = vmul.f32 %v2849_v55, %v14680_v13  ;;  %v14942_v2 = vld [vmem:[#allocation95_spill] sm:$0xff] }
 0x28d   : > { %14926 = vst [vmem:[#allocation194_spill] sm:$0xff] %v11593_v36  ;;  %v2906_v38 = vmax.f32 %v14929_v61, %v2892_v54  ;;  %v2891_v47 = vmax.f32 %v11372_v45, %v2877_v25  ;;  %v3062_v48 = vadd.f32 %v3048_v53, %v14932_v58  ;;  %v11611_v61 = vadd.f32 %v11380_v11, %v2904_v40  ;;  %v14934_v54 = vld [vmem:[#allocation25_spill] sm:$0xff]  ;;  %v3306_v40 = vld [vmem:[%s7018_s23 + $0x41] sm:$0xff] }
 0x28e   : > { %14930 = vst [vmem:[#allocation130_spill] sm:$0xff] %v11599_v62  ;;  %14931 = vst [vmem:[#allocation26_spill] sm:$0xff] %v11605_v6  ;;  %v3440_v59 = vmul.f32 %v2985_v17, %v14934_v54  ;;  %v14935_v62 = vld [vmem:[#allocation23_spill] sm:$0xff]  ;;  %4194 = vperm.xlu1 %6894, %v4158_v7   ;;  %v11616_v55 = vadd.f32 %v11380_v11, %v2903_v22  ;;  %v11622_v25 = vmul.f32 %v2844_v1, %v14736_v14  ;;  %v14939_v17 = vld [vmem:[#allocation38_spill] sm:$0xff] }
 0x28f   : > { %14933 = vst [vmem:[#allocation201_spill] sm:$0xff] %v11611_v61  ;;  %v3061_v21 = vadd.f32 %v3047_v39, %v14935_v62  ;;  %v11619_v45 = vadd.f32 %v11380_v11, %v2906_v38  ;;  %v3050_v53 = vmul.f32 %v2995_v50, %v14925_v41  ;;  %4189 = vperm.xlu0 %6893, %v4157_v24   ;;  %v3305_v38 = vld [vmem:[%s7018_s23 + $0x39] sm:$0xff]  ;;  %v3005_v4 = vpop.permute.xlu1 %3004 }
 0x290   : > { %14936 = vst [vmem:[#allocation136_spill] sm:$0xff] %v11616_v55  ;;  %14938 = vst [vmem:[#allocation23_spill] sm:$0xff] %v11622_v25  ;;  %v14940_v62 = vmax.f32 %v14685_v37, %v14939_v17  ;;  %v11631_v7 = vmul.f32 %v2844_v1, %v14680_v13  ;;  %v3439_v22 = vmul.f32 %v2980_v57, %v14934_v54  ;;  %v3000_v57 = vpop.permute.xlu0 %2999 }
 0x291   : > { %14937 = vst [vmem:[#allocation19_spill] sm:$0xff] %v11619_v45  ;;  %v3090_v6 = vadd.f32 %v14942_v2, %v3062_v48  ;;  %v3089_v25 = vadd.f32 %v14943_v10, %v3061_v21  ;;  %v3064_v44 = vadd.f32 %v3050_v53, %v14944_v30  ;;  %v3049_v24 = vmul.f32 %v2990_v8, %v14925_v41  ;;  %v14946_v10 = vld [vmem:[#allocation49_spill] sm:$0xff] }
 0x292   : > { %v2905_v39 = vmax.f32 %v14940_v62, %v2891_v47  ;;  %14941 = vst [vmem:[#allocation38_spill] sm:$0xff] %v11631_v7  ;;  %v11641_v37 = vadd.f32 %v3440_v59, %v14945_v9  ;;  %v3442_v13 = vmul.f32 %v2995_v50, %v14934_v54  ;;  %v3052_v1 = vmul.f32 %v3005_v4, %v14925_v41  ;;  %v14948_v9 = vld [vmem:[#allocation45_spill] sm:$0xff]  ;;  %v14951_v47 = vld [vmem:[#allocation64_spill] sm:$0xff] }
 0x293   : > { %3350 = vperm.xlu1 %6894, %v3306_v40   ;;  %v3063_v30 = vadd.f32 %v3049_v24, %v14946_v10  ;;  %v3441_v48 = vmul.f32 %v2990_v8, %v14934_v54  ;;  %3345 = vperm.xlu0 %6893, %v3305_v38   ;;  %v11653_v59 = vadd.f32 %v3439_v22, %v14948_v9  ;;  %v14949_v50 = vld [vmem:[#allocation53_spill] sm:$0xff]  ;;  %v14952_v24 = vld [vmem:[#allocation24_spill] sm:$0xff] }
 0x294   : > { %v11650_v2 = vadd.f32 %v11380_v11, %v2905_v39  ;;  %v3066_v53 = vadd.f32 %v3052_v1, %v14949_v50  ;;  %v3051_v17 = vmul.f32 %v3000_v57, %v14925_v41  ;;  %v14950_v40 = vld [vmem:[#allocation61_spill] sm:$0xff]  ;;  %v11661_v21 = vadd.f32 %v14951_v47, %v3089_v25  ;;  %v3015_v11 = vpop.permute.xlu1 %3014  ;;  %v5048_v39 = vld [vmem:[#allocation3 + $0x4] sm:$0xf]  ;;  %v5049_v38 = vld [vmem:[#allocation3 + $0x8] sm:$0xf] }
 0x295   : > { %v11658_v62 = vadd.f32 %v14950_v40, %v3090_v6  ;;  %v3092_v10 = vadd.f32 %v14952_v24, %v3064_v44  ;;  %v3444_v8 = vmul.f32 %v3005_v4, %v14934_v54  ;;  %v14953_v22 = vld [vmem:[#allocation37_spill] sm:$0xff]  ;;  %v14955_v1 = vld [vmem:[#allocation56_spill] sm:$0xff]  ;;  %v3443_v58 = vmul.f32 %v3000_v57, %v14934_v54  ;;  %v3010_v40 = vpop.permute.xlu0 %3009  ;;  %v14956_v25 = vld [vmem:[#allocation99_spill] sm:$0xff] }
 0x296   : > { %14947 = vst [vmem:[#allocation95_spill] sm:$0xff] %v11650_v2  ;;  %v11666_v9 = vadd.f32 %v3442_v13, %v14953_v22  ;;  %v3065_v50 = vadd.f32 %v3051_v17, %v14955_v1  ;;  %v3054_v6 = vmul.f32 %v3015_v11, %v14925_v41  ;;  %v3091_v44 = vadd.f32 %v14956_v25, %v3063_v30  ;;  %v14957_v47 = vld [vmem:[#allocation39_spill] sm:$0xff]  ;;  %v14959_v4 = vld [vmem:[#allocation100_spill] sm:$0xff]  ;;  %v14960_v22 = vld [vmem:[#allocation46_spill] sm:$0xff] }
 0x297   : > { %4530 = vperm.xlu1 %6894, %v11561_v0   ;;  %v11674_v24 = vadd.f32 %v3441_v48, %v14957_v47  ;;  %v3094_v45 = vadd.f32 %v14959_v4, %v3066_v53  ;;  %v3053_v7 = vmul.f32 %v3010_v40, %v14925_v41  ;;  %4525 = vperm.xlu0 %6893, %v11304_v23   ;;  %v3810_v13 = vld [vmem:[%s7018_s23 + $0xc1] sm:$0xff] }
 0x298   : > { %14954 = vst [vmem:[#allocation98_spill] sm:$0xff] %v11666_v9  ;;  %v5047_v17 = vld [vmem:[#allocation3] sm:$0xf]  ;;  %v3068_v57 = vadd.f32 %v3054_v6, %v14960_v22  ;;  %v3446_v1 = vmul.f32 %v3015_v11, %v14934_v54  ;;  %v3445_v16 = vmul.f32 %v3010_v40, %v14934_v54  ;;  %v11683_v0 = vcombine.low %v5048_v39, %v5049_v38  ;;  %v14962_v30 = vld [vmem:[#allocation16_spill] sm:$0xff]  ;;  %v3025_v26 = vpop.permute.xlu1 %3024 }
 0x299   : > { %14958 = vst [vmem:[#allocation29_spill] sm:$0xff] %v11674_v24  ;;  %v11686_v25 = vadd.f32 %v14962_v30, %v3092_v10  ;;  %v14963_v48 = vld [vmem:[#allocation40_spill] sm:$0xff]  ;;  %v14966_v23 = vld [vmem:[#allocation47_spill] sm:$0xff]  ;;  %v11694_v6 = vadd.f32 %v3443_v58, %v14967_v56  ;;  %v3056_v40 = vmul.f32 %v3025_v26, %v14925_v41  ;;  %v11698_v10 = vcombine.low %v5047_v17, %v5048_v39  ;;  %v5050_v30 = vld [vmem:[#allocation3 + $0xc] sm:$0xf] }
 0x29a   : > { %14961 = vst [vmem:[#allocation205_spill] sm:$0xff] %v11683_v0  ;;  %v11689_v47 = vadd.f32 %v3444_v8, %v14963_v48  ;;  %v14965_v53 = vld [vmem:[#allocation104_spill] sm:$0xff]  ;;  %v3067_v27 = vadd.f32 %v3053_v7, %v14966_v23  ;;  %v14969_v11 = vld [vmem:[#allocation75_spill] sm:$0xff]  ;;  %v3020_v0 = vpop.permute.xlu0 %3019  ;;  %v14971_v8 = vld [vmem:[#allocation77_spill] sm:$0xff]  ;;  %v3448_v7 = vmul.f32 %v3025_v26, %v14934_v54  ;;  %v11725_v61 = vcombine.low %v5049_v38, %v5050_v30 }
 0x29b   : > { %v3093_v4 = vadd.f32 %v14965_v53, %v3065_v50  ;;  %14968 = vst [vmem:[#allocation45_spill] sm:$0xff] %v11694_v6  ;;  %v3096_v22 = vadd.f32 %v14969_v11, %v3068_v57  ;;  %3854 = vperm.xlu1 %6894, %v3810_v13   ;;  %14970 = vst [vmem:[#allocation53_spill] sm:$0xff] %v11698_v10  ;;  %v11701_v48 = vadd.f32 %v14971_v8, %v3091_v44  ;;  %v11710_v58 = vld [vmem:[%s7018_s23 + $0xc9] sm:$0xff]  ;;  %v14975_v39 = vld [vmem:[#allocation107_spill] sm:$0xff] }
 0x29c   : > { %14964 = vst [vmem:[#allocation49_spill] sm:$0xff] %v11689_v47  ;;  %v11704_v50 = vadd.f32 %v14972_v63, %v3094_v45  ;;  %v3055_v56 = vmul.f32 %v3020_v0, %v14925_v41  ;;  %3849 = vperm.xlu0 %6893, %v11516_v49   ;;  %v14973_v57 = vld [vmem:[#allocation32_spill] sm:$0xff]  ;;  %v3095_v17 = vadd.f32 %v14975_v39, %v3067_v27  ;;  %v14976_v23 = vld [vmem:[#allocation97_spill] sm:$0xff]  ;;  %v14980_v26 = vld [vmem:[#allocation55_spill] sm:$0xff]  ;;  %v3035_v60 = vpop.permute.xlu1 %3034 }
 0x29d   : > { %v11713_v53 = vadd.f32 %v3446_v1, %v14973_v57  ;;  %v11717_v11 = vadd.f32 %v3445_v16, %v14976_v23  ;;  %v14978_v44 = vld [vmem:[#allocation76_spill] sm:$0xff]  ;;  %v3447_v49 = vmul.f32 %v3020_v0, %v14934_v54  ;;  %14981 = vst [vmem:[#allocation24_spill] sm:$0xff] %v11725_v61  ;;  %v14982_v1 = vld [vmem:[#allocation50_spill] sm:$0xff]  ;;  %v14983_v27 = vld [vmem:[#allocation21_spill] sm:$0xff]  ;;  %v3058_v39 = vmul.f32 %v3035_v60, %v14925_v41 }
 0x29e   : > { %v3070_v8 = vadd.f32 %v3056_v40, %v14978_v44  ;;  %v14979_v63 = vld [vmem:[#allocation72_spill] sm:$0xff]  ;;  %v3069_v55 = vadd.f32 %v3055_v56, %v14980_v26  ;;  %v11728_v57 = vadd.f32 %v14982_v1, %v3096_v22  ;;  %v3030_v40 = vpop.permute.xlu0 %3029  ;;  %v14985_v23 = vmax.f32 %v11463_v12, 0.0  ;;  %v14986_v44 = vld [vmem:[#allocation6_spill] sm:$0xff]  ;;  %v14991_v61 = vld [vmem:[#allocation111_spill] sm:$0xff] }
 0x29f   : > { %14974 = vst [vmem:[#allocation61_spill] sm:$0xff] %v11713_v53  ;;  %14977 = vst [vmem:[#allocation64_spill] sm:$0xff] %v11717_v11  ;;  %v11721_v45 = vadd.f32 %v14979_v63, %v3093_v4  ;;  %3528 = vperm.xlu1 %6894, %v11710_v58   ;;  %v14984_v4 = vld [vmem:[#allocation5_spill] sm:$0xff]  ;;  %v11737_v0 = vadd.f32 %v3448_v7, %v14986_v44  ;;  %v3450_v38 = vmul.f32 %v3035_v60, %v14934_v54  ;;  %v14990_v1 = vld [vmem:[#allocation80_spill] sm:$0xff] }
 0x2a0   : > { %v3098_v16 = vadd.f32 %v14983_v27, %v3070_v8  ;;  %v4666_v56 = vmul.f32 %v14985_v23, %v14984_v4  ;;  %v3057_v30 = vmul.f32 %v3030_v40, %v14925_v41  ;;  %3523 = vperm.xlu0 %6893, %v3810_v13   ;;  %v11742_v22 = vld [vmem:[%s7018_s23 + $0x2c9] sm:$0xff]  ;;  %v14988_v8 = vld [vmem:[#allocation138_spill] sm:$0xff]  ;;  %v14989_v63 = vmax.f32 %v11483_v32, 0.0  ;;  %v14992_v23 = vld [vmem:[#allocation63_spill] sm:$0xff]  ;;  %v3045_v32 = vpop.permute.xlu1 %3044 }
 0x2a1   : > { %14987 = vst [vmem:[#allocation37_spill] sm:$0xff] %v11737_v0  ;;  %v11748_v27 = vadd.f32 %v14990_v1, %v3095_v17  ;;  %v3097_v12 = vadd.f32 %v14991_v61, %v3069_v55  ;;  %v3072_v4 = vadd.f32 %v3058_v39, %v14992_v23  ;;  %v11753_v7 = vld [vmem:[%s7018_s23 + $0x2c1] sm:$0xff]  ;;  %v14993_v60 = vld [vmem:[#allocation13_spill] sm:$0xff]  ;;  %v3449_v53 = vmul.f32 %v3030_v40, %v14934_v54  ;;  %v15000_v40 = vld [vmem:[#allocation54_spill] sm:$0xff] }
 0x2a2   : > { %v4668_v26 = vmul.f32 %v14989_v63, %v14988_v8  ;;  %v6637_v44 = vpack.c.bf16 %v4666_v56, %v4666_v56  ;;  %v11756_v0 = vadd.f32 %v3447_v49, %v14993_v60  ;;  %v14995_v13 = vld [vmem:[#allocation67_spill] sm:$0xff]  ;;  %v14996_v8 = vld [vmem:[#allocation124_spill] sm:$0xff]  ;;  %v3060_v55 = vmul.f32 %v3045_v32, %v14925_v41  ;;  %v3040_v39 = vpop.permute.xlu0 %3039  ;;  %v14998_v49 = vld [vmem:[#allocation229_spill] sm:$0xff] }
 0x2a3   : > { %v3071_v11 = vadd.f32 %v3057_v30, %v14995_v13  ;;  %v11761_v17 = vadd.f32 %v14996_v8, %v3098_v16  ;;  %v14997_v1 = vld [vmem:[#allocation59_spill] sm:$0xff]  ;;  %3696 = vperm.xlu1 %6894, %v11742_v22   ;;  %v14999_v56 = vmax.f32 %v11493_v15, 0.0  ;;  %v11771_v23 = vadd.f32 %v3450_v38, %v15000_v40  ;;  %v15005_v15 = vld [vmem:[#allocation114_spill] sm:$0xff] }
 0x2a4   : > { %14994 = vst [vmem:[#allocation56_spill] sm:$0xff] %v11756_v0  ;;  %v6639_v63 = vpack.c.bf16 %v4668_v26, %v4668_v26  ;;  %v3100_v61 = vadd.f32 %v14997_v1, %v3072_v4  ;;  %4813 = vst.msk [vmem:[#allocation3 + $0x10] sm:$0xf] %vm4719_vm0, %v6637_v44  ;;  %v3452_v16 = vmul.f32 %v3045_v32, %v14934_v54  ;;  %3691 = vperm.xlu0 %6893, %v11753_v7   ;;  %v4160_v4 = vld [vmem:[%s7018_s23 + $0x241] sm:$0xff]  ;;  %v15002_v26 = vld [vmem:[#allocation230_spill] sm:$0xff]  ;;  %v3153_v36 = vpop.permute.xlu1 %3152 }
 0x2a5   : > { %v4667_v30 = vmul.f32 %v14999_v56, %v14998_v49  ;;  %15001 = vst [vmem:[#allocation99_spill] sm:$0xff] %v11771_v23  ;;  %v3059_v8 = vmul.f32 %v3040_v39, %v14925_v41  ;;  %v15003_v60 = vmax.f32 %v11520_v29, 0.0  ;;  %v15004_v13 = vld [vmem:[#allocation7_spill] sm:$0xff]  ;;  %v3099_v56 = vadd.f32 %v15005_v15, %v3071_v11  ;;  %v15006_v38 = vld [vmem:[#allocation70_spill] sm:$0xff] }
 0x2a6   : > { %4815 = vst.msk [vmem:[#allocation3 + $0x18] sm:$0xf] %vm4719_vm0, %v6639_v63  ;;  %v11782_v1 = vadd.f32 %v15004_v13, %v3097_v12  ;;  %v3074_v40 = vadd.f32 %v3060_v55, %v15006_v38  ;;  %v4159_v23 = vld [vmem:[%s7018_s23 + $0x239] sm:$0xff]  ;;  %v3451_v63 = vmul.f32 %v3040_v39, %v14934_v54  ;;  %v3986_v55 = vmul.f32 %v3153_v36, %v14925_v41  ;;  %v15015_v39 = vld [vmem:[#allocation89_spill] sm:$0xff] }
 0x2a7   : > { %v4670_v44 = vmul.f32 %v15003_v60, %v15002_v26  ;;  %v6638_v32 = vpack.c.bf16 %v4667_v30, %v4667_v30  ;;  %v15007_v49 = vld [vmem:[#allocation35_spill] sm:$0xff]  ;;  %v15009_v10 = vld [vmem:[#allocation82_spill] sm:$0xff]  ;;  %v15010_v60 = vld [vmem:[#allocation128_spill] sm:$0xff]  ;;  %v3148_v30 = vpop.permute.xlu0 %3147  ;;  %4204 = vperm.xlu1 %6894, %v4160_v4  }
 0x2a8   : > { %v11788_v0 = vadd.f32 %v3449_v53, %v15007_v49  ;;  %v3073_v33 = vadd.f32 %v3059_v8, %v15009_v10  ;;  %v11793_v26 = vadd.f32 %v15010_v60, %v3100_v61  ;;  %v15011_v12 = vld [vmem:[#allocation87_spill] sm:$0xff]  ;;  %v15013_v10 = vld [vmem:[#allocation57_spill] sm:$0xff]  ;;  %v4294_v8 = vmul.f32 %v3153_v36, %v14934_v54  ;;  %4199 = vperm.xlu0 %6893, %v4159_v23   ;;  %v15016_v38 = vld [vmem:[#allocation66_spill] sm:$0xff] }
 0x2a9   : > { %v6641_v29 = vpack.c.bf16 %v4670_v44, %v4670_v44  ;;  %v3102_v13 = vadd.f32 %v15011_v12, %v3074_v40  ;;  %v15012_v11 = vld [vmem:[#allocation31_spill] sm:$0xff]  ;;  %4814 = vst.msk [vmem:[#allocation3 + $0x14] sm:$0xf] %vm4719_vm0, %v6638_v32  ;;  %v11800_v53 = vadd.f32 %v3452_v16, %v15013_v10  ;;  %v3308_v44 = vld [vmem:[%s7018_s23 + $0x51] sm:$0xff]  ;;  %v11808_v40 = vadd.f32 %v15016_v38, %v3099_v56  ;;  %v3307_v12 = vld [vmem:[%s7018_s23 + $0x49] sm:$0xff]  ;;  %v3163_v56 = vpop.permute.xlu1 %3162 }
 0x2aa   : > { %15008 = vst [vmem:[#allocation39_spill] sm:$0xff] %v11788_v0  ;;  %v3216_v15 = vmul.f32 %v3153_v36, %v15012_v11  ;;  %v3101_v49 = vadd.f32 %v15015_v39, %v3073_v33  ;;  %v3215_v61 = vmul.f32 %v3148_v30, %v15012_v11  ;;  %v15017_v60 = vld [vmem:[#allocation34_spill] sm:$0xff]  ;;  %v3985_v16 = vmul.f32 %v3148_v30, %v14925_v41  ;;  %v15020_v39 = vld [vmem:[#allocation28_spill] sm:$0xff]  ;;  %v15021_v38 = vld [vmem:[#allocation127_spill] sm:$0xff] }
 0x2ab   : > { %15014 = vst [vmem:[#allocation100_spill] sm:$0xff] %v11800_v53  ;;  %4817 = vst.msk [vmem:[#allocation3 + $0x20] sm:$0xf] %vm4719_vm0, %v6641_v29  ;;  %v4000_v32 = vadd.f32 %v3986_v55, %v15017_v60  ;;  %v15018_v10 = vld [vmem:[#allocation78_spill] sm:$0xff]  ;;  %v11818_v53 = vmul.f32 %v3153_v36, %v15020_v39  ;;  %v11822_v29 = vmul.f32 %v3148_v30, %v15020_v39  ;;  %v15023_v55 = vld [vmem:[#allocation131_spill] sm:$0xff]  ;;  %3360 = vperm.xlu1 %6894, %v3308_v44  }
 0x2ac   : > { %v3230_v4 = vadd.f32 %v3216_v15, %v11658_v62  ;;  %v11815_v33 = vadd.f32 %v3451_v63, %v15018_v10  ;;  %v3229_v23 = vadd.f32 %v3215_v61, %v11661_v21  ;;  %v11825_v0 = vadd.f32 %v15021_v38, %v3102_v13  ;;  %v15022_v62 = vld [vmem:[#allocation132_spill] sm:$0xff]  ;;  %v3158_v10 = vpop.permute.xlu0 %3157  ;;  %3355 = vperm.xlu0 %6893, %v3307_v12   ;;  %v15026_v38 = vld [vmem:[#allocation143_spill] sm:$0xff] }
 0x2ad   : > { %v11828_v15 = vadd.f32 %v15022_v62, %v3101_v49  ;;  %v3999_v60 = vadd.f32 %v3985_v16, %v15023_v55  ;;  %v3218_v63 = vmul.f32 %v3163_v56, %v15012_v11  ;;  %v15024_v36 = vld [vmem:[#allocation144_spill] sm:$0xff]  ;;  %v11834_v21 = vmul.f32 %v3148_v30, %v14934_v54  ;;  %v15027_v62 = vld [vmem:[#allocation146_spill] sm:$0xff]  ;;  %v15037_v47 = vld [vmem:[#allocation147_spill] sm:$0xff] }
 0x2ae   : > { %15019 = vst [vmem:[#allocation46_spill] sm:$0xff] %v11815_v33  ;;  %v4028_v33 = vadd.f32 %v15024_v36, %v4000_v32  ;;  %v3988_v61 = vmul.f32 %v3163_v56, %v14925_v41  ;;  %v11838_v13 = vadd.f32 %v4294_v8, %v15025_v28  ;;  %v11841_v49 = vadd.f32 %v15026_v38, %v3230_v4  ;;  %v15029_v32 = vld [vmem:[#allocation133_spill] sm:$0xff]  ;;  %v3173_v8 = vpop.permute.xlu1 %3172  ;;  %v15030_v4 = vld [vmem:[#allocation148_spill] sm:$0xff] }
 0x2af   : > { %v11844_v16 = vadd.f32 %v15027_v62, %v3229_v23  ;;  %v3232_v55 = vadd.f32 %v3218_v63, %v11686_v25  ;;  %v3217_v44 = vmul.f32 %v3158_v10, %v15012_v11  ;;  %v11849_v30 = vmul.f32 %v3163_v56, %v15020_v39  ;;  %4540 = vperm.xlu1 %6894, %v11753_v7  }
 0x2b0   : > { %v4002_v36 = vadd.f32 %v3988_v61, %v15029_v32  ;;  %v11853_v12 = vmul.f32 %v3163_v56, %v14934_v54  ;;  %v3987_v28 = vmul.f32 %v3158_v10, %v14925_v41  ;;  %v11857_v38 = vadd.f32 %v15030_v4, %v3999_v60  ;;  %v3168_v62 = vpop.permute.xlu0 %3167  ;;  %v15032_v61 = vld [vmem:[#allocation135_spill] sm:$0xff]  ;;  %4535 = vperm.xlu0 %6893, %v11550_v46   ;;  %v3812_v60 = vld [vmem:[%s7018_s23 + $0xd1] sm:$0xff] }
 0x2b1   : > { %15028 = vst [vmem:[#allocation16_spill] sm:$0xff] %v11849_v30  ;;  %v3231_v23 = vadd.f32 %v3217_v44, %v11701_v48  ;;  %v11861_v25 = vmul.f32 %v3158_v10, %v15020_v39  ;;  %v3220_v63 = vmul.f32 %v3173_v8, %v15012_v11  ;;  %v11867_v56 = vmul.f32 %v3158_v10, %v14934_v54  ;;  %v15033_v4 = vld [vmem:[#allocation186_spill] sm:$0xff]  ;;  %v15034_v44 = vld [vmem:[#allocation151_spill] sm:$0xff]  ;;  %v15036_v10 = vld [vmem:[#allocation152_spill] sm:$0xff] }
 0x2b2   : > { %v4001_v32 = vadd.f32 %v3987_v28, %v15032_v61  ;;  %v3990_v51 = vmul.f32 %v3173_v8, %v14925_v41  ;;  %v11873_v48 = vadd.f32 %v15033_v4, %v4028_v33  ;;  %v11876_v6 = vadd.f32 %v15034_v44, %v3232_v55  ;;  %v3183_v55 = vpop.permute.xlu1 %3182  ;;  %v15038_v4 = vld [vmem:[#allocation155_spill] sm:$0xff] }
 0x2b3   : > { %15031 = vst [vmem:[#allocation40_spill] sm:$0xff] %v11861_v25  ;;  %v3234_v20 = vadd.f32 %v3220_v63, %v11704_v50  ;;  %v11880_v7 = vmul.f32 %v3173_v8, %v15020_v39  ;;  %v3219_v28 = vmul.f32 %v3168_v62, %v15012_v11  ;;  %v11884_v61 = vadd.f32 %v15036_v10, %v4002_v36 }
 0x2b4   : > { %v4004_v46 = vadd.f32 %v3990_v51, %v15037_v47  ;;  %v11888_v2 = vmul.f32 %v3173_v8, %v14934_v54  ;;  %v3989_v33 = vmul.f32 %v3168_v62, %v14925_v41  ;;  %v11892_v44 = vadd.f32 %v15038_v4, %v3231_v23  ;;  %v3178_v10 = vpop.permute.xlu0 %3177  ;;  %3864 = vperm.xlu1 %6894, %v3812_v60   ;;  %v15041_v47 = vld [vmem:[#allocation156_spill] sm:$0xff] }
 0x2b5   : > { %15035 = vst [vmem:[#allocation104_spill] sm:$0xff] %v11880_v7  ;;  %v3233_v50 = vadd.f32 %v3219_v28, %v11721_v45  ;;  %v11896_v63 = vmul.f32 %v3168_v62, %v15020_v39  ;;  %v3222_v36 = vmul.f32 %v3183_v55, %v15012_v11  ;;  %v15040_v7 = vld [vmem:[#allocation158_spill] sm:$0xff]  ;;  %v11904_v19 = vmul.f32 %v3168_v62, %v14934_v54  ;;  %v15045_v62 = vld [vmem:[#allocation157_spill] sm:$0xff] }
 0x2b6   : > { %v11900_v51 = vadd.f32 %v15040_v7, %v4001_v32  ;;  %v4003_v8 = vadd.f32 %v3989_v33, %v15041_v47  ;;  %v3992_v23 = vmul.f32 %v3183_v55, %v14925_v41  ;;  %3859 = vperm.xlu0 %6893, %v11710_v58   ;;  %v11909_v45 = vld [vmem:[%s7018_s23 + $0xd9] sm:$0xff]  ;;  %v11916_v31 = vmul.f32 %v3183_v55, %v15020_v39 }
 0x2b7   : > { %15039 = vst [vmem:[#allocation47_spill] sm:$0xff] %v11896_v63  ;;  %v15042_v28 = vld [vmem:[#allocation162_spill] sm:$0xff]  ;;  %v3236_v63 = vadd.f32 %v3222_v36, %v11728_v57  ;;  %v3221_v32 = vmul.f32 %v3178_v10, %v15012_v11  ;;  %v15044_v7 = vld [vmem:[#allocation163_spill] sm:$0xff]  ;;  %v11924_v58 = vmul.f32 %v3183_v55, %v14934_v54  ;;  %v3991_v34 = vmul.f32 %v3178_v10, %v14925_v41 }
 0x2b8   : > { %v11912_v4 = vadd.f32 %v15042_v28, %v3234_v20  ;;  %15043 = vst [vmem:[#allocation92_spill] sm:$0xff] %v11916_v31  ;;  %v11920_v33 = vadd.f32 %v15044_v7, %v4004_v46  ;;  %v4006_v47 = vadd.f32 %v3992_v23, %v15045_v62  ;;  %v3193_v20 = vpop.permute.xlu1 %3192  ;;  %v15046_v28 = vld [vmem:[#allocation165_spill] sm:$0xff]  ;;  %v11932_v36 = vmul.f32 %v3178_v10, %v15020_v39  ;;  %v3188_v7 = vpop.permute.xlu0 %3187  ;;  %v15048_v23 = vld [vmem:[#allocation168_spill] sm:$0xff]  ;;  %v15049_v62 = vld [vmem:[#allocation166_spill] sm:$0xff] }
 0x2b9   : > { %v11928_v25 = vadd.f32 %v15046_v28, %v3233_v50  ;;  %v3235_v57 = vadd.f32 %v3221_v32, %v11748_v27  ;;  %v3224_v46 = vmul.f32 %v3193_v20, %v15012_v11  ;;  %3538 = vperm.xlu1 %6894, %v11909_v45   ;;  %v11937_v55 = vadd.f32 %v15048_v23, %v4003_v8  ;;  %v11945_v27 = vld [vmem:[%s7018_s23 + $0x2d9] sm:$0xff]  ;;  %v11956_v23 = vld [vmem:[%s7018_s23 + $0x2d1] sm:$0xff] }
 0x2ba   : > { %15047 = vst [vmem:[#allocation75_spill] sm:$0xff] %v11932_v36  ;;  %v4005_v31 = vadd.f32 %v3991_v34, %v15049_v62  ;;  %v11941_v30 = vmul.f32 %v3178_v10, %v14934_v54  ;;  %v3994_v50 = vmul.f32 %v3193_v20, %v14925_v41  ;;  %3533 = vperm.xlu0 %6893, %v3812_v60   ;;  %15050 = vst [vmem:[#allocation77_spill] sm:$0xff] %v11945_v27  ;;  %v15051_v32 = vld [vmem:[#allocation171_spill] sm:$0xff]  ;;  %v15054_v34 = vld [vmem:[#allocation172_spill] sm:$0xff] }
 0x2bb   : > { %v11948_v28 = vadd.f32 %v15051_v32, %v3236_v63  ;;  %v3238_v36 = vadd.f32 %v3224_v46, %v11761_v17  ;;  %v11952_v24 = vmul.f32 %v3193_v20, %v15020_v39  ;;  %v3223_v8 = vmul.f32 %v3188_v7, %v15012_v11  ;;  %v15056_v62 = vld [vmem:[#allocation167_spill] sm:$0xff] }
 0x2bc   : > { %v11959_v10 = vadd.f32 %v15054_v34, %v4006_v47  ;;  %v4008_v60 = vadd.f32 %v3994_v50, %v15056_v62  ;;  %v11963_v35 = vmul.f32 %v3193_v20, %v14934_v54  ;;  %v3993_v63 = vmul.f32 %v3188_v7, %v14925_v41  ;;  %v3203_v32 = vpop.permute.xlu1 %3202  ;;  %v15058_v17 = vld [vmem:[#allocation175_spill] sm:$0xff]  ;;  %v3198_v34 = vpop.permute.xlu0 %3197  ;;  %v15061_v50 = vld [vmem:[#allocation178_spill] sm:$0xff] }
 0x2bd   : > { %15052 = vst [vmem:[#allocation102_spill] sm:$0xff] %v11948_v28  ;;  %15053 = vst [vmem:[#allocation32_spill] sm:$0xff] %v11952_v24  ;;  %v11967_v46 = vadd.f32 %v15058_v17, %v3235_v57  ;;  %v3237_v24 = vadd.f32 %v3223_v8, %v11782_v1  ;;  %v11971_v28 = vmul.f32 %v3188_v7, %v15020_v39  ;;  %3706 = vperm.xlu1 %6894, %v11945_v27   ;;  %v15063_v62 = vld [vmem:[#allocation182_spill] sm:$0xff]  ;;  %v15066_v8 = vld [vmem:[#allocation176_spill] sm:$0xff] }
 0x2be   : > { %15055 = vst [vmem:[#allocation107_spill] sm:$0xff] %v11959_v10  ;;  %15057 = vst [vmem:[#allocation97_spill] sm:$0xff] %v11963_v35  ;;  %v3226_v47 = vmul.f32 %v3203_v32, %v15012_v11  ;;  %v11976_v20 = vadd.f32 %v15061_v50, %v4005_v31  ;;  %v11979_v35 = vadd.f32 %v15063_v62, %v3238_v36  ;;  %3701 = vperm.xlu0 %6893, %v11956_v23   ;;  %v4162_v1 = vld [vmem:[%s7018_s23 + $0x251] sm:$0xff]  ;;  %v4161_v50 = vld [vmem:[%s7018_s23 + $0x249] sm:$0xff] }
 0x2bf   : > { %15059 = vst [vmem:[#allocation76_spill] sm:$0xff] %v11967_v46  ;;  %15060 = vst [vmem:[#allocation72_spill] sm:$0xff] %v11971_v28  ;;  %v11982_v57 = vmul.f32 %v3188_v7, %v14934_v54  ;;  %v3996_v17 = vmul.f32 %v3203_v32, %v14925_v41  ;;  %v4007_v28 = vadd.f32 %v3993_v63, %v15066_v8  ;;  %v15068_v36 = vld [vmem:[#allocation183_spill] sm:$0xff]  ;;  %v15070_v7 = vld [vmem:[#allocation177_spill] sm:$0xff] }
 0x2c0   : > { %15062 = vst [vmem:[#allocation55_spill] sm:$0xff] %v11976_v20  ;;  %15064 = vst [vmem:[#allocation50_spill] sm:$0xff] %v11979_v35  ;;  %v3240_v46 = vadd.f32 %v3226_v47, %v11793_v26  ;;  %v11990_v27 = vmul.f32 %v3203_v32, %v15020_v39  ;;  %v3225_v31 = vmul.f32 %v3198_v34, %v15012_v11  ;;  %v12002_v63 = vpop.permute.xlu1 %3212  ;;  %v15073_v26 = vld [vmem:[#allocation185_spill] sm:$0xff] }
 0x2c1   : > { %15065 = vst [vmem:[#allocation21_spill] sm:$0xff] %v11982_v57  ;;  %v11995_v62 = vadd.f32 %v15068_v36, %v4008_v60  ;;  %v4010_v35 = vadd.f32 %v3996_v17, %v15070_v7  ;;  %v11999_v57 = vmul.f32 %v3203_v32, %v14934_v54  ;;  %v3995_v20 = vmul.f32 %v3198_v34, %v14925_v41  ;;  %v12012_v17 = vpop.permute.xlu0 %3207  ;;  %v15077_v7 = vld [vmem:[#allocation187_spill] sm:$0xff] }
 0x2c2   : > { %15067 = vst [vmem:[#allocation6_spill] sm:$0xff] %v11990_v27  ;;  %15072 = vst [vmem:[#allocation63_spill] sm:$0xff] %v12002_v63  ;;  %v12005_v47 = vadd.f32 %v15073_v26, %v3237_v24  ;;  %v3239_v8 = vadd.f32 %v3225_v31, %v11808_v40  ;;  %v3228_v60 = vmul.f32 %v12002_v63, %v15012_v11  ;;  %4214 = vperm.xlu1 %6894, %v4162_v1   ;;  %v3310_v31 = vld [vmem:[%s7018_s23 + $0x61] sm:$0xff] }
 0x2c3   : > { %15069 = vst [vmem:[#allocation80_spill] sm:$0xff] %v11995_v62  ;;  %15071 = vst [vmem:[#allocation111_spill] sm:$0xff] %v11999_v57  ;;  %v3998_v36 = vmul.f32 %v12002_v63, %v14925_v41  ;;  %v12015_v32 = vmul.f32 %v3198_v34, %v15020_v39  ;;  %v4009_v27 = vadd.f32 %v3995_v20, %v15077_v7  ;;  %4209 = vperm.xlu0 %6893, %v4161_v50   ;;  %v15078_v26 = vld [vmem:[#allocation188_spill] sm:$0xff]  ;;  %v15079_v63 = vld [vmem:[#allocation191_spill] sm:$0xff] }
 0x2c4   : > { %15074 = vst [vmem:[#allocation13_spill] sm:$0xff] %v12005_v47  ;;  %15075 = vst [vmem:[#allocation67_spill] sm:$0xff] %v12012_v17  ;;  %v3227_v24 = vmul.f32 %v12012_v17, %v15012_v11  ;;  %v3997_v40 = vmul.f32 %v12012_v17, %v14925_v41  ;;  %v12024_v57 = vadd.f32 %v15078_v26, %v4007_v28  ;;  %v15081_v1 = vld [vmem:[#allocation192_spill] sm:$0xff]  ;;  %v3309_v20 = vld [vmem:[%s7018_s23 + $0x59] sm:$0xff]  ;;  %v3321_v28 = vpop.permute.xlu1 %3320 }
 0x2c5   : > { %15076 = vst [vmem:[#allocation124_spill] sm:$0xff] %v12015_v32  ;;  %v12027_v47 = vadd.f32 %v15079_v63, %v3240_v46  ;;  %v12030_v62 = vadd.f32 %v15081_v1, %v4010_v35  ;;  %v12033_v32 = vmul.f32 %v3198_v34, %v14934_v54  ;;  %v15084_v7 = vld [vmem:[#allocation195_spill] sm:$0xff]  ;;  %v12040_v17 = vadd.f32 %v3228_v60, %v11825_v0  ;;  %v15087_v50 = vld [vmem:[#allocation197_spill] sm:$0xff]  ;;  %v15090_v26 = vld [vmem:[#allocation196_spill] sm:$0xff]  ;;  %v3316_v0 = vpop.permute.xlu0 %3315 }
 0x2c6   : > { %v12037_v9 = vadd.f32 %v15084_v7, %v3239_v8  ;;  %v12043_v10 = vadd.f32 %v3998_v36, %v15087_v50  ;;  %v15089_v46 = vld [vmem:[#allocation43_spill] sm:$0xff]  ;;  %v12048_v35 = vadd.f32 %v15090_v26, %v4009_v27  ;;  %v12051_v34 = vadd.f32 %v3227_v24, %v11828_v15  ;;  %v15093_v1 = vld [vmem:[#allocation198_spill] sm:$0xff]  ;;  %3370 = vperm.xlu1 %6894, %v3310_v31   ;;  %v15095_v27 = vld [vmem:[#allocation96_spill] sm:$0xff] }
 0x2c7   : > { %15080 = vst [vmem:[#allocation59_spill] sm:$0xff] %v12027_v47  ;;  %15082 = vst [vmem:[#allocation54_spill] sm:$0xff] %v12030_v62  ;;  %v4055_v63 = vadd.f32 %v15089_v46, %v11857_v38  ;;  %v12054_v62 = vadd.f32 %v3997_v40, %v15093_v1  ;;  %v4070_v8 = vmul.f32 %v3321_v28, %v15012_v11  ;;  %3365 = vperm.xlu0 %6893, %v3309_v20   ;;  %v15096_v20 = vld [vmem:[#allocation73_spill] sm:$0xff] }
 0x2c8   : > { %15083 = vst [vmem:[#allocation7_spill] sm:$0xff] %v12033_v32  ;;  %15085 = vst [vmem:[#allocation114_spill] sm:$0xff] %v12037_v9  ;;  %v3384_v60 = vmul.f32 %v11367_v52, %v3321_v28  ;;  %v12059_v36 = vmul.f32 %v3321_v28, %v14736_v14  ;;  %v4069_v38 = vmul.f32 %v3316_v0, %v15012_v11  ;;  %v3331_v46 = vpop.permute.xlu1 %3330 }
 0x2c9   : > { %15086 = vst [vmem:[#allocation70_spill] sm:$0xff] %v12040_v17  ;;  %15088 = vst [vmem:[#allocation35_spill] sm:$0xff] %v12043_v10  ;;  %v4058_v7 = vadd.f32 %v15095_v27, %v11884_v61  ;;  %v12065_v15 = vmul.f32 %v3321_v28, %v15020_v39  ;;  %v3383_v24 = vmul.f32 %v11367_v52, %v3316_v0  ;;  %v15097_v61 = vld [vmem:[#allocation60_spill] sm:$0xff]  ;;  %v15098_v28 = vld [vmem:[#allocation62_spill] sm:$0xff] }
 0x2ca   : > { %15091 = vst [vmem:[#allocation82_spill] sm:$0xff] %v12048_v35  ;;  %15092 = vst [vmem:[#allocation128_spill] sm:$0xff] %v12051_v34  ;;  %v12069_v40 = vmul.f32 %v3316_v0, %v14736_v14  ;;  %v12072_v31 = vmul.f32 %v3316_v0, %v15020_v39  ;;  %v4084_v50 = vadd.f32 %v4070_v8, %v11873_v48  ;;  %4550 = vperm.xlu1 %6894, %v11956_v23   ;;  %v15099_v0 = vld [vmem:[#allocation83_spill] sm:$0xff]  ;;  %v15100_v48 = vld [vmem:[#allocation33_spill] sm:$0xff] }
 0x2cb   : > { %15094 = vst [vmem:[#allocation87_spill] sm:$0xff] %v12054_v62  ;;  %v4057_v26 = vadd.f32 %v15096_v20, %v11900_v51  ;;  %v4060_v1 = vadd.f32 %v15097_v61, %v11920_v33  ;;  %v4059_v27 = vadd.f32 %v15098_v28, %v11937_v55  ;;  %v4083_v34 = vadd.f32 %v4069_v38, %v4055_v63  ;;  %v3326_v62 = vpop.permute.xlu0 %3325  ;;  %v3814_v63 = vld [vmem:[%s7018_s23 + $0xe1] sm:$0xff] }
 0x2cc   : > { %v4072_v17 = vmul.f32 %v3331_v46, %v15012_v11  ;;  %v12085_v10 = vadd.f32 %v11834_v21, %v15099_v0  ;;  %v12089_v8 = vadd.f32 %v11853_v12, %v15100_v48  ;;  %v3386_v51 = vmul.f32 %v11367_v52, %v3331_v46  ;;  %4545 = vperm.xlu0 %6893, %v11742_v22   ;;  %v15101_v38 = vld [vmem:[#allocation11_spill] sm:$0xff]  ;;  %v3341_v0 = vpop.permute.xlu1 %3340 }
 0x2cd   : > { %v12093_v33 = vmul.f32 %v3331_v46, %v14736_v14  ;;  %v4071_v55 = vmul.f32 %v3326_v62, %v15012_v11  ;;  %v12100_v23 = vadd.f32 %v11867_v56, %v15101_v38  ;;  %v12103_v21 = vmul.f32 %v3331_v46, %v15020_v39  ;;  %v15103_v22 = vld [vmem:[#allocation139_spill] sm:$0xff]  ;;  %v15105_v46 = vld [vmem:[#allocation120_spill] sm:$0xff] }
 0x2ce   : > { %v3385_v12 = vmul.f32 %v11367_v52, %v3326_v62  ;;  %v12107_v20 = vmul.f32 %v3326_v62, %v14736_v14  ;;  %v12110_v61 = vmul.f32 %v3326_v62, %v15020_v39  ;;  %v4086_v28 = vadd.f32 %v4072_v17, %v4058_v7  ;;  %v15104_v56 = vld [vmem:[#allocation119_spill] sm:$0xff]  ;;  %3874 = vperm.xlu1 %6894, %v3814_v63   ;;  %v15106_v62 = vld [vmem:[#allocation141_spill] sm:$0xff] }
 0x2cf   : > { %v3286_v48 = vadd.f32 %v15103_v22, %v11841_v49  ;;  %v3285_v38 = vadd.f32 %v15104_v56, %v11844_v16  ;;  %v3288_v35 = vadd.f32 %v15105_v46, %v11876_v6  ;;  %v4085_v54 = vadd.f32 %v4071_v55, %v4057_v26  ;;  %v3336_v47 = vpop.permute.xlu0 %3335  ;;  %v12132_v6 = vld [vmem:[%s7018_s23 + $0xe9] sm:$0xff] }
 0x2d0   : > { %15102 = vst [vmem:[#allocation31_spill] sm:$0xff] %v12110_v61  ;;  %v4074_v9 = vmul.f32 %v3341_v0, %v15012_v11  ;;  %v3287_v32 = vadd.f32 %v15106_v62, %v11892_v44  ;;  %v15107_v61 = vld [vmem:[#allocation122_spill] sm:$0xff]  ;;  %v3388_v49 = vmul.f32 %v11367_v52, %v3341_v0  ;;  %v12127_v7 = vmul.f32 %v3341_v0, %v14736_v14  ;;  %v15109_v26 = vld [vmem:[#allocation153_spill] sm:$0xff]  ;;  %v15113_v62 = vld [vmem:[#allocation112_spill] sm:$0xff] }
 0x2d1   : > { %v12123_v17 = vadd.f32 %v11888_v2, %v15107_v61  ;;  %v4073_v16 = vmul.f32 %v3336_v47, %v15012_v11  ;;  %3869 = vperm.xlu0 %6893, %v11909_v45   ;;  %v12136_v55 = vadd.f32 %v11904_v19, %v15109_v26  ;;  %v12139_v44 = vmul.f32 %v3341_v0, %v15020_v39  ;;  %v3489_v45 = vpop.permute.xlu1 %3488  ;;  %v15114_v26 = vld [vmem:[#allocation12_spill] sm:$0xff] }
 0x2d2   : > { %15108 = vst [vmem:[#allocation57_spill] sm:$0xff] %v12127_v7  ;;  %v3387_v2 = vmul.f32 %v11367_v52, %v3336_v47  ;;  %v12143_v61 = vmul.f32 %v3336_v47, %v14736_v14  ;;  %v12146_v22 = vmul.f32 %v3336_v47, %v15020_v39  ;;  %v4088_v56 = vadd.f32 %v4074_v9, %v4060_v1  ;;  %v15116_v47 = vld [vmem:[#allocation200_spill] sm:$0xff] }
 0x2d3   : > { %15110 = vst [vmem:[#allocation89_spill] sm:$0xff] %v12139_v44  ;;  %v12148_v46 = vadd.f32 %v3384_v60, %v3286_v48  ;;  %v4112_v19 = vadd.f32 %v15113_v62, %v4084_v50  ;;  %v4111_v7 = vadd.f32 %v15114_v26, %v4083_v34  ;;  %v3552_v0 = vmul.f32 %v3489_v45, %v14925_v41  ;;  %v3484_v44 = vpop.permute.xlu0 %3483  ;;  %v12160_v1 = vld [vmem:[%s7018_s23 + $0x2e9] sm:$0xff]  ;;  %v12168_v45 = vld [vmem:[%s7018_s23 + $0x2e1] sm:$0xff] }
 0x2d4   : > { %15111 = vst [vmem:[#allocation66_spill] sm:$0xff] %v12143_v61  ;;  %15112 = vst [vmem:[#allocation34_spill] sm:$0xff] %v12146_v22  ;;  %3548 = vperm.xlu1 %6894, %v12132_v6   ;;  %v12154_v52 = vadd.f32 %v3383_v24, %v3285_v38  ;;  %v15115_v61 = vld [vmem:[#allocation134_spill] sm:$0xff]  ;;  %v4113_v22 = vadd.f32 %v15116_v47, %v4085_v54  ;;  %v4087_v9 = vadd.f32 %v4073_v16, %v4059_v27  ;;  %v15117_v54 = vld [vmem:[#allocation91_spill] sm:$0xff] }
 0x2d5   : > { %v4114_v14 = vadd.f32 %v15115_v61, %v4086_v28  ;;  %v3551_v60 = vmul.f32 %v3484_v44, %v14925_v41  ;;  %3543 = vperm.xlu0 %6893, %v3814_v63   ;;  %v12162_v50 = vadd.f32 %v3386_v51, %v3288_v35  ;;  %v12164_v34 = vadd.f32 %v3385_v12, %v3287_v32  ;;  %v3657_v35 = vpop.permute.xlu1 %3656  ;;  %v15118_v51 = vld [vmem:[#allocation48_spill] sm:$0xff]  ;;  %v15122_v61 = vld [vmem:[#allocation169_spill] sm:$0xff] }
 0x2d6   : > { %v3566_v48 = vadd.f32 %v3552_v0, %v11641_v37  ;;  %v12171_v24 = vadd.f32 %v11389_v43, %v4112_v19  ;;  %v12174_v28 = vadd.f32 %v11403_v5, %v4111_v7  ;;  %v3290_v27 = vadd.f32 %v15117_v54, %v11912_v4  ;;  %v15119_v12 = vld [vmem:[#allocation44_spill] sm:$0xff]  ;;  %v15123_v26 = vld [vmem:[#allocation233_spill] sm:$0xff] }
 0x2d7   : > { %v3565_v63 = vadd.f32 %v3551_v60, %v11653_v59  ;;  %v12180_v32 = vadd.f32 %v11423_v3, %v4114_v14  ;;  %v12183_v37 = vadd.f32 %v11445_v18, %v4113_v22  ;;  %v3289_v43 = vadd.f32 %v15118_v51, %v11928_v25  ;;  %v3652_v7 = vpop.permute.xlu0 %3651  ;;  %v15120_v59 = vld [vmem:[#allocation232_spill] sm:$0xff]  ;;  %v15121_v14 = vld [vmem:[#allocation51_spill] sm:$0xff] }
 0x2d8   : > { %v3594_v5 = vadd.f32 %v15119_v12, %v3566_v48  ;;  %v4322_v38 = vmul.f32 %v3657_v35, %v14925_v41  ;;  %3716 = vperm.xlu1 %6894, %v12160_v1   ;;  %v12190_v4 = vadd.f32 %v3388_v49, %v3290_v27  ;;  %v4116_v16 = vadd.f32 %v15120_v59, %v4088_v56  ;;  %v4164_v44 = vld [vmem:[%s7018_s23 + $0x261] sm:$0xff]  ;;  %v4163_v56 = vld [vmem:[%s7018_s23 + $0x259] sm:$0xff]  ;;  %v3312_v12 = vld [vmem:[%s7018_s23 + $0x71] sm:$0xff] }
 0x2d9   : > { %v3593_v3 = vadd.f32 %v15121_v14, %v3565_v63  ;;  %v4321_v18 = vmul.f32 %v3652_v7, %v14925_v41  ;;  %3711 = vperm.xlu0 %6893, %v12168_v45   ;;  %v12197_v25 = vadd.f32 %v3387_v2, %v3289_v43  ;;  %v12201_v22 = vadd.f32 %v11924_v58, %v15122_v61  ;;  %v3499_v48 = vpop.permute.xlu1 %3498  ;;  %v15124_v54 = vld [vmem:[#allocation180_spill] sm:$0xff]  ;;  %v15125_v27 = vld [vmem:[#allocation71_spill] sm:$0xff]  ;;  %v15130_v14 = vld [vmem:[#allocation98_spill] sm:$0xff] }
 0x2da   : > { %v3622_v62 = vadd.f32 %v11818_v53, %v3594_v5  ;;  %v3720_v49 = vmul.f32 %v3657_v35, %v15012_v11  ;;  %v4336_v19 = vadd.f32 %v4322_v38, %v11838_v13  ;;  %v4115_v0 = vadd.f32 %v15123_v26, %v4087_v9  ;;  %v15126_v51 = vld [vmem:[#allocation116_spill] sm:$0xff]  ;;  %v15127_v5 = vld [vmem:[#allocation107_spill] sm:$0xff] }
 0x2db   : > { %v3621_v47 = vadd.f32 %v11822_v29, %v3593_v3  ;;  %v3719_v60 = vmul.f32 %v3652_v7, %v15012_v11  ;;  %v4335_v2 = vadd.f32 %v4321_v18, %v12085_v10  ;;  %v12213_v58 = vadd.f32 %v11941_v30, %v15124_v54  ;;  %v3494_v35 = vpop.permute.xlu0 %3493  ;;  %v15128_v30 = vld [vmem:[#allocation207_spill] sm:$0xff]  ;;  %v3311_v18 = vld [vmem:[%s7018_s23 + $0x69] sm:$0xff] }
 0x2dc   : > { %v3734_v53 = vadd.f32 %v3720_v49, %v3622_v62  ;;  %v4364_v63 = vadd.f32 %v15125_v27, %v4336_v19  ;;  %v3554_v13 = vmul.f32 %v3499_v48, %v14925_v41  ;;  %4224 = vperm.xlu1 %6894, %v4164_v44   ;;  %v12218_v9 = vadd.f32 %v11466_v42, %v4116_v16  ;;  %v15129_v7 = vld [vmem:[#allocation103_spill] sm:$0xff]  ;;  %v15131_v44 = vld [vmem:[#allocation150_spill] sm:$0xff]  ;;  %v15133_v16 = vld [vmem:[#allocation208_spill] sm:$0xff] }
 0x2dd   : > { %v3733_v29 = vadd.f32 %v3719_v60, %v3621_v47  ;;  %v4363_v43 = vadd.f32 %v15126_v51, %v4335_v2  ;;  %v3553_v10 = vmul.f32 %v3494_v35, %v14925_v41  ;;  %4219 = vperm.xlu0 %6893, %v4163_v56   ;;  %v12225_v38 = vadd.f32 %v15128_v30, %v15127_v5  ;;  %v15132_v42 = vld [vmem:[#allocation55_spill] sm:$0xff]  ;;  %v15135_v56 = vld [vmem:[#allocation29_spill] sm:$0xff]  ;;  %v3667_v47 = vpop.permute.xlu1 %3666  ;;  %v15136_v60 = vld [vmem:[#allocation102_spill] sm:$0xff] }
 0x2de   : > { %v3762_v59 = vadd.f32 %v15129_v7, %v3734_v53  ;;  %v3568_v3 = vadd.f32 %v3554_v13, %v15130_v14  ;;  %v12231_v61 = vadd.f32 %v15131_v44, %v4115_v0  ;;  %v12235_v62 = vadd.f32 %v15133_v16, %v15132_v42  ;;  %v15134_v49 = vld [vmem:[#allocation115_spill] sm:$0xff]  ;;  %v15137_v2 = vld [vmem:[#allocation209_spill] sm:$0xff]  ;;  %v15138_v54 = vld [vmem:[#allocation76_spill] sm:$0xff] }
 0x2df   : > { %v3761_v19 = vadd.f32 %v15134_v49, %v3733_v29  ;;  %v3567_v26 = vadd.f32 %v3553_v10, %v15135_v56  ;;  %v12241_v48 = vadd.f32 %v15137_v2, %v15136_v60  ;;  %v15139_v53 = vld [vmem:[#allocation210_spill] sm:$0xff]  ;;  %v4324_v35 = vmul.f32 %v3667_v47, %v14925_v41  ;;  %v3662_v51 = vpop.permute.xlu0 %3661  ;;  %v15141_v29 = vld [vmem:[#allocation213_spill] sm:$0xff]  ;;  %v15144_v16 = vld [vmem:[#allocation215_spill] sm:$0xff] }
 0x2e0   : > { %v12245_v27 = vadd.f32 %v15139_v53, %v15138_v54  ;;  %v15140_v13 = vld [vmem:[#allocation106_spill] sm:$0xff]  ;;  %3380 = vperm.xlu1 %6894, %v3312_v12   ;;  %v4392_v5 = vadd.f32 %v12065_v15, %v4364_v63  ;;  %v15142_v30 = vld [vmem:[#allocation97_spill] sm:$0xff]  ;;  %v4323_v44 = vmul.f32 %v3662_v51, %v14925_v41  ;;  %v4391_v42 = vadd.f32 %v12072_v31, %v4363_v43  ;;  %v15146_v56 = vld [vmem:[#allocation16_spill] sm:$0xff] }
 0x2e1   : > { %v3596_v0 = vadd.f32 %v15140_v13, %v3568_v3  ;;  %v12252_v10 = vadd.f32 %v15142_v30, %v15141_v29  ;;  %v15143_v7 = vld [vmem:[#allocation117_spill] sm:$0xff]  ;;  %3375 = vperm.xlu0 %6893, %v3311_v18   ;;  %v3722_v12 = vmul.f32 %v3667_v47, %v15012_v11  ;;  %v4338_v15 = vadd.f32 %v4324_v35, %v12089_v8  ;;  %v15147_v2 = vld [vmem:[#allocation40_spill] sm:$0xff]  ;;  %v3825_v31 = vpop.permute.xlu1 %3824  ;;  %v15148_v13 = vld [vmem:[#allocation79_spill] sm:$0xff] }
 0x2e2   : > { %v3595_v14 = vadd.f32 %v15143_v7, %v3567_v26  ;;  %v15145_v49 = vld [vmem:[#allocation21_spill] sm:$0xff]  ;;  %v3790_v63 = vadd.f32 %v12059_v36, %v3762_v59  ;;  %v3721_v26 = vmul.f32 %v3662_v51, %v15012_v11  ;;  %v4337_v18 = vadd.f32 %v4323_v44, %v12100_v23  ;;  %v12273_v47 = vld [vmem:[%s13866_s1 + $0x8] ss:$0 sm:$0xff] }
 0x2e3   : > { %v12259_v3 = vadd.f32 %v15145_v49, %v15144_v16  ;;  %v3624_v60 = vadd.f32 %v15146_v56, %v3596_v0  ;;  %v3789_v43 = vadd.f32 %v12069_v40, %v3761_v19  ;;  %v4366_v29 = vadd.f32 %v15148_v13, %v4338_v15  ;;  %v3820_v59 = vpop.permute.xlu0 %3819  ;;  %v15149_v19 = vld [vmem:[#allocation77_spill] sm:$0xff]  ;;  %v15150_v51 = vld [vmem:[#allocation80_spill] sm:$0xff]  ;;  %v15154_v56 = vld [vmem:[#allocation218_spill] sm:$0xff] }
 0x2e4   : > { %v3623_v54 = vadd.f32 %v15147_v2, %v3595_v14  ;;  %v3888_v36 = vmul.f32 %v12273_v47, %v3825_v31  ;;  %v4406_v8 = vmul.f32 %v3825_v31, %v15012_v11  ;;  %4560 = vperm.xlu1 %6894, %v12168_v45   ;;  %v3887_v23 = vmul.f32 %v12273_v47, %v3820_v59  ;;  %v3816_v35 = vld [vmem:[%s7018_s23 + $0xf1] sm:$0xff] }
 0x2e5   : > { %v3736_v53 = vadd.f32 %v3722_v12, %v3624_v60  ;;  %v4405_v40 = vmul.f32 %v3820_v59, %v15012_v11  ;;  %4555 = vperm.xlu0 %6893, %v15149_v19   ;;  %v15151_v30 = vld [vmem:[#allocation217_spill] sm:$0xff]  ;;  %v15152_v14 = vld [vmem:[#allocation118_spill] sm:$0xff]  ;;  %v12290_v60 = vadd.f32 %v15154_v56, %v12024_v57  ;;  %v15157_v12 = vld [vmem:[#allocation4_spill] sm:$0xff]  ;;  %v3835_v19 = vpop.permute.xlu1 %3834 }
 0x2e6   : > { %v3735_v0 = vadd.f32 %v3721_v26, %v3623_v54  ;;  %v12284_v7 = vadd.f32 %v15151_v30, %v15150_v51  ;;  %v15153_v16 = vld [vmem:[#allocation81_spill] sm:$0xff]  ;;  %v15158_v15 = vmax.f32 %v15157_v12, 0.0  ;;  %v15159_v54 = vld [vmem:[#allocation203_spill] sm:$0xff]  ;;  %v12296_v31 = vadd.f32 %v3888_v36, %v3790_v63 }
 0x2e7   : > { %v3764_v44 = vadd.f32 %v15152_v14, %v3736_v53  ;;  %v4365_v49 = vadd.f32 %v15153_v16, %v4337_v18  ;;  %15155 = vst [vmem:[#allocation78_spill] sm:$0xff] %v12290_v60  ;;  %v15156_v45 = vld [vmem:[#allocation109_spill] sm:$0xff]  ;;  %v4420_v13 = vadd.f32 %v4406_v8, %v4392_v5  ;;  %v12298_v59 = vadd.f32 %v3887_v23, %v3789_v43  ;;  %v3830_v30 = vpop.permute.xlu0 %3829  ;;  %v15161_v23 = vld [vmem:[#allocation50_spill] sm:$0xff] }
 0x2e8   : > { %v4669_v2 = vmul.f32 %v15158_v15, %v15156_v45  ;;  %v3763_v26 = vadd.f32 %v15159_v54, %v3735_v0  ;;  %v4394_v53 = vadd.f32 %v12103_v21, %v4366_v29  ;;  %v3890_v57 = vmul.f32 %v12273_v47, %v3835_v19  ;;  %3884 = vperm.xlu1 %6894, %v3816_v35   ;;  %v4166_v43 = vld [vmem:[%s7018_s23 + $0x271] sm:$0xff]  ;;  %v15160_v21 = vld [vmem:[#allocation31_spill] sm:$0xff]  ;;  %v4165_v8 = vld [vmem:[%s7018_s23 + $0x269] sm:$0xff] }
 0x2e9   : > { %v3792_v18 = vadd.f32 %v12093_v33, %v3764_v44  ;;  %v4408_v51 = vmul.f32 %v3835_v19, %v15012_v11  ;;  %v4419_v14 = vadd.f32 %v4405_v40, %v4391_v42  ;;  %v3889_v63 = vmul.f32 %v12273_v47, %v3830_v30  ;;  %3879 = vperm.xlu0 %6893, %v12132_v6   ;;  %v15162_v44 = vld [vmem:[#allocation199_spill] sm:$0xff]  ;;  %v3509_v16 = vpop.permute.xlu1 %3508  ;;  %v15164_v54 = vld [vmem:[#allocation129_spill] sm:$0xff] }
 0x2ea   : > { %v3791_v0 = vadd.f32 %v12107_v20, %v3763_v26  ;;  %v4407_v5 = vmul.f32 %v3830_v30, %v15012_v11  ;;  %v4393_v29 = vadd.f32 %v15160_v21, %v4365_v49  ;;  %v12315_v35 = vadd.f32 %v15162_v44, %v15161_v23  ;;  %v6902_v20 = vld [vmem:[%s13868_s3 + $0x88] sm:$0xff]   ;;  %v15167_v30 = vld [vmem:[#allocation219_spill] sm:$0xff]  ;;  %v15172_v44 = vld [vmem:[#allocation45_spill] sm:$0xff] }
 0x2eb   : > { %v12309_v36 = vadd.f32 %v3890_v57, %v3792_v18  ;;  %v4422_v33 = vadd.f32 %v4408_v51, %v4394_v53  ;;  %v6640_v49 = vpack.c.bf16 %v4669_v2, %v4669_v2  ;;  %v3556_v12 = vmul.f32 %v3509_v16, %v14925_v41  ;;  %v3504_v15 = vpop.permute.xlu0 %3503  ;;  %v4502_v18 = vld [vmem:[%s7018_s23 + $0x2f1] sm:$0xff] }
 0x2ec   : > { %15163 = vst [vmem:[#allocation28_spill] sm:$0xff] %v12315_v35  ;;  %v12324_v40 = vadd.f32 %v3889_v63, %v3791_v0  ;;  %v4421_v56 = vadd.f32 %v4407_v5, %v4393_v29  ;;  %4234 = vperm.xlu1 %6894, %v4166_v43   ;;  %v12328_v26 = vadd.f32 %v15164_v54, %v4420_v13  ;;  %v15165_v53 = vld [vmem:[#allocation142_spill] sm:$0xff]  ;;  %v15166_v51 = vld [vmem:[#allocation13_spill] sm:$0xff]  ;;  %v14057_v0 = vmov 0.0   ;;  %v15171_v29 = vld [vmem:[#allocation68_spill] sm:$0xff] }
 0x2ed   : > { %v3555_v19 = vmul.f32 %v3504_v15, %v14925_v41  ;;  %4229 = vperm.xlu0 %6893, %v4165_v8   ;;  %v12333_v57 = vadd.f32 %v15165_v53, %v4419_v14  ;;  %4816 = vst.msk [vmem:[#allocation3 + $0x1c] sm:$0xf] %vm4719_vm0, %v6640_v49  ;;  %v12338_v2 = vadd.f32 %v15167_v30, %v15166_v51  ;;  %v15170_v43 = vld [vmem:[#allocation49_spill] sm:$0xff]  ;;  %v6903_v14 = vld [vmem:[%s13868_s3 + $0x80] sm:$0xff]   ;;  %v3677_v49 = vpop.permute.xlu1 %3676  ;;  %v15177_v53 = vld [vmem:[#allocation194_spill] sm:$0xff] }
 0x2ee   : > { %6809 = vmatprep.subr.bf16.mxu1 %v14057_v0  ;;  %v3570_v21 = vadd.f32 %v3556_v12, %v15170_v43  ;;  %v12346_v8 = vadd.f32 %v15171_v29, %v4422_v33  ;;  %6813 = vmatprep.mubr.msk.bf16.mxu1 %vm6968_vm12, %v14057_v0  ;;  %v15173_v12 = vld [vmem:[#allocation240_spill] sm:$0xff]  ;;  %v15174_v33 = vld [vmem:[#allocation126_spill] sm:$0xff]  ;;  %v15176_v54 = vld [vmem:[#allocation243_spill] sm:$0xff]  ;;  %v15178_v51 = vmax.f32 %v15177_v53, 0.0  ;;  %v4326_v5 = vmul.f32 %v3677_v49, %v14925_v41 }
 0x2ef   : > { %15168 = vst [vmem:[#allocation127_spill] sm:$0xff] %v12338_v2  ;;  %6810 = vmatpush3.bf16.msra.mxu1 %v6902_v20  ;;  %v3569_v16 = vadd.f32 %v3555_v19, %v15172_v44  ;;  %v15175_v15 = vmax.f32 %v15174_v33, 0.0  ;;  %v15179_v43 = vld [vmem:[#allocation84_spill] sm:$0xff]  ;;  %v3672_v13 = vpop.permute.xlu0 %3671  ;;  %v15180_v23 = vld [vmem:[#allocation154_spill] sm:$0xff]  ;;  %v15182_v44 = vld [vmem:[#allocation111_spill] sm:$0xff] }
 0x2f0   : > { %6811 = vmatprep.subr.bf16.mxu1 %v14057_v0  ;;  %v4671_v30 = vmul.f32 %v15178_v51, %v15176_v54  ;;  %v3598_v29 = vadd.f32 %v15179_v43, %v3570_v21  ;;  %4570 = vperm.xlu1 %6894, %v4502_v18   ;;  %v4449_v6 = vadd.f32 %v15180_v23, %v4421_v56  ;;  %v15181_v19 = vld [vmem:[#allocation42_spill] sm:$0xff]  ;;  %v15185_v53 = vld [vmem:[#allocation88_spill] sm:$0xff]  ;;  %v15186_v51 = vld [vmem:[#allocation7_spill] sm:$0xff] }
 0x2f1   : > { %v4672_v20 = vmul.f32 %v15175_v15, %v15173_v12  ;;  %v12368_v42 = vadd.f32 %v15182_v44, %v15181_v19  ;;  %v5052_v0 = vld [vmem:[#allocation3 + $0x14] sm:$0xf]  ;;  %v4325_v15 = vmul.f32 %v3672_v13, %v14925_v41  ;;  %4565 = vperm.xlu0 %6893, %v12160_v1   ;;  %v12375_v21 = vadd.f32 %v15186_v51, %v15185_v53  ;;  %v15188_v54 = vld [vmem:[#allocation104_spill] sm:$0xff]  ;;  %v5051_v19 = vld [vmem:[#allocation3 + $0x10] sm:$0xf]  ;;  %v4175_v45 = vpop.permute.xlu1 %4174 }
 0x2f2   : > { %v15184_v63 = vld [vmem:[#allocation86_spill] sm:$0xff]  ;;  %v3626_v18 = vadd.f32 %v15188_v54, %v3598_v29  ;;  %v3724_v56 = vmul.f32 %v3677_v49, %v15012_v11  ;;  %v4340_v23 = vadd.f32 %v4326_v5, %v12123_v17  ;;  %v6642_v44 = vpack.c.bf16 %v4671_v30, %v4671_v30  ;;  %v15189_v12 = vld [vmem:[#allocation47_spill] sm:$0xff]  ;;  %v15192_v17 = vld [vmem:[#allocation52_spill] sm:$0xff] }
 0x2f3   : > { %15183 = vst [vmem:[#allocation132_spill] sm:$0xff] %v12368_v42  ;;  %v3597_v33 = vadd.f32 %v15184_v63, %v3569_v16  ;;  %15187 = vst [vmem:[#allocation131_spill] sm:$0xff] %v12375_v21  ;;  %v6643_v43 = vpack.c.bf16 %v4672_v20, %v4672_v20  ;;  %6812 = vmatpush3.bf16.msra.mxu1 %v6903_v14  ;;  %v3723_v16 = vmul.f32 %v3672_v13, %v15012_v11  ;;  %v15191_v54 = vld [vmem:[#allocation123_spill] sm:$0xff]  ;;  %v4170_v14 = vpop.permute.xlu0 %4169 }
 0x2f4   : > { %v4339_v1 = vadd.f32 %v4325_v15, %v12136_v55  ;;  %v12383_v42 = vcombine.low %v5051_v19, %v5052_v0  ;;  %v3738_v20 = vadd.f32 %v3724_v56, %v3626_v18  ;;  %v4368_v29 = vadd.f32 %v15191_v54, %v4340_v23  ;;  %4818 = vst.msk [vmem:[#allocation3 + $0x24] sm:$0xf] %vm4719_vm0, %v6642_v44  ;;  %v15194_v13 = vld [vmem:[#allocation27_spill] sm:$0xff]  ;;  %v15195_v15 = vld [vmem:[#allocation121_spill] sm:$0xff] }
 0x2f5   : > { %v3625_v63 = vadd.f32 %v15189_v12, %v3597_v33  ;;  %4819 = vst.msk [vmem:[#allocation3 + $0x28] sm:$0xf] %vm4719_vm0, %v6643_v43  ;;  %v4238_v49 = vmul.f32 %v12273_v47, %v4175_v45  ;;  %v4462_v5 = vmul.f32 %v4175_v45, %v15192_v17  ;;  %v15193_v12 = vld [vmem:[#allocation53_spill] sm:$0xff]  ;;  %v4237_v30 = vmul.f32 %v12273_v47, %v4170_v14  ;;  %v15196_v51 = vld [vmem:[#allocation59_spill] sm:$0xff]  ;;  %v15197_v43 = vld [vmem:[#allocation224_spill] sm:$0xff] }
 0x2f6   : > { %15190 = vst [vmem:[#allocation144_spill] sm:$0xff] %v12383_v42  ;;  %5141 = vrot.lane.b32.xlu1 %v15193_v12, %s6969_s15  ;;  %v4367_v0 = vadd.f32 %v15194_v13, %v4339_v1  ;;  %v4461_v33 = vmul.f32 %v4170_v14, %v15192_v17  ;;  %v3766_v53 = vadd.f32 %v15195_v15, %v3738_v20  ;;  %v15199_v45 = vld [vmem:[#allocation114_spill] sm:$0xff]  ;;  %v15200_v56 = vld [vmem:[#allocation225_spill] sm:$0xff]  ;;  %v15203_v54 = vld [vmem:[#allocation63_spill] sm:$0xff]  ;;  %v4185_v14 = vpop.permute.xlu1 %4184  ;;  %v15229_v42 = vmov 1.0  }
 0x2f7   : > { %v3737_v55 = vadd.f32 %v3723_v16, %v3625_v63  ;;  %v12398_v18 = vadd.f32 %v15197_v43, %v15196_v51  ;;  %v12402_v23 = vadd.f32 %v15200_v56, %v15199_v45  ;;  %v15202_v19 = vld [vmem:[#allocation25_spill] sm:$0xff]  ;;  %v4252_v1 = vadd.f32 %v4238_v49, %v12171_v24  ;;  %v4180_v45 = vpop.permute.xlu0 %4179  ;;  %v15207_v49 = vld [vmem:[#allocation34_spill] sm:$0xff] }
 0x2f8   : > { %v4306_v44 = vmul.f32 %v15203_v54, %v15202_v19  ;;  %v15204_v63 = vld [vmem:[#allocation149_spill] sm:$0xff]  ;;  %v4476_v13 = vadd.f32 %v4462_v5, %v12328_v26  ;;  %v12411_v20 = vmul.f32 %v15203_v54, %v15020_v39  ;;  %v4251_v15 = vadd.f32 %v4237_v30, %v12174_v28  ;;  %v15209_v28 = vld [vmem:[#allocation66_spill] sm:$0xff] }
 0x2f9   : > { %15198 = vst [vmem:[#allocation58_spill] sm:$0xff] %v12398_v18  ;;  %15201 = vst [vmem:[#allocation143_spill] sm:$0xff] %v12402_v23  ;;  %v3765_v16 = vadd.f32 %v15204_v63, %v3737_v55  ;;  %v4240_v51 = vmul.f32 %v12273_v47, %v4185_v14  ;;  %v4464_v43 = vmul.f32 %v4185_v14, %v15192_v17  ;;  %v15206_v56 = vld [vmem:[#allocation89_spill] sm:$0xff]  ;;  %v15210_v14 = vld [vmem:[#allocation30_spill] sm:$0xff] }
 0x2fa   : > { %15205 = vst [vmem:[#allocation146_spill] sm:$0xff] %v12411_v20  ;;  %v12417_v12 = vadd.f32 %v15206_v56, %v4368_v29  ;;  %v4475_v55 = vadd.f32 %v4461_v33, %v12333_v57  ;;  %v4239_v24 = vmul.f32 %v12273_v47, %v4180_v45  ;;  %v4463_v26 = vmul.f32 %v4180_v45, %v15192_v17  ;;  %v15208_v54 = vld [vmem:[#allocation57_spill] sm:$0xff]  ;;  %v15212_v29 = vld [vmem:[#allocation67_spill] sm:$0xff]  ;;  %v4511_v45 = vpop.permute.xlu1 %4510 }
 0x2fb   : > { %v12423_v5 = vadd.f32 %v15207_v49, %v4367_v0  ;;  %v12426_v63 = vadd.f32 %v15208_v54, %v3766_v53  ;;  %v12429_v30 = vadd.f32 %v15209_v28, %v3765_v16  ;;  %v12432_v20 = vadd.f32 %v4306_v44, %v15210_v14  ;;  %v15214_v53 = vld [vmem:[#allocation54_spill] sm:$0xff]  ;;  %v4506_v14 = vpop.permute.xlu0 %4505  ;;  %v15223_v18 = vld [vmem:[#allocation201_spill] sm:$0xff] }
 0x2fc   : > { %v12436_v56 = vmul.f32 %v15212_v29, %v15020_v39  ;;  %v4254_v57 = vadd.f32 %v4240_v51, %v12180_v32  ;;  %v4478_v33 = vadd.f32 %v4464_v43, %v12346_v8  ;;  %v4305_v0 = vmul.f32 %v15212_v29, %v15202_v19  ;;  %v15215_v49 = vld [vmem:[#allocation14_spill] sm:$0xff]  ;;  %v15220_v8 = vld [vmem:[#allocation35_spill] sm:$0xff]  ;;  %v15221_v51 = vld [vmem:[#allocation8_spill] sm:$0xff] }
 0x2fd   : > { %15211 = vst [vmem:[#allocation133_spill] sm:$0xff] %v12432_v20  ;;  %v12444_v54 = vadd.f32 %v15215_v49, %v15214_v53  ;;  %v4253_v16 = vadd.f32 %v4239_v24, %v12183_v37  ;;  %v4477_v44 = vadd.f32 %v4463_v26, %v4449_v6  ;;  %v4574_v28 = vmul.f32 %v12273_v47, %v4511_v45  ;;  %v15217_v20 = vld [vmem:[#allocation82_spill] sm:$0xff]  ;;  %v5054_v19 = vld [vmem:[#allocation3 + $0x1c] sm:$0xf] }
 0x2fe   : > { %15213 = vst [vmem:[#allocation148_spill] sm:$0xff] %v12436_v56  ;;  %v15218_v56 = vld [vmem:[#allocation15_spill] sm:$0xff]  ;;  %v4573_v32 = vmul.f32 %v12273_v47, %v4506_v14  ;;  %v4040_v43 = vadd.f32 %v15221_v51, %v15220_v8  ;;  %v15222_v29 = vld [vmem:[#allocation94_spill] sm:$0xff]  ;;  %v15224_v53 = vmax.f32 %v15223_v18, 0.0  ;;  %v4521_v8 = vpop.permute.xlu1 %4520  ;;  %v15233_v18 = vld [vmem:[#allocation136_spill] sm:$0xff] }
 0x2ff   : > { %15216 = vst [vmem:[#allocation135_spill] sm:$0xff] %v12444_v54  ;;  %v12450_v23 = vadd.f32 %v15218_v56, %v15217_v20  ;;  %v15225_v54 = vld [vmem:[#allocation145_spill] sm:$0xff]  ;;  %v4588_v6 = vadd.f32 %v4574_v28, %v4476_v13  ;;  %v15227_v24 = vld [vmem:[#allocation87_spill] sm:$0xff]  ;;  %v15228_v26 = vld [vmem:[#allocation202_spill] sm:$0xff] }
 0x300   : > { %v4674_v49 = vmul.f32 %v15224_v53, %v15222_v29  ;;  %v15226_v37 = vand.u32 7, %v15225_v54  ;;  %v4039_v45 = vadd.f32 %v15228_v26, %v15227_v24  ;;  %v15231_v56 = vld [vmem:[#allocation70_spill] sm:$0xff]  ;;  %v4587_v21 = vadd.f32 %v4573_v32, %v4475_v55  ;;  %v15235_v54 = vld [vmem:[#allocation128_spill] sm:$0xff]  ;;  %v4516_v26 = vpop.permute.xlu0 %4515 }
 0x301   : > { %15219 = vst [vmem:[#allocation186_spill] sm:$0xff] %v12450_v23  ;;  %v15232_v14 = vld [vmem:[#allocation18_spill] sm:$0xff]  ;;  %v15234_v53 = vmax.f32 %v15233_v18, 0.0  ;;  %v4602_v28 = vmax.f32 %v4252_v1, %v4588_v6  ;;  %v4576_v24 = vmul.f32 %v12273_v47, %v4521_v8  ;;  %v4575_v32 = vmul.f32 %v12273_v47, %v4516_v26  ;;  %v15242_v18 = vld [vmem:[#allocation108_spill] sm:$0xff] }
 0x302   : > { %vm459_vm13 = vcmp.eq.s32.totalorder %v15226_v37, 7  ;;  %v3270_v23 = vadd.f32 %v15232_v14, %v15231_v56  ;;  %v5053_v51 = vld [vmem:[#allocation3 + $0x18] sm:$0xf]  ;;  %v6645_v2 = vpack.c.bf16 %v4674_v49, %v4674_v49  ;;  %v15236_v37 = vld [vmem:[#allocation204_spill] sm:$0xff]  ;;  %v4601_v55 = vmax.f32 %v4251_v15, %v4587_v21 }
 0x303   : > { %v12463_v20 = vsel %vm459_vm13, 0.0, %v15229_v42  ;;  %v3269_v13 = vadd.f32 %v15236_v37, %v15235_v54  ;;  %v15237_v42 = vld [vmem:[#allocation228_spill] sm:$0xff]  ;;  %v12476_v35 = vcombine.low %v5053_v51, %v5054_v19  ;;  %v15239_v49 = vld [vmem:[#allocation74_spill] sm:$0xff]  ;;  %v15241_v1 = vmax.f32 %v12148_v46, %v12296_v31  ;;  %v3845_v19 = vpop.permute.xlu1 %3844  ;;  %v15249_v46 = vld [vmem:[#allocation231_spill] sm:$0xff] }
 0x304   : > { %15230 = vst [vmem:[#allocation151_spill] sm:$0xff] %v12463_v20  ;;  %v4673_v29 = vmul.f32 %v15234_v53, %v12463_v20  ;;  %v12474_v60 = vadd.f32 %v4305_v0, %v15237_v42  ;;  %v12480_v56 = vadd.f32 %v15239_v49, %v4040_v43  ;;  %4821 = vst.msk [vmem:[#allocation3 + $0x30] sm:$0xf] %vm4719_vm0, %v6645_v2  ;;  %v15244_v42 = vld [vmem:[#allocation17_spill] sm:$0xff]  ;;  %v15247_v2 = vld [vmem:[#allocation20_spill] sm:$0xff]  ;;  %v3840_v51 = vpop.permute.xlu0 %3839 }
 0x305   : > { %15238 = vst [vmem:[#allocation152_spill] sm:$0xff] %v12476_v35  ;;  %v4616_v6 = vmax.f32 %v15241_v1, %v4602_v28  ;;  %v4590_v8 = vadd.f32 %v4576_v24, %v4478_v33  ;;  %v12487_v53 = vadd.f32 %v15242_v18, %v4039_v45  ;;  %v12490_v0 = vadd.s32 104, %v15244_v42  ;;  %v12505_v33 = vld [vmem:[%s13867_s2] ss:$0 sm:$0xff] }
 0x306   : > { %15240 = vst [vmem:[#allocation147_spill] sm:$0xff] %v12480_v56  ;;  %v6644_v14 = vpack.c.bf16 %v4673_v29, %v4673_v29  ;;  %v15246_v21 = vmax.f32 %v12154_v52, %v12298_v59  ;;  %v4589_v43 = vadd.f32 %v4575_v32, %v4477_v44  ;;  %v12497_v29 = vadd.f32 %v15247_v2, %v3270_v23 }
 0x307   : > { %15243 = vst [vmem:[#allocation155_spill] sm:$0xff] %v12487_v53  ;;  %15245 = vst [vmem:[#allocation158_spill] sm:$0xff] %v12490_v0  ;;  %v12500_v31 = vadd.f32 %v15249_v46, %v3269_v13  ;;  %v4678_v45 = vadd.f32 %v12505_v33, %v4616_v6  ;;  %v4604_v52 = vmax.f32 %v4254_v57, %v4590_v8  ;;  %v3519_v1 = vpop.permute.xlu1 %3518  ;;  %v12527_v6 = vadd.s32 96, %v15244_v42  ;;  %v15254_v8 = vld [vmem:[#allocation65_spill] sm:$0xff] }
 0x308   : > { %v4615_v15 = vmax.f32 %v15246_v21, %v4601_v55  ;;  %4820 = vst.msk [vmem:[#allocation3 + $0x2c] sm:$0xf] %vm4719_vm0, %v6644_v14  ;;  %15248 = vst [vmem:[#allocation156_spill] sm:$0xff] %v12497_v29  ;;  %v3892_v59 = vmul.f32 %v12273_v47, %v3845_v19  ;;  %v4410_v44 = vmul.f32 %v3845_v19, %v15012_v11  ;;  %v3514_v21 = vpop.permute.xlu0 %3513  ;;  %v15256_v46 = vld [vmem:[#allocation61_spill] sm:$0xff] }
 0x309   : > { %15250 = vst [vmem:[#allocation162_spill] sm:$0xff] %v12500_v31  ;;  %v4603_v54 = vmax.f32 %v4253_v16, %v4589_v43  ;;  %v3891_v37 = vmul.f32 %v12273_v47, %v3840_v51  ;;  %v4409_v13 = vmul.f32 %v3840_v51, %v15012_v11  ;;  %v4692_v28 = vmax.f32 %v4678_v45, 0.0  ;;  %15253 = vst [vmem:[#allocation163_spill] sm:$0xff] %v12527_v6 }
 0x30a   : > { %v4677_v23 = vadd.f32 %v12505_v33, %v4615_v15  ;;  %v15251_v24 = vmax.f32 %v12162_v50, %v12309_v36  ;;  %v12517_v57 = vadd.f32 %v3892_v59, %v12426_v63  ;;  %v15252_v49 = vmax.f32 %v12164_v34, %v12324_v40  ;;  %v15255_v15 = vld [vmem:[#allocation110_spill] sm:$0xff] }
 0x30b   : > { %v12524_v16 = vadd.f32 %v3891_v37, %v12429_v30  ;;  %v4706_v50 = vmul.f32 %v4692_v28, %v15254_v8  ;;  %v4424_v63 = vadd.f32 %v4410_v44, %v12417_v12  ;;  %v3558_v18 = vmul.f32 %v3519_v1, %v14925_v41  ;;  %v15257_v44 = vld [vmem:[#allocation64_spill] sm:$0xff] }
 0x30c   : > { %v4618_v26 = vmax.f32 %v15251_v24, %v4604_v52  ;;  %v4691_v32 = vmax.f32 %v4677_v23, 0.0  ;;  %v4617_v14 = vmax.f32 %v15252_v49, %v4603_v54  ;;  %v12536_v40 = vadd.f32 %v4409_v13, %v12423_v5  ;;  %v3687_v23 = vpop.permute.xlu1 %3686  ;;  %v15258_v5 = vld [vmem:[#allocation5_spill] sm:$0xff]  ;;  %v15259_v13 = vld [vmem:[#allocation22_spill] sm:$0xff]  ;;  %v3682_v24 = vpop.permute.xlu0 %3681 }
 0x30d   : > { %v3557_v30 = vmul.f32 %v3514_v21, %v14925_v41  ;;  %v6649_v42 = vpack.c.bf16 %v4706_v50, %v4706_v50  ;;  %v3572_v45 = vadd.f32 %v3558_v18, %v15256_v46  ;;  %v6910_v49 = vld [vmem:[%s13868_s3 + $0x78] sm:$0xff]   ;;  %v15261_v50 = vld [vmem:[#allocation36_spill] sm:$0xff]  ;;  %v15262_v18 = vld [vmem:[#allocation159_spill] sm:$0xff]  ;;  %v3725_v59 = vmul.f32 %v3682_v24, %v15012_v11 }
 0x30e   : > { %v4680_v36 = vadd.f32 %v12505_v33, %v4618_v26  ;;  %v4705_v43 = vmul.f32 %v4691_v32, %v15255_v15  ;;  %v4679_v34 = vadd.f32 %v12505_v33, %v4617_v14  ;;  %v15260_v26 = vld [vmem:[#allocation90_spill] sm:$0xff]  ;;  %6675 = vmatprep.subr.bf16.mxu0 %v6910_v49  ;;  %6742 = vmatprep.subr.bf16.mxu1 %v6910_v49 }
 0x30f   : > { %v3571_v51 = vadd.f32 %v3557_v30, %v15257_v44  ;;  %v4878_v54 = vshrl.u32 %v6649_v42, 16  ;;  %v3600_v28 = vadd.f32 %v15259_v13, %v3572_v45  ;;  %v12548_v32 = vadd.f32 %v15260_v26, %v4424_v63  ;;  %v12556_v14 = vld [vmem:[%s13868_s3 + $0x38] sm:$0xff]   ;;  %v15263_v63 = vld [vmem:[#allocation92_spill] sm:$0xff] }
 0x310   : > { %v4694_v19 = vmax.f32 %v4680_v36, 0.0  ;;  %v6648_v12 = vpack.c.bf16 %v4705_v43, %v4705_v43  ;;  %v4693_v52 = vmax.f32 %v4679_v34, 0.0  ;;  %v4881_v1 = vshll.u32 %v6649_v42, 16  ;;  %v4195_v44 = vpop.permute.xlu1 %4194  ;;  %6676 = vmatpush3.bf16.msra.mxu0 %v12556_v14  ;;  %v4190_v49 = vpop.permute.xlu0 %4189 }
 0x311   : > { %v3599_v21 = vadd.f32 %v15262_v18, %v3571_v51  ;;  %v4880_v15 = vrot.slane %v4878_v54, 7  ;;  %v3628_v30 = vadd.f32 %v15263_v63, %v3600_v28  ;;  %v3726_v45 = vmul.f32 %v3687_v23, %v15012_v11  ;;  %v12578_v51 = vld [vmem:[%s13868_s3 + $0x30] sm:$0xff]   ;;  %v15268_v28 = vld [vmem:[#allocation75_spill] sm:$0xff] }
 0x312   : > { %v4708_v37 = vmul.f32 %v4694_v19, %v15258_v5  ;;  %v4870_v8 = vshrl.u32 %v6648_v12, 16  ;;  %v4707_v36 = vmul.f32 %v4693_v52, %v15261_v50  ;;  %v4873_v43 = vshll.u32 %v6648_v12, 16  ;;  %v12573_v12 = vld [vmem:[%s13868_s3 + $0x70] sm:$0xff]  }
 0x313   : > { %v4328_v52 = vmul.f32 %v3687_v23, %v14925_v41  ;;  %v4883_v54 = vor.u32 %v4881_v1, %v4880_v15  ;;  %v5012_v23 = vld [vmem:[#allocation2 + $0x4] sm:$0xf]  ;;  %v3627_v26 = vadd.f32 %v15268_v28, %v3599_v21  ;;  %6677 = vmatprep.subr.bf16.mxu0 %v12573_v12  ;;  %v3740_v1 = vadd.f32 %v3726_v45, %v3628_v30 }
 0x314   : > { %v6651_v34 = vpack.c.bf16 %v4708_v37, %v4708_v37  ;;  %v4872_v46 = vrot.slane %v4870_v8, 7  ;;  %v6650_v42 = vpack.c.bf16 %v4707_v36, %v4707_v36  ;;  %6678 = vmatpush3.bf16.msra.mxu0 %v12578_v51  ;;  %v4885_v30 = vrot.slane %v4880_v15, 4 }
 0x315   : > { %v4342_v55 = vadd.f32 %v4328_v52, %v12201_v22  ;;  %v12606_v22 = vld [vmem:[%s13868_s3 + $0x28] sm:$0xff]   ;;  %v4242_v15 = vmul.f32 %v12273_v47, %v4195_v44 }
 0x316   : > { %v4896_v37 = vshrl.u32 %v6651_v34, 16  ;;  %v4899_v13 = vshll.u32 %v6651_v34, 16  ;;  %v4875_v8 = vor.u32 %v4873_v43, %v4872_v46  ;;  %v4876_v50 = vrot.slane %v4872_v46, 4  ;;  %v12595_v34 = vld [vmem:[%s13868_s3 + $0x68] sm:$0xff]  }
 0x317   : > { %v4887_v36 = vshrl.u32 %v6650_v42, 16  ;;  %v4890_v18 = vshll.u32 %v6650_v42, 16  ;;  %v4327_v42 = vmul.f32 %v3682_v24, %v14925_v41  ;;  %v3346_v24 = vpop.permute.xlu0 %3345  ;;  %6679 = vmatprep.subr.bf16.mxu0 %v12595_v34 }
 0x318   : > { %v12588_v63 = vrot.slane %v4896_v37, 7  ;;  %v4884_v21 = vsel %vm12563_vm2, %v4876_v50, %v4883_v54  ;;  %v5013_v43 = vsel %vm12582_vm3, %v4875_v8, %v5012_v23  ;;  %v3351_v37 = vpop.permute.xlu1 %3350  ;;  %v15269_v54 = vld [vmem:[#allocation10_spill] sm:$0xff]  ;;  %v3739_v8 = vadd.f32 %v3725_v59, %v3627_v26  ;;  %6680 = vmatpush3.bf16.msra.mxu0 %v12606_v22 }
 0x319   : > { %v4889_v46 = vrot.slane %v4887_v36, 7  ;;  %5014 = vst [vmem:[#allocation2 + $0x4] sm:$0xf] %v5013_v43  ;;  %5015 = vst.msk [vmem:[#allocation2 + $0x8] sm:$0xf] %vm4719_vm0, %v4884_v21  ;;  %v4451_v5 = vadd.f32 %v15269_v54, %v12536_v40  ;;  %v4341_v50 = vadd.f32 %v4327_v42, %v12213_v58  ;;  %v4466_v36 = vmul.f32 %v4195_v44, %v15192_v17  ;;  %v12622_v40 = vld [vmem:[%s13868_s3 + $0x60] sm:$0xff]  }
 0x31a   : > { %v4901_v45 = vor.u32 %v4899_v13, %v12588_v63  ;;  %v4241_v21 = vmul.f32 %v12273_v47, %v4190_v49  ;;  %v4465_v13 = vmul.f32 %v4190_v49, %v15192_v17  ;;  %v15270_v58 = vld [vmem:[#allocation160_spill] sm:$0xff]  ;;  %v15271_v43 = vld [vmem:[#allocation173_spill] sm:$0xff]  ;;  %v12634_v49 = vld [vmem:[%s13868_s3 + $0x20] sm:$0xff]   ;;  %6681 = vmatprep.subr.bf16.mxu0 %v12622_v40 }
 0x31b   : > { %v4892_v23 = vor.u32 %v4890_v18, %v4889_v46  ;;  %v4894_v28 = vrot.slane %v4889_v46, 4  ;;  %v3768_v26 = vadd.f32 %v15270_v58, %v3740_v1  ;;  %v4370_v46 = vadd.f32 %v15271_v43, %v4342_v55  ;;  %v15272_v42 = vld [vmem:[#allocation179_spill] sm:$0xff]  ;;  %v15273_v54 = vld [vmem:[#allocation206_spill] sm:$0xff] }
 0x31c   : > { %v4531_v44 = vpop.permute.xlu1 %4530  ;;  %v4256_v1 = vadd.f32 %v4242_v15, %v12218_v9  ;;  %v4480_v55 = vadd.f32 %v4466_v36, %v12548_v32  ;;  %v3390_v58 = vmul.f32 %v12273_v47, %v3351_v37  ;;  %v3782_v43 = vmul.f32 %v3351_v37, %v15192_v17  ;;  %6682 = vmatpush3.bf16.msra.mxu0 %v12634_v49 }
 0x31d   : > { %v4893_v18 = vsel %vm12563_vm2, %v4885_v30, %v4892_v23  ;;  %v4902_v59 = vsel %vm12563_vm2, %v4894_v28, %v4901_v45  ;;  %v3767_v30 = vadd.f32 %v15272_v42, %v3739_v8  ;;  %v4369_v45 = vadd.f32 %v15273_v54, %v4341_v50  ;;  %v4526_v23 = vpop.permute.xlu0 %4525  ;;  %v12670_v54 = vld [vmem:[%s13868_s3 + $0x18] sm:$0xff]  }
 0x31e   : > { %5016 = vst.msk [vmem:[#allocation2 + $0xc] sm:$0xf] %vm4719_vm0, %v4893_v18  ;;  %5017 = vst.msk [vmem:[#allocation2 + $0x10] sm:$0xf] %vm4719_vm0, %v4902_v59  ;;  %v4255_v28 = vadd.f32 %v4241_v21, %v12231_v61  ;;  %v4076_v18 = vmul.f32 %v3351_v37, %v15012_v11  ;;  %v4479_v59 = vadd.f32 %v4465_v13, %v4451_v5  ;;  %v12658_v5 = vld [vmem:[%s13868_s3 + $0x58] sm:$0xff]  }
 0x31f   : > { %v4384_v8 = vmul.f32 %v3351_v37, %v15020_v39  ;;  %v3389_v50 = vmul.f32 %v12273_v47, %v3346_v24  ;;  %v4075_v9 = vmul.f32 %v3346_v24, %v15012_v11  ;;  %v3781_v32 = vmul.f32 %v3346_v24, %v15192_v17  ;;  %15274 = vst [vmem:[#allocation157_spill] sm:$0xff] %v12670_v54 }
 0x320   : > { %v4383_v15 = vmul.f32 %v3346_v24, %v15020_v39  ;;  %v4578_v36 = vmul.f32 %v12273_v47, %v4531_v44  ;;  %v4577_v61 = vmul.f32 %v12273_v47, %v4526_v23  ;;  %v3855_v21 = vpop.permute.xlu1 %3854  ;;  %v12661_v37 = vadd.f32 %v4076_v18, %v12225_v38  ;;  %v12676_v18 = vld [vmem:[#allocation2 + $0x4] sm:$0xf]  ;;  %6683 = vmatprep.subr.bf16.mxu0 %v12658_v5 }
 0x321   : > { %v12664_v13 = vadd.f32 %v3390_v58, %v12241_v48  ;;  %v3796_v42 = vadd.f32 %v3782_v43, %v3768_v26  ;;  %v3894_v24 = vmul.f32 %v12273_v47, %v3855_v21  ;;  %v3850_v44 = vpop.permute.xlu0 %3849  ;;  %v12673_v23 = vadd.f32 %v4075_v9, %v12235_v62  ;;  %v12678_v48 = vld [vmem:[#allocation2 + $0x8] sm:$0xf]  ;;  %6684 = vmatpush3.bf16.msra.mxu0 %v12670_v54 }
 0x322   : > { %v4592_v52 = vadd.f32 %v4578_v36, %v4480_v55  ;;  %v4591_v2 = vadd.f32 %v4577_v61, %v4479_v59  ;;  %v4412_v38 = vmul.f32 %v3855_v21, %v15012_v11  ;;  %v4398_v26 = vadd.f32 %v4384_v8, %v4370_v46  ;;  %v12693_v46 = vld [vmem:[%s13868_s3 + $0x50] sm:$0xff]  }
 0x323   : > { %v12681_v58 = vadd.f32 %v3894_v24, %v3796_v42  ;;  %v12684_v43 = vadd.f32 %v3389_v50, %v12245_v27  ;;  %v3893_v20 = vmul.f32 %v12273_v47, %v3850_v44  ;;  %v3795_v55 = vadd.f32 %v3781_v32, %v3767_v30  ;;  %15275 = vst [vmem:[#allocation165_spill] sm:$0xff] %v12693_v46 }
 0x324   : > { %v4606_v62 = vmax.f32 %v4256_v1, %v4592_v52  ;;  %v4605_v9 = vmax.f32 %v4255_v28, %v4591_v2  ;;  %v4397_v59 = vadd.f32 %v4383_v15, %v4369_v45  ;;  %v3529_v36 = vpop.permute.xlu1 %3528  ;;  %v12695_v8 = vadd.f32 %v4412_v38, %v4398_v26  ;;  %v12706_v45 = vld [vmem:[%s13868_s3 + $0x10] sm:$0xff]   ;;  %6685 = vmatprep.subr.bf16.mxu0 %v12693_v46 }
 0x325   : > { %v5036_v61 = vld [vmem:[#allocation2 + $0xc] sm:$0xf]  ;;  %v12687_v21 = vld [vmem:[#allocation2 + $0x10] sm:$0xf]  ;;  %v4411_v27 = vmul.f32 %v3850_v44, %v15012_v11  ;;  %v3560_v52 = vmul.f32 %v3529_v36, %v14925_v41  ;;  %v3524_v2 = vpop.permute.xlu0 %3523  ;;  %v12701_v30 = vcombine.low %v12676_v18, %v12678_v48  ;;  %15276 = vst [vmem:[#allocation168_spill] sm:$0xff] %v12706_v45  ;;  %v15277_v1 = vmax.f32 %v12190_v4, %v12517_v57 }
 0x326   : > { %v15278_v50 = vmax.f32 %v12197_v25, %v12524_v16  ;;  %v3559_v42 = vmul.f32 %v3524_v2, %v14925_v41  ;;  %v12718_v24 = vadd.f32 %v3893_v20, %v3795_v55  ;;  %v15279_v44 = vld [vmem:[#allocation37_spill] sm:$0xff]  ;;  %v12722_v26 = vcombine.low %v5036_v61, %v12687_v21  ;;  %v15280_v16 = vld [vmem:[#allocation56_spill] sm:$0xff]  ;;  %6686 = vmatpush3.bf16.msra.mxu0 %v12706_v45  ;;  %v15281_v20 = vld [vmem:[#allocation211_spill] sm:$0xff] }
 0x327   : > { %v4620_v28 = vmax.f32 %v15277_v1, %v4606_v62  ;;  %v3574_v38 = vadd.f32 %v3560_v52, %v15279_v44  ;;  %v5269_v4 = vshrl.u32 %v12701_v30, 16  ;;  %v5271_v36 = vshll.u32 %v12701_v30, 16  ;;  %v15282_v15 = vld [vmem:[#allocation189_spill] sm:$0xff] }
 0x328   : > { %v4619_v32 = vmax.f32 %v15278_v50, %v4605_v9  ;;  %v3573_v62 = vadd.f32 %v3559_v42, %v15280_v16  ;;  %v3697_v9 = vpop.permute.xlu1 %3696  ;;  %v5276_v50 = vshll.u32 %v12722_v26, 16  ;;  %v15283_v16 = vld [vmem:[#allocation32_spill] sm:$0xff] }
 0x329   : > { %v4682_v25 = vadd.f32 %v12505_v33, %v4620_v28  ;;  %v3602_v55 = vadd.f32 %v15281_v20, %v3574_v38  ;;  %v3728_v52 = vmul.f32 %v3697_v9, %v15012_v11  ;;  %v4330_v2 = vmul.f32 %v3697_v9, %v14925_v41  ;;  %v3692_v1 = vpop.permute.xlu0 %3691  ;;  %v12742_v9 = vld [vmem:[%s13868_s3 + $0x48] sm:$0xff]  }
 0x32a   : > { %v4681_v57 = vadd.f32 %v12505_v33, %v4619_v32  ;;  %v3601_v32 = vadd.f32 %v15282_v15, %v3573_v62  ;;  %v3727_v42 = vmul.f32 %v3692_v1, %v15012_v11  ;;  %v4329_v31 = vmul.f32 %v3692_v1, %v14925_v41  ;;  %v15284_v15 = vld [vmem:[#allocation138_spill] sm:$0xff]  ;;  %v15285_v62 = vld [vmem:[#allocation229_spill] sm:$0xff]  ;;  %6687 = vmatprep.subr.bf16.mxu0 %v12742_v9 }
 0x32b   : > { %v4696_v44 = vmax.f32 %v4682_v25, 0.0  ;;  %v3630_v6 = vadd.f32 %v15283_v16, %v3602_v55  ;;  %v4344_v0 = vadd.f32 %v4330_v2, %v12252_v10  ;;  %v5273_v38 = vrot.slane %v5271_v36, 1  ;;  %v12747_v25 = vld [vmem:[%s13868_s3 + $0x8] sm:$0xff]   ;;  %v5033_v2 = vld [vmem:[#allocation2] sm:$0xf] }
 0x32c   : > { %v4695_v28 = vmax.f32 %v4681_v57, 0.0  ;;  %v15286_v55 = vld [vmem:[#allocation72_spill] sm:$0xff]  ;;  %v12752_v10 = vrot.slane %v5276_v50, 1  ;;  %v4205_v36 = vpop.permute.xlu1 %4204  ;;  %v4425_v1 = vadd.f32 %v4411_v27, %v4397_v59  ;;  %v4343_v53 = vadd.f32 %v4329_v31, %v12259_v3  ;;  %6688 = vmatpush3.bf16.msra.mxu0 %v12747_v25  ;;  %v12763_v50 = vld [vmem:[%s13868_s3 + $0x40] sm:$0xff]  }
 0x32d   : > { %v4710_v57 = vmul.f32 %v4696_v44, %v15284_v15  ;;  %v3629_v16 = vadd.f32 %v15286_v55, %v3601_v32  ;;  %v3742_v29 = vadd.f32 %v3728_v52, %v3630_v6  ;;  %v5274_v56 = vor.u32 %v5273_v38, %v5269_v4  ;;  %v4200_v35 = vpop.permute.xlu0 %4199  ;;  %15287 = vst [vmem:[#allocation166_spill] sm:$0xff] %v12763_v50  ;;  %v12768_v3 = vld [vmem:[%s13868_s3] sm:$0xff]   ;;  %v15289_v6 = vld [vmem:[#allocation193_spill] sm:$0xff]  ;;  %v15292_v52 = vld [vmem:[#allocation212_spill] sm:$0xff] }
 0x32e   : > { %v4709_v20 = vmul.f32 %v4695_v28, %v15285_v62  ;;  %v12757_v44 = vcombine.low %v12678_v48, %v5036_v61  ;;  %15288 = vst [vmem:[#allocation171_spill] sm:$0xff] %v12768_v3  ;;  %v12773_v59 = vadd.f32 %v15289_v6, %v4344_v0  ;;  %v12780_v61 = vcombine.low %v5033_v2, %v12676_v18  ;;  %v15293_v32 = vld [vmem:[#allocation216_spill] sm:$0xff]  ;;  %v15298_v31 = vld [vmem:[#allocation235_spill] sm:$0xff] }
 0x32f   : > { %v6653_v45 = vpack.c.bf16 %v4710_v57, %v4710_v57  ;;  %v3741_v54 = vadd.f32 %v3727_v42, %v3629_v16  ;;  %v12777_v48 = vsel %vm5158_vm4, %v5274_v56, %v12752_v10  ;;  %v12783_v28 = vadd.f32 %v15292_v52, %v3742_v29  ;;  %6689 = vmatprep.subr.bf16.mxu0 %v12763_v50 }
 0x330   : > { %v6652_v46 = vpack.c.bf16 %v4709_v20, %v4709_v20  ;;  %15290 = vst [vmem:[#allocation172_spill] sm:$0xff] %v12777_v48  ;;  %15291 = vst [vmem:[#allocation167_spill] sm:$0xff] %v12780_v61  ;;  %v12786_v42 = vadd.f32 %v15293_v32, %v4343_v53  ;;  %5328 = vrot.lane.b32.xlu0 %v12777_v48, %s6969_s15  ;;  %v3361_v0 = vpop.permute.xlu1 %3360  ;;  %v5162_v15 = vshll.u32 %v12780_v61, 16  ;;  %v5167_v18 = vshll.u32 %v12757_v44, 16  ;;  %v15294_v20 = vld [vmem:[#allocation214_spill] sm:$0xff] }
 0x331   : > { %v4914_v27 = vshrl.u32 %v6653_v45, 16  ;;  %v4917_v38 = vshll.u32 %v6653_v45, 16  ;;  %v3356_v57 = vpop.permute.xlu0 %3355  ;;  %v12796_v55 = vadd.f32 %v15294_v20, %v3741_v54  ;;  %v15295_v53 = vld [vmem:[#allocation234_spill] sm:$0xff]  ;;  %6690 = vmatpush3.bf16.msra.mxu0 %v12768_v3  ;;  %v5160_v2 = vshrl.u32 %v12780_v61, 16  ;;  %v15297_v54 = vld [vmem:[#allocation140_spill] sm:$0xff] }
 0x332   : > { %v4905_v4 = vshrl.u32 %v6652_v46, 16  ;;  %v4908_v56 = vshll.u32 %v6652_v46, 16  ;;  %v4118_v16 = vadd.f32 %v15295_v53, %v12661_v37  ;;  %v5164_v45 = vrot.slane %v5162_v15, 1 }
 0x333   : > { %v12793_v62 = vrot.slane %v4914_v27, 7  ;;  %v12802_v46 = vrot.slane %v5167_v18, 1  ;;  %v4468_v6 = vmul.f32 %v4205_v36, %v15192_v17  ;;  %v15296_v52 = vmov 0.0  }
 0x334   : > { %v4907_v29 = vrot.slane %v4905_v4, 7  ;;  %6841 = vmatprep.subr.bf16.mxu0 %v15296_v52  ;;  %v4454_v20 = vadd.f32 %v15297_v54, %v12695_v8  ;;  %5345 = vrot.lane.b32.xlu0 %v12757_v44, %s6970_s30  ;;  %v4541_v37 = vpop.permute.xlu1 %4540  ;;  %v5165_v18 = vor.u32 %v5164_v45, %v5160_v2  ;;  %v4244_v53 = vmul.f32 %v12273_v47, %v4205_v36  ;;  %v15303_v45 = vld [vmem:[#allocation137_spill] sm:$0xff] }
 0x335   : > { %v4919_v27 = vor.u32 %v4917_v38, %v12793_v62  ;;  %v4117_v48 = vadd.f32 %v15298_v31, %v12673_v23  ;;  %v4536_v61 = vpop.permute.xlu0 %4535  ;;  %v15299_v38 = vrot.slane %v12588_v63, 4  ;;  %v4243_v3 = vmul.f32 %v12273_v47, %v4200_v35  ;;  %v15302_v63 = vld [vmem:[#allocation164_spill] sm:$0xff] }
 0x336   : > { %v4910_v4 = vor.u32 %v4908_v56, %v4907_v29  ;;  %v4912_v32 = vrot.slane %v4907_v29, 4  ;;  %v15300_v29 = vld [vmem:[#allocation161_spill] sm:$0xff]  ;;  %v12827_v23 = vsel %vm5158_vm4, %v5165_v18, %v12802_v46  ;;  %v4482_v36 = vadd.f32 %v4468_v6, %v4454_v20 }
 0x337   : > { %v4146_v54 = vadd.f32 %v15300_v29, %v4118_v16  ;;  %15301 = vst [vmem:[#allocation175_spill] sm:$0xff] %v12827_v23  ;;  %v4145_v31 = vadd.f32 %v15302_v63, %v4117_v48  ;;  %v4467_v2 = vmul.f32 %v4200_v35, %v15192_v17  ;;  %5219 = vrot.lane.b32.xlu1 %v12827_v23, %s6970_s30  ;;  %v15304_v35 = vld [vmem:[#allocation24_spill] sm:$0xff]  ;;  %v15307_v23 = vld [vmem:[#allocation127_spill] sm:$0xff] }
 0x338   : > { %v4911_v56 = vsel %vm12563_vm2, %v15299_v38, %v4910_v4  ;;  %v4920_v8 = vsel %vm12563_vm2, %v4912_v32, %v4919_v27  ;;  %v4453_v16 = vadd.f32 %v15303_v45, %v4425_v1  ;;  %v3392_v27 = vmul.f32 %v12273_v47, %v3361_v0  ;;  %v3865_v38 = vpop.permute.xlu1 %3864  ;;  %5362 = vrot.lane.b32.xlu0 %v15304_v35, %s6971_s6 }
 0x339   : > { %5018 = vst.msk [vmem:[#allocation2 + $0x14] sm:$0xf] %vm4719_vm0, %v4911_v56  ;;  %5019 = vst.msk [vmem:[#allocation2 + $0x18] sm:$0xf] %vm4719_vm0, %v4920_v8  ;;  %v3784_v4 = vmul.f32 %v3361_v0, %v15192_v17  ;;  %v4078_v32 = vmul.f32 %v3361_v0, %v15012_v11  ;;  %v4258_v56 = vadd.f32 %v4244_v53, %v4146_v54  ;;  %v3860_v20 = vpop.permute.xlu0 %3859  ;;  %v15305_v53 = vld [vmem:[#allocation28_spill] sm:$0xff] }
 0x33a   : > { %v4257_v18 = vadd.f32 %v4243_v3, %v4145_v31  ;;  %v4386_v6 = vmul.f32 %v3361_v0, %v15020_v39  ;;  %v3391_v48 = vmul.f32 %v12273_v47, %v3356_v57  ;;  %v4481_v8 = vadd.f32 %v4467_v2, %v4453_v16 }
 0x33b   : > { %v3783_v1 = vmul.f32 %v3356_v57, %v15192_v17  ;;  %v4077_v29 = vmul.f32 %v3356_v57, %v15012_v11  ;;  %v4580_v63 = vmul.f32 %v12273_v47, %v4541_v37  ;;  %v12845_v45 = vadd.f32 %v4078_v32, %v12284_v7  ;;  %5242 = vrot.lane.b32.xlu1 %v12701_v30, %s6971_s6  ;;  %v15306_v7 = vld [vmem:[#allocation78_spill] sm:$0xff] }
 0x33c   : > { %v4385_v3 = vmul.f32 %v3356_v57, %v15020_v39  ;;  %v4579_v0 = vmul.f32 %v12273_v47, %v4536_v61  ;;  %v12850_v54 = vadd.f32 %v3392_v27, %v15305_v53  ;;  %v3798_v2 = vadd.f32 %v3784_v4, %v12783_v28  ;;  %v3539_v15 = vpop.permute.xlu1 %3538 }
 0x33d   : > { %v4594_v31 = vadd.f32 %v4580_v63, %v4482_v36  ;;  %v3896_v16 = vmul.f32 %v12273_v47, %v3865_v38  ;;  %v4414_v37 = vmul.f32 %v3865_v38, %v15012_v11  ;;  %v12858_v32 = vadd.f32 %v4077_v29, %v15306_v7  ;;  %v3534_v53 = vpop.permute.xlu0 %3533 }
 0x33e   : > { %v4593_v57 = vadd.f32 %v4579_v0, %v4481_v8  ;;  %v4400_v61 = vadd.f32 %v4386_v6, %v12773_v59  ;;  %v12862_v27 = vadd.f32 %v3391_v48, %v15307_v23  ;;  %v3797_v28 = vadd.f32 %v3783_v1, %v12796_v55  ;;  %v15310_v48 = vld [vmem:[#allocation99_spill] sm:$0xff] }
 0x33f   : > { %v4608_v50 = vmax.f32 %v4258_v56, %v4594_v31  ;;  %v12864_v30 = vadd.f32 %v3896_v16, %v3798_v2  ;;  %v3895_v36 = vmul.f32 %v12273_v47, %v3860_v20  ;;  %v4399_v29 = vadd.f32 %v4385_v3, %v12786_v42  ;;  %5143 = vrot.lane.b32.xlu1 %v15304_v35, %s6969_s15  ;;  %v15311_v3 = vld [vmem:[#allocation39_spill] sm:$0xff] }
 0x340   : > { %v5038_v4 = vld [vmem:[#allocation2 + $0x14] sm:$0xf]  ;;  %v12868_v38 = vld [vmem:[#allocation2 + $0x18] sm:$0xf]  ;;  %v4607_v63 = vmax.f32 %v4257_v18, %v4593_v57  ;;  %v3562_v8 = vmul.f32 %v3539_v15, %v14925_v41  ;;  %v3561_v59 = vmul.f32 %v3534_v53, %v14925_v41  ;;  %v15308_v23 = vmax.f32 %v12664_v13, %v12681_v58  ;;  %v3707_v18 = vpop.permute.xlu1 %3706  ;;  %v15314_v53 = vld [vmem:[#allocation132_spill] sm:$0xff] }
 0x341   : > { %v4428_v55 = vadd.f32 %v4414_v37, %v4400_v61  ;;  %v4413_v6 = vmul.f32 %v3860_v20, %v15012_v11  ;;  %v15309_v42 = vmax.f32 %v12684_v43, %v12718_v24  ;;  %v3702_v31 = vpop.permute.xlu0 %3701  ;;  %v12887_v2 = vcombine.low %v5038_v4, %v12868_v38  ;;  %v15312_v43 = vld [vmem:[#allocation220_spill] sm:$0xff]  ;;  %v15313_v37 = vld [vmem:[#allocation221_spill] sm:$0xff] }
 0x342   : > { %v4622_v56 = vmax.f32 %v15308_v23, %v4608_v50  ;;  %v3576_v1 = vadd.f32 %v3562_v8, %v15310_v48  ;;  %v3575_v0 = vadd.f32 %v3561_v59, %v15311_v3  ;;  %v12890_v58 = vadd.f32 %v3895_v36, %v3797_v28  ;;  %v15315_v23 = vld [vmem:[#allocation6_spill] sm:$0xff] }
 0x343   : > { %v4621_v15 = vmax.f32 %v15309_v42, %v4607_v63  ;;  %v3730_v50 = vmul.f32 %v3707_v18, %v15012_v11  ;;  %v4332_v20 = vmul.f32 %v3707_v18, %v14925_v41  ;;  %v3729_v57 = vmul.f32 %v3702_v31, %v15012_v11  ;;  %v15316_v18 = vld [vmem:[#allocation124_spill] sm:$0xff] }
 0x344   : > { %v4684_v13 = vadd.f32 %v12505_v33, %v4622_v56  ;;  %v3604_v24 = vadd.f32 %v15312_v43, %v3576_v1  ;;  %v3603_v7 = vadd.f32 %v15313_v37, %v3575_v0  ;;  %v4331_v8 = vmul.f32 %v3702_v31, %v14925_v41  ;;  %v4215_v36 = vpop.permute.xlu1 %4214  ;;  %v15317_v1 = vld [vmem:[#allocation230_spill] sm:$0xff]  ;;  %v15319_v31 = vld [vmem:[#allocation109_spill] sm:$0xff] }
 0x345   : > { %v4683_v16 = vadd.f32 %v12505_v33, %v4621_v15  ;;  %v4346_v63 = vadd.f32 %v4332_v20, %v15314_v53  ;;  %v5280_v28 = vshrl.u32 %v12722_v26, 16  ;;  %v5284_v15 = vshll.u32 %v12887_v2, 16  ;;  %v4210_v48 = vpop.permute.xlu0 %4209 }
 0x346   : > { %v4698_v61 = vmax.f32 %v4684_v13, 0.0  ;;  %v3632_v56 = vadd.f32 %v15315_v23, %v3604_v24  ;;  %v3631_v42 = vadd.f32 %v15316_v18, %v3603_v7  ;;  %v4427_v0 = vadd.f32 %v4413_v6, %v4399_v29  ;;  %v15318_v13 = vld [vmem:[#allocation131_spill] sm:$0xff]  ;;  %v15320_v7 = vld [vmem:[#allocation9_spill] sm:$0xff] }
 0x347   : > { %v4697_v59 = vmax.f32 %v4683_v16, 0.0  ;;  %v4345_v43 = vadd.f32 %v4331_v8, %v15318_v13  ;;  %v5282_v20 = vor.u32 %v5280_v28, %v12752_v10  ;;  %v12908_v35 = vrot.slane %v5284_v15, 1  ;;  %v15321_v8 = vld [vmem:[#allocation223_spill] sm:$0xff] }
 0x348   : > { %v4712_v3 = vmul.f32 %v4698_v61, %v15317_v1  ;;  %v3744_v53 = vadd.f32 %v3730_v50, %v3632_v56  ;;  %v3743_v47 = vadd.f32 %v3729_v57, %v3631_v42  ;;  %v12913_v23 = vadd.f32 %v15320_v7, %v4346_v63  ;;  %v3371_v29 = vpop.permute.xlu1 %3370  ;;  %v15322_v56 = vld [vmem:[#allocation222_spill] sm:$0xff]  ;;  %v15323_v63 = vld [vmem:[#allocation85_spill] sm:$0xff] }
 0x349   : > { %v4711_v37 = vmul.f32 %v4697_v59, %v15319_v31  ;;  %v12916_v61 = vcombine.low %v12687_v21, %v5038_v4  ;;  %v12919_v10 = vadd.f32 %v15321_v8, %v4345_v43  ;;  %v12923_v50 = vsel %vm5158_vm4, %v5282_v20, %v12908_v35  ;;  %v3366_v28 = vpop.permute.xlu0 %3365  ;;  %v15325_v7 = vld [vmem:[#allocation41_spill] sm:$0xff] }
 0x34a   : > { %v6655_v16 = vpack.c.bf16 %v4712_v3, %v4712_v3  ;;  %v5171_v57 = vshrl.u32 %v12757_v44, 16  ;;  %v3772_v18 = vadd.f32 %v15322_v56, %v3744_v53  ;;  %v12928_v42 = vadd.f32 %v15323_v63, %v3743_v47  ;;  %5330 = vrot.lane.b32.xlu0 %v12923_v50, %s6969_s15  ;;  %v15324_v3 = vld [vmem:[#allocation236_spill] sm:$0xff]  ;;  %v15327_v63 = vld [vmem:[#allocation170_spill] sm:$0xff] }
 0x34b   : > { %v6654_v6 = vpack.c.bf16 %v4711_v37, %v4711_v37  ;;  %v5175_v21 = vshll.u32 %v12916_v61, 16  ;;  %v4120_v13 = vadd.f32 %v15324_v3, %v12845_v45  ;;  %v4470_v47 = vmul.f32 %v4215_v36, %v15192_v17  ;;  %v15326_v45 = vld [vmem:[#allocation237_spill] sm:$0xff] }
 0x34c   : > { %v4932_v59 = vshrl.u32 %v6655_v16, 16  ;;  %v4935_v4 = vshll.u32 %v6655_v16, 16  ;;  %v5173_v1 = vor.u32 %v5171_v57, %v12802_v46  ;;  %v4551_v37 = vpop.permute.xlu1 %4550  ;;  %v4456_v8 = vadd.f32 %v15325_v7, %v4428_v55  ;;  %v12945_v16 = vld [vmem:[%s13866_s1 + $0x8] ss:$0 sm:$0xff]  ;;  %v15328_v55 = vld [vmem:[#allocation105_spill] sm:$0xff] }
 0x34d   : > { %v4923_v15 = vshrl.u32 %v6654_v6, 16  ;;  %v4926_v20 = vshll.u32 %v6654_v6, 16  ;;  %v12938_v31 = vrot.slane %v5175_v21, 1  ;;  %v4246_v46 = vmul.f32 %v12945_v16, %v4215_v36 }
 0x34e   : > { %v12936_v43 = vrot.slane %v4932_v59, 7  ;;  %v4119_v57 = vadd.f32 %v15326_v45, %v12858_v32  ;;  %v4546_v59 = vpop.permute.xlu0 %4545  ;;  %v4148_v21 = vadd.f32 %v15327_v63, %v4120_v13  ;;  %5347 = vrot.lane.b32.xlu0 %v12916_v61, %s6970_s30  ;;  %v4484_v32 = vadd.f32 %v4470_v47, %v4456_v8 }
 0x34f   : > { %v4925_v53 = vrot.slane %v4923_v15, 7  ;;  %v12953_v56 = vsel %vm5158_vm4, %v5173_v1, %v12938_v31  ;;  %v4455_v15 = vadd.f32 %v15328_v55, %v4427_v0  ;;  %v4245_v13 = vmul.f32 %v12945_v16, %v4210_v48 }
 0x350   : > { %v4937_v6 = vor.u32 %v4935_v4, %v12936_v43  ;;  %5221 = vrot.lane.b32.xlu1 %v12953_v56, %s6970_s30  ;;  %6814 = vmatmul.mubr.msk.bf16.vlgmr.msra.gmra.mxu1 %vm5392_vm5, %v12953_v56  ;;  %v15329_v4 = vld [vmem:[#allocation174_spill] sm:$0xff]  ;;  %v4469_v0 = vmul.f32 %v4210_v48, %v15192_v17  ;;  %v3786_v45 = vmul.f32 %v3371_v29, %v15192_v17  ;;  %v3875_v63 = vpop.permute.xlu1 %3874 }
 0x351   : > { %v4928_v36 = vor.u32 %v4926_v20, %v4925_v53  ;;  %v4930_v7 = vrot.slane %v4925_v53, 4  ;;  %v4147_v1 = vadd.f32 %v15329_v4, %v4119_v57  ;;  %6817 = vmatprep.mubr.msk.bf16.mxu1 %vm6968_vm12, %v15296_v52  ;;  %v15330_v20 = vrot.slane %v12793_v62, 4  ;;  %6743 = vmatpush3.bf16.msra.mxu1 %v12556_v14 }
 0x352   : > { %v4260_v8 = vadd.f32 %v4246_v46, %v4148_v21  ;;  %v3394_v57 = vmul.f32 %v12945_v16, %v3371_v29  ;;  %v3870_v55 = vpop.permute.xlu0 %3869  ;;  %v12981_v4 = vmul.f32 %v3371_v29, %v15012_v11  ;;  %v4388_v62 = vmul.f32 %v3371_v29, %v15020_v39  ;;  %6744 = vmatprep.subr.bf16.mxu1 %v12573_v12 }
 0x353   : > { %v4929_v53 = vsel %vm12563_vm2, %v15330_v20, %v4928_v36  ;;  %v4938_v47 = vsel %vm12563_vm2, %v4930_v7, %v4937_v6  ;;  %v4259_v48 = vadd.f32 %v4245_v13, %v4147_v1  ;;  %v3393_v36 = vmul.f32 %v12945_v16, %v3366_v28  ;;  %v15331_v6 = vld [vmem:[#allocation144_spill] sm:$0xff] }
 0x354   : > { %5020 = vst.msk [vmem:[#allocation2 + $0x1c] sm:$0xf] %vm4719_vm0, %v4929_v53  ;;  %5021 = vst.msk [vmem:[#allocation2 + $0x20] sm:$0xf] %vm4719_vm0, %v4938_v47  ;;  %5364 = vrot.lane.b32.xlu0 %v15331_v6, %s6971_s6  ;;  %v4483_v46 = vadd.f32 %v4469_v0, %v4455_v15  ;;  %5244 = vrot.lane.b32.xlu1 %v12722_v26, %s6971_s6  ;;  %v3785_v14 = vmul.f32 %v3366_v28, %v15192_v17  ;;  %v3549_v53 = vpop.permute.xlu1 %3548  ;;  %v15332_v26 = vld [vmem:[#allocation58_spill] sm:$0xff] }
 0x355   : > { %v4582_v21 = vmul.f32 %v12945_v16, %v4551_v37  ;;  %v4581_v7 = vmul.f32 %v12945_v16, %v4546_v59  ;;  %v12993_v1 = vmul.f32 %v3366_v28, %v15012_v11  ;;  %v4387_v29 = vmul.f32 %v3366_v28, %v15020_v39  ;;  %6745 = vmatpush3.bf16.msra.mxu1 %v12578_v51  ;;  %v15333_v28 = vld [vmem:[#allocation143_spill] sm:$0xff] }
 0x356   : > { %v3800_v13 = vadd.f32 %v3786_v45, %v3772_v18  ;;  %v3898_v20 = vmul.f32 %v12945_v16, %v3875_v63  ;;  %v12999_v47 = vadd.f32 %v3394_v57, %v15332_v26  ;;  %v4416_v37 = vmul.f32 %v3875_v63, %v15012_v11  ;;  %v3544_v3 = vpop.permute.xlu0 %3543  ;;  %6746 = vmatprep.subr.bf16.mxu1 %v12595_v34  ;;  %v15339_v26 = vld [vmem:[#allocation69_spill] sm:$0xff] }
 0x357   : > { %v4596_v15 = vadd.f32 %v4582_v21, %v4484_v32  ;;  %v4595_v0 = vadd.f32 %v4581_v7, %v4483_v46  ;;  %v4402_v59 = vadd.f32 %v4388_v62, %v12913_v23  ;;  %v13007_v18 = vadd.f32 %v3393_v36, %v15333_v28 }
 0x358   : > { %v13004_v24 = vadd.f32 %v3898_v20, %v3800_v13  ;;  %v3897_v45 = vmul.f32 %v12945_v16, %v3870_v55  ;;  %5145 = vrot.lane.b32.xlu1 %v15331_v6, %s6969_s15  ;;  %v3799_v63 = vadd.f32 %v3785_v14, %v12928_v42  ;;  %v4415_v51 = vmul.f32 %v3870_v55, %v15012_v11  ;;  %v3717_v46 = vpop.permute.xlu1 %3716 }
 0x359   : > { %v4610_v12 = vmax.f32 %v4260_v8, %v4596_v15  ;;  %v4609_v32 = vmax.f32 %v4259_v48, %v4595_v0  ;;  %v13015_v57 = vadd.f32 %v4416_v37, %v4402_v59  ;;  %v4401_v23 = vadd.f32 %v4387_v29, %v12919_v10  ;;  %6747 = vmatpush3.bf16.msra.mxu1 %v12606_v22  ;;  %v15336_v29 = vld [vmem:[#allocation100_spill] sm:$0xff]  ;;  %v15338_v0 = vld [vmem:[#allocation226_spill] sm:$0xff]  ;;  %v15340_v59 = vld [vmem:[#allocation133_spill] sm:$0xff] }
 0x35a   : > { %v3564_v62 = vmul.f32 %v3549_v53, %v14925_v41  ;;  %v3563_v36 = vmul.f32 %v3544_v3, %v14925_v41  ;;  %v15334_v34 = vmax.f32 %v12850_v54, %v12864_v30  ;;  %v15335_v8 = vmax.f32 %v12862_v27, %v12890_v58  ;;  %v3712_v14 = vpop.permute.xlu0 %3711  ;;  %v15337_v30 = vld [vmem:[#allocation46_spill] sm:$0xff]  ;;  %6748 = vmatprep.subr.bf16.mxu1 %v12622_v40 }
 0x35b   : > { %v3926_v42 = vmax.f32 %v12999_v47, %v13004_v24  ;;  %v13028_v55 = vadd.f32 %v3897_v45, %v3799_v63  ;;  %v5040_v10 = vld [vmem:[#allocation2 + $0x1c] sm:$0xf]  ;;  %v13030_v7 = vld [vmem:[#allocation2 + $0x20] sm:$0xf]  ;;  %v13033_v3 = vadd.f32 %v4415_v51, %v4401_v23  ;;  %v4334_v27 = vmul.f32 %v3717_v46, %v14925_v41 }
 0x35c   : > { %v4624_v21 = vmax.f32 %v15334_v34, %v4610_v12  ;;  %v4623_v48 = vmax.f32 %v15335_v8, %v4609_v32  ;;  %v3578_v54 = vadd.f32 %v3564_v62, %v15336_v29  ;;  %v3577_v13 = vadd.f32 %v3563_v36, %v15337_v30  ;;  %v4225_v12 = vpop.permute.xlu1 %4224  ;;  %v15342_v62 = vld [vmem:[#allocation148_spill] sm:$0xff]  ;;  %v13183_v24 = vld [vmem:[%s13867_s2] ss:$0 sm:$0xff] }
 0x35d   : > { %v3732_v53 = vmul.f32 %v3717_v46, %v15012_v11  ;;  %v4333_v15 = vmul.f32 %v3712_v14, %v14925_v41  ;;  %v4348_v28 = vadd.f32 %v4334_v27, %v15340_v59  ;;  %v13047_v45 = vcombine.low %v5040_v10, %v13030_v7  ;;  %6749 = vmatpush3.bf16.msra.mxu1 %v12634_v49  ;;  %v15341_v41 = vld [vmem:[#allocation146_spill] sm:$0xff] }
 0x35e   : > { %v4686_v58 = vadd.f32 %v12505_v33, %v4624_v21  ;;  %v4685_v20 = vadd.f32 %v12505_v33, %v4623_v48  ;;  %v3606_v22 = vadd.f32 %v15338_v0, %v3578_v54  ;;  %v3605_v37 = vadd.f32 %v15339_v26, %v3577_v13  ;;  %v13052_v51 = vpop.permute.xlu0 %4219  ;;  %6750 = vmatprep.subr.bf16.mxu1 %v12658_v5  ;;  %v15343_v21 = vld [vmem:[#allocation240_spill] sm:$0xff]  ;;  %v15344_v48 = vld [vmem:[#allocation243_spill] sm:$0xff]  ;;  %v15345_v54 = vld [vmem:[#allocation93_spill] sm:$0xff] }
 0x35f   : > { %v3925_v63 = vmax.f32 %v13007_v18, %v13028_v55  ;;  %v4347_v33 = vadd.f32 %v4333_v15, %v12474_v60  ;;  %v5288_v46 = vshrl.u32 %v12887_v2, 16  ;;  %v5292_v34 = vshll.u32 %v13047_v45, 16  ;;  %v15346_v0 = vld [vmem:[#allocation101_spill] sm:$0xff]  ;;  %v15347_v26 = vld [vmem:[#allocation135_spill] sm:$0xff] }
 0x360   : > { %v4700_v32 = vmax.f32 %v4686_v58, 0.0  ;;  %v4699_v40 = vmax.f32 %v4685_v20, 0.0  ;;  %v3634_v23 = vadd.f32 %v15341_v41, %v3606_v22  ;;  %v3633_v36 = vadd.f32 %v15342_v62, %v3605_v37  ;;  %v3381_v20 = vpop.permute.xlu1 %3380  ;;  %v15350_v41 = vld [vmem:[#allocation113_spill] sm:$0xff] }
 0x361   : > { %v13063_v60 = vadd.f32 %v15345_v54, %v4348_v28  ;;  %v3731_v30 = vmul.f32 %v3712_v14, %v15012_v11  ;;  %v5290_v13 = vor.u32 %v5288_v46, %v12908_v35  ;;  %v13067_v27 = vrot.slane %v5292_v34, 1  ;;  %v15348_v28 = vld [vmem:[#allocation157_spill] sm:$0xff]  ;;  %v15351_v46 = vld [vmem:[#allocation238_spill] sm:$0xff] }
 0x362   : > { %v4714_v8 = vmul.f32 %v4700_v32, %v15343_v21  ;;  %v4713_v29 = vmul.f32 %v4699_v40, %v15344_v48  ;;  %v3746_v49 = vadd.f32 %v3732_v53, %v3634_v23  ;;  %v13070_v58 = vcombine.low %v12868_v38, %v5040_v10  ;;  %v3376_v59 = vpop.permute.xlu0 %3375  ;;  %6751 = vmatpush3.bf16.msra.mxu1 %v15348_v28  ;;  %v15349_v53 = vld [vmem:[#allocation165_spill] sm:$0xff] }
 0x363   : > { %v13073_v22 = vadd.f32 %v15346_v0, %v4347_v33  ;;  %v4094_v37 = vadd.f32 %v12981_v4, %v15347_v26  ;;  %v3745_v14 = vadd.f32 %v3731_v30, %v3633_v36  ;;  %v13080_v35 = vsel %vm5158_vm4, %v5290_v13, %v13067_v27  ;;  %6752 = vmatprep.subr.bf16.mxu1 %v15349_v53  ;;  %v15353_v13 = vld [vmem:[#allocation227_spill] sm:$0xff]  ;;  %v15355_v26 = vld [vmem:[#allocation186_spill] sm:$0xff] }
 0x364   : > { %v6657_v15 = vpack.c.bf16 %v4714_v8, %v4714_v8  ;;  %v6656_v5 = vpack.c.bf16 %v4713_v29, %v4713_v29  ;;  %v5179_v38 = vshrl.u32 %v12916_v61, 16  ;;  %v5183_v10 = vshll.u32 %v13070_v58, 16  ;;  %5332 = vrot.lane.b32.xlu0 %v13080_v35, %s6969_s15  ;;  %v4561_v21 = vpop.permute.xlu1 %4560 }
 0x365   : > { %v3774_v23 = vadd.f32 %v15350_v41, %v3746_v49  ;;  %v4122_v34 = vadd.f32 %v15351_v46, %v4094_v37  ;;  %v4248_v29 = vmul.f32 %v12945_v16, %v4225_v12  ;;  %v4472_v54 = vmul.f32 %v4225_v12, %v15192_v17  ;;  %v15352_v49 = vld [vmem:[#allocation168_spill] sm:$0xff] }
 0x366   : > { %v4950_v32 = vshrl.u32 %v6657_v15, 16  ;;  %v4953_v40 = vshll.u32 %v6657_v15, 16  ;;  %v4941_v33 = vshrl.u32 %v6656_v5, 16  ;;  %v4944_v4 = vshll.u32 %v6656_v5, 16  ;;  %v4556_v30 = vpop.permute.xlu0 %4555  ;;  %6753 = vmatpush3.bf16.msra.mxu1 %v15352_v49  ;;  %v15354_v5 = vld [vmem:[#allocation181_spill] sm:$0xff] }
 0x367   : > { %v5181_v62 = vor.u32 %v5179_v38, %v12938_v31  ;;  %v13089_v36 = vrot.slane %v5183_v10, 1  ;;  %v3773_v15 = vadd.f32 %v15353_v13, %v3745_v14  ;;  %v4150_v0 = vadd.f32 %v15354_v5, %v4122_v34  ;;  %6754 = vmatprep.subr.bf16.mxu1 %v12742_v9  ;;  %v15356_v14 = vld [vmem:[#allocation184_spill] sm:$0xff] }
 0x368   : > { %v13092_v8 = vrot.slane %v4950_v32, 7  ;;  %v4943_v48 = vrot.slane %v4941_v33, 7  ;;  %v4093_v37 = vadd.f32 %v12993_v1, %v15355_v26  ;;  %v4458_v10 = vadd.f32 %v15356_v14, %v13015_v57  ;;  %v15357_v32 = vld [vmem:[#allocation239_spill] sm:$0xff]  ;;  %v15358_v1 = vld [vmem:[#allocation125_spill] sm:$0xff]  ;;  %5349 = vrot.lane.b32.xlu0 %v13070_v58, %s6970_s30 }
 0x369   : > { %v13100_v31 = vsel %vm5158_vm4, %v5181_v62, %v13089_v36  ;;  %v4262_v53 = vadd.f32 %v4248_v29, %v4150_v0  ;;  %v4457_v41 = vadd.f32 %v15358_v1, %v13033_v3  ;;  %v4247_v9 = vmul.f32 %v12945_v16, %v13052_v51  ;;  %v15360_v3 = vld [vmem:[#allocation190_spill] sm:$0xff] }
 0x36a   : > { %v4955_v28 = vor.u32 %v4953_v40, %v13092_v8  ;;  %v4946_v38 = vor.u32 %v4944_v4, %v4943_v48  ;;  %v4948_v12 = vrot.slane %v4943_v48, 4  ;;  %5223 = vrot.lane.b32.xlu1 %v13100_v31, %s6970_s30  ;;  %6818 = vmatmul.mubr.msk.bf16.gmra.mxu1 %vm5392_vm5, %v13100_v31  ;;  %v4121_v33 = vadd.f32 %v15357_v32, %v4093_v37  ;;  %v3885_v40 = vpop.permute.xlu1 %3884  ;;  %v3880_v13 = vpop.permute.xlu0 %3879 }
 0x36b   : > { %v15359_v4 = vrot.slane %v12936_v43, 4  ;;  %v4486_v46 = vadd.f32 %v4472_v54, %v4458_v10  ;;  %v4471_v34 = vmul.f32 %v13052_v51, %v15192_v17  ;;  %6821 = vmatprep.mubr.msk.bf16.mxu1 %vm6968_vm12, %v15296_v52  ;;  %v3788_v43 = vmul.f32 %v3381_v20, %v15192_v17  ;;  %6755 = vmatpush3.bf16.msra.mxu1 %v12747_v25  ;;  %v15363_v10 = vld [vmem:[#allocation155_spill] sm:$0xff] }
 0x36c   : > { %v4956_v57 = vsel %vm12563_vm2, %v4948_v12, %v4955_v28  ;;  %v4149_v48 = vadd.f32 %v15360_v3, %v4121_v33  ;;  %v4082_v29 = vmul.f32 %v3381_v20, %v15012_v11  ;;  %v4390_v49 = vmul.f32 %v3381_v20, %v15020_v39  ;;  %v15362_v12 = vld [vmem:[#allocation147_spill] sm:$0xff]  ;;  %v15364_v33 = vld [vmem:[#allocation166_spill] sm:$0xff] }
 0x36d   : > { %v4947_v62 = vsel %vm12563_vm2, %v15359_v4, %v4946_v38  ;;  %5023 = vst.msk [vmem:[#allocation2 + $0x28] sm:$0xf] %vm4719_vm0, %v4956_v57  ;;  %v4485_v54 = vadd.f32 %v4471_v34, %v4457_v41  ;;  %v3396_v51 = vmul.f32 %v12945_v16, %v3381_v20  ;;  %v3787_v5 = vmul.f32 %v3376_v59, %v15192_v17  ;;  %v15361_v38 = vld [vmem:[#allocation152_spill] sm:$0xff]  ;;  %v15365_v4 = vld [vmem:[#allocation171_spill] sm:$0xff] }
 0x36e   : > { %5022 = vst.msk [vmem:[#allocation2 + $0x24] sm:$0xf] %vm4719_vm0, %v4947_v62  ;;  %5246 = vrot.lane.b32.xlu1 %v12887_v2, %s6971_s6  ;;  %v4081_v0 = vmul.f32 %v3376_v59, %v15012_v11  ;;  %v4261_v26 = vadd.f32 %v4247_v9, %v4149_v48  ;;  %v3395_v37 = vmul.f32 %v12945_v16, %v3376_v59  ;;  %v15366_v62 = vld [vmem:[#allocation156_spill] sm:$0xff]  ;;  %v4230_v48 = vpop.permute.xlu0 %4229 }
 0x36f   : > { %v4389_v28 = vmul.f32 %v3376_v59, %v15020_v39  ;;  %5366 = vrot.lane.b32.xlu0 %v15361_v38, %s6971_s6  ;;  %v4584_v25 = vmul.f32 %v12945_v16, %v4561_v21  ;;  %v4096_v14 = vadd.f32 %v4082_v29, %v15362_v12  ;;  %v4583_v20 = vmul.f32 %v12945_v16, %v4556_v30  ;;  %v4235_v59 = vpop.permute.xlu1 %4234  ;;  %v15367_v29 = vld [vmem:[#allocation241_spill] sm:$0xff]  ;;  %v15371_v12 = vld [vmem:[#allocation242_spill] sm:$0xff] }
 0x370   : > { %v4095_v2 = vadd.f32 %v4081_v0, %v15363_v10  ;;  %v3802_v32 = vadd.f32 %v3788_v43, %v3774_v23  ;;  %6756 = vmatprep.subr.bf16.mxu1 %v15364_v33  ;;  %v4404_v41 = vadd.f32 %v4390_v49, %v13063_v60  ;;  %v3900_v9 = vmul.f32 %v12945_v16, %v3885_v40  ;;  %v15372_v10 = vld [vmem:[#allocation38_spill] sm:$0xff] }
 0x371   : > { %v4598_v1 = vadd.f32 %v4584_v25, %v4486_v46  ;;  %v4418_v39 = vmul.f32 %v3885_v40, %v15012_v11  ;;  %6757 = vmatpush3.bf16.msra.mxu1 %v15365_v4  ;;  %v4597_v21 = vadd.f32 %v4583_v20, %v4485_v54  ;;  %v13158_v57 = vadd.f32 %v3396_v51, %v15366_v62 }
 0x372   : > { %5147 = vrot.lane.b32.xlu1 %v15361_v38, %s6969_s15  ;;  %v3801_v23 = vadd.f32 %v3787_v5, %v3773_v15  ;;  %v4403_v30 = vadd.f32 %v4389_v28, %v13073_v22  ;;  %v3914_v34 = vadd.f32 %v3900_v9, %v3802_v32  ;;  %v3899_v3 = vmul.f32 %v12945_v16, %v3880_v13  ;;  %v15368_v22 = vld [vmem:[#allocation162_spill] sm:$0xff] }
 0x373   : > { %v4612_v46 = vmax.f32 %v4262_v53, %v4598_v1  ;;  %v4432_v60 = vadd.f32 %v4418_v39, %v4404_v41  ;;  %6873 = vmatprep.subr.bf16.mxu1 %v15296_v52  ;;  %v4611_v40 = vmax.f32 %v4261_v26, %v4597_v21  ;;  %v4417_v43 = vmul.f32 %v3880_v13, %v15012_v11  ;;  %v15369_v5 = vld [vmem:[#allocation26_spill] sm:$0xff]  ;;  %v4571_v55 = vpop.permute.xlu1 %4570 }
 0x374   : > { %v4124_v49 = vadd.f32 %v15367_v29, %v4096_v14  ;;  %v4250_v54 = vmul.f32 %v12945_v16, %v4235_v59  ;;  %v13170_v53 = vadd.f32 %v3395_v37, %v15368_v22  ;;  %v13172_v51 = vadd.f32 %v3899_v3, %v3801_v23  ;;  %v15370_v13 = vld [vmem:[#allocation130_spill] sm:$0xff]  ;;  %v15376_v23 = vld [vmem:[#allocation163_spill] sm:$0xff] }
 0x375   : > { %v4626_v15 = vmax.f32 %v3926_v42, %v4612_v46  ;;  %v4460_v0 = vadd.f32 %v15369_v5, %v4432_v60  ;;  %v4625_v26 = vmax.f32 %v3925_v63, %v4611_v40  ;;  %v4431_v11 = vadd.f32 %v4417_v43, %v4403_v30  ;;  %v15373_v9 = vld [vmem:[#allocation158_spill] sm:$0xff]  ;;  %v5042_v4 = vld [vmem:[#allocation2 + $0x24] sm:$0xf]  ;;  %v13199_v46 = vld [vmem:[#allocation2 + $0x28] sm:$0xf] }
 0x376   : > { %v4152_v28 = vadd.f32 %v15370_v13, %v4124_v49  ;;  %v4474_v25 = vmul.f32 %v4235_v59, %v15192_v17  ;;  %v3928_v42 = vmax.f32 %v13158_v57, %v3914_v34  ;;  %v3927_v37 = vmax.f32 %v13170_v53, %v13172_v51  ;;  %v4566_v59 = vpop.permute.xlu0 %4565  ;;  %v15377_v34 = vld [vmem:[#allocation94_spill] sm:$0xff]  ;;  %v15378_v3 = vld [vmem:[#allocation23_spill] sm:$0xff] }
 0x377   : > { %v4688_v47 = vadd.f32 %v13183_v24, %v4626_v15  ;;  %v4123_v18 = vadd.f32 %v15371_v12, %v4095_v2  ;;  %v4687_v63 = vadd.f32 %v13183_v24, %v4625_v26  ;;  %v4459_v20 = vadd.f32 %v15372_v10, %v4431_v11  ;;  %v15381_v49 = vld [vmem:[#allocation151_spill] sm:$0xff] }
 0x378   : > { %v4264_v14 = vadd.f32 %v4250_v54, %v4152_v28  ;;  %v4249_v32 = vmul.f32 %v12945_v16, %v4230_v48  ;;  %v4488_v1 = vadd.f32 %v4474_v25, %v4460_v0  ;;  %v4473_v41 = vmul.f32 %v4230_v48, %v15192_v17  ;;  %v15379_v17 = vld [vmem:[#allocation19_spill] sm:$0xff] }
 0x379   : > { %v4702_v33 = vmax.f32 %v4688_v47, 0.0  ;;  %v15374_v39 = vand.u32 7, %v15373_v9  ;;  %v4701_v21 = vmax.f32 %v4687_v63, 0.0  ;;  %v15375_v62 = vmov 1.0   ;;  %v15382_v13 = vld [vmem:[#allocation95_spill] sm:$0xff] }
 0x37a   : > { %v4586_v57 = vmul.f32 %v12945_v16, %v4571_v55  ;;  %v369_v30 = vand.u32 7, %v15376_v23  ;;  %v4151_v40 = vadd.f32 %v15378_v3, %v4123_v18  ;;  %v4487_v43 = vadd.f32 %v4473_v41, %v4459_v20 }
 0x37b   : > { %vm462_vm6 = vcmp.eq.s32.totalorder %v15374_v39, 7  ;;  %v4716_v60 = vmul.f32 %v4702_v33, %v15377_v34  ;;  %v15380_v48 = vmax.f32 %v15379_v17, 0.0  ;;  %v4715_v54 = vmul.f32 %v4701_v21, %v15381_v49 }
 0x37c   : > { %v476_v2 = vsel %vm462_vm6, 0.0, %v15375_v62  ;;  %v4600_v15 = vadd.f32 %v4586_v57, %v4488_v1  ;;  %vm461_vm7 = vcmp.eq.s32.totalorder %v369_v30, 7  ;;  %v4585_v22 = vmul.f32 %v12945_v16, %v4566_v59 }
 0x37d   : > { %v4676_v29 = vmul.f32 %v15380_v48, %v476_v2  ;;  %v6659_v53 = vpack.c.bf16 %v4716_v60, %v4716_v60  ;;  %v475_v5 = vsel %vm461_vm7, 0.0, %v15375_v62  ;;  %v13209_v0 = vcombine.low %v5042_v4, %v13199_v46 }
 0x37e   : > { %v6658_v26 = vpack.c.bf16 %v4715_v54, %v4715_v54  ;;  %v4614_v11 = vmax.f32 %v4264_v14, %v4600_v15  ;;  %v15383_v28 = vmax.f32 %v15382_v13, 0.0  ;;  %v4599_v47 = vadd.f32 %v4585_v22, %v4487_v43  ;;  %v13251_v54 = vld [vmem:[#allocation3 + $0x20] sm:$0xf] }
 0x37f   : > { %v6647_v51 = vpack.c.bf16 %v4676_v29, %v4676_v29  ;;  %v4968_v12 = vshrl.u32 %v6659_v53, 16  ;;  %v4263_v18 = vadd.f32 %v4249_v32, %v4151_v40  ;;  %v5296_v55 = vshrl.u32 %v13047_v45, 16 }
 0x380   : > { %v4675_v25 = vmul.f32 %v15383_v28, %v475_v5  ;;  %v5300_v16 = vshll.u32 %v13209_v0, 16  ;;  %v4971_v63 = vshll.u32 %v6659_v53, 16  ;;  %v4959_v10 = vshrl.u32 %v6658_v26, 16 }
 0x381   : > { %4823 = vst.msk [vmem:[#allocation3 + $0x38] sm:$0xf] %vm4719_vm0, %v6647_v51  ;;  %v4628_v20 = vmax.f32 %v3928_v42, %v4614_v11  ;;  %v13216_v1 = vrot.slane %v4968_v12, 7  ;;  %v4613_v41 = vmax.f32 %v4263_v18, %v4599_v47  ;;  %v5298_v14 = vor.u32 %v5296_v55, %v13067_v27  ;;  %v5030_v51 = vld [vmem:[#allocation2 + $0x3c] sm:$0x1] }
 0x382   : > { %v6646_v33 = vpack.c.bf16 %v4675_v25, %v4675_v25  ;;  %v13219_v9 = vrot.slane %v5300_v16, 1  ;;  %v4961_v39 = vrot.slane %v4959_v10, 7  ;;  %v4962_v59 = vshll.u32 %v6658_v26, 16 }
 0x383   : > { %v4690_v32 = vadd.f32 %v13183_v24, %v4628_v20  ;;  %v13224_v21 = vcombine.low %v13030_v7, %v5042_v4  ;;  %v4973_v62 = vor.u32 %v4971_v63, %v13216_v1  ;;  %v4627_v42 = vmax.f32 %v3927_v37, %v4613_v41  ;;  %v6950_v20 = vld [vmem:[#allocation3 + $0xc] sm:$0xf] }
 0x384   : > { %4822 = vst.msk [vmem:[#allocation3 + $0x34] sm:$0xf] %vm4719_vm0, %v6646_v33  ;;  %v13229_v57 = vsel %vm5158_vm4, %v5298_v14, %v13219_v9  ;;  %v4957_v27 = vrot.slane %v13092_v8, 4  ;;  %v4964_v23 = vor.u32 %v4962_v59, %v4961_v39  ;;  %v4966_v30 = vrot.slane %v4961_v39, 4  ;;  %v6951_v33 = vld [vmem:[#allocation3 + $0x10] sm:$0xf] }
 0x385   : > { %v4704_v34 = vmax.f32 %v4690_v32, 0.0  ;;  %5334 = vrot.lane.b32.xlu0 %v13229_v57, %s6969_s15  ;;  %v4689_v60 = vadd.f32 %v13183_v24, %v4627_v42  ;;  %v5187_v7 = vshrl.u32 %v13070_v58, 16  ;;  %v5191_v4 = vshll.u32 %v13224_v21, 16  ;;  %v13244_v24 = vld [vmem:[#allocation3 + $0x24] sm:$0xf]  ;;  %v15384_v32 = vld [vmem:[#allocation205_spill] sm:$0xff] }
 0x386   : > { %v4965_v37 = vsel %vm12563_vm2, %v4957_v27, %v4964_v23  ;;  %v4974_v3 = vsel %vm12563_vm2, %v4966_v30, %v4973_v62  ;;  %v4975_v53 = vrot.slane %v13216_v1, 4  ;;  %v5304_v63 = vshrl.u32 %v13209_v0, 16 }
 0x387   : > { %v4718_v40 = vmul.f32 %v4704_v34, %v476_v2  ;;  %5024 = vst.msk [vmem:[#allocation2 + $0x2c] sm:$0xf] %vm4719_vm0, %v4965_v37  ;;  %5025 = vst.msk [vmem:[#allocation2 + $0x30] sm:$0xf] %vm4719_vm0, %v4974_v3  ;;  %v4703_v8 = vmax.f32 %v4689_v60, 0.0  ;;  %v5189_v43 = vor.u32 %v5187_v7, %v13089_v36  ;;  %v5193_v17 = vrot.slane %v5191_v4, 1 }
 0x388   : > { %v13259_v36 = vcombine.low %v13251_v54, %v13244_v24  ;;  %v5195_v10 = vshrl.u32 %v13224_v21, 16  ;;  %v13276_v1 = vcombine.low %v6950_v20, %v6951_v33  ;;  %v5610_v62 = vshll.u32 %v15384_v32, 16  ;;  %v13305_v7 = vld [vmem:[#allocation3 + $0x2c] sm:$0xf]  ;;  %v13314_v3 = vld [vmem:[#allocation3 + $0x28] sm:$0xf] }
 0x389   : > { %v6661_v48 = vpack.c.bf16 %v4718_v40, %v4718_v40  ;;  %5351 = vrot.lane.b32.xlu0 %v13224_v21, %s6970_s30  ;;  %v4717_v29 = vmul.f32 %v4703_v8, %v475_v5  ;;  %v13249_v49 = vsel %vm5158_vm4, %v5189_v43, %v5193_v17  ;;  %v5608_v4 = vshrl.u32 %v15384_v32, 16  ;;  %v15385_v20 = vld [vmem:[#allocation24_spill] sm:$0xff] }
 0x38a   : > { %5225 = vrot.lane.b32.xlu1 %v13249_v49, %s6970_s30  ;;  %6822 = vmatmul.mubr.msk.bf16.gmra.mxu1 %vm5392_vm5, %v13249_v49  ;;  %v5197_v59 = vor.u32 %v5195_v10, %v5193_v17  ;;  %v5614_v60 = vshll.u32 %v13276_v1, 16  ;;  %v5612_v19 = vrot.slane %v5610_v62, 1  ;;  %v13318_v17 = vcombine.low %v13314_v3, %v13305_v7  ;;  %v5142_v62 = vpop.permute.xlu1 %5141 }
 0x38b   : > { %v4986_v2 = vshrl.u32 %v6661_v48, 16  ;;  %v6660_v15 = vpack.c.bf16 %v4717_v29, %v4717_v29  ;;  %6825 = vmatprep.mubr.msk.bf16.mxu1 %vm6968_vm12, %v15296_v52  ;;  %v4989_v5 = vshll.u32 %v6661_v48, 16  ;;  %v13354_v10 = vld [vmem:[#allocation3 + $0x34] sm:$0xf] }
 0x38c   : > { %v13308_v37 = vrot.slane %v5614_v60, 1  ;;  %v5613_v40 = vor.u32 %v5612_v19, %v5608_v4  ;;  %v5525_v19 = vshll.u32 %v15385_v20, 16 }
 0x38d   : > { %v4988_v22 = vrot.slane %v4986_v2, 7  ;;  %5368 = vrot.lane.b32.xlu0 %v13259_v36, %s6971_s6  ;;  %v4977_v26 = vshrl.u32 %v6660_v15, 16  ;;  %v4980_v13 = vshll.u32 %v6660_v15, 16 }
 0x38e   : > { %5248 = vrot.lane.b32.xlu1 %v13047_v45, %s6971_s6  ;;  %v5044_v28 = vld [vmem:[#allocation2 + $0x2c] sm:$0xf]  ;;  %v5045_v25 = vld [vmem:[#allocation2 + $0x30] sm:$0xf]  ;;  %v5617_v2 = vsel %vm5158_vm4, %v5613_v40, %v13308_v37  ;;  %v15387_v40 = vld [vmem:[#allocation175_spill] sm:$0xff] }
 0x38f   : > { %v4993_v11 = vrot.slane %v4988_v22, 4  ;;  %v4991_v47 = vor.u32 %v4989_v5, %v4988_v22  ;;  %v4979_v12 = vrot.slane %v4977_v26, 7  ;;  %v13269_v18 = vcombine.low %v5044_v28, %v5045_v25 }
 0x390   : > { %v13272_v55 = vcombine.low %v13199_v46, %v5044_v28  ;;  %v5306_v46 = vor.u32 %v5304_v63, %v13219_v9 }
 0x391   : > { %v5031_v16 = vsel %vm5029_vm9, %v4993_v11, %v5030_v51  ;;  %v4982_v45 = vor.u32 %v4980_v13, %v4979_v12  ;;  %v4984_v41 = vrot.slane %v4979_v12, 4  ;;  %v5308_v14 = vshll.u32 %v13269_v18, 16 }
 0x392   : > { %5032 = vst [vmem:[#allocation2 + $0x3c] sm:$0x1] %v5031_v16  ;;  %v5199_v39 = vshll.u32 %v13272_v55, 16  ;;  %5149 = vrot.lane.b32.xlu1 %v13259_v36, %s6969_s15  ;;  %v5312_v15 = vshrl.u32 %v13269_v18, 16 }
 0x393   : > { %v4983_v42 = vsel %vm12563_vm2, %v4975_v53, %v4982_v45  ;;  %v4992_v27 = vsel %vm12563_vm2, %v4984_v41, %v4991_v47  ;;  %v5310_v23 = vrot.slane %v5308_v14, 1  ;;  %v5203_v53 = vshrl.u32 %v13272_v55, 16  ;;  %v6933_v45 = vld [vmem:[#allocation2 + $0x40] ss:$0 sps:$4 sm:$0x11]  }
 0x394   : > { %v5201_v30 = vrot.slane %v5199_v39, 1  ;;  %5026 = vst.msk [vmem:[#allocation2 + $0x34] sm:$0xf] %vm4719_vm0, %v4983_v42  ;;  %5027 = vst.msk [vmem:[#allocation2 + $0x38] sm:$0xf] %vm4719_vm0, %v4992_v27  ;;  %v5388_v4 = vshll.u32 %v6933_v45, 16 }
 0x395   : > { %v13291_v34 = vsel %vm5158_vm4, %v5306_v46, %v5310_v23  ;;  %v5314_v5 = vor.u32 %v5312_v15, %v5310_v23  ;;  %v13362_v41 = vld [vmem:[#allocation3 + $0x30] sm:$0xf]  ;;  %v6952_v27 = vld [vmem:[#allocation3 + $0x14] sm:$0xf]  ;;  %v6953_v23 = vld [vmem:[#allocation3 + $0x18] sm:$0xf] }
 0x396   : > { %v13294_v9 = vsel %vm5158_vm4, %v5197_v59, %v5201_v30  ;;  %5336 = vrot.lane.b32.xlu0 %v13291_v34, %s6969_s15  ;;  %v5205_v11 = vor.u32 %v5203_v53, %v5201_v30  ;;  %v13366_v14 = vcombine.low %v13362_v41, %v13354_v10  ;;  %v15386_v46 = vld [vmem:[#allocation53_spill] sm:$0xff]  ;;  %v13369_v30 = vcombine.low %v6952_v27, %v6953_v23  ;;  %v15388_v45 = vld [vmem:[#allocation167_spill] sm:$0xff] }
 0x397   : > { %5227 = vrot.lane.b32.xlu1 %v13294_v9, %s6970_s30  ;;  %6826 = vmatmul.mubr.msk.bf16.gmra.mxu1 %vm5392_vm5, %v13294_v9  ;;  %v5520_v59 = vshll.u32 %v15386_v46, 16  ;;  %vm5407_vm0 = vcmask 523264   ;;  %v5618_v27 = vshrl.u32 %v13276_v1, 16 }
 0x398   : > { %6829 = vmatprep.mubr.msk.bf16.mxu1 %vm6968_vm12, %v15296_v52 }
 0x399   : > { %v5067_v22 = vld [vmem:[#allocation2 + $0x3c] sm:$0xf] }
 0x39a   : > { %5353 = vrot.lane.b32.xlu0 %v13272_v55, %s6970_s30 }
 0x39b   : > { %5250 = vrot.lane.b32.xlu1 %v13209_v0, %s6971_s6  ;;  %v5046_v8 = vld [vmem:[#allocation2 + $0x34] sm:$0xf]  ;;  %v5063_v43 = vld [vmem:[#allocation2 + $0x38] sm:$0xf] }
 0x39c   : > { %v13320_v48 = vcombine.low %v5046_v8, %v5063_v43  ;;  %v13322_v29 = vcombine.low %v5045_v25, %v5046_v8  ;;  %v13335_v28 = vcombine.low %v5063_v43, %v5067_v22  ;;  %v5522_v8 = vrot.slane %v5520_v59, 1 }
 0x39d   : > { %v5518_v22 = vshrl.u32 %v15386_v46, 16  ;;  %v5394_v59 = vsel %vm5392_vm5, %v15388_v45, %v5142_v62 }
 0x39e   : > { %5370 = vrot.lane.b32.xlu0 %v13318_v17, %s6971_s6  ;;  %v5316_v0 = vshll.u32 %v13320_v48, 16  ;;  %v5207_v51 = vshll.u32 %v13322_v29, 16  ;;  %v5211_v12 = vshrl.u32 %v13322_v29, 16  ;;  %v5380_v16 = vshll.u32 %v13335_v28, 16 }
 0x39f   : > { %5661 = vrot.lane.b32.xlu1 %v5617_v2, %s6969_s15  ;;  %v5384_v43 = vshrl.u32 %v13335_v28, 16 }
 0x3a0   : > { %v13333_v26 = vrot.slane %v5316_v0, 1  ;;  %v5209_v13 = vrot.slane %v5207_v51, 1  ;;  %v5382_v39 = vrot.slane %v5380_v16, 1  ;;  %v5621_v0 = vshll.u32 %v13369_v30, 16 }
 0x3a1   : > { %v5523_v16 = vor.u32 %v5522_v8, %v5518_v22  ;;  %v5320_v8 = vshrl.u32 %v13320_v48, 16  ;;  %v13432_v22 = vld [vmem:[%s13868_s3 + $0x80] sm:$0xff]  }
 0x3a2   : > { %v13339_v25 = vsel %vm5158_vm4, %v5314_v5, %v13333_v26  ;;  %v13344_v47 = vsel %vm5158_vm4, %v5205_v11, %v5209_v13  ;;  %v5329_v63 = vpop.permute.xlu0 %5328  ;;  %v13358_v33 = vor.u32 %v5211_v12, %v5209_v13  ;;  %v13392_v5 = vrot.slane %v5525_v19, 1 }
 0x3a3   : > { %5355 = vrot.lane.b32.xlu1 %v13322_v29, %s6970_s30  ;;  %5338 = vrot.lane.b32.xlu0 %v13339_v25, %s6969_s15  ;;  %v5446_v15 = vsel %vm5392_vm5, %v15384_v32, %v5329_v63  ;;  %v5386_v11 = vor.u32 %v5384_v43, %v5382_v39  ;;  %v5390_v13 = vrot.slane %v5388_v4, 1  ;;  %v6934_v63 = vld [vmem:[#allocation2 + $0x3c] ss:$0 sps:$4 sm:$0x11]   ;;  %v13400_v23 = vrot.slane %v5621_v0, 1 }
 0x3a4   : > { %6830 = vmatmul.mubr.msk.bf16.gmra.mxu1 %vm5392_vm5, %v13344_v47  ;;  %v13375_v60 = vsel %vm5158_vm4, %v13358_v33, %v5382_v39  ;;  %v5528_v39 = vsel %vm5158_vm4, %v5523_v16, %v13392_v5  ;;  %v5324_v43 = vshll.u32 %v6934_v63, 16 }
 0x3a5   : > { %6833 = vmatprep.mubr.msk.bf16.mxu1 %vm6968_vm12, %v15296_v52  ;;  %v13408_v4 = vsel %vm5158_vm4, %v5386_v11, %v5390_v13 }
 0x3a6   : > { %v5346_v42 = vpop.permute.xlu0 %5345 }
 0x3a7   : > { %5675 = vrot.lane.b32.xlu1 %v15385_v20, %s6970_s30  ;;  %5151 = vrot.lane.b32.xlu0 %v13318_v17, %s6969_s15  ;;  %v5466_v53 = vsel %vm5407_vm0, %v5446_v15, %v5346_v42  ;;  %v5322_v15 = vor.u32 %v5320_v8, %v13333_v26  ;;  %v6937_v26 = vld [vmem:[#allocation2 + $0x38] ss:$0 sps:$4 sm:$0x11]  }
 0x3a8   : > { %v5215_v13 = vshll.u32 %v6937_v26, 16 }
 0x3a9   : > { %v5220_v2 = vpop.permute.xlu1 %5219 }
 0x3aa   : > { %v5363_v51 = vpop.permute.xlu0 %5362  ;;  %v5409_v19 = vsel %vm5407_vm0, %v5394_v59, %v5220_v2  ;;  %v13421_v2 = vld [vmem:[%s13868_s3 + $0x88] sm:$0xff]   ;;  %v5217_v45 = vrot.slane %v5215_v13, 1  ;;  %v5529_v59 = vshrl.u32 %v15385_v20, 16 }
 0x3ab   : > { %5372 = vrot.lane.b32.xlu1 %v13366_v14, %s6971_s6  ;;  %5500 = vrot.lane.b32.xlu0 %v15387_v40, %s6969_s15  ;;  %v5480_v12 = vsel %vm5422_vm10, %v5466_v53, %v5363_v51  ;;  %v5620_v40 = vor.u32 %v5618_v27, %v13308_v37  ;;  %v5326_v37 = vrot.slane %v5324_v43, 1  ;;  %v13442_v53 = vld [vmem:[#allocation3 + $0x38] sm:$0xf] }
 0x3ac   : > { %6834 = vmatmul.mubr.msk.bf16.gmra.mxu1 %vm5392_vm5, %v13375_v60  ;;  %5985 = vmatprep.mubr.bf16.mxu0 %v5480_v12  ;;  %v5533_v12 = vshll.u32 %v15331_v6, 16  ;;  %v13463_v27 = vsel %vm5158_vm4, %v13358_v33, %v5217_v45  ;;  %v5531_v33 = vor.u32 %v5529_v59, %v13392_v5  ;;  %v5537_v5 = vshrl.u32 %v15331_v6, 16 }
 0x3ad   : > { %6837 = vmatprep.mubr.msk.bf16.mxu1 %vm6968_vm12, %v15296_v52  ;;  %v5243_v42 = vpop.permute.xlu1 %5242  ;;  %v13438_v0 = vsel %vm5158_vm4, %v5322_v15, %v5326_v37  ;;  %v5541_v37 = vshll.u32 %v15361_v38, 16  ;;  %v5545_v59 = vshrl.u32 %v15361_v38, 16 }
 0x3ae   : > { %v5424_v62 = vsel %vm5422_vm10, %v5409_v19, %v5243_v42  ;;  %v5535_v19 = vrot.slane %v5533_v12, 1 }
 0x3af   : > { %5689 = vrot.lane.b32.xlu1 %v12953_v56, %s6971_s6  ;;  %5229 = vrot.lane.b32.xlu0 %v13344_v47, %s6970_s30 }
 0x3b0   : > { %5986 = vmatmul.mubr.bf16.vlgmr.msra.gmra.mxu0 %v5424_v62 }
 0x3b1   : > { %6842 = vmatpush3.bf16.msra.mxu0 %v13421_v2  ;;  %v5144_v11 = vpop.permute.xlu1 %5143 }
 0x3b2   : > { %6843 = vmatprep.subr.bf16.mxu0 %v15296_v52 }
 0x3b3   : > { %5591 = vrot.lane.b32.xlu1 %v15384_v32, %s6971_s6  ;;  %5577 = vrot.lane.b32.xlu0 %v5528_v39, %s6970_s30  ;;  %v5624_v32 = vsel %vm5158_vm4, %v5620_v40, %v13400_v23  ;;  %v6956_v39 = vld [vmem:[#allocation3 + $0x1c] sm:$0xf] }
 0x3b4   : > { %6838 = vmatmul.mubr.msk.bf16.gmra.mxu1 %vm5392_vm5, %v13408_v4  ;;  %v13466_v62 = vcombine.low %v6956_v39, %v13251_v54 }
 0x3b5   : > { %6844 = vmatpush3.bf16.msra.mxu0 %v13432_v22 }
 0x3b6   : > { %v5628_v26 = vshll.u32 %v13466_v62, 16 }
 0x3b7   : > { %5663 = vrot.lane.b32.xlu1 %v5624_v32, %s6969_s15  ;;  %5252 = vrot.lane.b32.xlu0 %v13269_v18, %s6971_s6  ;;  %v5068_v18 = vld [vmem:[#allocation3 + $0x3c] sm:$0xf] }
 0x3bb   : > { %5357 = vrot.lane.b32.xlu1 %v13335_v28, %s6970_s30  ;;  %5340 = vrot.lane.b32.xlu0 %v13438_v0, %s6969_s15  ;;  %v13449_v28 = vcombine.low %v13442_v53, %v5068_v18  ;;  %v5543_v18 = vrot.slane %v5541_v37, 1 }
 0x3bc   : > { %v5331_v51 = vpop.permute.xlu0 %5330 }
 0x3bd   : > { %v5449_v42 = vsel %vm5392_vm5, %v13276_v1, %v5331_v51  ;;  %v5625_v51 = vshrl.u32 %v13369_v30, 16 }
 0x3bf   : > { %5677 = vrot.lane.b32.xlu1 %v15331_v6, %s6970_s30  ;;  %5153 = vrot.lane.b32.xlu0 %v13366_v14, %s6969_s15  ;;  %v5627_v13 = vor.u32 %v5625_v51, %v13400_v23 }
 0x3c0   : > { %v5348_v16 = vpop.permute.xlu0 %5347 }
 0x3c1   : > { %v5468_v40 = vsel %vm5407_vm0, %v5449_v42, %v5348_v16 }
 0x3c2   : > { %v5222_v63 = vpop.permute.xlu1 %5221 }
 0x3c3   : > { %5374 = vrot.lane.b32.xlu1 %v13449_v28, %s6971_s6  ;;  %5502 = vrot.lane.b32.xlu0 %v12953_v56, %s6969_s15  ;;  %v5396_v56 = vsel %vm5392_vm5, %v12757_v44, %v5144_v11  ;;  %v13481_v44 = vsel %vm5158_vm4, %v5531_v33, %v5535_v19  ;;  %v5630_v11 = vrot.slane %v5628_v26, 1  ;;  %v5557_v26 = vshll.u32 %v13318_v17, 16 }
 0x3c4   : > { %v5411_v43 = vsel %vm5407_vm0, %v5396_v56, %v5222_v63  ;;  %v5549_v63 = vshll.u32 %v13259_v36, 16 }
 0x3c5   : > { %v5631_v16 = vsel %vm5158_vm4, %v5627_v13, %v5630_v11 }
 0x3c6   : > { %v5365_v8 = vpop.permute.xlu0 %5364  ;;  %v5245_v32 = vpop.permute.xlu1 %5244  ;;  %v5551_v42 = vrot.slane %v5549_v63, 1  ;;  %v13552_v63 = vcombine.low %v13354_v10, %v13442_v53  ;;  %v5561_v10 = vshrl.u32 %v13318_v17, 16 }
 0x3c7   : > { %5691 = vrot.lane.b32.xlu1 %v13100_v31, %s6971_s6  ;;  %5231 = vrot.lane.b32.xlu0 %v13463_v27, %s6970_s30  ;;  %v5483_v15 = vsel %vm5422_vm10, %v5468_v40, %v5365_v8  ;;  %v5427_v54 = vsel %vm5422_vm10, %v5411_v43, %v5245_v32  ;;  %v13524_v32 = vcombine.low %v13305_v7, %v13362_v41 }
 0x3c8   : > { %5993 = vmatprep.mubr.bf16.mxu0 %v5483_v15 }
 0x3c9   : > { %5994 = vmatmul.mubr.bf16.gmra.mxu0 %v5427_v54  ;;  %v5642_v41 = vshll.u32 %v13524_v32, 16 }
 0x3ca   : > { %v5146_v23 = vpop.permute.xlu1 %5145 }
 0x3cb   : > { %5593 = vrot.lane.b32.xlu1 %v13276_v1, %s6971_s6  ;;  %5579 = vrot.lane.b32.xlu0 %v13481_v44, %s6970_s30  ;;  %v5539_v1 = vor.u32 %v5537_v5, %v5535_v19  ;;  %v5547_v19 = vor.u32 %v5545_v59, %v5543_v18  ;;  %v5398_v15 = vsel %vm5392_vm5, %v12916_v61, %v5146_v23  ;;  %v5565_v23 = vshll.u32 %v13366_v14, 16 }
 0x3cd   : > { %v13494_v12 = vsel %vm5158_vm4, %v5539_v1, %v5543_v18  ;;  %v13517_v8 = vsel %vm5158_vm4, %v5547_v19, %v5551_v42  ;;  %v5559_v18 = vrot.slane %v5557_v26, 1  ;;  %v5567_v53 = vrot.slane %v5565_v23, 1 }
 0x3cf   : > { %5504 = vrot.lane.b32.xlu1 %v13100_v31, %s6969_s15  ;;  %5254 = vrot.lane.b32.xlu0 %v13320_v48, %s6971_s6  ;;  %v13501_v31 = vcombine.low %v13244_v24, %v13314_v3  ;;  %v5632_v24 = vshrl.u32 %v13466_v62, 16 }
 0x3d1   : > { %v5635_v48 = vshll.u32 %v13501_v31, 16  ;;  %v5634_v56 = vor.u32 %v5632_v24, %v5630_v11  ;;  %v5639_v51 = vshrl.u32 %v13501_v31, 16  ;;  %v5644_v11 = vrot.slane %v5642_v41, 1 }
 0x3d3   : > { %5581 = vrot.lane.b32.xlu1 %v13494_v12, %s6970_s30  ;;  %5665 = vrot.lane.b32.xlu0 %v5631_v16, %s6969_s15  ;;  %v5637_v3 = vrot.slane %v5635_v48, 1 }
 0x3d5   : > { %v5638_v43 = vsel %vm5158_vm4, %v5634_v56, %v5637_v3  ;;  %v5641_v13 = vor.u32 %v5639_v51, %v5637_v3  ;;  %v6941_v56 = vld [vmem:[#allocation3 + $0x3c] ss:$0 sps:$4 sm:$0x11]  }
 0x3d6   : > { %v5333_v45 = vpop.permute.xlu0 %5332 }
 0x3d7   : > { %5595 = vrot.lane.b32.xlu1 %v13369_v30, %s6971_s6  ;;  %5679 = vrot.lane.b32.xlu0 %v15361_v38, %s6970_s30  ;;  %v5645_v48 = vsel %vm5158_vm4, %v5641_v13, %v5644_v11 }
 0x3da   : > { %v5350_v40 = vpop.permute.xlu0 %5349 }
 0x3db   : > { %5506 = vrot.lane.b32.xlu1 %v13249_v49, %s6969_s15  ;;  %5693 = vrot.lane.b32.xlu0 %v13249_v49, %s6971_s6  ;;  %v5452_v49 = vsel %vm5392_vm5, %v13369_v30, %v5333_v45  ;;  %v5553_v30 = vshrl.u32 %v13259_v36, 16  ;;  %v5646_v45 = vshrl.u32 %v13524_v32, 16 }
 0x3dc   : > { %v5224_v39 = vpop.permute.xlu1 %5223  ;;  %v5470_v54 = vsel %vm5407_vm0, %v5452_v49, %v5350_v40  ;;  %v6940_v40 = vld [vmem:[#allocation3 + $0x38] ss:$0 sps:$4 sm:$0x11]  }
 0x3dd   : > { %v5413_v5 = vsel %vm5407_vm0, %v5398_v15, %v5224_v39  ;;  %v5555_v1 = vor.u32 %v5553_v30, %v5551_v42  ;;  %v5563_v42 = vor.u32 %v5561_v10, %v5559_v18  ;;  %v5648_v24 = vor.u32 %v5646_v45, %v5644_v11 }
 0x3de   : > { %v5573_v15 = vshll.u32 %v6940_v40, 16 }
 0x3df   : > { %5583 = vrot.lane.b32.xlu1 %v13517_v8, %s6970_s30  ;;  %5667 = vrot.lane.b32.xlu0 %v5638_v43, %s6969_s15  ;;  %v13548_v16 = vsel %vm5158_vm4, %v5555_v1, %v5559_v18  ;;  %v13571_v3 = vsel %vm5158_vm4, %v5563_v42, %v5567_v53 }
 0x3e0   : > { %v5247_v33 = vpop.permute.xlu1 %5246  ;;  %v5575_v11 = vrot.slane %v5573_v15, 1 }
 0x3e1   : > { %v5367_v37 = vpop.permute.xlu0 %5366  ;;  %v5430_v61 = vsel %vm5422_vm10, %v5413_v5, %v5247_v33  ;;  %v5569_v33 = vshrl.u32 %v13366_v14, 16 }
 0x3e2   : > { %v5486_v7 = vsel %vm5422_vm10, %v5470_v54, %v5367_v37  ;;  %v5653_v37 = vshrl.u32 %v13552_v63, 16 }
 0x3e3   : > { %5597 = vrot.lane.b32.xlu1 %v13466_v62, %s6971_s6  ;;  %5681 = vrot.lane.b32.xlu0 %v13259_v36, %s6970_s30  ;;  %v13585_v5 = vor.u32 %v5569_v33, %v5567_v53 }
 0x3e4   : > { %6001 = vmatprep.mubr.bf16.mxu0 %v5486_v7  ;;  %v5148_v43 = vpop.permute.xlu1 %5147 }
 0x3e5   : > { %6002 = vmatmul.mubr.bf16.gmra.mxu0 %v5430_v61  ;;  %v5400_v18 = vsel %vm5392_vm5, %v13070_v58, %v5148_v43 }
 0x3e7   : > { %5508 = vrot.lane.b32.xlu1 %v13294_v9, %s6969_s15  ;;  %5695 = vrot.lane.b32.xlu0 %v13294_v9, %s6971_s6  ;;  %v5649_v9 = vshll.u32 %v13552_v63, 16 }
 0x3e9   : > { %v5651_v59 = vrot.slane %v5649_v9, 1 }
 0x3eb   : > { %5585 = vrot.lane.b32.xlu1 %v13548_v16, %s6970_s30  ;;  %5669 = vrot.lane.b32.xlu0 %v5645_v48, %s6969_s15  ;;  %v5652_v39 = vsel %vm5158_vm4, %v5648_v24, %v5651_v59  ;;  %v5655_v61 = vor.u32 %v5653_v37, %v5651_v59 }
 0x3ef   : > { %5599 = vrot.lane.b32.xlu1 %v13501_v31, %s6971_s6  ;;  %5683 = vrot.lane.b32.xlu0 %v13318_v17, %s6970_s30 }
 0x3f3   : > { %5510 = vrot.lane.b32.xlu1 %v13344_v47, %s6969_s15  ;;  %5697 = vrot.lane.b32.xlu0 %v13344_v47, %s6971_s6  ;;  %v5657_v47 = vshll.u32 %v6941_v56, 16 }
 0x3f5   : > { %v5659_v30 = vrot.slane %v5657_v47, 1 }
 0x3f7   : > { %v5335_v19 = vpop.permute.xlu0 %5334  ;;  %5587 = vrot.lane.b32.xlu1 %v13571_v3, %s6970_s30  ;;  %5671 = vrot.lane.b32.xlu0 %v5652_v39, %s6969_s15  ;;  %v5660_v58 = vsel %vm5158_vm4, %v5655_v61, %v5659_v30 }
 0x3f8   : > { %v5455_v26 = vsel %vm5392_vm5, %v13466_v62, %v5335_v19 }
 0x3fb   : > { %v5352_v49 = vpop.permute.xlu0 %5351  ;;  %5601 = vrot.lane.b32.xlu1 %v13524_v32, %s6971_s6  ;;  %5685 = vrot.lane.b32.xlu0 %v13366_v14, %s6970_s30 }
 0x3fc   : > { %v5226_v54 = vpop.permute.xlu1 %5225  ;;  %v5472_v7 = vsel %vm5407_vm0, %v5455_v26, %v5352_v49 }
 0x3fd   : > { %v5415_v62 = vsel %vm5407_vm0, %v5400_v18, %v5226_v54 }
 0x3ff   : > { %v5369_v41 = vpop.permute.xlu0 %5368  ;;  %5512 = vrot.lane.b32.xlu1 %v13463_v27, %s6969_s15  ;;  %5699 = vrot.lane.b32.xlu0 %v13375_v60, %s6971_s6  ;;  %v5576_v27 = vsel %vm5158_vm4, %v13585_v5, %v5575_v11 }
 0x400   : > { %v5489_v51 = vsel %vm5422_vm10, %v5472_v7, %v5369_v41  ;;  %v5249_v1 = vpop.permute.xlu1 %5248  ;;  %v15389_v41 = vld [vmem:[#allocation172_spill] sm:$0xff] }
 0x401   : > { %6009 = vmatprep.mubr.bf16.mxu0 %v5489_v51  ;;  %v5433_v13 = vsel %vm5422_vm10, %v5415_v62, %v5249_v1 }
 0x402   : > { %6010 = vmatmul.mubr.bf16.gmra.mxu0 %v5433_v13 }
 0x403   : > { %5589 = vrot.lane.b32.xlu1 %v5576_v27, %s6970_s30  ;;  %5673 = vrot.lane.b32.xlu0 %v5660_v58, %s6969_s15 }
 0x404   : > { %v5150_v48 = vpop.permute.xlu1 %5149 }
 0x405   : > { %v5402_v45 = vsel %vm5392_vm5, %v13224_v21, %v5150_v48 }
 0x407   : > { %5603 = vrot.lane.b32.xlu1 %v13552_v63, %s6971_s6  ;;  %5687 = vrot.lane.b32.xlu0 %v13449_v28, %s6970_s30 }
 0x408   : > { %v5337_v23 = vpop.permute.xlu0 %5336 }
 0x409   : > { %v5228_v60 = vpop.permute.xlu1 %5227  ;;  %v5458_v53 = vsel %vm5392_vm5, %v13501_v31, %v5337_v23 }
 0x40a   : > { %v5417_v19 = vsel %vm5407_vm0, %v5402_v45, %v5228_v60 }
 0x40b   : > { %5701 = vrot.lane.b32.xlu0 %v13408_v4, %s6971_s6 }
 0x40c   : > { %v5354_v10 = vpop.permute.xlu0 %5353 }
 0x40d   : > { %v5251_v9 = vpop.permute.xlu1 %5250  ;;  %v5474_v59 = vsel %vm5407_vm0, %v5458_v53, %v5354_v10 }
 0x40e   : > { %v5436_v4 = vsel %vm5422_vm10, %v5417_v19, %v5251_v9 }
 0x410   : > { %v5371_v24 = vpop.permute.xlu0 %5370  ;;  %v13615_v56 = vpop.f32.mrf.mxu1 }
 0x411   : > { %v5662_v42 = vpop.permute.xlu1 %5661  ;;  %v5492_v39 = vsel %vm5422_vm10, %v5474_v59, %v5371_v24 }
 0x412   : > { %6017 = vmatprep.mubr.bf16.mxu0 %v5492_v39  ;;  %v6815_v40 = vpop.f32.mrf.mxu1  ;;  %v5770_v61 = vsel %vm5392_vm5, %v15389_v41, %v5662_v42 }
 0x413   : > { %6018 = vmatmul.mubr.bf16.gmra.mxu0 %v5436_v4 }
 0x414   : > { %v13618_v49 = vpop.f32.mrf.mxu1 }
 0x415   : > { %v5356_v43 = vpop.permute.xlu1 %5355  ;;  %v5339_v31 = vpop.permute.xlu0 %5338 }
 0x416   : > { %v6816_v21 = vpop.f32.mrf.mxu1  ;;  %v5461_v33 = vsel %vm5392_vm5, %v13524_v32, %v5339_v31 }
 0x417   : > { %v5476_v37 = vsel %vm5407_vm0, %v5461_v33, %v5356_v43 }
 0x419   : > { %v5676_v47 = vpop.permute.xlu1 %5675  ;;  %v5152_v15 = vpop.permute.xlu0 %5151 }
 0x41a   : > { %v5790_v30 = vsel %vm5407_vm0, %v5770_v61, %v5676_v47  ;;  %v5404_v58 = vsel %vm5392_vm5, %v13272_v55, %v5152_v15 }
 0x41d   : > { %v5373_v54 = vpop.permute.xlu1 %5372  ;;  %v5501_v26 = vpop.permute.xlu0 %5500 }
 0x41e   : > { %v5495_v7 = vsel %vm5422_vm10, %v5476_v37, %v5373_v54  ;;  %v5720_v32 = vsel %vm5392_vm5, %v15386_v46, %v5501_v26 }
 0x41f   : > { %6025 = vmatprep.mubr.bf16.mxu0 %v5495_v7 }
 0x421   : > { %v5690_v18 = vpop.permute.xlu1 %5689  ;;  %v5230_v51 = vpop.permute.xlu0 %5229 }
 0x422   : > { %v5804_v11 = vsel %vm5422_vm10, %v5790_v30, %v5690_v18  ;;  %v5419_v60 = vsel %vm5407_vm0, %v5404_v58, %v5230_v51 }
 0x423   : > { %6184 = vmatprep.mubr.bf16.mxu1 %v5804_v11 }
 0x425   : > { %v5592_v62 = vpop.permute.xlu1 %5591  ;;  %v5578_v1 = vpop.permute.xlu0 %5577 }
 0x426   : > { %v5734_v13 = vsel %vm5407_vm0, %v5720_v32, %v5578_v1 }
 0x427   : > { %v5748_v27 = vsel %vm5422_vm10, %v5734_v13, %v5592_v62 }
 0x428   : > { %6185 = vmatmul.mubr.bf16.vlgmr.msra.gmra.mxu1 %v5748_v27 }
 0x429   : > { %v5664_v48 = vpop.permute.xlu1 %5663  ;;  %v5253_v23 = vpop.permute.xlu0 %5252  ;;  %6875 = vmatpush3.bf16.msra.mxu1 %v13421_v2 }
 0x42a   : > { %v13636_v9 = vpop.f32.mrf.mxu1  ;;  %v5439_v10 = vsel %vm5422_vm10, %v5419_v60, %v5253_v23  ;;  %6874 = vmatprep.subr.bf16.mxu1 %v15296_v52  ;;  %v5773_v43 = vsel %vm5392_vm5, %v12923_v50, %v5664_v48 }
 0x42b   : > { %6026 = vmatmul.mubr.bf16.gmra.mxu0 %v5439_v10 }
 0x42c   : > { %v6819_v46 = vpop.f32.mrf.mxu1 }
 0x42d   : > { %v5358_v53 = vpop.permute.xlu1 %5357  ;;  %v5341_v45 = vpop.permute.xlu0 %5340  ;;  %6876 = vmatpush3.bf16.msra.mxu1 %v13432_v22 }
 0x42e   : > { %v13641_v55 = vpop.f32.mrf.mxu1  ;;  %v5464_v24 = vsel %vm5392_vm5, %v13552_v63, %v5341_v45 }
 0x42f   : > { %v5478_v39 = vsel %vm5407_vm0, %v5464_v24, %v5358_v53 }
 0x430   : > { %v6820_v59 = vpop.f32.mrf.mxu1 }
 0x431   : > { %v5678_v42 = vpop.permute.xlu1 %5677  ;;  %v5154_v2 = vpop.permute.xlu0 %5153 }
 0x432   : > { %v5792_v22 = vsel %vm5407_vm0, %v5773_v43, %v5678_v42  ;;  %v5406_v26 = vsel %vm5392_vm5, %v13322_v29, %v5154_v2 }
 0x435   : > { %v5375_v19 = vpop.permute.xlu1 %5374  ;;  %v5503_v4 = vpop.permute.xlu0 %5502 }
 0x436   : > { %v5498_v40 = vsel %vm5422_vm10, %v5478_v39, %v5375_v19  ;;  %v5722_v63 = vsel %vm5392_vm5, %v15385_v20, %v5503_v4 }
 0x437   : > { %6033 = vmatprep.mubr.bf16.mxu0 %v5498_v40 }
 0x439   : > { %v5692_v31 = vpop.permute.xlu1 %5691  ;;  %v5232_v21 = vpop.permute.xlu0 %5231 }
 0x43a   : > { %v5807_v47 = vsel %vm5422_vm10, %v5792_v22, %v5692_v31  ;;  %v5421_v7 = vsel %vm5407_vm0, %v5406_v26, %v5232_v21 }
 0x43b   : > { %6192 = vmatprep.mubr.bf16.mxu1 %v5807_v47 }
 0x43d   : > { %v5594_v33 = vpop.permute.xlu1 %5593  ;;  %v5580_v15 = vpop.permute.xlu0 %5579 }
 0x43e   : > { %v5736_v54 = vsel %vm5407_vm0, %v5722_v63, %v5580_v15 }
 0x43f   : > { %v5751_v37 = vsel %vm5422_vm10, %v5736_v54, %v5594_v33 }
 0x440   : > { %6193 = vmatmul.mubr.bf16.gmra.mxu1 %v5751_v37 }
 0x441   : > { %v5505_v50 = vpop.permute.xlu1 %5504  ;;  %v5255_v41 = vpop.permute.xlu0 %5254 }
 0x442   : > { %v5442_v61 = vsel %vm5422_vm10, %v5421_v7, %v5255_v41  ;;  %v5724_v1 = vsel %vm5392_vm5, %v15331_v6, %v5505_v50 }
 0x443   : > { %6034 = vmatmul.mubr.bf16.gmra.mxu0 %v5442_v61 }
 0x444   : > { %6845 = vmatprep.mubr.msk.bf16.mxu0 %vm6968_vm12, %v15296_v52 }
 0x445   : > { %v5582_v30 = vpop.permute.xlu1 %5581  ;;  %v5666_v20 = vpop.permute.xlu0 %5665 }
 0x446   : > { %v5776_v62 = vsel %vm5392_vm5, %v13080_v35, %v5666_v20  ;;  %v5738_v48 = vsel %vm5407_vm0, %v5724_v1, %v5582_v30  ;;  %v5707_v30 = vshll.u32 %v13449_v28, 16 }
 0x449   : > { %v5596_v18 = vpop.permute.xlu1 %5595  ;;  %v5680_v51 = vpop.permute.xlu0 %5679 }
 0x44a   : > { %v13661_v11 = vpop.f32.mrf.mxu1  ;;  %v5794_v13 = vsel %vm5407_vm0, %v5776_v62, %v5680_v51  ;;  %v5754_v60 = vsel %vm5422_vm10, %v5738_v48, %v5596_v18 }
 0x44b   : > { %6846 = vmatmul.mubr.msk.bf16.vlgmr.msra.gmra.mxu0 %vm5392_vm5, %v13481_v44 }
 0x44c   : > { %v6823_v29 = vpop.f32.mrf.mxu1  ;;  %6849 = vmatprep.mubr.msk.bf16.mxu0 %vm6968_vm12, %v15296_v52 }
 0x44d   : > { %v5507_v32 = vpop.permute.xlu1 %5506  ;;  %v5694_v27 = vpop.permute.xlu0 %5693 }
 0x44e   : > { %v13672_v58 = vpop.f32.mrf.mxu1  ;;  %v5810_v44 = vsel %vm5422_vm10, %v5794_v13, %v5694_v27  ;;  %v5726_v42 = vsel %vm5392_vm5, %v15361_v38, %v5507_v32  ;;  %v5709_v32 = vrot.slane %v5707_v30, 1 }
 0x44f   : > { %6200 = vmatprep.mubr.bf16.mxu1 %v5810_v44 }
 0x450   : > { %v6824_v35 = vpop.f32.mrf.mxu1  ;;  %6201 = vmatmul.mubr.bf16.gmra.mxu1 %v5754_v60  ;;  %v5710_v60 = vsel %vm5158_vm4, %v13585_v5, %v5709_v32 }
 0x451   : > { %v5584_v23 = vpop.permute.xlu1 %5583  ;;  %v5668_v10 = vpop.permute.xlu0 %5667 }
 0x452   : > { %v5779_v45 = vsel %vm5392_vm5, %v13229_v57, %v5668_v10 }
 0x453   : > { %6850 = vmatmul.mubr.msk.bf16.gmra.mxu0 %vm5392_vm5, %v13494_v12  ;;  %v5740_v12 = vsel %vm5407_vm0, %v5726_v42, %v5584_v23 }
 0x454   : > { %6853 = vmatprep.mubr.msk.bf16.mxu0 %vm6968_vm12, %v15296_v52 }
 0x455   : > { %v5598_v6 = vpop.permute.xlu1 %5597  ;;  %v5682_v46 = vpop.permute.xlu0 %5681 }
 0x456   : > { %v5796_v24 = vsel %vm5407_vm0, %v5779_v45, %v5682_v46  ;;  %v5757_v57 = vsel %vm5422_vm10, %v5740_v12, %v5598_v6 }
 0x457   : > { %v13681_v53 = vpop.f32.mrf.mxu1 }
 0x459   : > { %v5509_v59 = vpop.permute.xlu1 %5508  ;;  %v6827_v2 = vpop.f32.mrf.mxu1 }
 0x45a   : > { %v5696_v19 = vpop.permute.xlu0 %5695  ;;  %v5728_v33 = vsel %vm5392_vm5, %v13259_v36, %v5509_v59  ;;  %v6942_v59 = vld [vmem:[#allocation3 + $0x40] ss:$0 sps:$4 sm:$0x11]  }
 0x45b   : > { %v5813_v39 = vsel %vm5422_vm10, %v5796_v24, %v5696_v19  ;;  %v13690_v4 = vpop.f32.mrf.mxu1  ;;  %6854 = vmatmul.mubr.msk.bf16.gmra.mxu0 %vm5392_vm5, %v13517_v8 }
 0x45c   : > { %6208 = vmatprep.mubr.bf16.mxu1 %v5813_v39  ;;  %6857 = vmatprep.mubr.msk.bf16.mxu0 %vm6968_vm12, %v15296_v52 }
 0x45d   : > { %6209 = vmatmul.mubr.bf16.gmra.mxu1 %v5757_v57  ;;  %v5586_v40 = vpop.permute.xlu1 %5585  ;;  %v6828_v38 = vpop.f32.mrf.mxu1 }
 0x45e   : > { %v5670_v43 = vpop.permute.xlu0 %5669  ;;  %v5742_v37 = vsel %vm5407_vm0, %v5728_v33, %v5586_v40  ;;  %v5715_v40 = vshll.u32 %v6942_v59, 16  ;;  %v5711_v38 = vshrl.u32 %v13449_v28, 16 }
 0x45f   : > { %v5782_v47 = vsel %vm5392_vm5, %v13291_v34, %v5670_v43 }
 0x460   : > { %v5717_v43 = vrot.slane %v5715_v40, 1 }
 0x461   : > { %v5600_v22 = vpop.permute.xlu1 %5599 }
 0x462   : > { %v5684_v31 = vpop.permute.xlu0 %5683  ;;  %v5760_v34 = vsel %vm5422_vm10, %v5742_v37, %v5600_v22 }
 0x463   : > { %6858 = vmatmul.mubr.msk.bf16.gmra.mxu0 %vm5392_vm5, %v13548_v16  ;;  %v5798_v63 = vsel %vm5407_vm0, %v5782_v47, %v5684_v31 }
 0x464   : > { %v13697_v21 = vpop.f32.mrf.mxu1  ;;  %6861 = vmatprep.mubr.msk.bf16.mxu0 %vm6968_vm12, %v15296_v52 }
 0x465   : > { %v5511_v8 = vpop.permute.xlu1 %5510 }
 0x466   : > { %v6831_v15 = vpop.f32.mrf.mxu1  ;;  %v5698_v54 = vpop.permute.xlu0 %5697  ;;  %v5730_v1 = vsel %vm5392_vm5, %v13318_v17, %v5511_v8 }
 0x467   : > { %v5816_v26 = vsel %vm5422_vm10, %v5798_v63, %v5698_v54 }
 0x468   : > { %v13710_v50 = vpop.f32.mrf.mxu1  ;;  %6216 = vmatprep.mubr.bf16.mxu1 %v5816_v26 }
 0x469   : > { %6217 = vmatmul.mubr.bf16.gmra.mxu1 %v5760_v34  ;;  %v5588_v16 = vpop.permute.xlu1 %5587 }
 0x46a   : > { %v6832_v7 = vpop.f32.mrf.mxu1  ;;  %v5672_v41 = vpop.permute.xlu0 %5671  ;;  %v5744_v48 = vsel %vm5407_vm0, %v5730_v1, %v5588_v16 }
 0x46b   : > { %6862 = vmatmul.mubr.msk.bf16.gmra.mxu0 %vm5392_vm5, %v13571_v3  ;;  %v5785_v29 = vsel %vm5392_vm5, %v13339_v25, %v5672_v41 }
 0x46c   : > { %v13713_v61 = vpop.f32.mrf.mxu1  ;;  %6865 = vmatprep.mubr.msk.bf16.mxu0 %vm6968_vm12, %v15296_v52 }
 0x46d   : > { %v5602_v36 = vpop.permute.xlu1 %5601 }
 0x46e   : > { %v6835_v20 = vpop.f32.mrf.mxu1  ;;  %v5686_v18 = vpop.permute.xlu0 %5685  ;;  %v5763_v25 = vsel %vm5422_vm10, %v5744_v48, %v5602_v36 }
 0x46f   : > { %v5800_v3 = vsel %vm5407_vm0, %v5785_v29, %v5686_v18 }
 0x470   : > { %v13720_v51 = vpop.f32.mrf.mxu1  ;;  %v6691_v22 = vpop.f32.mrf.mxu0 }
 0x471   : > { %v5513_v62 = vpop.permute.xlu1 %5512 }
 0x472   : > { %v6836_v13 = vpop.f32.mrf.mxu1  ;;  %v5700_v27 = vpop.permute.xlu0 %5699  ;;  %v5732_v24 = vsel %vm5392_vm5, %v13366_v14, %v5513_v62 }
 0x473   : > { %v5819_v44 = vsel %vm5422_vm10, %v5800_v3, %v5700_v27  ;;  %6866 = vmatmul.mubr.msk.bf16.gmra.mxu0 %vm5392_vm5, %v5710_v60  ;;  %v6692_v31 = vpop.f32.mrf.mxu0 }
 0x474   : > { %v13731_v35 = vpop.f32.mrf.mxu1  ;;  %6224 = vmatprep.mubr.bf16.mxu1 %v5819_v44 }
 0x475   : > { %6225 = vmatmul.mubr.bf16.gmra.mxu1 %v5763_v25  ;;  %v5590_v10 = vpop.permute.xlu1 %5589  ;;  %v6694_v47 = vpop.f32.mrf.mxu0 }
 0x476   : > { %v6839_v17 = vpop.f32.mrf.mxu1  ;;  %v5674_v23 = vpop.permute.xlu0 %5673  ;;  %v5746_v12 = vsel %vm5407_vm0, %v5732_v24, %v5590_v10 }
 0x477   : > { %v5788_v42 = vsel %vm5392_vm5, %v13438_v0, %v5674_v23  ;;  %v5713_v0 = vor.u32 %v5711_v38, %v5709_v32  ;;  %v6695_v8 = vpop.f32.mrf.mxu0 }
 0x478   : > { %v13735_v6 = vpop.f32.mrf.mxu1  ;;  %v6696_v24 = vadd.f32 %v6695_v8, %v6694_v47 }
 0x479   : > { %v5604_v5 = vpop.permute.xlu1 %5603  ;;  %v5718_v14 = vsel %vm5158_vm4, %v5713_v0, %v5717_v43 }
 0x47a   : > { %v6840_v46 = vpop.f32.mrf.mxu1  ;;  %v5688_v45 = vpop.permute.xlu0 %5687  ;;  %v5766_v57 = vsel %vm5422_vm10, %v5746_v12, %v5604_v5  ;;  %v6693_v5 = vadd.f32 %v6692_v31, %v6691_v22  ;;  %v6080_v0 = vadd.f32 %v6696_v24, %v13618_v49  ;;  %v13787_v31 = vld [vmem:[%s13869_s4] ss:$0 sm:$0xff] }
 0x47b   : > { %v5802_v2 = vsel %vm5407_vm0, %v5788_v42, %v5688_v45 }
 0x47c   : > { %v6077_v38 = vadd.f32 %v6693_v5, %v13615_v56 }
 0x47e   : > { %v5702_v19 = vpop.permute.xlu0 %5701 }
 0x47f   : > { %v5822_v39 = vsel %vm5422_vm10, %v5802_v2, %v5702_v19 }
 0x480   : > { %6232 = vmatprep.mubr.bf16.mxu1 %v5822_v39 }
 0x481   : > { %6233 = vmatmul.mubr.bf16.gmra.mxu1 %v5766_v57 }
 0x482   : > { %6869 = vmatprep.mubr.msk.bf16.mxu1 %vm6968_vm12, %v15296_v52 }
 0x489   : > { %6870 = vmatmul.mubr.msk.bf16.vlgmr.msra.gmra.mxu1 %vm5392_vm5, %v5718_v14  ;;  %v6697_v33 = vpop.f32.mrf.mxu0 }
 0x48b   : > { %v6698_v63 = vpop.f32.mrf.mxu0 }
 0x48c   : > { %v6699_v43 = vadd.f32 %v6698_v63, %v6697_v33 }
 0x48d   : > { %v6700_v15 = vpop.f32.mrf.mxu0 }
 0x48e   : > { %v6085_v8 = vadd.f32 %v6699_v43, %v13636_v9 }
 0x48f   : > { %v6701_v54 = vpop.f32.mrf.mxu0 }
 0x490   : > { %v6702_v56 = vadd.f32 %v6701_v54, %v6700_v15 }
 0x4a5   : > { %v6703_v37 = vpop.f32.mrf.mxu0 }
 0x4a7   : > { %v6704_v26 = vpop.f32.mrf.mxu0 }
 0x4a9   : > { %v13750_v28 = vpop.f32.mrf.mxu0 }
 0x4ab   : > { %v13752_v34 = vpop.f32.mrf.mxu0 }
 0x4c2   : > { %v13754_v52 = vpop.f32.mrf.mxu0 }
 0x4c4   : > { %v13756_v16 = vpop.f32.mrf.mxu0 }
 0x4c6   : > { %v13758_v7 = vpop.f32.mrf.mxu0 }
 0x4c8   : > { %v13760_v41 = vpop.f32.mrf.mxu0 }
 0x4d3   : > { %v13762_v36 = vpop.f32.mrf.mxu0 }
 0x4d5   : > { %v13764_v30 = vpop.f32.mrf.mxu0 }
 0x4d7   : > { %v13766_v20 = vpop.f32.mrf.mxu0 }
 0x4d9   : > { %v13768_v18 = vpop.f32.mrf.mxu0 }
 0x4e8   : > { %v6758_v29 = vpop.f32.mrf.mxu1 }
 0x4ea   : > { %v6759_v32 = vpop.f32.mrf.mxu1 }
 0x4eb   : > { %v13770_v62 = vpop.f32.mrf.mxu0  ;;  %v6760_v2 = vadd.f32 %v6759_v32, %v6758_v29 }
 0x4ec   : > { %v6761_v3 = vpop.f32.mrf.mxu1 }
 0x4ed   : > { %v13772_v1 = vpop.f32.mrf.mxu0 }
 0x4ee   : > { %v6762_v27 = vpop.f32.mrf.mxu1 }
 0x4ef   : > { %v13774_v13 = vpop.f32.mrf.mxu0  ;;  %v6763_v12 = vadd.f32 %v6762_v27, %v6761_v3 }
 0x4f1   : > { %v13776_v48 = vpop.f32.mrf.mxu0 }
 0x500   : > { %v6764_v44 = vpop.f32.mrf.mxu1 }
 0x502   : > { %v6765_v17 = vpop.f32.mrf.mxu1 }
 0x503   : > { %v6727_v60 = vpop.f32.mrf.mxu0 }
 0x504   : > { %v6767_v45 = vpop.f32.mrf.mxu1 }
 0x505   : > { %v6728_v25 = vpop.f32.mrf.mxu0 }
 0x506   : > { %v13778_v23 = vadd.f32 %v6728_v25, %v6727_v60  ;;  %v6768_v39 = vpop.f32.mrf.mxu1 }
 0x507   : > { %v6730_v10 = vpop.f32.mrf.mxu0  ;;  %v6769_v33 = vadd.f32 %v6768_v39, %v6767_v45 }
 0x509   : > { %v6731_v46 = vpop.f32.mrf.mxu0 }
 0x50a   : > { %v13780_v59 = vadd.f32 %v6731_v46, %v6730_v10  ;;  %v6766_v10 = vadd.f32 %v6765_v17, %v6764_v44  ;;  %v6705_v44 = vadd.f32 %v6704_v26, %v6703_v37 }
 0x50b   : > { %v6275_v42 = vpop.f32.mrf.mxu0 }
 0x50c   : > { %15390 = vst [vmem:[#allocation178_spill] sm:$0xff] %v13780_v59  ;;  %v6276_v57 = vadd.f32 %v6760_v2, %v6275_v42  ;;  %v6088_v42 = vadd.f32 %v6702_v56, %v13641_v55  ;;  %v6093_v26 = vadd.f32 %v6705_v44, %v13661_v11  ;;  %v6711_v11 = vadd.f32 %v13756_v16, %v13754_v52 }
 0x50d   : > { %v6847_v19 = vpop.f32.mrf.mxu0 }
 0x50e   : > { %v6330_v46 = vmax.f32 %v6077_v38, %v6276_v57 }
 0x50f   : > { %v6278_v40 = vpop.f32.mrf.mxu0 }
 0x510   : > { %v6279_v14 = vadd.f32 %v6763_v12, %v6278_v40  ;;  %v6770_v60 = vpop.f32.mrf.mxu1 }
 0x511   : > { %v6848_v25 = vpop.f32.mrf.mxu0 }
 0x512   : > { %v6331_v59 = vmax.f32 %v6080_v0, %v6279_v14  ;;  %v6771_v22 = vpop.f32.mrf.mxu1 }
 0x513   : > { %v6283_v47 = vpop.f32.mrf.mxu0  ;;  %v6772_v54 = vadd.f32 %v6771_v22, %v6770_v60 }
 0x514   : > { %v6344_v29 = vmax.f32 %v6330_v46, %v6331_v59  ;;  %v6284_v32 = vadd.f32 %v6766_v10, %v6283_v47  ;;  %v6773_v27 = vpop.f32.mrf.mxu1 }
 0x515   : > { %v6851_v49 = vpop.f32.mrf.mxu0 }
 0x516   : > { %v6363_v63 = vadd.f32 %v13787_v31, %v6344_v29  ;;  %v6332_v3 = vmax.f32 %v6085_v8, %v6284_v32  ;;  %v6774_v19 = vpop.f32.mrf.mxu1 }
 0x517   : > { %v6286_v17 = vpop.f32.mrf.mxu0  ;;  %v6775_v43 = vadd.f32 %v6774_v19, %v6773_v27 }
 0x518   : > { %v6376_v5 = vmax.f32 %v6363_v63, 0.0  ;;  %v6345_v24 = vmax.f32 %v6331_v59, %v6332_v3  ;;  %v6287_v2 = vadd.f32 %v6769_v33, %v6286_v17  ;;  %v6708_v59 = vadd.f32 %v13752_v34, %v13750_v28 }
 0x519   : > { %v6852_v9 = vpop.f32.mrf.mxu0  ;;  %v6101_v33 = vadd.f32 %v6711_v11, %v13681_v53 }
 0x51a   : > { %v6662_v15 = vpack.c.bf16 %v6376_v5, %v6376_v5  ;;  %v6364_v45 = vadd.f32 %v13787_v31, %v6345_v24  ;;  %v6333_v37 = vmax.f32 %v6088_v42, %v6287_v2  ;;  %v6096_v28 = vadd.f32 %v6708_v59, %v13672_v58 }
 0x51b   : > { %v6291_v55 = vpop.f32.mrf.mxu0  ;;  %v6714_v58 = vadd.f32 %v13760_v41, %v13758_v7 }
 0x51c   : > { %6443 = vst.msk [vmem:[%s13796_s22] sm:$0xf] %vm6442_vm11, %v6662_v15  ;;  %v6377_v12 = vmax.f32 %v6364_v45, 0.0  ;;  %v6346_v39 = vmax.f32 %v6332_v3, %v6333_v37  ;;  %v6292_v57 = vadd.f32 %v6772_v54, %v6291_v55  ;;  %v6717_v54 = vadd.f32 %v13764_v30, %v13762_v36 }
 0x51d   : > { %v6776_v40 = vpop.f32.mrf.mxu1  ;;  %v6855_v38 = vpop.f32.mrf.mxu0  ;;  %v6104_v53 = vadd.f32 %v6714_v58, %v13690_v4 }
 0x51e   : > { %v6663_v0 = vpack.c.bf16 %v6377_v12, %v6377_v12  ;;  %v6365_v14 = vadd.f32 %v13787_v31, %v6346_v39  ;;  %v6334_v60 = vmax.f32 %v6093_v26, %v6292_v57  ;;  %v6720_v38 = vadd.f32 %v13768_v18, %v13766_v20 }
 0x51f   : > { %v6777_v25 = vpop.f32.mrf.mxu1  ;;  %v6294_v10 = vpop.f32.mrf.mxu0 }
 0x520   : > { %6444 = vst.msk [vmem:[%s13796_s22 + $0x4] sm:$0xf] %vm6442_vm11, %v6663_v0  ;;  %v6378_v34 = vmax.f32 %v6365_v14, 0.0  ;;  %v6347_v46 = vmax.f32 %v6333_v37, %v6334_v60  ;;  %v6295_v22 = vadd.f32 %v6775_v43, %v6294_v10  ;;  %v6778_v32 = vadd.f32 %v6777_v25, %v6776_v40 }
 0x521   : > { %v6779_v47 = vpop.f32.mrf.mxu1  ;;  %v6856_v8 = vpop.f32.mrf.mxu0  ;;  %v6109_v40 = vadd.f32 %v6717_v54, %v13697_v21 }
 0x522   : > { %v6664_v56 = vpack.c.bf16 %v6378_v34, %v6378_v34  ;;  %v6366_v29 = vadd.f32 %v13787_v31, %v6347_v46  ;;  %v6335_v49 = vmax.f32 %v6096_v28, %v6295_v22  ;;  %v6112_v28 = vadd.f32 %v6720_v38, %v13710_v50 }
 0x523   : > { %v6780_v52 = vpop.f32.mrf.mxu1  ;;  %v6299_v16 = vpop.f32.mrf.mxu0 }
 0x524   : > { %6445 = vst.msk [vmem:[%s13796_s22 + $0x8] sm:$0xf] %vm6442_vm11, %v6664_v56  ;;  %v6379_v63 = vmax.f32 %v6366_v29, 0.0  ;;  %v6348_v3 = vmax.f32 %v6334_v60, %v6335_v49  ;;  %v6300_v27 = vadd.f32 %v6778_v32, %v6299_v16  ;;  %v6781_v5 = vadd.f32 %v6780_v52, %v6779_v47 }
 0x525   : > { %v6859_v44 = vpop.f32.mrf.mxu0  ;;  %v6723_v56 = vadd.f32 %v13772_v1, %v13770_v62 }
 0x526   : > { %v6665_v17 = vpack.c.bf16 %v6379_v63, %v6379_v63  ;;  %v6367_v42 = vadd.f32 %v13787_v31, %v6348_v3  ;;  %v6336_v24 = vmax.f32 %v6101_v33, %v6300_v27  ;;  %v6726_v27 = vadd.f32 %v13776_v48, %v13774_v13 }
 0x527   : > { %v6302_v2 = vpop.f32.mrf.mxu0  ;;  %v6117_v3 = vadd.f32 %v6723_v56, %v13713_v61 }
 0x528   : > { %6446 = vst.msk [vmem:[%s13796_s22 + $0xc] sm:$0xf] %vm6442_vm11, %v6665_v17  ;;  %v6380_v9 = vmax.f32 %v6367_v42, 0.0  ;;  %v6349_v15 = vmax.f32 %v6335_v49, %v6336_v24  ;;  %v6303_v7 = vadd.f32 %v6781_v5, %v6302_v2  ;;  %v6120_v2 = vadd.f32 %v6726_v27, %v13720_v51 }
 0x529   : > { %v6782_v41 = vpop.f32.mrf.mxu1  ;;  %v6860_v45 = vpop.f32.mrf.mxu0 }
 0x52a   : > { %v6666_v19 = vpack.c.bf16 %v6380_v9, %v6380_v9  ;;  %v6368_v37 = vadd.f32 %v13787_v31, %v6349_v15  ;;  %v6337_v26 = vmax.f32 %v6104_v53, %v6303_v7 }
 0x52b   : > { %v6783_v55 = vpop.f32.mrf.mxu1  ;;  %v6307_v12 = vpop.f32.mrf.mxu0 }
 0x52c   : > { %v6784_v59 = vadd.f32 %v6783_v55, %v6782_v41  ;;  %6447 = vst.msk [vmem:[%s13796_s22 + $0x10] sm:$0xf] %vm6442_vm11, %v6666_v19  ;;  %v6381_v4 = vmax.f32 %v6368_v37, 0.0  ;;  %v6350_v39 = vmax.f32 %v6336_v24, %v6337_v26 }
 0x52d   : > { %v6785_v57 = vpop.f32.mrf.mxu1  ;;  %v6863_v30 = vpop.f32.mrf.mxu0 }
 0x52e   : > { %v6308_v36 = vadd.f32 %v6784_v59, %v6307_v12  ;;  %v6667_v0 = vpack.c.bf16 %v6381_v4, %v6381_v4  ;;  %v6369_v43 = vadd.f32 %v13787_v31, %v6350_v39  ;;  %v6125_v12 = vadd.f32 %v13778_v23, %v13731_v35 }
 0x52f   : > { %v6786_v14 = vpop.f32.mrf.mxu1  ;;  %v6310_v11 = vpop.f32.mrf.mxu0 }
 0x530   : > { %v6338_v60 = vmax.f32 %v6109_v40, %v6308_v36  ;;  %v6787_v25 = vadd.f32 %v6786_v14, %v6785_v57  ;;  %6448 = vst.msk [vmem:[%s13796_s22 + $0x14] sm:$0xf] %vm6442_vm11, %v6667_v0  ;;  %v6382_v10 = vmax.f32 %v6369_v43, 0.0  ;;  %v15391_v36 = vld [vmem:[#allocation178_spill] sm:$0xff] }
 0x531   : > { %v6864_v46 = vpop.f32.mrf.mxu0  ;;  %v6128_v30 = vadd.f32 %v15391_v36, %v13735_v6 }
 0x532   : > { %v6351_v34 = vmax.f32 %v6337_v26, %v6338_v60  ;;  %v6311_v21 = vadd.f32 %v6787_v25, %v6310_v11  ;;  %v6668_v22 = vpack.c.bf16 %v6382_v10, %v6382_v10 }
 0x533   : > { %v6315_v47 = vpop.f32.mrf.mxu0 }
 0x534   : > { %v6370_v20 = vadd.f32 %v13787_v31, %v6351_v34  ;;  %v6339_v18 = vmax.f32 %v6112_v28, %v6311_v21  ;;  %6449 = vst.msk [vmem:[%s13796_s22 + $0x18] sm:$0xf] %vm6442_vm11, %v6668_v22 }
 0x535   : > { %v6788_v8 = vpop.f32.mrf.mxu1  ;;  %v6867_v49 = vpop.f32.mrf.mxu0 }
 0x536   : > { %v6383_v29 = vmax.f32 %v6370_v20, 0.0  ;;  %v6352_v32 = vmax.f32 %v6338_v60, %v6339_v18 }
 0x537   : > { %v6789_v33 = vpop.f32.mrf.mxu1  ;;  %v6318_v58 = vpop.f32.mrf.mxu0 }
 0x538   : > { %v6669_v50 = vpack.c.bf16 %v6383_v29, %v6383_v29  ;;  %v6371_v52 = vadd.f32 %v13787_v31, %v6352_v32  ;;  %v6790_v16 = vadd.f32 %v6789_v33, %v6788_v8 }
 0x539   : > { %v6791_v63 = vpop.f32.mrf.mxu1  ;;  %v6868_v1 = vpop.f32.mrf.mxu0 }
 0x53a   : > { %6450 = vst.msk [vmem:[%s13796_s22 + $0x1c] sm:$0xf] %vm6442_vm11, %v6669_v50  ;;  %v6384_v44 = vmax.f32 %v6371_v52, 0.0  ;;  %v6316_v62 = vadd.f32 %v6790_v16, %v6315_v47 }
 0x53b   : > { %v6792_v17 = vpop.f32.mrf.mxu1 }
 0x53c   : > { %v6670_v42 = vpack.c.bf16 %v6384_v44, %v6384_v44  ;;  %v6340_v5 = vmax.f32 %v6117_v3, %v6316_v62  ;;  %v6793_v24 = vadd.f32 %v6792_v17, %v6791_v63 }
 0x53e   : > { %6451 = vst.msk [vmem:[%s13796_s22 + $0x20] sm:$0xf] %vm6442_vm11, %v6670_v42  ;;  %v6353_v53 = vmax.f32 %v6339_v18, %v6340_v5  ;;  %v6319_v9 = vadd.f32 %v6793_v24, %v6318_v58 }
 0x540   : > { %v6372_v61 = vadd.f32 %v13787_v31, %v6353_v53  ;;  %v6341_v13 = vmax.f32 %v6120_v2, %v6319_v9 }
 0x541   : > { %v6794_v48 = vpop.f32.mrf.mxu1 }
 0x542   : > { %v6385_v15 = vmax.f32 %v6372_v61, 0.0  ;;  %v6354_v7 = vmax.f32 %v6340_v5, %v6341_v13 }
 0x543   : > { %v6795_v41 = vpop.f32.mrf.mxu1 }
 0x544   : > { %v6671_v54 = vpack.c.bf16 %v6385_v15, %v6385_v15  ;;  %v6373_v45 = vadd.f32 %v13787_v31, %v6354_v7  ;;  %v6796_v55 = vadd.f32 %v6795_v41, %v6794_v48 }
 0x545   : > { %v6797_v19 = vpop.f32.mrf.mxu1 }
 0x546   : > { %6452 = vst.msk [vmem:[%s13796_s22 + $0x24] sm:$0xf] %vm6442_vm11, %v6671_v54  ;;  %v6386_v37 = vmax.f32 %v6373_v45, 0.0 }
 0x547   : > { %v6798_v51 = vpop.f32.mrf.mxu1 }
 0x548   : > { %v6672_v26 = vpack.c.bf16 %v6386_v37, %v6386_v37  ;;  %v6799_v57 = vadd.f32 %v6798_v51, %v6797_v19 }
 0x549   : > { %v6323_v59 = vpop.f32.mrf.mxu1 }
 0x54a   : > { %6453 = vst.msk [vmem:[%s13796_s22 + $0x28] sm:$0xf] %vm6442_vm11, %v6672_v26  ;;  %v6324_v4 = vadd.f32 %v6796_v55, %v6323_v59 }
 0x54b   : > { %v6871_v39 = vpop.f32.mrf.mxu1 }
 0x54c   : > { %v6342_v40 = vmax.f32 %v6125_v12, %v6324_v4 }
 0x54d   : > { %v6326_v38 = vpop.f32.mrf.mxu1 }
 0x54e   : > { %v6355_v0 = vmax.f32 %v6341_v13, %v6342_v40  ;;  %v6327_v43 = vadd.f32 %v6799_v57, %v6326_v38 }
 0x54f   : > { %v6872_v14 = vpop.f32.mrf.mxu1 }
 0x550   : > { %v6374_v60 = vadd.f32 %v13787_v31, %v6355_v0  ;;  %v6343_v25 = vmax.f32 %v6128_v30, %v6327_v43 }
 0x552   : > { %v6387_v11 = vmax.f32 %v6374_v60, 0.0  ;;  %v6356_v35 = vmax.f32 %v6342_v40, %v6343_v25 }
 0x554   : > { %v6673_v23 = vpack.c.bf16 %v6387_v11, %v6387_v11  ;;  %v6375_v10 = vadd.f32 %v13787_v31, %v6356_v35 }
 0x556   : > { %6454 = vst.msk [vmem:[%s13796_s22 + $0x2c] sm:$0xf] %vm6442_vm11, %v6673_v23  ;;  %v6388_v28 = vmax.f32 %v6375_v10, 0.0 }
 0x558   : > { %v6674_v34 = vpack.c.bf16 %v6388_v28, %v6388_v28 }
 0x55a   : > { %6455 = vst.msk [vmem:[%s13796_s22 + $0x30] sm:$0xf] %vm6442_vm11, %v6674_v34 }
 0x55b PF: > { %s15_s18 = sadd.s32 1, %s6963_s18  }
 0x55c   : > { %p12_p4 = scmp.ge.s32.totalorder %s15_s18, 4  }
 0x55e   :  { %14 = sbr.rel (!%p12_p4) target bundleno = 1 (0x1), region = 70 }

</bundles_post_ra>
